<compile_context>
chip_gen: v7x
topology: tpu7x:2x2x1
jax: 0.10.0
libtpu: 0.0.40
codegen_flags: <defaults>
</compile_context>

<pallas_src>
import functools
import math

import jax
import jax.numpy as jnp
from jax import lax
from jax.experimental import pallas as pl
from jax.experimental.pallas import tpu as pltpu

VMEM_LIMIT = 48 * 1024 * 1024            # within v5e/v6e/v7x budgets
BN_SCALE = 1.0 / math.sqrt(1.0 + 1e-5)   # inference BN with default init


def _round_up(x, m):
    return (x + m - 1) // m * m


def _pick_tile(total, target):
    """Largest multiple of 8 that divides `total` (a multiple of 8) and is <= target."""
    target = max(8, min(target, total))
    target -= target % 8
    for cand in range(target, 7, -8):
        if total % cand == 0:
            return cand
    return 8


# ----------------------------------------------------------------------------
# Kernel bodies
# ----------------------------------------------------------------------------

def _pdist_kernel(xr_ref, xa_ref, n2_ref, o_ref):
    # -||xi - xj||^2 for a row tile against all points of one batch.
    xr = xr_ref[0].astype(jnp.float32)                            # (tn, C)
    xa = xa_ref[0].astype(jnp.float32)                            # (N,  C)
    inner = lax.dot_general(xr, xa, (((1,), (1,)), ((), ())),
                            preferred_element_type=jnp.float32)   # (tn, N)
    n2r = jnp.sum(xr * xr, axis=1, keepdims=True)                 # (tn, 1)
    o_ref[0] = (2.0 * inner - n2r) - n2_ref[0]


def _edge_conv_kernel(*refs, k, two):
    # Fused: edge-feature concat (via split weights) -> conv1(+BN+LReLU)
    #        [-> conv2(+BN+LReLU)] -> max over the k neighbors.
    if two:
        (feat_ref, xc_ref, wa_ref, wb_ref, s1_ref, b1_ref,
         w2_ref, s2_ref, b2_ref, o_ref) = refs
    else:
        feat_ref, xc_ref, wa_ref, wb_ref, s1_ref, b1_ref, o_ref = refs
    wa = wa_ref[...]
    s1 = s1_ref[...]
    b1 = b1_ref[...]
    # center-point contribution (x @ (W_bot - W_top)), shared across all k.
    xb = jnp.dot(xc_ref[0], wb_ref[...], preferred_element_type=jnp.float32)
    if two:
        w2 = w2_ref[...]
        s2 = s2_ref[...]
        b2 = b2_ref[...]
    acc = None
    for j in range(k):                                            # k is static
        h = jnp.dot(feat_ref[0, j], wa, preferred_element_type=jnp.float32) + xb
        h = h * s1 + b1
        h = jnp.maximum(h, 0.2 * h)                               # LeakyReLU(0.2)
        if two:
            h = jnp.dot(h.astype(jnp.bfloat16), w2,
                        preferred_element_type=jnp.float32)
            h = h * s2 + b2
            h = jnp.maximum(h, 0.2 * h)
        acc = h if acc is None else jnp.maximum(acc, h)
    o_ref[0] = acc.astype(o_ref.dtype)


def _conv_gmax_kernel(*refs, n_in):
    # Fused 1x1 conv (+BN+LReLU) with a running global max over the point axis.
    x_refs = refs[:n_in]
    w_refs = refs[n_in:2 * n_in]
    s_ref, b_ref, o_ref = refs[2 * n_in:]
    h = jnp.dot(x_refs[0][0], w_refs[0][...], preferred_element_type=jnp.float32)
    for j in range(1, n_in):
        h = h + jnp.dot(x_refs[j][0], w_refs[j][...],
                        preferred_element_type=jnp.float32)
    h = h * s_ref[...] + b_ref[...]
    h = jnp.maximum(h, 0.2 * h)
    m = jnp.max(h, axis=0, keepdims=True)                         # (1, Cout)

    @pl.when(pl.program_id(1) == 0)
    def _():
        o_ref[0] = m

    @pl.when(pl.program_id(1) != 0)
    def _():
        o_ref[0] = jnp.maximum(o_ref[0], m)


def _mm_affine_kernel(x_ref, w_ref, s_ref, b_ref, o_ref, *, act):
    y = jnp.dot(x_ref[...], w_ref[...], preferred_element_type=jnp.float32)
    y = y * s_ref[...] + b_ref[...]
    if act:
        y = jnp.maximum(y, 0.2 * y)
    o_ref[...] = y.astype(o_ref.dtype)


def _seg_head_kernel(gl_ref, x1_ref, x2_ref, x3_ref,
                     w8g_ref, w8a_ref, w8b_ref, w8c_ref, s8_ref, b8_ref,
                     w9_ref, s9_ref, b9_ref,
                     w10_ref, s10_ref, b10_ref,
                     w11_ref, o_ref):
    # conv8 with split weights (global feature broadcast handled by (1,·) add)
    h = jnp.dot(x1_ref[0], w8a_ref[...], preferred_element_type=jnp.float32)
    h = h + jnp.dot(x2_ref[0], w8b_ref[...], preferred_element_type=jnp.float32)
    h = h + jnp.dot(x3_ref[0], w8c_ref[...], preferred_element_type=jnp.float32)
    h = h + jnp.dot(gl_ref[0], w8g_ref[...], preferred_element_type=jnp.float32)
    h = h * s8_ref[...] + b8_ref[...]
    h = jnp.maximum(h, 0.2 * h)
    # TODO(synk): dp1 dropout is identity (inference); stochastic dropout omitted.
    h = jnp.dot(h.astype(jnp.bfloat16), w9_ref[...],
                preferred_element_type=jnp.float32)
    h = h * s9_ref[...] + b9_ref[...]
    h = jnp.maximum(h, 0.2 * h)
    # TODO(synk): dp2 dropout is identity (inference).
    h = jnp.dot(h.astype(jnp.bfloat16), w10_ref[...],
                preferred_element_type=jnp.float32)
    h = h * s10_ref[...] + b10_ref[...]
    h = jnp.maximum(h, 0.2 * h)
    o = jnp.dot(h.astype(jnp.bfloat16), w11_ref[...],
                preferred_element_type=jnp.float32)
    o_ref[0] = o.astype(o_ref.dtype)


# ----------------------------------------------------------------------------
# Wrappers
# ----------------------------------------------------------------------------

def neg_pairwise_sqdist(x_t, tile_n=512):
    """x_t: (B, N, C) -> (B, N, N) negative squared Euclidean distances (f32)."""
    B, N, C = x_t.shape
    Np = _round_up(N, 8)
    xp = x_t if Np == N else jnp.pad(x_t, ((0, 0), (0, Np - N), (0, 0)))
    n2 = jnp.sum(xp.astype(jnp.float32) ** 2, axis=-1)[:, None, :]   # (B, 1, Np)
    tn = _pick_tile(Np, tile_n)
    sim = pl.pallas_call(
        _pdist_kernel,
        out_shape=jax.ShapeDtypeStruct((B, Np, Np), jnp.float32),
        grid=(B, Np // tn),
        in_specs=[
            pl.BlockSpec((1, tn, C), lambda b, i: (b, i, 0)),
            pl.BlockSpec((1, Np, C), lambda b, i: (b, 0, 0)),
            pl.BlockSpec((1, 1, Np), lambda b, i: (b, 0, 0)),
        ],
        out_specs=pl.BlockSpec((1, tn, Np), lambda b, i: (b, i, 0)),
        compiler_params=pltpu.CompilerParams(
            dimension_semantics=("parallel", "parallel"),
            vmem_limit_bytes=VMEM_LIMIT),
    )(xp, xp, n2)
    return sim[:, :N, :N]


def gather_neighbors(x_t, k):
    """x_t: (B, N, C) -> neighbor features (B, k, N, C) (knn in feature space)."""
    sim = neg_pairwise_sqdist(x_t)                      # (B, N, N)
    _, idx = lax.top_k(sim, k)                          # (B, N, k)
    idx_t = jnp.transpose(idx, (0, 2, 1))               # (B, k, N)
    # TODO(synk): gather kept in JAX (data-dependent indices).
    feat = jax.vmap(lambda pts, ids: pts[ids])(x_t, idx_t)   # (B, k, N, C)
    return feat


def edge_conv(feat, xc, p1, p2=None, *, tile_n=256):
    """Fused EdgeConv block.
    feat: (B, K, N, C) neighbor features, xc: (B, N, C) centers.
    Computes max_k(lrelu(bn(conv2(lrelu(bn(conv1(cat(feat-xc, xc))))))))
    (conv2 optional) -> (B, N, Cout) bf16."""
    B, K, N, C = feat.shape
    Np = _round_up(N, 8)
    if Np != N:
        feat = jnp.pad(feat, ((0, 0), (0, 0), (0, Np - N), (0, 0)))
        xc = jnp.pad(xc, ((0, 0), (0, Np - N), (0, 0)))
    feat = feat.astype(jnp.bfloat16)
    xc = xc.astype(jnp.bfloat16)
    tn = _pick_tile(Np, tile_n)

    wa, wb, s1, b1 = p1
    c1 = wa.shape[1]
    two = p2 is not None
    cout = p2[0].shape[1] if two else c1

    args = [feat, xc, wa, wb, s1, b1]
    in_specs = [
        pl.BlockSpec((1, K, tn, C), lambda b, i: (b, 0, i, 0)),
        pl.BlockSpec((1, tn, C), lambda b, i: (b, i, 0)),
        pl.BlockSpec((C, c1), lambda b, i: (0, 0)),
        pl.BlockSpec((C, c1), lambda b, i: (0, 0)),
        pl.BlockSpec((1, c1), lambda b, i: (0, 0)),
        pl.BlockSpec((1, c1), lambda b, i: (0, 0)),
    ]
    if two:
        w2, s2, b2 = p2
        args += [w2, s2, b2]
        in_specs += [
            pl.BlockSpec((c1, cout), lambda b, i: (0, 0)),
            pl.BlockSpec((1, cout), lambda b, i: (0, 0)),
            pl.BlockSpec((1, cout), lambda b, i: (0, 0)),
        ]
    out = pl.pallas_call(
        functools.partial(_edge_conv_kernel, k=K, two=two),
        out_shape=jax.ShapeDtypeStruct((B, Np, cout), jnp.bfloat16),
        grid=(B, Np // tn),
        in_specs=in_specs,
        out_specs=pl.BlockSpec((1, tn, cout), lambda b, i: (b, i, 0)),
        compiler_params=pltpu.CompilerParams(
            dimension_semantics=("parallel", "parallel"),
            vmem_limit_bytes=VMEM_LIMIT),
    )(*args)
    return out[:, :N, :]


def conv_global_max(xs, ws, s, b, tile_n=512):
    """max over points of lrelu(bn(sum_i xs[i] @ ws[i])).
    xs: list of (B, N, Ci); ws: list of (Ci, Cout).  Returns (B, Cout) f32."""
    B, N, _ = xs[0].shape
    Cout = ws[0].shape[1]
    Np = _round_up(N, 8)
    if Np != N:
        # edge-replicate so padded rows never change the max
        xs = [jnp.pad(x, ((0, 0), (0, Np - N), (0, 0)), mode='edge') for x in xs]
    xs = [x.astype(jnp.bfloat16) for x in xs]
    tn = _pick_tile(Np, tile_n)
    n_in = len(xs)
    in_specs = (
        [pl.BlockSpec((1, tn, x.shape[2]), lambda bq, nq: (bq, nq, 0)) for x in xs]
        + [pl.BlockSpec(w.shape, lambda bq, nq: (0, 0)) for w in ws]
        + [pl.BlockSpec((1, Cout), lambda bq, nq: (0, 0)),
           pl.BlockSpec((1, Cout), lambda bq, nq: (0, 0))]
    )
    out = pl.pallas_call(
        functools.partial(_conv_gmax_kernel, n_in=n_in),
        out_shape=jax.ShapeDtypeStruct((B, 1, Cout), jnp.float32),
        grid=(B, Np // tn),
        in_specs=in_specs,
        out_specs=pl.BlockSpec((1, 1, Cout), lambda bq, nq: (bq, 0, 0)),
        compiler_params=pltpu.CompilerParams(
            dimension_semantics=("parallel", "arbitrary"),
            vmem_limit_bytes=VMEM_LIMIT),
    )(*xs, *ws, s, b)
    return out[:, 0, :]


def mm_affine(x, w, s, b, act=True, tile_m=512):
    """x: (M, Cin) -> [leaky_relu]((x @ w) * scale + bias) : (M, Cout) f32."""
    M, Cin = x.shape
    Cout = w.shape[1]
    Mp = _round_up(M, 8)
    xb = x.astype(jnp.bfloat16)
    if Mp != M:
        xb = jnp.pad(xb, ((0, Mp - M), (0, 0)))
    tm = _pick_tile(Mp, tile_m)
    out = pl.pallas_call(
        functools.partial(_mm_affine_kernel, act=act),
        out_shape=jax.ShapeDtypeStruct((Mp, Cout), jnp.float32),
        grid=(Mp // tm,),
        in_specs=[
            pl.BlockSpec((tm, Cin), lambda i: (i, 0)),
            pl.BlockSpec((Cin, Cout), lambda i: (0, 0)),
            pl.BlockSpec((1, Cout), lambda i: (0, 0)),
            pl.BlockSpec((1, Cout), lambda i: (0, 0)),
        ],
        out_specs=pl.BlockSpec((tm, Cout), lambda i: (i, 0)),
        compiler_params=pltpu.CompilerParams(
            dimension_semantics=("parallel",),
            vmem_limit_bytes=VMEM_LIMIT),
    )(xb, w, s, b)
    return out[:M]


def seg_head(gl, x1, x2, x3, p8, p9, p10, w11, tile_n=512):
    """Fused conv8->conv9->conv10->conv11 head.
    gl: (B, 1, emb+64) global feature; x1/x2/x3: (B, N, 64).
    Returns (B, N, seg_pad) f32 (lane-dense padded output)."""
    B, N, _ = x1.shape
    Np = _round_up(N, 8)
    if Np != N:
        pad = ((0, 0), (0, Np - N), (0, 0))
        x1 = jnp.pad(x1, pad)
        x2 = jnp.pad(x2, pad)
        x3 = jnp.pad(x3, pad)
    tn = _pick_tile(Np, tile_n)
    (w8g, w8a, w8b, w8c), s8, b8 = p8
    w9, s9, b9 = p9
    w10, s10, b10 = p10
    Cg = gl.shape[-1]
    Cseg = w11.shape[1]
    out = pl.pallas_call(
        _seg_head_kernel,
        out_shape=jax.ShapeDtypeStruct((B, Np, Cseg), jnp.float32),
        grid=(B, Np // tn),
        in_specs=[
            pl.BlockSpec((1, 1, Cg), lambda bq, nq: (bq, 0, 0)),
            pl.BlockSpec((1, tn, 64), lambda bq, nq: (bq, nq, 0)),
            pl.BlockSpec((1, tn, 64), lambda bq, nq: (bq, nq, 0)),
            pl.BlockSpec((1, tn, 64), lambda bq, nq: (bq, nq, 0)),
            pl.BlockSpec(w8g.shape, lambda bq, nq: (0, 0)),
            pl.BlockSpec(w8a.shape, lambda bq, nq: (0, 0)),
            pl.BlockSpec(w8b.shape, lambda bq, nq: (0, 0)),
            pl.BlockSpec(w8c.shape, lambda bq, nq: (0, 0)),
            pl.BlockSpec((1, 256), lambda bq, nq: (0, 0)),
            pl.BlockSpec((1, 256), lambda bq, nq: (0, 0)),
            pl.BlockSpec(w9.shape, lambda bq, nq: (0, 0)),
            pl.BlockSpec((1, 256), lambda bq, nq: (0, 0)),
            pl.BlockSpec((1, 256), lambda bq, nq: (0, 0)),
            pl.BlockSpec(w10.shape, lambda bq, nq: (0, 0)),
            pl.BlockSpec((1, 128), lambda bq, nq: (0, 0)),
            pl.BlockSpec((1, 128), lambda bq, nq: (0, 0)),
            pl.BlockSpec(w11.shape, lambda bq, nq: (0, 0)),
        ],
        out_specs=pl.BlockSpec((1, tn, Cseg), lambda bq, nq: (bq, nq, 0)),
        compiler_params=pltpu.CompilerParams(
            dimension_semantics=("parallel", "parallel"),
            vmem_limit_bytes=VMEM_LIMIT),
    )(gl.astype(jnp.bfloat16), x1, x2, x3,
      w8g, w8a, w8b, w8c, s8, b8, w9, s9, b9, w10, s10, b10, w11)
    return out[:, :N, :]


# ----------------------------------------------------------------------------
# Parameters (deterministic in-script init)
# ----------------------------------------------------------------------------

def _conv_bn_params(key, cin, cout):
    w = (jax.random.normal(key, (cin, cout), jnp.float32) /
         math.sqrt(cin)).astype(jnp.bfloat16)
    s = jnp.full((1, cout), BN_SCALE, jnp.float32)
    b = jnp.zeros((1, cout), jnp.float32)
    return (w, s, b)


def _edge_conv_bn_params(key, c, cout):
    # conv on cat(feat - x, x): 2c -> cout, split so the concat is never built:
    #   y = feat @ W[:c] + x @ (W[c:] - W[:c])
    w = jax.random.normal(key, (2 * c, cout), jnp.float32) / math.sqrt(2 * c)
    wa = w[:c]
    wb = w[c:] - wa
    s = jnp.full((1, cout), BN_SCALE, jnp.float32)
    b = jnp.zeros((1, cout), jnp.float32)
    return (wa.astype(jnp.bfloat16), wb.astype(jnp.bfloat16), s, b)


def init_params(key, emb_dims, seg_num_all, num_cat):
    keys = jax.random.split(key, 16)
    p = {}
    # Transform_Net
    p['t_conv1'] = _edge_conv_bn_params(keys[0], 3, 64)
    p['t_conv2'] = _conv_bn_params(keys[1], 64, 128)
    p['t_conv3'] = _conv_bn_params(keys[2], 128, 1024)
    p['t_lin1'] = _conv_bn_params(keys[3], 1024, 512)
    p['t_lin2'] = _conv_bn_params(keys[4], 512, 256)
    # transform head: weight=0, bias=eye(3) (exactly the PyTorch init)
    p['t_out'] = (jnp.zeros((256, 9), jnp.bfloat16),
                  jnp.ones((1, 9), jnp.float32),
                  jnp.eye(3, dtype=jnp.float32).reshape(1, 9))
    # DGCNN body
    p['conv1'] = _edge_conv_bn_params(keys[5], 3, 64)
    p['conv2'] = _conv_bn_params(keys[6], 64, 64)
    p['conv3'] = _edge_conv_bn_params(keys[7], 64, 64)
    p['conv4'] = _conv_bn_params(keys[8], 64, 64)
    p['conv5'] = _edge_conv_bn_params(keys[9], 64, 64)
    w6, s6, b6 = _conv_bn_params(keys[10], 192, emb_dims)
    p['conv6'] = ([w6[0:64], w6[64:128], w6[128:192]], s6, b6)
    p['conv7'] = _conv_bn_params(keys[11], num_cat, 64)
    w8, s8, b8 = _conv_bn_params(keys[12], emb_dims + 64 + 3 * 64, 256)   # 1280
    cg = emb_dims + 64
    p['conv8'] = ((w8[:cg], w8[cg:cg + 64], w8[cg + 64:cg + 128],
                   w8[cg + 128:cg + 192]), s8, b8)
    p['conv9'] = _conv_bn_params(keys[13], 256, 256)
    p['conv10'] = _conv_bn_params(keys[14], 256, 128)
    w11 = jax.random.normal(keys[15], (128, seg_num_all), jnp.float32) / math.sqrt(128)
    segp = _round_up(seg_num_all, 128)   # lane-dense padded output columns
    w11p = jnp.zeros((128, segp), jnp.float32).at[:, :seg_num_all].set(w11)
    p['conv11'] = w11p.astype(jnp.bfloat16)
    return p


# ----------------------------------------------------------------------------
# Forward pass
# ----------------------------------------------------------------------------

def transform_net(p, feat0, x_t):
    """feat0: (B, k, N, 3) neighbor coords, x_t: (B, N, 3) -> (B, 3, 3)."""
    B, _, N, _ = feat0.shape
    h = edge_conv(feat0, x_t, p['t_conv1'], p['t_conv2'])          # (B, N, 128)
    w3, s3, b3 = p['t_conv3']
    g = conv_global_max([h], [w3], s3, b3)                         # (B, 1024)
    h = mm_affine(g, *p['t_lin1'])                                 # (B, 512)
    h = mm_affine(h, *p['t_lin2'])                                 # (B, 256)
    t = mm_affine(h, *p['t_out'], act=False)                       # (B, 9)
    return t.reshape(B, 3, 3)


@functools.partial(jax.jit, static_argnames=("k", "seg_num_all"))
def dgcnn_partseg_forward(params, x, l, k, seg_num_all):
    """x: (B, 3, N) points, l: (B, 16) one-hot category -> (B, seg_num_all, N)."""
    B, _, N = x.shape
    x_t = jnp.transpose(x, (0, 2, 1)).astype(jnp.float32)          # (B, N, 3)

    feat0 = gather_neighbors(x_t, k)                               # (B, k, N, 3)
    t = transform_net(params, feat0, x_t)                          # (B, 3, 3)
    x_t = jnp.einsum('bnc,bcd->bnd', x_t, t)                       # tiny bmm -> XLA

    feat = gather_neighbors(x_t, k)
    x1 = edge_conv(feat, x_t, params['conv1'], params['conv2'])    # (B, N, 64)

    feat = gather_neighbors(x1, k)
    x2 = edge_conv(feat, x1, params['conv3'], params['conv4'])     # (B, N, 64)

    feat = gather_neighbors(x2, k)
    x3 = edge_conv(feat, x2, params['conv5'])                      # (B, N, 64)

    w6, s6, b6 = params['conv6']
    g = conv_global_max([x1, x2, x3], w6, s6, b6)                  # (B, emb)

    lf = mm_affine(l.astype(jnp.float32), *params['conv7'])        # (B, 64)
    gl = jnp.concatenate([g, lf], axis=-1)[:, None, :]             # (B, 1, emb+64)

    out = seg_head(gl, x1, x2, x3, params['conv8'], params['conv9'],
                   params['conv10'], params['conv11'])             # (B, N, seg_pad)
    out = out[:, :, :seg_num_all]
    return jnp.transpose(out, (0, 2, 1))                           # (B, seg, N)


# ----------------------------------------------------------------------------

if __name__ == "__main__":
    B, N, K = 2, 16, 4            # batch, points, knn neighbors (args.k)
    EMB = 1024                    # args.emb_dims (conv8 hardcodes 1280 = 1024+64+192)
    SEG = 8                       # seg_num_all
    NCAT = 16                     # one-hot category label width (conv7 input)

    key = jax.random.PRNGKey(0)
    kx, kl, kp = jax.random.split(key, 3)
    x = jax.random.normal(kx, (B, 3, N), jnp.float32)
    labels = jax.random.randint(kl, (B,), 0, NCAT)
    l = jax.nn.one_hot(labels, NCAT, dtype=jnp.float32)
    params = init_params(kp, EMB, SEG, NCAT)

    out = dgcnn_partseg_forward(params, x, l, k=K, seg_num_all=SEG)
    out = jax.block_until_ready(out)
    assert out.shape == (B, SEG, N), out.shape
    assert bool(jnp.all(jnp.isfinite(out)))
    print("KERNEL_OK")
</pallas_src>

<mosaic_0001>
module attributes {stable_mosaic.version = 11 : i64} {
  func.func @_pdist_kernel(%arg0: i32, %arg1: i32, %arg2: memref<1x16x3xf32, #tpu.memory_space<vmem>>, %arg3: memref<1x16x3xf32, #tpu.memory_space<vmem>>, %arg4: memref<1x1x16xf32, #tpu.memory_space<vmem>>, %arg5: memref<1x16x16xf32, #tpu.memory_space<vmem>>) attributes {dimension_semantics = [#tpu.dimension_semantics<parallel>, #tpu.dimension_semantics<parallel>], iteration_bounds = array<i64: 2, 1>, scalar_prefetch = 0 : i64, scratch_operands = 0 : i64, tpu.core_type = #tpu.core_type<tc>, window_params = [{transform_indices = @transform_0, window_bounds = array<i64: 1, 16, 3>}, {transform_indices = @transform_1, window_bounds = array<i64: 1, 16, 3>}, {transform_indices = @transform_2, window_bounds = array<i64: 1, 1, 16>}, {transform_indices = @transform_3, window_bounds = array<i64: 1, 16, 16>}]} {
    %c0 = arith.constant 0 : index
    %c0_0 = arith.constant 0 : index
    %c0_1 = arith.constant 0 : index
    %0 = vector.load %arg2[%c0, %c0_0, %c0_1] : memref<1x16x3xf32, #tpu.memory_space<vmem>>, vector<1x16x3xf32>
    %1 = vector.shape_cast %0 : vector<1x16x3xf32> to vector<16x3xf32>
    %c0_2 = arith.constant 0 : index
    %c0_3 = arith.constant 0 : index
    %c0_4 = arith.constant 0 : index
    %2 = vector.load %arg3[%c0_2, %c0_3, %c0_4] : memref<1x16x3xf32, #tpu.memory_space<vmem>>, vector<1x16x3xf32>
    %3 = vector.shape_cast %2 : vector<1x16x3xf32> to vector<16x3xf32>
    %cst = arith.constant dense<0.000000e+00> : vector<16x16xf32>
    %4 = tpu.matmul %1, %3, %cst {dimension_numbers = #tpu.dot_dimension_numbers<[1], [1], [0], [0], [0, 0, 1, 0], [], []>} : vector<16x3xf32>, vector<16x3xf32>, vector<16x16xf32> -> vector<16x16xf32>
    %5 = arith.mulf %1, %1 : vector<16x3xf32>
    %cst_5 = arith.constant dense<0.000000e+00> : vector<16xf32>
    %6 = vector.multi_reduction <add>, %5, %cst_5 [1] : vector<16x3xf32> to vector<16xf32>
    %7 = vector.shape_cast %6 : vector<16xf32> to vector<16x1xf32>
    %cst_6 = arith.constant 2.000000e+00 : f32
    %8 = vector.broadcast %cst_6 : f32 to vector<16x16xf32>
    %9 = arith.mulf %8, %4 : vector<16x16xf32>
    %10 = vector.broadcast %7 : vector<16x1xf32> to vector<16x16xf32>
    %11 = arith.subf %9, %10 : vector<16x16xf32>
    %c0_7 = arith.constant 0 : index
    %c0_8 = arith.constant 0 : index
    %c0_9 = arith.constant 0 : index
    %12 = vector.load %arg4[%c0_7, %c0_8, %c0_9] : memref<1x1x16xf32, #tpu.memory_space<vmem>>, vector<1x1x16xf32>
    %13 = vector.shape_cast %12 : vector<1x1x16xf32> to vector<1x16xf32>
    %14 = vector.broadcast %13 : vector<1x16xf32> to vector<16x16xf32>
    %15 = arith.subf %11, %14 : vector<16x16xf32>
    %c0_10 = arith.constant 0 : index
    %c0_11 = arith.constant 0 : index
    %c0_12 = arith.constant 0 : index
    %16 = vector.load %arg5[%c0_10, %c0_11, %c0_12] : memref<1x16x16xf32, #tpu.memory_space<vmem>>, vector<1x16x16xf32>
    %17 = vector.shape_cast %16 : vector<1x16x16xf32> to vector<16x16xf32>
    %18 = vector.shape_cast %15 : vector<16x16xf32> to vector<1x16x16xf32>
    tpu.vector_store %arg5[%c0_10, %c0_11, %c0_12], %18 {strides = array<i32>} : memref<1x16x16xf32, #tpu.memory_space<vmem>>, vector<1x16x16xf32>,
    return
  }
  func.func @transform_0(%arg0: i32, %arg1: i32) -> (i32, i32, i32) {
    %c0_i32 = arith.constant 0 : i32
    %c0_i32_0 = arith.constant 0 : i32
    return %arg0, %arg1, %c0_i32 : i32, i32, i32
  }
  func.func @transform_1(%arg0: i32, %arg1: i32) -> (i32, i32, i32) {
    %c0_i32 = arith.constant 0 : i32
    %c0_i32_0 = arith.constant 0 : i32
    %c0_i32_1 = arith.constant 0 : i32
    return %arg0, %c0_i32, %c0_i32_0 : i32, i32, i32
  }
  func.func @transform_2(%arg0: i32, %arg1: i32) -> (i32, i32, i32) {
    %c0_i32 = arith.constant 0 : i32
    %c0_i32_0 = arith.constant 0 : i32
    %c0_i32_1 = arith.constant 0 : i32
    return %arg0, %c0_i32, %c0_i32_0 : i32, i32, i32
  }
  func.func @transform_3(%arg0: i32, %arg1: i32) -> (i32, i32, i32) {
    %c0_i32 = arith.constant 0 : i32
    %c0_i32_0 = arith.constant 0 : i32
    return %arg0, %arg1, %c0_i32 : i32, i32, i32
  }
}

module attributes {stable_mosaic.version = 11 : i64} {
  func.func @_edge_conv_kernel(%arg0: i32, %arg1: i32, %arg2: memref<1x4x16x3xbf16, #tpu.memory_space<vmem>>, %arg3: memref<1x16x3xbf16, #tpu.memory_space<vmem>>, %arg4: memref<3x64xbf16, #tpu.memory_space<vmem>>, %arg5: memref<3x64xbf16, #tpu.memory_space<vmem>>, %arg6: memref<1x64xf32, #tpu.memory_space<vmem>>, %arg7: memref<1x64xf32, #tpu.memory_space<vmem>>, %arg8: memref<64x128xbf16, #tpu.memory_space<vmem>>, %arg9: memref<1x128xf32, #tpu.memory_space<vmem>>, %arg10: memref<1x128xf32, #tpu.memory_space<vmem>>, %arg11: memref<1x16x128xbf16, #tpu.memory_space<vmem>>) attributes {dimension_semantics = [#tpu.dimension_semantics<parallel>, #tpu.dimension_semantics<parallel>], iteration_bounds = array<i64: 2, 1>, scalar_prefetch = 0 : i64, scratch_operands = 0 : i64, tpu.core_type = #tpu.core_type<tc>, window_params = [{transform_indices = @transform_0, window_bounds = array<i64: 1, 4, 16, 3>}, {transform_indices = @transform_1, window_bounds = array<i64: 1, 16, 3>}, {pipeline_mode = #tpu.pipeline_mode<synchronous>, transform_indices = @transform_2, window_bounds = array<i64: 3, 64>}, {pipeline_mode = #tpu.pipeline_mode<synchronous>, transform_indices = @transform_3, window_bounds = array<i64: 3, 64>}, {pipeline_mode = #tpu.pipeline_mode<synchronous>, transform_indices = @transform_4, window_bounds = array<i64: 1, 64>}, {pipeline_mode = #tpu.pipeline_mode<synchronous>, transform_indices = @transform_5, window_bounds = array<i64: 1, 64>}, {pipeline_mode = #tpu.pipeline_mode<synchronous>, transform_indices = @transform_6, window_bounds = array<i64: 64, 128>}, {pipeline_mode = #tpu.pipeline_mode<synchronous>, transform_indices = @transform_7, window_bounds = array<i64: 1, 128>}, {pipeline_mode = #tpu.pipeline_mode<synchronous>, transform_indices = @transform_8, window_bounds = array<i64: 1, 128>}, {transform_indices = @transform_9, window_bounds = array<i64: 1, 16, 128>}]} {
    %c0 = arith.constant 0 : index
    %c0_0 = arith.constant 0 : index
    %0 = vector.load %arg4[%c0, %c0_0] : memref<3x64xbf16, #tpu.memory_space<vmem>>, vector<3x64xbf16>
    %c0_1 = arith.constant 0 : index
    %c0_2 = arith.constant 0 : index
    %1 = vector.load %arg6[%c0_1, %c0_2] : memref<1x64xf32, #tpu.memory_space<vmem>>, vector<1x64xf32>
    %c0_3 = arith.constant 0 : index
    %c0_4 = arith.constant 0 : index
    %2 = vector.load %arg7[%c0_3, %c0_4] : memref<1x64xf32, #tpu.memory_space<vmem>>, vector<1x64xf32>
    %c0_5 = arith.constant 0 : index
    %c0_6 = arith.constant 0 : index
    %c0_7 = arith.constant 0 : index
    %3 = vector.load %arg3[%c0_5, %c0_6, %c0_7] : memref<1x16x3xbf16, #tpu.memory_space<vmem>>, vector<1x16x3xbf16>
    %4 = vector.shape_cast %3 : vector<1x16x3xbf16> to vector<16x3xbf16>
    %c0_8 = arith.constant 0 : index
    %c0_9 = arith.constant 0 : index
    %5 = vector.load %arg5[%c0_8, %c0_9] : memref<3x64xbf16, #tpu.memory_space<vmem>>, vector<3x64xbf16>
    %cst = arith.constant dense<0.000000e+00> : vector<16x64xf32>
    %6 = tpu.matmul %4, %5, %cst {dimension_numbers = #tpu.dot_dimension_numbers<[1], [0], [0], [1], [0, 0, 1, 1], [], []>} : vector<16x3xbf16>, vector<3x64xbf16>, vector<16x64xf32> -> vector<16x64xf32>
    %c0_10 = arith.constant 0 : index
    %c0_11 = arith.constant 0 : index
    %7 = vector.load %arg8[%c0_10, %c0_11] : memref<64x128xbf16, #tpu.memory_space<vmem>>, vector<64x128xbf16>
    %c0_12 = arith.constant 0 : index
    %c0_13 = arith.constant 0 : index
    %8 = vector.load %arg9[%c0_12, %c0_13] : memref<1x128xf32, #tpu.memory_space<vmem>>, vector<1x128xf32>
    %c0_14 = arith.constant 0 : index
    %c0_15 = arith.constant 0 : index
    %9 = vector.load %arg10[%c0_14, %c0_15] : memref<1x128xf32, #tpu.memory_space<vmem>>, vector<1x128xf32>
    %c0_16 = arith.constant 0 : index
    %c0_17 = arith.constant 0 : index
    %c0_18 = arith.constant 0 : index
    %c0_19 = arith.constant 0 : index
    %10 = vector.load %arg2[%c0_16, %c0_17, %c0_18, %c0_19] : memref<1x4x16x3xbf16, #tpu.memory_space<vmem>>, vector<1x1x16x3xbf16>
    %11 = vector.shape_cast %10 : vector<1x1x16x3xbf16> to vector<16x3xbf16>
    %cst_20 = arith.constant dense<0.000000e+00> : vector<16x64xf32>
    %12 = tpu.matmul %11, %0, %cst_20 {dimension_numbers = #tpu.dot_dimension_numbers<[1], [0], [0], [1], [0, 0, 1, 1], [], []>} : vector<16x3xbf16>, vector<3x64xbf16>, vector<16x64xf32> -> vector<16x64xf32>
    %13 = arith.addf %12, %6 : vector<16x64xf32>
    %14 = vector.broadcast %1 : vector<1x64xf32> to vector<16x64xf32>
    %15 = arith.mulf %13, %14 : vector<16x64xf32>
    %16 = vector.broadcast %2 : vector<1x64xf32> to vector<16x64xf32>
    %17 = arith.addf %15, %16 : vector<16x64xf32>
    %cst_21 = arith.constant 2.000000e-01 : f32
    %18 = vector.broadcast %cst_21 : f32 to vector<16x64xf32>
    %19 = arith.mulf %18, %17 : vector<16x64xf32>
    %20 = arith.maximumf %17, %19 : vector<16x64xf32>
    %21 = arith.truncf %20 : vector<16x64xf32> to vector<16x64xbf16>
    %cst_22 = arith.constant dense<0.000000e+00> : vector<16x128xf32>
    %22 = tpu.matmul %21, %7, %cst_22 {dimension_numbers = #tpu.dot_dimension_numbers<[1], [0], [0], [1], [0, 0, 1, 1], [], []>} : vector<16x64xbf16>, vector<64x128xbf16>, vector<16x128xf32> -> vector<16x128xf32>
    %23 = vector.broadcast %8 : vector<1x128xf32> to vector<16x128xf32>
    %24 = arith.mulf %22, %23 : vector<16x128xf32>
    %25 = vector.broadcast %9 : vector<1x128xf32> to vector<16x128xf32>
    %26 = arith.addf %24, %25 : vector<16x128xf32>
    %cst_23 = arith.constant 2.000000e-01 : f32
    %27 = vector.broadcast %cst_23 : f32 to vector<16x128xf32>
    %28 = arith.mulf %27, %26 : vector<16x128xf32>
    %29 = arith.maximumf %26, %28 : vector<16x128xf32>
    %c0_24 = arith.constant 0 : index
    %c1 = arith.constant 1 : index
    %c0_25 = arith.constant 0 : index
    %c0_26 = arith.constant 0 : index
    %30 = vector.load %arg2[%c0_24, %c1, %c0_25, %c0_26] : memref<1x4x16x3xbf16, #tpu.memory_space<vmem>>, vector<1x1x16x3xbf16>
    %31 = vector.shape_cast %30 : vector<1x1x16x3xbf16> to vector<16x3xbf16>
    %cst_27 = arith.constant dense<0.000000e+00> : vector<16x64xf32>
    %32 = tpu.matmul %31, %0, %cst_27 {dimension_numbers = #tpu.dot_dimension_numbers<[1], [0], [0], [1], [0, 0, 1, 1], [], []>} : vector<16x3xbf16>, vector<3x64xbf16>, vector<16x64xf32> -> vector<16x64xf32>
    %33 = arith.addf %32, %6 : vector<16x64xf32>
    %34 = vector.broadcast %1 : vector<1x64xf32> to vector<16x64xf32>
    %35 = arith.mulf %33, %34 : vector<16x64xf32>
    %36 = vector.broadcast %2 : vector<1x64xf32> to vector<16x64xf32>
    %37 = arith.addf %35, %36 : vector<16x64xf32>
    %cst_28 = arith.constant 2.000000e-01 : f32
    %38 = vector.broadcast %cst_28 : f32 to vector<16x64xf32>
    %39 = arith.mulf %38, %37 : vector<16x64xf32>
    %40 = arith.maximumf %37, %39 : vector<16x64xf32>
    %41 = arith.truncf %40 : vector<16x64xf32> to vector<16x64xbf16>
    %cst_29 = arith.constant dense<0.000000e+00> : vector<16x128xf32>
    %42 = tpu.matmul %41, %7, %cst_29 {dimension_numbers = #tpu.dot_dimension_numbers<[1], [0], [0], [1], [0, 0, 1, 1], [], []>} : vector<16x64xbf16>, vector<64x128xbf16>, vector<16x128xf32> -> vector<16x128xf32>
    %43 = vector.broadcast %8 : vector<1x128xf32> to vector<16x128xf32>
    %44 = arith.mulf %42, %43 : vector<16x128xf32>
    %45 = vector.broadcast %9 : vector<1x128xf32> to vector<16x128xf32>
    %46 = arith.addf %44, %45 : vector<16x128xf32>
    %cst_30 = arith.constant 2.000000e-01 : f32
    %47 = vector.broadcast %cst_30 : f32 to vector<16x128xf32>
    %48 = arith.mulf %47, %46 : vector<16x128xf32>
    %49 = arith.maximumf %46, %48 : vector<16x128xf32>
    %50 = arith.maximumf %29, %49 : vector<16x128xf32>
    %c0_31 = arith.constant 0 : index
    %c2 = arith.constant 2 : index
    %c0_32 = arith.constant 0 : index
    %c0_33 = arith.constant 0 : index
    %51 = vector.load %arg2[%c0_31, %c2, %c0_32, %c0_33] : memref<1x4x16x3xbf16, #tpu.memory_space<vmem>>, vector<1x1x16x3xbf16>
    %52 = vector.shape_cast %51 : vector<1x1x16x3xbf16> to vector<16x3xbf16>
    %cst_34 = arith.constant dense<0.000000e+00> : vector<16x64xf32>
    %53 = tpu.matmul %52, %0, %cst_34 {dimension_numbers = #tpu.dot_dimension_numbers<[1], [0], [0], [1], [0, 0, 1, 1], [], []>} : vector<16x3xbf16>, vector<3x64xbf16>, vector<16x64xf32> -> vector<16x64xf32>
    %54 = arith.addf %53, %6 : vector<16x64xf32>
    %55 = vector.broadcast %1 : vector<1x64xf32> to vector<16x64xf32>
    %56 = arith.mulf %54, %55 : vector<16x64xf32>
    %57 = vector.broadcast %2 : vector<1x64xf32> to vector<16x64xf32>
    %58 = arith.addf %56, %57 : vector<16x64xf32>
    %cst_35 = arith.constant 2.000000e-01 : f32
    %59 = vector.broadcast %cst_35 : f32 to vector<16x64xf32>
    %60 = arith.mulf %59, %58 : vector<16x64xf32>
    %61 = arith.maximumf %58, %60 : vector<16x64xf32>
    %62 = arith.truncf %61 : vector<16x64xf32> to vector<16x64xbf16>
    %cst_36 = arith.constant dense<0.000000e+00> : vector<16x128xf32>
    %63 = tpu.matmul %62, %7, %cst_36 {dimension_numbers = #tpu.dot_dimension_numbers<[1], [0], [0], [1], [0, 0, 1, 1], [], []>} : vector<16x64xbf16>, vector<64x128xbf16>, vector<16x128xf32> -> vector<16x128xf32>
    %64 = vector.broadcast %8 : vector<1x128xf32> to vector<16x128xf32>
    %65 = arith.mulf %63, %64 : vector<16x128xf32>
    %66 = vector.broadcast %9 : vector<1x128xf32> to vector<16x128xf32>
    %67 = arith.addf %65, %66 : vector<16x128xf32>
    %cst_37 = arith.constant 2.000000e-01 : f32
    %68 = vector.broadcast %cst_37 : f32 to vector<16x128xf32>
    %69 = arith.mulf %68, %67 : vector<16x128xf32>
    %70 = arith.maximumf %67, %69 : vector<16x128xf32>
    %71 = arith.maximumf %50, %70 : vector<16x128xf32>
    %c0_38 = arith.constant 0 : index
    %c3 = arith.constant 3 : index
    %c0_39 = arith.constant 0 : index
    %c0_40 = arith.constant 0 : index
    %72 = vector.load %arg2[%c0_38, %c3, %c0_39, %c0_40] : memref<1x4x16x3xbf16, #tpu.memory_space<vmem>>, vector<1x1x16x3xbf16>
    %73 = vector.shape_cast %72 : vector<1x1x16x3xbf16> to vector<16x3xbf16>
    %cst_41 = arith.constant dense<0.000000e+00> : vector<16x64xf32>
    %74 = tpu.matmul %73, %0, %cst_41 {dimension_numbers = #tpu.dot_dimension_numbers<[1], [0], [0], [1], [0, 0, 1, 1], [], []>} : vector<16x3xbf16>, vector<3x64xbf16>, vector<16x64xf32> -> vector<16x64xf32>
    %75 = arith.addf %74, %6 : vector<16x64xf32>
    %76 = vector.broadcast %1 : vector<1x64xf32> to vector<16x64xf32>
    %77 = arith.mulf %75, %76 : vector<16x64xf32>
    %78 = vector.broadcast %2 : vector<1x64xf32> to vector<16x64xf32>
    %79 = arith.addf %77, %78 : vector<16x64xf32>
    %cst_42 = arith.constant 2.000000e-01 : f32
    %80 = vector.broadcast %cst_42 : f32 to vector<16x64xf32>
    %81 = arith.mulf %80, %79 : vector<16x64xf32>
    %82 = arith.maximumf %79, %81 : vector<16x64xf32>
    %83 = arith.truncf %82 : vector<16x64xf32> to vector<16x64xbf16>
    %cst_43 = arith.constant dense<0.000000e+00> : vector<16x128xf32>
    %84 = tpu.matmul %83, %7, %cst_43 {dimension_numbers = #tpu.dot_dimension_numbers<[1], [0], [0], [1], [0, 0, 1, 1], [], []>} : vector<16x64xbf16>, vector<64x128xbf16>, vector<16x128xf32> -> vector<16x128xf32>
    %85 = vector.broadcast %8 : vector<1x128xf32> to vector<16x128xf32>
    %86 = arith.mulf %84, %85 : vector<16x128xf32>
    %87 = vector.broadcast %9 : vector<1x128xf32> to vector<16x128xf32>
    %88 = arith.addf %86, %87 : vector<16x128xf32>
    %cst_44 = arith.constant 2.000000e-01 : f32
    %89 = vector.broadcast %cst_44 : f32 to vector<16x128xf32>
    %90 = arith.mulf %89, %88 : vector<16x128xf32>
    %91 = arith.maximumf %88, %90 : vector<16x128xf32>
    %92 = arith.maximumf %71, %91 : vector<16x128xf32>
    %93 = arith.truncf %92 : vector<16x128xf32> to vector<16x128xbf16>
    %c0_45 = arith.constant 0 : index
    %c0_46 = arith.constant 0 : index
    %c0_47 = arith.constant 0 : index
    %94 = vector.load %arg11[%c0_45, %c0_46, %c0_47] : memref<1x16x128xbf16, #tpu.memory_space<vmem>>, vector<1x16x128xbf16>
    %95 = vector.shape_cast %94 : vector<1x16x128xbf16> to vector<16x128xbf16>
    %96 = vector.shape_cast %93 : vector<16x128xbf16> to vector<1x16x128xbf16>
    tpu.vector_store %arg11[%c0_45, %c0_46, %c0_47], %96 {strides = array<i32>} : memref<1x16x128xbf16, #tpu.memory_space<vmem>>, vector<1x16x128xbf16>,
    return
  }
  func.func @transform_0(%arg0: i32, %arg1: i32) -> (i32, i32, i32, i32) {
    %c0_i32 = arith.constant 0 : i32
    %c0_i32_0 = arith.constant 0 : i32
    %c0_i32_1 = arith.constant 0 : i32
    return %arg0, %c0_i32, %arg1, %c0_i32_0 : i32, i32, i32, i32
  }
  func.func @transform_1(%arg0: i32, %arg1: i32) -> (i32, i32, i32) {
    %c0_i32 = arith.constant 0 : i32
    %c0_i32_0 = arith.constant 0 : i32
    return %arg0, %arg1, %c0_i32 : i32, i32, i32
  }
  func.func @transform_2(%arg0: i32, %arg1: i32) -> (i32, i32) {
    %c0_i32 = arith.constant 0 : i32
    %c0_i32_0 = arith.constant 0 : i32
    %c0_i32_1 = arith.constant 0 : i32
    return %c0_i32, %c0_i32_0 : i32, i32
  }
  func.func @transform_3(%arg0: i32, %arg1: i32) -> (i32, i32) {
    %c0_i32 = arith.constant 0 : i32
    %c0_i32_0 = arith.constant 0 : i32
    %c0_i32_1 = arith.constant 0 : i32
    return %c0_i32, %c0_i32_0 : i32, i32
  }
  func.func @transform_4(%arg0: i32, %arg1: i32) -> (i32, i32) {
    %c0_i32 = arith.constant 0 : i32
    %c0_i32_0 = arith.constant 0 : i32
    %c0_i32_1 = arith.constant 0 : i32
    return %c0_i32, %c0_i32_0 : i32, i32
  }
  func.func @transform_5(%arg0: i32, %arg1: i32) -> (i32, i32) {
    %c0_i32 = arith.constant 0 : i32
    %c0_i32_0 = arith.constant 0 : i32
    %c0_i32_1 = arith.constant 0 : i32
    return %c0_i32, %c0_i32_0 : i32, i32
  }
  func.func @transform_6(%arg0: i32, %arg1: i32) -> (i32, i32) {
    %c0_i32 = arith.constant 0 : i32
    %c0_i32_0 = arith.constant 0 : i32
    %c0_i32_1 = arith.constant 0 : i32
    return %c0_i32, %c0_i32_0 : i32, i32
  }
  func.func @transform_7(%arg0: i32, %arg1: i32) -> (i32, i32) {
    %c0_i32 = arith.constant 0 : i32
    %c0_i32_0 = arith.constant 0 : i32
    %c0_i32_1 = arith.constant 0 : i32
    return %c0_i32, %c0_i32_0 : i32, i32
  }
  func.func @transform_8(%arg0: i32, %arg1: i32) -> (i32, i32) {
    %c0_i32 = arith.constant 0 : i32
    %c0_i32_0 = arith.constant 0 : i32
    %c0_i32_1 = arith.constant 0 : i32
    return %c0_i32, %c0_i32_0 : i32, i32
  }
  func.func @transform_9(%arg0: i32, %arg1: i32) -> (i32, i32, i32) {
    %c0_i32 = arith.constant 0 : i32
    %c0_i32_0 = arith.constant 0 : i32
    return %arg0, %arg1, %c0_i32 : i32, i32, i32
  }
}

module attributes {stable_mosaic.version = 11 : i64} {
  func.func @_conv_gmax_kernel(%arg0: i32, %arg1: i32, %arg2: memref<1x16x128xbf16, #tpu.memory_space<vmem>>, %arg3: memref<128x1024xbf16, #tpu.memory_space<vmem>>, %arg4: memref<1x1024xf32, #tpu.memory_space<vmem>>, %arg5: memref<1x1024xf32, #tpu.memory_space<vmem>>, %arg6: memref<1x1x1024xf32, #tpu.memory_space<vmem>>) attributes {dimension_semantics = [#tpu.dimension_semantics<parallel>, #tpu.dimension_semantics<arbitrary>], iteration_bounds = array<i64: 2, 1>, scalar_prefetch = 0 : i64, scratch_operands = 0 : i64, tpu.core_type = #tpu.core_type<tc>, window_params = [{transform_indices = @transform_0, window_bounds = array<i64: 1, 16, 128>}, {pipeline_mode = #tpu.pipeline_mode<synchronous>, transform_indices = @transform_1, window_bounds = array<i64: 128, 1024>}, {pipeline_mode = #tpu.pipeline_mode<synchronous>, transform_indices = @transform_2, window_bounds = array<i64: 1, 1024>}, {pipeline_mode = #tpu.pipeline_mode<synchronous>, transform_indices = @transform_3, window_bounds = array<i64: 1, 1024>}, {transform_indices = @transform_4, window_bounds = array<i64: 1, 1, 1024>}]} {
    %c0 = arith.constant 0 : index
    %c0_0 = arith.constant 0 : index
    %c0_1 = arith.constant 0 : index
    %0 = vector.load %arg2[%c0, %c0_0, %c0_1] : memref<1x16x128xbf16, #tpu.memory_space<vmem>>, vector<1x16x128xbf16>
    %1 = vector.shape_cast %0 : vector<1x16x128xbf16> to vector<16x128xbf16>
    %c0_2 = arith.constant 0 : index
    %c0_3 = arith.constant 0 : index
    %2 = vector.load %arg3[%c0_2, %c0_3] : memref<128x1024xbf16, #tpu.memory_space<vmem>>, vector<128x1024xbf16>
    %cst = arith.constant dense<0.000000e+00> : vector<16x1024xf32>
    %3 = tpu.matmul %1, %2, %cst {dimension_numbers = #tpu.dot_dimension_numbers<[1], [0], [0], [1], [0, 0, 1, 1], [], []>} : vector<16x128xbf16>, vector<128x1024xbf16>, vector<16x1024xf32> -> vector<16x1024xf32>
    %c0_4 = arith.constant 0 : index
    %c0_5 = arith.constant 0 : index
    %4 = vector.load %arg4[%c0_4, %c0_5] : memref<1x1024xf32, #tpu.memory_space<vmem>>, vector<1x1024xf32>
    %5 = vector.broadcast %4 : vector<1x1024xf32> to vector<16x1024xf32>
    %6 = arith.mulf %3, %5 : vector<16x1024xf32>
    %c0_6 = arith.constant 0 : index
    %c0_7 = arith.constant 0 : index
    %7 = vector.load %arg5[%c0_6, %c0_7] : memref<1x1024xf32, #tpu.memory_space<vmem>>, vector<1x1024xf32>
    %8 = vector.broadcast %7 : vector<1x1024xf32> to vector<16x1024xf32>
    %9 = arith.addf %6, %8 : vector<16x1024xf32>
    %cst_8 = arith.constant 2.000000e-01 : f32
    %10 = vector.broadcast %cst_8 : f32 to vector<16x1024xf32>
    %11 = arith.mulf %10, %9 : vector<16x1024xf32>
    %12 = arith.maximumf %9, %11 : vector<16x1024xf32>
    %cst_9 = arith.constant dense<0xFF800000> : vector<1024xf32>
    %13 = vector.multi_reduction <maximumf>, %12, %cst_9 [0] : vector<16x1024xf32> to vector<1024xf32>
    %14 = vector.shape_cast %13 : vector<1024xf32> to vector<1x1024xf32>
    %c0_i32 = arith.constant 0 : i32
    %15 = arith.cmpi eq, %arg1, %c0_i32 : i32
    %16 = arith.extui %15 : i1 to i32
    %c0_i32_10 = arith.constant 0 : i32
    %17 = arith.cmpi ne, %16, %c0_i32_10 : i32
    scf.if %17 {
      %c0_13 = arith.constant 0 : index
      %c0_14 = arith.constant 0 : index
      %c0_15 = arith.constant 0 : index
      %21 = vector.load %arg6[%c0_13, %c0_14, %c0_15] : memref<1x1x1024xf32, #tpu.memory_space<vmem>>, vector<1x1x1024xf32>
      %22 = vector.shape_cast %21 : vector<1x1x1024xf32> to vector<1x1024xf32>
      %23 = vector.shape_cast %14 : vector<1x1024xf32> to vector<1x1x1024xf32>
      tpu.vector_store %arg6[%c0_13, %c0_14, %c0_15], %23 {strides = array<i32>} : memref<1x1x1024xf32, #tpu.memory_space<vmem>>, vector<1x1x1024xf32>,
    } else {
    }
    %c0_i32_11 = arith.constant 0 : i32
    %18 = arith.cmpi ne, %arg1, %c0_i32_11 : i32
    %19 = arith.extui %18 : i1 to i32
    %c0_i32_12 = arith.constant 0 : i32
    %20 = arith.cmpi ne, %19, %c0_i32_12 : i32
    scf.if %20 {
      %c0_13 = arith.constant 0 : index
      %c0_14 = arith.constant 0 : index
      %c0_15 = arith.constant 0 : index
      %21 = vector.load %arg6[%c0_13, %c0_14, %c0_15] : memref<1x1x1024xf32, #tpu.memory_space<vmem>>, vector<1x1x1024xf32>
      %22 = vector.shape_cast %21 : vector<1x1x1024xf32> to vector<1x1024xf32>
      %23 = arith.maximumf %22, %14 : vector<1x1024xf32>
      %c0_16 = arith.constant 0 : index
      %c0_17 = arith.constant 0 : index
      %c0_18 = arith.constant 0 : index
      %24 = vector.load %arg6[%c0_16, %c0_17, %c0_18] : memref<1x1x1024xf32, #tpu.memory_space<vmem>>, vector<1x1x1024xf32>
      %25 = vector.shape_cast %24 : vector<1x1x1024xf32> to vector<1x1024xf32>
      %26 = vector.shape_cast %23 : vector<1x1024xf32> to vector<1x1x1024xf32>
      tpu.vector_store %arg6[%c0_16, %c0_17, %c0_18], %26 {strides = array<i32>} : memref<1x1x1024xf32, #tpu.memory_space<vmem>>, vector<1x1x1024xf32>,
    } else {
    }
    return
  }
  func.func @transform_0(%arg0: i32, %arg1: i32) -> (i32, i32, i32) {
    %c0_i32 = arith.constant 0 : i32
    %c0_i32_0 = arith.constant 0 : i32
    return %arg0, %arg1, %c0_i32 : i32, i32, i32
  }
  func.func @transform_1(%arg0: i32, %arg1: i32) -> (i32, i32) {
    %c0_i32 = arith.constant 0 : i32
    %c0_i32_0 = arith.constant 0 : i32
    %c0_i32_1 = arith.constant 0 : i32
    return %c0_i32, %c0_i32_0 : i32, i32
  }
  func.func @transform_2(%arg0: i32, %arg1: i32) -> (i32, i32) {
    %c0_i32 = arith.constant 0 : i32
    %c0_i32_0 = arith.constant 0 : i32
    %c0_i32_1 = arith.constant 0 : i32
    return %c0_i32, %c0_i32_0 : i32, i32
  }
  func.func @transform_3(%arg0: i32, %arg1: i32) -> (i32, i32) {
    %c0_i32 = arith.constant 0 : i32
    %c0_i32_0 = arith.constant 0 : i32
    %c0_i32_1 = arith.constant 0 : i32
    return %c0_i32, %c0_i32_0 : i32, i32
  }
  func.func @transform_4(%arg0: i32, %arg1: i32) -> (i32, i32, i32) {
    %c0_i32 = arith.constant 0 : i32
    %c0_i32_0 = arith.constant 0 : i32
    %c0_i32_1 = arith.constant 0 : i32
    return %arg0, %c0_i32, %c0_i32_0 : i32, i32, i32
  }
}

module attributes {stable_mosaic.version = 11 : i64} {
  func.func @_mm_affine_kernel(%arg0: i32, %arg1: memref<8x1024xbf16, #tpu.memory_space<vmem>>, %arg2: memref<1024x512xbf16, #tpu.memory_space<vmem>>, %arg3: memref<1x512xf32, #tpu.memory_space<vmem>>, %arg4: memref<1x512xf32, #tpu.memory_space<vmem>>, %arg5: memref<8x512xf32, #tpu.memory_space<vmem>>) attributes {dimension_semantics = [#tpu.dimension_semantics<parallel>], iteration_bounds = array<i64: 1>, scalar_prefetch = 0 : i64, scratch_operands = 0 : i64, tpu.core_type = #tpu.core_type<tc>, window_params = [{transform_indices = @transform_0, window_bounds = array<i64: 8, 1024>}, {pipeline_mode = #tpu.pipeline_mode<synchronous>, transform_indices = @transform_1, window_bounds = array<i64: 1024, 512>}, {pipeline_mode = #tpu.pipeline_mode<synchronous>, transform_indices = @transform_2, window_bounds = array<i64: 1, 512>}, {pipeline_mode = #tpu.pipeline_mode<synchronous>, transform_indices = @transform_3, window_bounds = array<i64: 1, 512>}, {transform_indices = @transform_4, window_bounds = array<i64: 8, 512>}]} {
    %c0 = arith.constant 0 : index
    %c0_0 = arith.constant 0 : index
    %0 = vector.load %arg1[%c0, %c0_0] : memref<8x1024xbf16, #tpu.memory_space<vmem>>, vector<8x1024xbf16>
    %c0_1 = arith.constant 0 : index
    %c0_2 = arith.constant 0 : index
    %1 = vector.load %arg2[%c0_1, %c0_2] : memref<1024x512xbf16, #tpu.memory_space<vmem>>, vector<1024x512xbf16>
    %cst = arith.constant dense<0.000000e+00> : vector<8x512xf32>
    %2 = tpu.matmul %0, %1, %cst {dimension_numbers = #tpu.dot_dimension_numbers<[1], [0], [0], [1], [0, 0, 1, 1], [], []>} : vector<8x1024xbf16>, vector<1024x512xbf16>, vector<8x512xf32> -> vector<8x512xf32>
    %c0_3 = arith.constant 0 : index
    %c0_4 = arith.constant 0 : index
    %3 = vector.load %arg3[%c0_3, %c0_4] : memref<1x512xf32, #tpu.memory_space<vmem>>, vector<1x512xf32>
    %4 = vector.broadcast %3 : vector<1x512xf32> to vector<8x512xf32>
    %5 = arith.mulf %2, %4 : vector<8x512xf32>
    %c0_5 = arith.constant 0 : index
    %c0_6 = arith.constant 0 : index
    %6 = vector.load %arg4[%c0_5, %c0_6] : memref<1x512xf32, #tpu.memory_space<vmem>>, vector<1x512xf32>
    %7 = vector.broadcast %6 : vector<1x512xf32> to vector<8x512xf32>
    %8 = arith.addf %5, %7 : vector<8x512xf32>
    %cst_7 = arith.constant 2.000000e-01 : f32
    %9 = vector.broadcast %cst_7 : f32 to vector<8x512xf32>
    %10 = arith.mulf %9, %8 : vector<8x512xf32>
    %11 = arith.maximumf %8, %10 : vector<8x512xf32>
    %c0_8 = arith.constant 0 : index
    %c0_9 = arith.constant 0 : index
    %12 = vector.load %arg5[%c0_8, %c0_9] : memref<8x512xf32, #tpu.memory_space<vmem>>, vector<8x512xf32>
    tpu.vector_store %arg5[%c0_8, %c0_9], %11 {strides = array<i32>} : memref<8x512xf32, #tpu.memory_space<vmem>>, vector<8x512xf32>,
    return
  }
  func.func @transform_0(%arg0: i32) -> (i32, i32) {
    %c0_i32 = arith.constant 0 : i32
    %c0_i32_0 = arith.constant 0 : i32
    return %arg0, %c0_i32 : i32, i32
  }
  func.func @transform_1(%arg0: i32) -> (i32, i32) {
    %c0_i32 = arith.constant 0 : i32
    %c0_i32_0 = arith.constant 0 : i32
    %c0_i32_1 = arith.constant 0 : i32
    return %c0_i32, %c0_i32_0 : i32, i32
  }
  func.func @transform_2(%arg0: i32) -> (i32, i32) {
    %c0_i32 = arith.constant 0 : i32
    %c0_i32_0 = arith.constant 0 : i32
    %c0_i32_1 = arith.constant 0 : i32
    return %c0_i32, %c0_i32_0 : i32, i32
  }
  func.func @transform_3(%arg0: i32) -> (i32, i32) {
    %c0_i32 = arith.constant 0 : i32
    %c0_i32_0 = arith.constant 0 : i32
    %c0_i32_1 = arith.constant 0 : i32
    return %c0_i32, %c0_i32_0 : i32, i32
  }
  func.func @transform_4(%arg0: i32) -> (i32, i32) {
    %c0_i32 = arith.constant 0 : i32
    %c0_i32_0 = arith.constant 0 : i32
    return %arg0, %c0_i32 : i32, i32
  }
}

module attributes {stable_mosaic.version = 11 : i64} {
  func.func @_mm_affine_kernel(%arg0: i32, %arg1: memref<8x512xbf16, #tpu.memory_space<vmem>>, %arg2: memref<512x256xbf16, #tpu.memory_space<vmem>>, %arg3: memref<1x256xf32, #tpu.memory_space<vmem>>, %arg4: memref<1x256xf32, #tpu.memory_space<vmem>>, %arg5: memref<8x256xf32, #tpu.memory_space<vmem>>) attributes {dimension_semantics = [#tpu.dimension_semantics<parallel>], iteration_bounds = array<i64: 1>, scalar_prefetch = 0 : i64, scratch_operands = 0 : i64, tpu.core_type = #tpu.core_type<tc>, window_params = [{transform_indices = @transform_0, window_bounds = array<i64: 8, 512>}, {pipeline_mode = #tpu.pipeline_mode<synchronous>, transform_indices = @transform_1, window_bounds = array<i64: 512, 256>}, {pipeline_mode = #tpu.pipeline_mode<synchronous>, transform_indices = @transform_2, window_bounds = array<i64: 1, 256>}, {pipeline_mode = #tpu.pipeline_mode<synchronous>, transform_indices = @transform_3, window_bounds = array<i64: 1, 256>}, {transform_indices = @transform_4, window_bounds = array<i64: 8, 256>}]} {
    %c0 = arith.constant 0 : index
    %c0_0 = arith.constant 0 : index
    %0 = vector.load %arg1[%c0, %c0_0] : memref<8x512xbf16, #tpu.memory_space<vmem>>, vector<8x512xbf16>
    %c0_1 = arith.constant 0 : index
    %c0_2 = arith.constant 0 : index
    %1 = vector.load %arg2[%c0_1, %c0_2] : memref<512x256xbf16, #tpu.memory_space<vmem>>, vector<512x256xbf16>
    %cst = arith.constant dense<0.000000e+00> : vector<8x256xf32>
    %2 = tpu.matmul %0, %1, %cst {dimension_numbers = #tpu.dot_dimension_numbers<[1], [0], [0], [1], [0, 0, 1, 1], [], []>} : vector<8x512xbf16>, vector<512x256xbf16>, vector<8x256xf32> -> vector<8x256xf32>
    %c0_3 = arith.constant 0 : index
    %c0_4 = arith.constant 0 : index
    %3 = vector.load %arg3[%c0_3, %c0_4] : memref<1x256xf32, #tpu.memory_space<vmem>>, vector<1x256xf32>
    %4 = vector.broadcast %3 : vector<1x256xf32> to vector<8x256xf32>
    %5 = arith.mulf %2, %4 : vector<8x256xf32>
    %c0_5 = arith.constant 0 : index
    %c0_6 = arith.constant 0 : index
    %6 = vector.load %arg4[%c0_5, %c0_6] : memref<1x256xf32, #tpu.memory_space<vmem>>, vector<1x256xf32>
    %7 = vector.broadcast %6 : vector<1x256xf32> to vector<8x256xf32>
    %8 = arith.addf %5, %7 : vector<8x256xf32>
    %cst_7 = arith.constant 2.000000e-01 : f32
    %9 = vector.broadcast %cst_7 : f32 to vector<8x256xf32>
    %10 = arith.mulf %9, %8 : vector<8x256xf32>
    %11 = arith.maximumf %8, %10 : vector<8x256xf32>
    %c0_8 = arith.constant 0 : index
    %c0_9 = arith.constant 0 : index
    %12 = vector.load %arg5[%c0_8, %c0_9] : memref<8x256xf32, #tpu.memory_space<vmem>>, vector<8x256xf32>
    tpu.vector_store %arg5[%c0_8, %c0_9], %11 {strides = array<i32>} : memref<8x256xf32, #tpu.memory_space<vmem>>, vector<8x256xf32>,
    return
  }
  func.func @transform_0(%arg0: i32) -> (i32, i32) {
    %c0_i32 = arith.constant 0 : i32
    %c0_i32_0 = arith.constant 0 : i32
    return %arg0, %c0_i32 : i32, i32
  }
  func.func @transform_1(%arg0: i32) -> (i32, i32) {
    %c0_i32 = arith.constant 0 : i32
    %c0_i32_0 = arith.constant 0 : i32
    %c0_i32_1 = arith.constant 0 : i32
    return %c0_i32, %c0_i32_0 : i32, i32
  }
  func.func @transform_2(%arg0: i32) -> (i32, i32) {
    %c0_i32 = arith.constant 0 : i32
    %c0_i32_0 = arith.constant 0 : i32
    %c0_i32_1 = arith.constant 0 : i32
    return %c0_i32, %c0_i32_0 : i32, i32
  }
  func.func @transform_3(%arg0: i32) -> (i32, i32) {
    %c0_i32 = arith.constant 0 : i32
    %c0_i32_0 = arith.constant 0 : i32
    %c0_i32_1 = arith.constant 0 : i32
    return %c0_i32, %c0_i32_0 : i32, i32
  }
  func.func @transform_4(%arg0: i32) -> (i32, i32) {
    %c0_i32 = arith.constant 0 : i32
    %c0_i32_0 = arith.constant 0 : i32
    return %arg0, %c0_i32 : i32, i32
  }
}

module attributes {stable_mosaic.version = 11 : i64} {
  func.func @_mm_affine_kernel(%arg0: i32, %arg1: memref<8x256xbf16, #tpu.memory_space<vmem>>, %arg2: memref<256x9xbf16, #tpu.memory_space<vmem>>, %arg3: memref<1x9xf32, #tpu.memory_space<vmem>>, %arg4: memref<1x9xf32, #tpu.memory_space<vmem>>, %arg5: memref<8x9xf32, #tpu.memory_space<vmem>>) attributes {dimension_semantics = [#tpu.dimension_semantics<parallel>], iteration_bounds = array<i64: 1>, scalar_prefetch = 0 : i64, scratch_operands = 0 : i64, tpu.core_type = #tpu.core_type<tc>, window_params = [{transform_indices = @transform_0, window_bounds = array<i64: 8, 256>}, {pipeline_mode = #tpu.pipeline_mode<synchronous>, transform_indices = @transform_1, window_bounds = array<i64: 256, 9>}, {pipeline_mode = #tpu.pipeline_mode<synchronous>, transform_indices = @transform_2, window_bounds = array<i64: 1, 9>}, {pipeline_mode = #tpu.pipeline_mode<synchronous>, transform_indices = @transform_3, window_bounds = array<i64: 1, 9>}, {transform_indices = @transform_4, window_bounds = array<i64: 8, 9>}]} {
    %c0 = arith.constant 0 : index
    %c0_0 = arith.constant 0 : index
    %0 = vector.load %arg1[%c0, %c0_0] : memref<8x256xbf16, #tpu.memory_space<vmem>>, vector<8x256xbf16>
    %c0_1 = arith.constant 0 : index
    %c0_2 = arith.constant 0 : index
    %1 = vector.load %arg2[%c0_1, %c0_2] : memref<256x9xbf16, #tpu.memory_space<vmem>>, vector<256x9xbf16>
    %cst = arith.constant dense<0.000000e+00> : vector<8x9xf32>
    %2 = tpu.matmul %0, %1, %cst {dimension_numbers = #tpu.dot_dimension_numbers<[1], [0], [0], [1], [0, 0, 1, 1], [], []>} : vector<8x256xbf16>, vector<256x9xbf16>, vector<8x9xf32> -> vector<8x9xf32>
    %c0_3 = arith.constant 0 : index
    %c0_4 = arith.constant 0 : index
    %3 = vector.load %arg3[%c0_3, %c0_4] : memref<1x9xf32, #tpu.memory_space<vmem>>, vector<1x9xf32>
    %4 = vector.broadcast %3 : vector<1x9xf32> to vector<8x9xf32>
    %5 = arith.mulf %2, %4 : vector<8x9xf32>
    %c0_5 = arith.constant 0 : index
    %c0_6 = arith.constant 0 : index
    %6 = vector.load %arg4[%c0_5, %c0_6] : memref<1x9xf32, #tpu.memory_space<vmem>>, vector<1x9xf32>
    %7 = vector.broadcast %6 : vector<1x9xf32> to vector<8x9xf32>
    %8 = arith.addf %5, %7 : vector<8x9xf32>
    %c0_7 = arith.constant 0 : index
    %c0_8 = arith.constant 0 : index
    %9 = vector.load %arg5[%c0_7, %c0_8] : memref<8x9xf32, #tpu.memory_space<vmem>>, vector<8x9xf32>
    tpu.vector_store %arg5[%c0_7, %c0_8], %8 {strides = array<i32>} : memref<8x9xf32, #tpu.memory_space<vmem>>, vector<8x9xf32>,
    return
  }
  func.func @transform_0(%arg0: i32) -> (i32, i32) {
    %c0_i32 = arith.constant 0 : i32
    %c0_i32_0 = arith.constant 0 : i32
    return %arg0, %c0_i32 : i32, i32
  }
  func.func @transform_1(%arg0: i32) -> (i32, i32) {
    %c0_i32 = arith.constant 0 : i32
    %c0_i32_0 = arith.constant 0 : i32
    %c0_i32_1 = arith.constant 0 : i32
    return %c0_i32, %c0_i32_0 : i32, i32
  }
  func.func @transform_2(%arg0: i32) -> (i32, i32) {
    %c0_i32 = arith.constant 0 : i32
    %c0_i32_0 = arith.constant 0 : i32
    %c0_i32_1 = arith.constant 0 : i32
    return %c0_i32, %c0_i32_0 : i32, i32
  }
  func.func @transform_3(%arg0: i32) -> (i32, i32) {
    %c0_i32 = arith.constant 0 : i32
    %c0_i32_0 = arith.constant 0 : i32
    %c0_i32_1 = arith.constant 0 : i32
    return %c0_i32, %c0_i32_0 : i32, i32
  }
  func.func @transform_4(%arg0: i32) -> (i32, i32) {
    %c0_i32 = arith.constant 0 : i32
    %c0_i32_0 = arith.constant 0 : i32
    return %arg0, %c0_i32 : i32, i32
  }
}

module attributes {stable_mosaic.version = 11 : i64} {
  func.func @_edge_conv_kernel(%arg0: i32, %arg1: i32, %arg2: memref<1x4x16x3xbf16, #tpu.memory_space<vmem>>, %arg3: memref<1x16x3xbf16, #tpu.memory_space<vmem>>, %arg4: memref<3x64xbf16, #tpu.memory_space<vmem>>, %arg5: memref<3x64xbf16, #tpu.memory_space<vmem>>, %arg6: memref<1x64xf32, #tpu.memory_space<vmem>>, %arg7: memref<1x64xf32, #tpu.memory_space<vmem>>, %arg8: memref<64x64xbf16, #tpu.memory_space<vmem>>, %arg9: memref<1x64xf32, #tpu.memory_space<vmem>>, %arg10: memref<1x64xf32, #tpu.memory_space<vmem>>, %arg11: memref<1x16x64xbf16, #tpu.memory_space<vmem>>) attributes {dimension_semantics = [#tpu.dimension_semantics<parallel>, #tpu.dimension_semantics<parallel>], iteration_bounds = array<i64: 2, 1>, scalar_prefetch = 0 : i64, scratch_operands = 0 : i64, tpu.core_type = #tpu.core_type<tc>, window_params = [{transform_indices = @transform_0, window_bounds = array<i64: 1, 4, 16, 3>}, {transform_indices = @transform_1, window_bounds = array<i64: 1, 16, 3>}, {pipeline_mode = #tpu.pipeline_mode<synchronous>, transform_indices = @transform_2, window_bounds = array<i64: 3, 64>}, {pipeline_mode = #tpu.pipeline_mode<synchronous>, transform_indices = @transform_3, window_bounds = array<i64: 3, 64>}, {pipeline_mode = #tpu.pipeline_mode<synchronous>, transform_indices = @transform_4, window_bounds = array<i64: 1, 64>}, {pipeline_mode = #tpu.pipeline_mode<synchronous>, transform_indices = @transform_5, window_bounds = array<i64: 1, 64>}, {pipeline_mode = #tpu.pipeline_mode<synchronous>, transform_indices = @transform_6, window_bounds = array<i64: 64, 64>}, {pipeline_mode = #tpu.pipeline_mode<synchronous>, transform_indices = @transform_7, window_bounds = array<i64: 1, 64>}, {pipeline_mode = #tpu.pipeline_mode<synchronous>, transform_indices = @transform_8, window_bounds = array<i64: 1, 64>}, {transform_indices = @transform_9, window_bounds = array<i64: 1, 16, 64>}]} {
    %c0 = arith.constant 0 : index
    %c0_0 = arith.constant 0 : index
    %0 = vector.load %arg4[%c0, %c0_0] : memref<3x64xbf16, #tpu.memory_space<vmem>>, vector<3x64xbf16>
    %c0_1 = arith.constant 0 : index
    %c0_2 = arith.constant 0 : index
    %1 = vector.load %arg6[%c0_1, %c0_2] : memref<1x64xf32, #tpu.memory_space<vmem>>, vector<1x64xf32>
    %c0_3 = arith.constant 0 : index
    %c0_4 = arith.constant 0 : index
    %2 = vector.load %arg7[%c0_3, %c0_4] : memref<1x64xf32, #tpu.memory_space<vmem>>, vector<1x64xf32>
    %c0_5 = arith.constant 0 : index
    %c0_6 = arith.constant 0 : index
    %c0_7 = arith.constant 0 : index
    %3 = vector.load %arg3[%c0_5, %c0_6, %c0_7] : memref<1x16x3xbf16, #tpu.memory_space<vmem>>, vector<1x16x3xbf16>
    %4 = vector.shape_cast %3 : vector<1x16x3xbf16> to vector<16x3xbf16>
    %c0_8 = arith.constant 0 : index
    %c0_9 = arith.constant 0 : index
    %5 = vector.load %arg5[%c0_8, %c0_9] : memref<3x64xbf16, #tpu.memory_space<vmem>>, vector<3x64xbf16>
    %cst = arith.constant dense<0.000000e+00> : vector<16x64xf32>
    %6 = tpu.matmul %4, %5, %cst {dimension_numbers = #tpu.dot_dimension_numbers<[1], [0], [0], [1], [0, 0, 1, 1], [], []>} : vector<16x3xbf16>, vector<3x64xbf16>, vector<16x64xf32> -> vector<16x64xf32>
    %c0_10 = arith.constant 0 : index
    %c0_11 = arith.constant 0 : index
    %7 = vector.load %arg8[%c0_10, %c0_11] : memref<64x64xbf16, #tpu.memory_space<vmem>>, vector<64x64xbf16>
    %c0_12 = arith.constant 0 : index
    %c0_13 = arith.constant 0 : index
    %8 = vector.load %arg9[%c0_12, %c0_13] : memref<1x64xf32, #tpu.memory_space<vmem>>, vector<1x64xf32>
    %c0_14 = arith.constant 0 : index
    %c0_15 = arith.constant 0 : index
    %9 = vector.load %arg10[%c0_14, %c0_15] : memref<1x64xf32, #tpu.memory_space<vmem>>, vector<1x64xf32>
    %c0_16 = arith.constant 0 : index
    %c0_17 = arith.constant 0 : index
    %c0_18 = arith.constant 0 : index
    %c0_19 = arith.constant 0 : index
    %10 = vector.load %arg2[%c0_16, %c0_17, %c0_18, %c0_19] : memref<1x4x16x3xbf16, #tpu.memory_space<vmem>>, vector<1x1x16x3xbf16>
    %11 = vector.shape_cast %10 : vector<1x1x16x3xbf16> to vector<16x3xbf16>
    %cst_20 = arith.constant dense<0.000000e+00> : vector<16x64xf32>
    %12 = tpu.matmul %11, %0, %cst_20 {dimension_numbers = #tpu.dot_dimension_numbers<[1], [0], [0], [1], [0, 0, 1, 1], [], []>} : vector<16x3xbf16>, vector<3x64xbf16>, vector<16x64xf32> -> vector<16x64xf32>
    %13 = arith.addf %12, %6 : vector<16x64xf32>
    %14 = vector.broadcast %1 : vector<1x64xf32> to vector<16x64xf32>
    %15 = arith.mulf %13, %14 : vector<16x64xf32>
    %16 = vector.broadcast %2 : vector<1x64xf32> to vector<16x64xf32>
    %17 = arith.addf %15, %16 : vector<16x64xf32>
    %cst_21 = arith.constant 2.000000e-01 : f32
    %18 = vector.broadcast %cst_21 : f32 to vector<16x64xf32>
    %19 = arith.mulf %18, %17 : vector<16x64xf32>
    %20 = arith.maximumf %17, %19 : vector<16x64xf32>
    %21 = arith.truncf %20 : vector<16x64xf32> to vector<16x64xbf16>
    %cst_22 = arith.constant dense<0.000000e+00> : vector<16x64xf32>
    %22 = tpu.matmul %21, %7, %cst_22 {dimension_numbers = #tpu.dot_dimension_numbers<[1], [0], [0], [1], [0, 0, 1, 1], [], []>} : vector<16x64xbf16>, vector<64x64xbf16>, vector<16x64xf32> -> vector<16x64xf32>
    %23 = vector.broadcast %8 : vector<1x64xf32> to vector<16x64xf32>
    %24 = arith.mulf %22, %23 : vector<16x64xf32>
    %25 = vector.broadcast %9 : vector<1x64xf32> to vector<16x64xf32>
    %26 = arith.addf %24, %25 : vector<16x64xf32>
    %cst_23 = arith.constant 2.000000e-01 : f32
    %27 = vector.broadcast %cst_23 : f32 to vector<16x64xf32>
    %28 = arith.mulf %27, %26 : vector<16x64xf32>
    %29 = arith.maximumf %26, %28 : vector<16x64xf32>
    %c0_24 = arith.constant 0 : index
    %c1 = arith.constant 1 : index
    %c0_25 = arith.constant 0 : index
    %c0_26 = arith.constant 0 : index
    %30 = vector.load %arg2[%c0_24, %c1, %c0_25, %c0_26] : memref<1x4x16x3xbf16, #tpu.memory_space<vmem>>, vector<1x1x16x3xbf16>
    %31 = vector.shape_cast %30 : vector<1x1x16x3xbf16> to vector<16x3xbf16>
    %cst_27 = arith.constant dense<0.000000e+00> : vector<16x64xf32>
    %32 = tpu.matmul %31, %0, %cst_27 {dimension_numbers = #tpu.dot_dimension_numbers<[1], [0], [0], [1], [0, 0, 1, 1], [], []>} : vector<16x3xbf16>, vector<3x64xbf16>, vector<16x64xf32> -> vector<16x64xf32>
    %33 = arith.addf %32, %6 : vector<16x64xf32>
    %34 = vector.broadcast %1 : vector<1x64xf32> to vector<16x64xf32>
    %35 = arith.mulf %33, %34 : vector<16x64xf32>
    %36 = vector.broadcast %2 : vector<1x64xf32> to vector<16x64xf32>
    %37 = arith.addf %35, %36 : vector<16x64xf32>
    %cst_28 = arith.constant 2.000000e-01 : f32
    %38 = vector.broadcast %cst_28 : f32 to vector<16x64xf32>
    %39 = arith.mulf %38, %37 : vector<16x64xf32>
    %40 = arith.maximumf %37, %39 : vector<16x64xf32>
    %41 = arith.truncf %40 : vector<16x64xf32> to vector<16x64xbf16>
    %cst_29 = arith.constant dense<0.000000e+00> : vector<16x64xf32>
    %42 = tpu.matmul %41, %7, %cst_29 {dimension_numbers = #tpu.dot_dimension_numbers<[1], [0], [0], [1], [0, 0, 1, 1], [], []>} : vector<16x64xbf16>, vector<64x64xbf16>, vector<16x64xf32> -> vector<16x64xf32>
    %43 = vector.broadcast %8 : vector<1x64xf32> to vector<16x64xf32>
    %44 = arith.mulf %42, %43 : vector<16x64xf32>
    %45 = vector.broadcast %9 : vector<1x64xf32> to vector<16x64xf32>
    %46 = arith.addf %44, %45 : vector<16x64xf32>
    %cst_30 = arith.constant 2.000000e-01 : f32
    %47 = vector.broadcast %cst_30 : f32 to vector<16x64xf32>
    %48 = arith.mulf %47, %46 : vector<16x64xf32>
    %49 = arith.maximumf %46, %48 : vector<16x64xf32>
    %50 = arith.maximumf %29, %49 : vector<16x64xf32>
    %c0_31 = arith.constant 0 : index
    %c2 = arith.constant 2 : index
    %c0_32 = arith.constant 0 : index
    %c0_33 = arith.constant 0 : index
    %51 = vector.load %arg2[%c0_31, %c2, %c0_32, %c0_33] : memref<1x4x16x3xbf16, #tpu.memory_space<vmem>>, vector<1x1x16x3xbf16>
    %52 = vector.shape_cast %51 : vector<1x1x16x3xbf16> to vector<16x3xbf16>
    %cst_34 = arith.constant dense<0.000000e+00> : vector<16x64xf32>
    %53 = tpu.matmul %52, %0, %cst_34 {dimension_numbers = #tpu.dot_dimension_numbers<[1], [0], [0], [1], [0, 0, 1, 1], [], []>} : vector<16x3xbf16>, vector<3x64xbf16>, vector<16x64xf32> -> vector<16x64xf32>
    %54 = arith.addf %53, %6 : vector<16x64xf32>
    %55 = vector.broadcast %1 : vector<1x64xf32> to vector<16x64xf32>
    %56 = arith.mulf %54, %55 : vector<16x64xf32>
    %57 = vector.broadcast %2 : vector<1x64xf32> to vector<16x64xf32>
    %58 = arith.addf %56, %57 : vector<16x64xf32>
    %cst_35 = arith.constant 2.000000e-01 : f32
    %59 = vector.broadcast %cst_35 : f32 to vector<16x64xf32>
    %60 = arith.mulf %59, %58 : vector<16x64xf32>
    %61 = arith.maximumf %58, %60 : vector<16x64xf32>
    %62 = arith.truncf %61 : vector<16x64xf32> to vector<16x64xbf16>
    %cst_36 = arith.constant dense<0.000000e+00> : vector<16x64xf32>
    %63 = tpu.matmul %62, %7, %cst_36 {dimension_numbers = #tpu.dot_dimension_numbers<[1], [0], [0], [1], [0, 0, 1, 1], [], []>} : vector<16x64xbf16>, vector<64x64xbf16>, vector<16x64xf32> -> vector<16x64xf32>
    %64 = vector.broadcast %8 : vector<1x64xf32> to vector<16x64xf32>
    %65 = arith.mulf %63, %64 : vector<16x64xf32>
    %66 = vector.broadcast %9 : vector<1x64xf32> to vector<16x64xf32>
    %67 = arith.addf %65, %66 : vector<16x64xf32>
    %cst_37 = arith.constant 2.000000e-01 : f32
    %68 = vector.broadcast %cst_37 : f32 to vector<16x64xf32>
    %69 = arith.mulf %68, %67 : vector<16x64xf32>
    %70 = arith.maximumf %67, %69 : vector<16x64xf32>
    %71 = arith.maximumf %50, %70 : vector<16x64xf32>
    %c0_38 = arith.constant 0 : index
    %c3 = arith.constant 3 : index
    %c0_39 = arith.constant 0 : index
    %c0_40 = arith.constant 0 : index
    %72 = vector.load %arg2[%c0_38, %c3, %c0_39, %c0_40] : memref<1x4x16x3xbf16, #tpu.memory_space<vmem>>, vector<1x1x16x3xbf16>
    %73 = vector.shape_cast %72 : vector<1x1x16x3xbf16> to vector<16x3xbf16>
    %cst_41 = arith.constant dense<0.000000e+00> : vector<16x64xf32>
    %74 = tpu.matmul %73, %0, %cst_41 {dimension_numbers = #tpu.dot_dimension_numbers<[1], [0], [0], [1], [0, 0, 1, 1], [], []>} : vector<16x3xbf16>, vector<3x64xbf16>, vector<16x64xf32> -> vector<16x64xf32>
    %75 = arith.addf %74, %6 : vector<16x64xf32>
    %76 = vector.broadcast %1 : vector<1x64xf32> to vector<16x64xf32>
    %77 = arith.mulf %75, %76 : vector<16x64xf32>
    %78 = vector.broadcast %2 : vector<1x64xf32> to vector<16x64xf32>
    %79 = arith.addf %77, %78 : vector<16x64xf32>
    %cst_42 = arith.constant 2.000000e-01 : f32
    %80 = vector.broadcast %cst_42 : f32 to vector<16x64xf32>
    %81 = arith.mulf %80, %79 : vector<16x64xf32>
    %82 = arith.maximumf %79, %81 : vector<16x64xf32>
    %83 = arith.truncf %82 : vector<16x64xf32> to vector<16x64xbf16>
    %cst_43 = arith.constant dense<0.000000e+00> : vector<16x64xf32>
    %84 = tpu.matmul %83, %7, %cst_43 {dimension_numbers = #tpu.dot_dimension_numbers<[1], [0], [0], [1], [0, 0, 1, 1], [], []>} : vector<16x64xbf16>, vector<64x64xbf16>, vector<16x64xf32> -> vector<16x64xf32>
    %85 = vector.broadcast %8 : vector<1x64xf32> to vector<16x64xf32>
    %86 = arith.mulf %84, %85 : vector<16x64xf32>
    %87 = vector.broadcast %9 : vector<1x64xf32> to vector<16x64xf32>
    %88 = arith.addf %86, %87 : vector<16x64xf32>
    %cst_44 = arith.constant 2.000000e-01 : f32
    %89 = vector.broadcast %cst_44 : f32 to vector<16x64xf32>
    %90 = arith.mulf %89, %88 : vector<16x64xf32>
    %91 = arith.maximumf %88, %90 : vector<16x64xf32>
    %92 = arith.maximumf %71, %91 : vector<16x64xf32>
    %93 = arith.truncf %92 : vector<16x64xf32> to vector<16x64xbf16>
    %c0_45 = arith.constant 0 : index
    %c0_46 = arith.constant 0 : index
    %c0_47 = arith.constant 0 : index
    %94 = vector.load %arg11[%c0_45, %c0_46, %c0_47] : memref<1x16x64xbf16, #tpu.memory_space<vmem>>, vector<1x16x64xbf16>
    %95 = vector.shape_cast %94 : vector<1x16x64xbf16> to vector<16x64xbf16>
    %96 = vector.shape_cast %93 : vector<16x64xbf16> to vector<1x16x64xbf16>
    tpu.vector_store %arg11[%c0_45, %c0_46, %c0_47], %96 {strides = array<i32>} : memref<1x16x64xbf16, #tpu.memory_space<vmem>>, vector<1x16x64xbf16>,
    return
  }
  func.func @transform_0(%arg0: i32, %arg1: i32) -> (i32, i32, i32, i32) {
    %c0_i32 = arith.constant 0 : i32
    %c0_i32_0 = arith.constant 0 : i32
    %c0_i32_1 = arith.constant 0 : i32
    return %arg0, %c0_i32, %arg1, %c0_i32_0 : i32, i32, i32, i32
  }
  func.func @transform_1(%arg0: i32, %arg1: i32) -> (i32, i32, i32) {
    %c0_i32 = arith.constant 0 : i32
    %c0_i32_0 = arith.constant 0 : i32
    return %arg0, %arg1, %c0_i32 : i32, i32, i32
  }
  func.func @transform_2(%arg0: i32, %arg1: i32) -> (i32, i32) {
    %c0_i32 = arith.constant 0 : i32
    %c0_i32_0 = arith.constant 0 : i32
    %c0_i32_1 = arith.constant 0 : i32
    return %c0_i32, %c0_i32_0 : i32, i32
  }
  func.func @transform_3(%arg0: i32, %arg1: i32) -> (i32, i32) {
    %c0_i32 = arith.constant 0 : i32
    %c0_i32_0 = arith.constant 0 : i32
    %c0_i32_1 = arith.constant 0 : i32
    return %c0_i32, %c0_i32_0 : i32, i32
  }
  func.func @transform_4(%arg0: i32, %arg1: i32) -> (i32, i32) {
    %c0_i32 = arith.constant 0 : i32
    %c0_i32_0 = arith.constant 0 : i32
    %c0_i32_1 = arith.constant 0 : i32
    return %c0_i32, %c0_i32_0 : i32, i32
  }
  func.func @transform_5(%arg0: i32, %arg1: i32) -> (i32, i32) {
    %c0_i32 = arith.constant 0 : i32
    %c0_i32_0 = arith.constant 0 : i32
    %c0_i32_1 = arith.constant 0 : i32
    return %c0_i32, %c0_i32_0 : i32, i32
  }
  func.func @transform_6(%arg0: i32, %arg1: i32) -> (i32, i32) {
    %c0_i32 = arith.constant 0 : i32
    %c0_i32_0 = arith.constant 0 : i32
    %c0_i32_1 = arith.constant 0 : i32
    return %c0_i32, %c0_i32_0 : i32, i32
  }
  func.func @transform_7(%arg0: i32, %arg1: i32) -> (i32, i32) {
    %c0_i32 = arith.constant 0 : i32
    %c0_i32_0 = arith.constant 0 : i32
    %c0_i32_1 = arith.constant 0 : i32
    return %c0_i32, %c0_i32_0 : i32, i32
  }
  func.func @transform_8(%arg0: i32, %arg1: i32) -> (i32, i32) {
    %c0_i32 = arith.constant 0 : i32
    %c0_i32_0 = arith.constant 0 : i32
    %c0_i32_1 = arith.constant 0 : i32
    return %c0_i32, %c0_i32_0 : i32, i32
  }
  func.func @transform_9(%arg0: i32, %arg1: i32) -> (i32, i32, i32) {
    %c0_i32 = arith.constant 0 : i32
    %c0_i32_0 = arith.constant 0 : i32
    return %arg0, %arg1, %c0_i32 : i32, i32, i32
  }
}

module attributes {stable_mosaic.version = 11 : i64} {
  func.func @_pdist_kernel(%arg0: i32, %arg1: i32, %arg2: memref<1x16x64xbf16, #tpu.memory_space<vmem>>, %arg3: memref<1x16x64xbf16, #tpu.memory_space<vmem>>, %arg4: memref<1x1x16xf32, #tpu.memory_space<vmem>>, %arg5: memref<1x16x16xf32, #tpu.memory_space<vmem>>) attributes {dimension_semantics = [#tpu.dimension_semantics<parallel>, #tpu.dimension_semantics<parallel>], iteration_bounds = array<i64: 2, 1>, scalar_prefetch = 0 : i64, scratch_operands = 0 : i64, tpu.core_type = #tpu.core_type<tc>, window_params = [{transform_indices = @transform_0, window_bounds = array<i64: 1, 16, 64>}, {transform_indices = @transform_1, window_bounds = array<i64: 1, 16, 64>}, {transform_indices = @transform_2, window_bounds = array<i64: 1, 1, 16>}, {transform_indices = @transform_3, window_bounds = array<i64: 1, 16, 16>}]} {
    %c0 = arith.constant 0 : index
    %c0_0 = arith.constant 0 : index
    %c0_1 = arith.constant 0 : index
    %0 = vector.load %arg2[%c0, %c0_0, %c0_1] : memref<1x16x64xbf16, #tpu.memory_space<vmem>>, vector<1x16x64xbf16>
    %1 = vector.shape_cast %0 : vector<1x16x64xbf16> to vector<16x64xbf16>
    %2 = arith.extf %1 : vector<16x64xbf16> to vector<16x64xf32>
    %c0_2 = arith.constant 0 : index
    %c0_3 = arith.constant 0 : index
    %c0_4 = arith.constant 0 : index
    %3 = vector.load %arg3[%c0_2, %c0_3, %c0_4] : memref<1x16x64xbf16, #tpu.memory_space<vmem>>, vector<1x16x64xbf16>
    %4 = vector.shape_cast %3 : vector<1x16x64xbf16> to vector<16x64xbf16>
    %5 = arith.extf %4 : vector<16x64xbf16> to vector<16x64xf32>
    %cst = arith.constant dense<0.000000e+00> : vector<16x16xf32>
    %6 = tpu.matmul %2, %5, %cst {dimension_numbers = #tpu.dot_dimension_numbers<[1], [1], [0], [0], [0, 0, 1, 0], [], []>} : vector<16x64xf32>, vector<16x64xf32>, vector<16x16xf32> -> vector<16x16xf32>
    %7 = arith.mulf %2, %2 : vector<16x64xf32>
    %cst_5 = arith.constant dense<0.000000e+00> : vector<16xf32>
    %8 = vector.multi_reduction <add>, %7, %cst_5 [1] : vector<16x64xf32> to vector<16xf32>
    %9 = vector.shape_cast %8 : vector<16xf32> to vector<16x1xf32>
    %cst_6 = arith.constant 2.000000e+00 : f32
    %10 = vector.broadcast %cst_6 : f32 to vector<16x16xf32>
    %11 = arith.mulf %10, %6 : vector<16x16xf32>
    %12 = vector.broadcast %9 : vector<16x1xf32> to vector<16x16xf32>
    %13 = arith.subf %11, %12 : vector<16x16xf32>
    %c0_7 = arith.constant 0 : index
    %c0_8 = arith.constant 0 : index
    %c0_9 = arith.constant 0 : index
    %14 = vector.load %arg4[%c0_7, %c0_8, %c0_9] : memref<1x1x16xf32, #tpu.memory_space<vmem>>, vector<1x1x16xf32>
    %15 = vector.shape_cast %14 : vector<1x1x16xf32> to vector<1x16xf32>
    %16 = vector.broadcast %15 : vector<1x16xf32> to vector<16x16xf32>
    %17 = arith.subf %13, %16 : vector<16x16xf32>
    %c0_10 = arith.constant 0 : index
    %c0_11 = arith.constant 0 : index
    %c0_12 = arith.constant 0 : index
    %18 = vector.load %arg5[%c0_10, %c0_11, %c0_12] : memref<1x16x16xf32, #tpu.memory_space<vmem>>, vector<1x16x16xf32>
    %19 = vector.shape_cast %18 : vector<1x16x16xf32> to vector<16x16xf32>
    %20 = vector.shape_cast %17 : vector<16x16xf32> to vector<1x16x16xf32>
    tpu.vector_store %arg5[%c0_10, %c0_11, %c0_12], %20 {strides = array<i32>} : memref<1x16x16xf32, #tpu.memory_space<vmem>>, vector<1x16x16xf32>,
    return
  }
  func.func @transform_0(%arg0: i32, %arg1: i32) -> (i32, i32, i32) {
    %c0_i32 = arith.constant 0 : i32
    %c0_i32_0 = arith.constant 0 : i32
    return %arg0, %arg1, %c0_i32 : i32, i32, i32
  }
  func.func @transform_1(%arg0: i32, %arg1: i32) -> (i32, i32, i32) {
    %c0_i32 = arith.constant 0 : i32
    %c0_i32_0 = arith.constant 0 : i32
    %c0_i32_1 = arith.constant 0 : i32
    return %arg0, %c0_i32, %c0_i32_0 : i32, i32, i32
  }
  func.func @transform_2(%arg0: i32, %arg1: i32) -> (i32, i32, i32) {
    %c0_i32 = arith.constant 0 : i32
    %c0_i32_0 = arith.constant 0 : i32
    %c0_i32_1 = arith.constant 0 : i32
    return %arg0, %c0_i32, %c0_i32_0 : i32, i32, i32
  }
  func.func @transform_3(%arg0: i32, %arg1: i32) -> (i32, i32, i32) {
    %c0_i32 = arith.constant 0 : i32
    %c0_i32_0 = arith.constant 0 : i32
    return %arg0, %arg1, %c0_i32 : i32, i32, i32
  }
}

module attributes {stable_mosaic.version = 11 : i64} {
  func.func @_edge_conv_kernel(%arg0: i32, %arg1: i32, %arg2: memref<1x4x16x64xbf16, #tpu.memory_space<vmem>>, %arg3: memref<1x16x64xbf16, #tpu.memory_space<vmem>>, %arg4: memref<64x64xbf16, #tpu.memory_space<vmem>>, %arg5: memref<64x64xbf16, #tpu.memory_space<vmem>>, %arg6: memref<1x64xf32, #tpu.memory_space<vmem>>, %arg7: memref<1x64xf32, #tpu.memory_space<vmem>>, %arg8: memref<64x64xbf16, #tpu.memory_space<vmem>>, %arg9: memref<1x64xf32, #tpu.memory_space<vmem>>, %arg10: memref<1x64xf32, #tpu.memory_space<vmem>>, %arg11: memref<1x16x64xbf16, #tpu.memory_space<vmem>>) attributes {dimension_semantics = [#tpu.dimension_semantics<parallel>, #tpu.dimension_semantics<parallel>], iteration_bounds = array<i64: 2, 1>, scalar_prefetch = 0 : i64, scratch_operands = 0 : i64, tpu.core_type = #tpu.core_type<tc>, window_params = [{transform_indices = @transform_0, window_bounds = array<i64: 1, 4, 16, 64>}, {transform_indices = @transform_1, window_bounds = array<i64: 1, 16, 64>}, {pipeline_mode = #tpu.pipeline_mode<synchronous>, transform_indices = @transform_2, window_bounds = array<i64: 64, 64>}, {pipeline_mode = #tpu.pipeline_mode<synchronous>, transform_indices = @transform_3, window_bounds = array<i64: 64, 64>}, {pipeline_mode = #tpu.pipeline_mode<synchronous>, transform_indices = @transform_4, window_bounds = array<i64: 1, 64>}, {pipeline_mode = #tpu.pipeline_mode<synchronous>, transform_indices = @transform_5, window_bounds = array<i64: 1, 64>}, {pipeline_mode = #tpu.pipeline_mode<synchronous>, transform_indices = @transform_6, window_bounds = array<i64: 64, 64>}, {pipeline_mode = #tpu.pipeline_mode<synchronous>, transform_indices = @transform_7, window_bounds = array<i64: 1, 64>}, {pipeline_mode = #tpu.pipeline_mode<synchronous>, transform_indices = @transform_8, window_bounds = array<i64: 1, 64>}, {transform_indices = @transform_9, window_bounds = array<i64: 1, 16, 64>}]} {
    %c0 = arith.constant 0 : index
    %c0_0 = arith.constant 0 : index
    %0 = vector.load %arg4[%c0, %c0_0] : memref<64x64xbf16, #tpu.memory_space<vmem>>, vector<64x64xbf16>
    %c0_1 = arith.constant 0 : index
    %c0_2 = arith.constant 0 : index
    %1 = vector.load %arg6[%c0_1, %c0_2] : memref<1x64xf32, #tpu.memory_space<vmem>>, vector<1x64xf32>
    %c0_3 = arith.constant 0 : index
    %c0_4 = arith.constant 0 : index
    %2 = vector.load %arg7[%c0_3, %c0_4] : memref<1x64xf32, #tpu.memory_space<vmem>>, vector<1x64xf32>
    %c0_5 = arith.constant 0 : index
    %c0_6 = arith.constant 0 : index
    %c0_7 = arith.constant 0 : index
    %3 = vector.load %arg3[%c0_5, %c0_6, %c0_7] : memref<1x16x64xbf16, #tpu.memory_space<vmem>>, vector<1x16x64xbf16>
    %4 = vector.shape_cast %3 : vector<1x16x64xbf16> to vector<16x64xbf16>
    %c0_8 = arith.constant 0 : index
    %c0_9 = arith.constant 0 : index
    %5 = vector.load %arg5[%c0_8, %c0_9] : memref<64x64xbf16, #tpu.memory_space<vmem>>, vector<64x64xbf16>
    %cst = arith.constant dense<0.000000e+00> : vector<16x64xf32>
    %6 = tpu.matmul %4, %5, %cst {dimension_numbers = #tpu.dot_dimension_numbers<[1], [0], [0], [1], [0, 0, 1, 1], [], []>} : vector<16x64xbf16>, vector<64x64xbf16>, vector<16x64xf32> -> vector<16x64xf32>
    %c0_10 = arith.constant 0 : index
    %c0_11 = arith.constant 0 : index
    %7 = vector.load %arg8[%c0_10, %c0_11] : memref<64x64xbf16, #tpu.memory_space<vmem>>, vector<64x64xbf16>
    %c0_12 = arith.constant 0 : index
    %c0_13 = arith.constant 0 : index
    %8 = vector.load %arg9[%c0_12, %c0_13] : memref<1x64xf32, #tpu.memory_space<vmem>>, vector<1x64xf32>
    %c0_14 = arith.constant 0 : index
    %c0_15 = arith.constant 0 : index
    %9 = vector.load %arg10[%c0_14, %c0_15] : memref<1x64xf32, #tpu.memory_space<vmem>>, vector<1x64xf32>
    %c0_16 = arith.constant 0 : index
    %c0_17 = arith.constant 0 : index
    %c0_18 = arith.constant 0 : index
    %c0_19 = arith.constant 0 : index
    %10 = vector.load %arg2[%c0_16, %c0_17, %c0_18, %c0_19] : memref<1x4x16x64xbf16, #tpu.memory_space<vmem>>, vector<1x1x16x64xbf16>
    %11 = vector.shape_cast %10 : vector<1x1x16x64xbf16> to vector<16x64xbf16>
    %cst_20 = arith.constant dense<0.000000e+00> : vector<16x64xf32>
    %12 = tpu.matmul %11, %0, %cst_20 {dimension_numbers = #tpu.dot_dimension_numbers<[1], [0], [0], [1], [0, 0, 1, 1], [], []>} : vector<16x64xbf16>, vector<64x64xbf16>, vector<16x64xf32> -> vector<16x64xf32>
    %13 = arith.addf %12, %6 : vector<16x64xf32>
    %14 = vector.broadcast %1 : vector<1x64xf32> to vector<16x64xf32>
    %15 = arith.mulf %13, %14 : vector<16x64xf32>
    %16 = vector.broadcast %2 : vector<1x64xf32> to vector<16x64xf32>
    %17 = arith.addf %15, %16 : vector<16x64xf32>
    %cst_21 = arith.constant 2.000000e-01 : f32
    %18 = vector.broadcast %cst_21 : f32 to vector<16x64xf32>
    %19 = arith.mulf %18, %17 : vector<16x64xf32>
    %20 = arith.maximumf %17, %19 : vector<16x64xf32>
    %21 = arith.truncf %20 : vector<16x64xf32> to vector<16x64xbf16>
    %cst_22 = arith.constant dense<0.000000e+00> : vector<16x64xf32>
    %22 = tpu.matmul %21, %7, %cst_22 {dimension_numbers = #tpu.dot_dimension_numbers<[1], [0], [0], [1], [0, 0, 1, 1], [], []>} : vector<16x64xbf16>, vector<64x64xbf16>, vector<16x64xf32> -> vector<16x64xf32>
    %23 = vector.broadcast %8 : vector<1x64xf32> to vector<16x64xf32>
    %24 = arith.mulf %22, %23 : vector<16x64xf32>
    %25 = vector.broadcast %9 : vector<1x64xf32> to vector<16x64xf32>
    %26 = arith.addf %24, %25 : vector<16x64xf32>
    %cst_23 = arith.constant 2.000000e-01 : f32
    %27 = vector.broadcast %cst_23 : f32 to vector<16x64xf32>
    %28 = arith.mulf %27, %26 : vector<16x64xf32>
    %29 = arith.maximumf %26, %28 : vector<16x64xf32>
    %c0_24 = arith.constant 0 : index
    %c1 = arith.constant 1 : index
    %c0_25 = arith.constant 0 : index
    %c0_26 = arith.constant 0 : index
    %30 = vector.load %arg2[%c0_24, %c1, %c0_25, %c0_26] : memref<1x4x16x64xbf16, #tpu.memory_space<vmem>>, vector<1x1x16x64xbf16>
    %31 = vector.shape_cast %30 : vector<1x1x16x64xbf16> to vector<16x64xbf16>
    %cst_27 = arith.constant dense<0.000000e+00> : vector<16x64xf32>
    %32 = tpu.matmul %31, %0, %cst_27 {dimension_numbers = #tpu.dot_dimension_numbers<[1], [0], [0], [1], [0, 0, 1, 1], [], []>} : vector<16x64xbf16>, vector<64x64xbf16>, vector<16x64xf32> -> vector<16x64xf32>
    %33 = arith.addf %32, %6 : vector<16x64xf32>
    %34 = vector.broadcast %1 : vector<1x64xf32> to vector<16x64xf32>
    %35 = arith.mulf %33, %34 : vector<16x64xf32>
    %36 = vector.broadcast %2 : vector<1x64xf32> to vector<16x64xf32>
    %37 = arith.addf %35, %36 : vector<16x64xf32>
    %cst_28 = arith.constant 2.000000e-01 : f32
    %38 = vector.broadcast %cst_28 : f32 to vector<16x64xf32>
    %39 = arith.mulf %38, %37 : vector<16x64xf32>
    %40 = arith.maximumf %37, %39 : vector<16x64xf32>
    %41 = arith.truncf %40 : vector<16x64xf32> to vector<16x64xbf16>
    %cst_29 = arith.constant dense<0.000000e+00> : vector<16x64xf32>
    %42 = tpu.matmul %41, %7, %cst_29 {dimension_numbers = #tpu.dot_dimension_numbers<[1], [0], [0], [1], [0, 0, 1, 1], [], []>} : vector<16x64xbf16>, vector<64x64xbf16>, vector<16x64xf32> -> vector<16x64xf32>
    %43 = vector.broadcast %8 : vector<1x64xf32> to vector<16x64xf32>
    %44 = arith.mulf %42, %43 : vector<16x64xf32>
    %45 = vector.broadcast %9 : vector<1x64xf32> to vector<16x64xf32>
    %46 = arith.addf %44, %45 : vector<16x64xf32>
    %cst_30 = arith.constant 2.000000e-01 : f32
    %47 = vector.broadcast %cst_30 : f32 to vector<16x64xf32>
    %48 = arith.mulf %47, %46 : vector<16x64xf32>
    %49 = arith.maximumf %46, %48 : vector<16x64xf32>
    %50 = arith.maximumf %29, %49 : vector<16x64xf32>
    %c0_31 = arith.constant 0 : index
    %c2 = arith.constant 2 : index
    %c0_32 = arith.constant 0 : index
    %c0_33 = arith.constant 0 : index
    %51 = vector.load %arg2[%c0_31, %c2, %c0_32, %c0_33] : memref<1x4x16x64xbf16, #tpu.memory_space<vmem>>, vector<1x1x16x64xbf16>
    %52 = vector.shape_cast %51 : vector<1x1x16x64xbf16> to vector<16x64xbf16>
    %cst_34 = arith.constant dense<0.000000e+00> : vector<16x64xf32>
    %53 = tpu.matmul %52, %0, %cst_34 {dimension_numbers = #tpu.dot_dimension_numbers<[1], [0], [0], [1], [0, 0, 1, 1], [], []>} : vector<16x64xbf16>, vector<64x64xbf16>, vector<16x64xf32> -> vector<16x64xf32>
    %54 = arith.addf %53, %6 : vector<16x64xf32>
    %55 = vector.broadcast %1 : vector<1x64xf32> to vector<16x64xf32>
    %56 = arith.mulf %54, %55 : vector<16x64xf32>
    %57 = vector.broadcast %2 : vector<1x64xf32> to vector<16x64xf32>
    %58 = arith.addf %56, %57 : vector<16x64xf32>
    %cst_35 = arith.constant 2.000000e-01 : f32
    %59 = vector.broadcast %cst_35 : f32 to vector<16x64xf32>
    %60 = arith.mulf %59, %58 : vector<16x64xf32>
    %61 = arith.maximumf %58, %60 : vector<16x64xf32>
    %62 = arith.truncf %61 : vector<16x64xf32> to vector<16x64xbf16>
    %cst_36 = arith.constant dense<0.000000e+00> : vector<16x64xf32>
    %63 = tpu.matmul %62, %7, %cst_36 {dimension_numbers = #tpu.dot_dimension_numbers<[1], [0], [0], [1], [0, 0, 1, 1], [], []>} : vector<16x64xbf16>, vector<64x64xbf16>, vector<16x64xf32> -> vector<16x64xf32>
    %64 = vector.broadcast %8 : vector<1x64xf32> to vector<16x64xf32>
    %65 = arith.mulf %63, %64 : vector<16x64xf32>
    %66 = vector.broadcast %9 : vector<1x64xf32> to vector<16x64xf32>
    %67 = arith.addf %65, %66 : vector<16x64xf32>
    %cst_37 = arith.constant 2.000000e-01 : f32
    %68 = vector.broadcast %cst_37 : f32 to vector<16x64xf32>
    %69 = arith.mulf %68, %67 : vector<16x64xf32>
    %70 = arith.maximumf %67, %69 : vector<16x64xf32>
    %71 = arith.maximumf %50, %70 : vector<16x64xf32>
    %c0_38 = arith.constant 0 : index
    %c3 = arith.constant 3 : index
    %c0_39 = arith.constant 0 : index
    %c0_40 = arith.constant 0 : index
    %72 = vector.load %arg2[%c0_38, %c3, %c0_39, %c0_40] : memref<1x4x16x64xbf16, #tpu.memory_space<vmem>>, vector<1x1x16x64xbf16>
    %73 = vector.shape_cast %72 : vector<1x1x16x64xbf16> to vector<16x64xbf16>
    %cst_41 = arith.constant dense<0.000000e+00> : vector<16x64xf32>
    %74 = tpu.matmul %73, %0, %cst_41 {dimension_numbers = #tpu.dot_dimension_numbers<[1], [0], [0], [1], [0, 0, 1, 1], [], []>} : vector<16x64xbf16>, vector<64x64xbf16>, vector<16x64xf32> -> vector<16x64xf32>
    %75 = arith.addf %74, %6 : vector<16x64xf32>
    %76 = vector.broadcast %1 : vector<1x64xf32> to vector<16x64xf32>
    %77 = arith.mulf %75, %76 : vector<16x64xf32>
    %78 = vector.broadcast %2 : vector<1x64xf32> to vector<16x64xf32>
    %79 = arith.addf %77, %78 : vector<16x64xf32>
    %cst_42 = arith.constant 2.000000e-01 : f32
    %80 = vector.broadcast %cst_42 : f32 to vector<16x64xf32>
    %81 = arith.mulf %80, %79 : vector<16x64xf32>
    %82 = arith.maximumf %79, %81 : vector<16x64xf32>
    %83 = arith.truncf %82 : vector<16x64xf32> to vector<16x64xbf16>
    %cst_43 = arith.constant dense<0.000000e+00> : vector<16x64xf32>
    %84 = tpu.matmul %83, %7, %cst_43 {dimension_numbers = #tpu.dot_dimension_numbers<[1], [0], [0], [1], [0, 0, 1, 1], [], []>} : vector<16x64xbf16>, vector<64x64xbf16>, vector<16x64xf32> -> vector<16x64xf32>
    %85 = vector.broadcast %8 : vector<1x64xf32> to vector<16x64xf32>
    %86 = arith.mulf %84, %85 : vector<16x64xf32>
    %87 = vector.broadcast %9 : vector<1x64xf32> to vector<16x64xf32>
    %88 = arith.addf %86, %87 : vector<16x64xf32>
    %cst_44 = arith.constant 2.000000e-01 : f32
    %89 = vector.broadcast %cst_44 : f32 to vector<16x64xf32>
    %90 = arith.mulf %89, %88 : vector<16x64xf32>
    %91 = arith.maximumf %88, %90 : vector<16x64xf32>
    %92 = arith.maximumf %71, %91 : vector<16x64xf32>
    %93 = arith.truncf %92 : vector<16x64xf32> to vector<16x64xbf16>
    %c0_45 = arith.constant 0 : index
    %c0_46 = arith.constant 0 : index
    %c0_47 = arith.constant 0 : index
    %94 = vector.load %arg11[%c0_45, %c0_46, %c0_47] : memref<1x16x64xbf16, #tpu.memory_space<vmem>>, vector<1x16x64xbf16>
    %95 = vector.shape_cast %94 : vector<1x16x64xbf16> to vector<16x64xbf16>
    %96 = vector.shape_cast %93 : vector<16x64xbf16> to vector<1x16x64xbf16>
    tpu.vector_store %arg11[%c0_45, %c0_46, %c0_47], %96 {strides = array<i32>} : memref<1x16x64xbf16, #tpu.memory_space<vmem>>, vector<1x16x64xbf16>,
    return
  }
  func.func @transform_0(%arg0: i32, %arg1: i32) -> (i32, i32, i32, i32) {
    %c0_i32 = arith.constant 0 : i32
    %c0_i32_0 = arith.constant 0 : i32
    %c0_i32_1 = arith.constant 0 : i32
    return %arg0, %c0_i32, %arg1, %c0_i32_0 : i32, i32, i32, i32
  }
  func.func @transform_1(%arg0: i32, %arg1: i32) -> (i32, i32, i32) {
    %c0_i32 = arith.constant 0 : i32
    %c0_i32_0 = arith.constant 0 : i32
    return %arg0, %arg1, %c0_i32 : i32, i32, i32
  }
  func.func @transform_2(%arg0: i32, %arg1: i32) -> (i32, i32) {
    %c0_i32 = arith.constant 0 : i32
    %c0_i32_0 = arith.constant 0 : i32
    %c0_i32_1 = arith.constant 0 : i32
    return %c0_i32, %c0_i32_0 : i32, i32
  }
  func.func @transform_3(%arg0: i32, %arg1: i32) -> (i32, i32) {
    %c0_i32 = arith.constant 0 : i32
    %c0_i32_0 = arith.constant 0 : i32
    %c0_i32_1 = arith.constant 0 : i32
    return %c0_i32, %c0_i32_0 : i32, i32
  }
  func.func @transform_4(%arg0: i32, %arg1: i32) -> (i32, i32) {
    %c0_i32 = arith.constant 0 : i32
    %c0_i32_0 = arith.constant 0 : i32
    %c0_i32_1 = arith.constant 0 : i32
    return %c0_i32, %c0_i32_0 : i32, i32
  }
  func.func @transform_5(%arg0: i32, %arg1: i32) -> (i32, i32) {
    %c0_i32 = arith.constant 0 : i32
    %c0_i32_0 = arith.constant 0 : i32
    %c0_i32_1 = arith.constant 0 : i32
    return %c0_i32, %c0_i32_0 : i32, i32
  }
  func.func @transform_6(%arg0: i32, %arg1: i32) -> (i32, i32) {
    %c0_i32 = arith.constant 0 : i32
    %c0_i32_0 = arith.constant 0 : i32
    %c0_i32_1 = arith.constant 0 : i32
    return %c0_i32, %c0_i32_0 : i32, i32
  }
  func.func @transform_7(%arg0: i32, %arg1: i32) -> (i32, i32) {
    %c0_i32 = arith.constant 0 : i32
    %c0_i32_0 = arith.constant 0 : i32
    %c0_i32_1 = arith.constant 0 : i32
    return %c0_i32, %c0_i32_0 : i32, i32
  }
  func.func @transform_8(%arg0: i32, %arg1: i32) -> (i32, i32) {
    %c0_i32 = arith.constant 0 : i32
    %c0_i32_0 = arith.constant 0 : i32
    %c0_i32_1 = arith.constant 0 : i32
    return %c0_i32, %c0_i32_0 : i32, i32
  }
  func.func @transform_9(%arg0: i32, %arg1: i32) -> (i32, i32, i32) {
    %c0_i32 = arith.constant 0 : i32
    %c0_i32_0 = arith.constant 0 : i32
    return %arg0, %arg1, %c0_i32 : i32, i32, i32
  }
}

module attributes {stable_mosaic.version = 11 : i64} {
  func.func @_edge_conv_kernel(%arg0: i32, %arg1: i32, %arg2: memref<1x4x16x64xbf16, #tpu.memory_space<vmem>>, %arg3: memref<1x16x64xbf16, #tpu.memory_space<vmem>>, %arg4: memref<64x64xbf16, #tpu.memory_space<vmem>>, %arg5: memref<64x64xbf16, #tpu.memory_space<vmem>>, %arg6: memref<1x64xf32, #tpu.memory_space<vmem>>, %arg7: memref<1x64xf32, #tpu.memory_space<vmem>>, %arg8: memref<1x16x64xbf16, #tpu.memory_space<vmem>>) attributes {dimension_semantics = [#tpu.dimension_semantics<parallel>, #tpu.dimension_semantics<parallel>], iteration_bounds = array<i64: 2, 1>, scalar_prefetch = 0 : i64, scratch_operands = 0 : i64, tpu.core_type = #tpu.core_type<tc>, window_params = [{transform_indices = @transform_0, window_bounds = array<i64: 1, 4, 16, 64>}, {transform_indices = @transform_1, window_bounds = array<i64: 1, 16, 64>}, {pipeline_mode = #tpu.pipeline_mode<synchronous>, transform_indices = @transform_2, window_bounds = array<i64: 64, 64>}, {pipeline_mode = #tpu.pipeline_mode<synchronous>, transform_indices = @transform_3, window_bounds = array<i64: 64, 64>}, {pipeline_mode = #tpu.pipeline_mode<synchronous>, transform_indices = @transform_4, window_bounds = array<i64: 1, 64>}, {pipeline_mode = #tpu.pipeline_mode<synchronous>, transform_indices = @transform_5, window_bounds = array<i64: 1, 64>}, {transform_indices = @transform_6, window_bounds = array<i64: 1, 16, 64>}]} {
    %c0 = arith.constant 0 : index
    %c0_0 = arith.constant 0 : index
    %0 = vector.load %arg4[%c0, %c0_0] : memref<64x64xbf16, #tpu.memory_space<vmem>>, vector<64x64xbf16>
    %c0_1 = arith.constant 0 : index
    %c0_2 = arith.constant 0 : index
    %1 = vector.load %arg6[%c0_1, %c0_2] : memref<1x64xf32, #tpu.memory_space<vmem>>, vector<1x64xf32>
    %c0_3 = arith.constant 0 : index
    %c0_4 = arith.constant 0 : index
    %2 = vector.load %arg7[%c0_3, %c0_4] : memref<1x64xf32, #tpu.memory_space<vmem>>, vector<1x64xf32>
    %c0_5 = arith.constant 0 : index
    %c0_6 = arith.constant 0 : index
    %c0_7 = arith.constant 0 : index
    %3 = vector.load %arg3[%c0_5, %c0_6, %c0_7] : memref<1x16x64xbf16, #tpu.memory_space<vmem>>, vector<1x16x64xbf16>
    %4 = vector.shape_cast %3 : vector<1x16x64xbf16> to vector<16x64xbf16>
    %c0_8 = arith.constant 0 : index
    %c0_9 = arith.constant 0 : index
    %5 = vector.load %arg5[%c0_8, %c0_9] : memref<64x64xbf16, #tpu.memory_space<vmem>>, vector<64x64xbf16>
    %cst = arith.constant dense<0.000000e+00> : vector<16x64xf32>
    %6 = tpu.matmul %4, %5, %cst {dimension_numbers = #tpu.dot_dimension_numbers<[1], [0], [0], [1], [0, 0, 1, 1], [], []>} : vector<16x64xbf16>, vector<64x64xbf16>, vector<16x64xf32> -> vector<16x64xf32>
    %c0_10 = arith.constant 0 : index
    %c0_11 = arith.constant 0 : index
    %c0_12 = arith.constant 0 : index
    %c0_13 = arith.constant 0 : index
    %7 = vector.load %arg2[%c0_10, %c0_11, %c0_12, %c0_13] : memref<1x4x16x64xbf16, #tpu.memory_space<vmem>>, vector<1x1x16x64xbf16>
    %8 = vector.shape_cast %7 : vector<1x1x16x64xbf16> to vector<16x64xbf16>
    %cst_14 = arith.constant dense<0.000000e+00> : vector<16x64xf32>
    %9 = tpu.matmul %8, %0, %cst_14 {dimension_numbers = #tpu.dot_dimension_numbers<[1], [0], [0], [1], [0, 0, 1, 1], [], []>} : vector<16x64xbf16>, vector<64x64xbf16>, vector<16x64xf32> -> vector<16x64xf32>
    %10 = arith.addf %9, %6 : vector<16x64xf32>
    %11 = vector.broadcast %1 : vector<1x64xf32> to vector<16x64xf32>
    %12 = arith.mulf %10, %11 : vector<16x64xf32>
    %13 = vector.broadcast %2 : vector<1x64xf32> to vector<16x64xf32>
    %14 = arith.addf %12, %13 : vector<16x64xf32>
    %cst_15 = arith.constant 2.000000e-01 : f32
    %15 = vector.broadcast %cst_15 : f32 to vector<16x64xf32>
    %16 = arith.mulf %15, %14 : vector<16x64xf32>
    %17 = arith.maximumf %14, %16 : vector<16x64xf32>
    %c0_16 = arith.constant 0 : index
    %c1 = arith.constant 1 : index
    %c0_17 = arith.constant 0 : index
    %c0_18 = arith.constant 0 : index
    %18 = vector.load %arg2[%c0_16, %c1, %c0_17, %c0_18] : memref<1x4x16x64xbf16, #tpu.memory_space<vmem>>, vector<1x1x16x64xbf16>
    %19 = vector.shape_cast %18 : vector<1x1x16x64xbf16> to vector<16x64xbf16>
    %cst_19 = arith.constant dense<0.000000e+00> : vector<16x64xf32>
    %20 = tpu.matmul %19, %0, %cst_19 {dimension_numbers = #tpu.dot_dimension_numbers<[1], [0], [0], [1], [0, 0, 1, 1], [], []>} : vector<16x64xbf16>, vector<64x64xbf16>, vector<16x64xf32> -> vector<16x64xf32>
    %21 = arith.addf %20, %6 : vector<16x64xf32>
    %22 = vector.broadcast %1 : vector<1x64xf32> to vector<16x64xf32>
    %23 = arith.mulf %21, %22 : vector<16x64xf32>
    %24 = vector.broadcast %2 : vector<1x64xf32> to vector<16x64xf32>
    %25 = arith.addf %23, %24 : vector<16x64xf32>
    %cst_20 = arith.constant 2.000000e-01 : f32
    %26 = vector.broadcast %cst_20 : f32 to vector<16x64xf32>
    %27 = arith.mulf %26, %25 : vector<16x64xf32>
    %28 = arith.maximumf %25, %27 : vector<16x64xf32>
    %29 = arith.maximumf %17, %28 : vector<16x64xf32>
    %c0_21 = arith.constant 0 : index
    %c2 = arith.constant 2 : index
    %c0_22 = arith.constant 0 : index
    %c0_23 = arith.constant 0 : index
    %30 = vector.load %arg2[%c0_21, %c2, %c0_22, %c0_23] : memref<1x4x16x64xbf16, #tpu.memory_space<vmem>>, vector<1x1x16x64xbf16>
    %31 = vector.shape_cast %30 : vector<1x1x16x64xbf16> to vector<16x64xbf16>
    %cst_24 = arith.constant dense<0.000000e+00> : vector<16x64xf32>
    %32 = tpu.matmul %31, %0, %cst_24 {dimension_numbers = #tpu.dot_dimension_numbers<[1], [0], [0], [1], [0, 0, 1, 1], [], []>} : vector<16x64xbf16>, vector<64x64xbf16>, vector<16x64xf32> -> vector<16x64xf32>
    %33 = arith.addf %32, %6 : vector<16x64xf32>
    %34 = vector.broadcast %1 : vector<1x64xf32> to vector<16x64xf32>
    %35 = arith.mulf %33, %34 : vector<16x64xf32>
    %36 = vector.broadcast %2 : vector<1x64xf32> to vector<16x64xf32>
    %37 = arith.addf %35, %36 : vector<16x64xf32>
    %cst_25 = arith.constant 2.000000e-01 : f32
    %38 = vector.broadcast %cst_25 : f32 to vector<16x64xf32>
    %39 = arith.mulf %38, %37 : vector<16x64xf32>
    %40 = arith.maximumf %37, %39 : vector<16x64xf32>
    %41 = arith.maximumf %29, %40 : vector<16x64xf32>
    %c0_26 = arith.constant 0 : index
    %c3 = arith.constant 3 : index
    %c0_27 = arith.constant 0 : index
    %c0_28 = arith.constant 0 : index
    %42 = vector.load %arg2[%c0_26, %c3, %c0_27, %c0_28] : memref<1x4x16x64xbf16, #tpu.memory_space<vmem>>, vector<1x1x16x64xbf16>
    %43 = vector.shape_cast %42 : vector<1x1x16x64xbf16> to vector<16x64xbf16>
    %cst_29 = arith.constant dense<0.000000e+00> : vector<16x64xf32>
    %44 = tpu.matmul %43, %0, %cst_29 {dimension_numbers = #tpu.dot_dimension_numbers<[1], [0], [0], [1], [0, 0, 1, 1], [], []>} : vector<16x64xbf16>, vector<64x64xbf16>, vector<16x64xf32> -> vector<16x64xf32>
    %45 = arith.addf %44, %6 : vector<16x64xf32>
    %46 = vector.broadcast %1 : vector<1x64xf32> to vector<16x64xf32>
    %47 = arith.mulf %45, %46 : vector<16x64xf32>
    %48 = vector.broadcast %2 : vector<1x64xf32> to vector<16x64xf32>
    %49 = arith.addf %47, %48 : vector<16x64xf32>
    %cst_30 = arith.constant 2.000000e-01 : f32
    %50 = vector.broadcast %cst_30 : f32 to vector<16x64xf32>
    %51 = arith.mulf %50, %49 : vector<16x64xf32>
    %52 = arith.maximumf %49, %51 : vector<16x64xf32>
    %53 = arith.maximumf %41, %52 : vector<16x64xf32>
    %54 = arith.truncf %53 : vector<16x64xf32> to vector<16x64xbf16>
    %c0_31 = arith.constant 0 : index
    %c0_32 = arith.constant 0 : index
    %c0_33 = arith.constant 0 : index
    %55 = vector.load %arg8[%c0_31, %c0_32, %c0_33] : memref<1x16x64xbf16, #tpu.memory_space<vmem>>, vector<1x16x64xbf16>
    %56 = vector.shape_cast %55 : vector<1x16x64xbf16> to vector<16x64xbf16>
    %57 = vector.shape_cast %54 : vector<16x64xbf16> to vector<1x16x64xbf16>
    tpu.vector_store %arg8[%c0_31, %c0_32, %c0_33], %57 {strides = array<i32>} : memref<1x16x64xbf16, #tpu.memory_space<vmem>>, vector<1x16x64xbf16>,
    return
  }
  func.func @transform_0(%arg0: i32, %arg1: i32) -> (i32, i32, i32, i32) {
    %c0_i32 = arith.constant 0 : i32
    %c0_i32_0 = arith.constant 0 : i32
    %c0_i32_1 = arith.constant 0 : i32
    return %arg0, %c0_i32, %arg1, %c0_i32_0 : i32, i32, i32, i32
  }
  func.func @transform_1(%arg0: i32, %arg1: i32) -> (i32, i32, i32) {
    %c0_i32 = arith.constant 0 : i32
    %c0_i32_0 = arith.constant 0 : i32
    return %arg0, %arg1, %c0_i32 : i32, i32, i32
  }
  func.func @transform_2(%arg0: i32, %arg1: i32) -> (i32, i32) {
    %c0_i32 = arith.constant 0 : i32
    %c0_i32_0 = arith.constant 0 : i32
    %c0_i32_1 = arith.constant 0 : i32
    return %c0_i32, %c0_i32_0 : i32, i32
  }
  func.func @transform_3(%arg0: i32, %arg1: i32) -> (i32, i32) {
    %c0_i32 = arith.constant 0 : i32
    %c0_i32_0 = arith.constant 0 : i32
    %c0_i32_1 = arith.constant 0 : i32
    return %c0_i32, %c0_i32_0 : i32, i32
  }
  func.func @transform_4(%arg0: i32, %arg1: i32) -> (i32, i32) {
    %c0_i32 = arith.constant 0 : i32
    %c0_i32_0 = arith.constant 0 : i32
    %c0_i32_1 = arith.constant 0 : i32
    return %c0_i32, %c0_i32_0 : i32, i32
  }
  func.func @transform_5(%arg0: i32, %arg1: i32) -> (i32, i32) {
    %c0_i32 = arith.constant 0 : i32
    %c0_i32_0 = arith.constant 0 : i32
    %c0_i32_1 = arith.constant 0 : i32
    return %c0_i32, %c0_i32_0 : i32, i32
  }
  func.func @transform_6(%arg0: i32, %arg1: i32) -> (i32, i32, i32) {
    %c0_i32 = arith.constant 0 : i32
    %c0_i32_0 = arith.constant 0 : i32
    return %arg0, %arg1, %c0_i32 : i32, i32, i32
  }
}

module attributes {stable_mosaic.version = 11 : i64} {
  func.func @_conv_gmax_kernel(%arg0: i32, %arg1: i32, %arg2: memref<1x16x64xbf16, #tpu.memory_space<vmem>>, %arg3: memref<1x16x64xbf16, #tpu.memory_space<vmem>>, %arg4: memref<1x16x64xbf16, #tpu.memory_space<vmem>>, %arg5: memref<64x1024xbf16, #tpu.memory_space<vmem>>, %arg6: memref<64x1024xbf16, #tpu.memory_space<vmem>>, %arg7: memref<64x1024xbf16, #tpu.memory_space<vmem>>, %arg8: memref<1x1024xf32, #tpu.memory_space<vmem>>, %arg9: memref<1x1024xf32, #tpu.memory_space<vmem>>, %arg10: memref<1x1x1024xf32, #tpu.memory_space<vmem>>) attributes {dimension_semantics = [#tpu.dimension_semantics<parallel>, #tpu.dimension_semantics<arbitrary>], iteration_bounds = array<i64: 2, 1>, scalar_prefetch = 0 : i64, scratch_operands = 0 : i64, tpu.core_type = #tpu.core_type<tc>, window_params = [{transform_indices = @transform_0, window_bounds = array<i64: 1, 16, 64>}, {transform_indices = @transform_1, window_bounds = array<i64: 1, 16, 64>}, {transform_indices = @transform_2, window_bounds = array<i64: 1, 16, 64>}, {pipeline_mode = #tpu.pipeline_mode<synchronous>, transform_indices = @transform_3, window_bounds = array<i64: 64, 1024>}, {pipeline_mode = #tpu.pipeline_mode<synchronous>, transform_indices = @transform_4, window_bounds = array<i64: 64, 1024>}, {pipeline_mode = #tpu.pipeline_mode<synchronous>, transform_indices = @transform_5, window_bounds = array<i64: 64, 1024>}, {pipeline_mode = #tpu.pipeline_mode<synchronous>, transform_indices = @transform_6, window_bounds = array<i64: 1, 1024>}, {pipeline_mode = #tpu.pipeline_mode<synchronous>, transform_indices = @transform_7, window_bounds = array<i64: 1, 1024>}, {transform_indices = @transform_8, window_bounds = array<i64: 1, 1, 1024>}]} {
    %c0 = arith.constant 0 : index
    %c0_0 = arith.constant 0 : index
    %c0_1 = arith.constant 0 : index
    %0 = vector.load %arg2[%c0, %c0_0, %c0_1] : memref<1x16x64xbf16, #tpu.memory_space<vmem>>, vector<1x16x64xbf16>
    %1 = vector.shape_cast %0 : vector<1x16x64xbf16> to vector<16x64xbf16>
    %c0_2 = arith.constant 0 : index
    %c0_3 = arith.constant 0 : index
    %2 = vector.load %arg5[%c0_2, %c0_3] : memref<64x1024xbf16, #tpu.memory_space<vmem>>, vector<64x1024xbf16>
    %cst = arith.constant dense<0.000000e+00> : vector<16x1024xf32>
    %3 = tpu.matmul %1, %2, %cst {dimension_numbers = #tpu.dot_dimension_numbers<[1], [0], [0], [1], [0, 0, 1, 1], [], []>} : vector<16x64xbf16>, vector<64x1024xbf16>, vector<16x1024xf32> -> vector<16x1024xf32>
    %c0_4 = arith.constant 0 : index
    %c0_5 = arith.constant 0 : index
    %c0_6 = arith.constant 0 : index
    %4 = vector.load %arg3[%c0_4, %c0_5, %c0_6] : memref<1x16x64xbf16, #tpu.memory_space<vmem>>, vector<1x16x64xbf16>
    %5 = vector.shape_cast %4 : vector<1x16x64xbf16> to vector<16x64xbf16>
    %c0_7 = arith.constant 0 : index
    %c0_8 = arith.constant 0 : index
    %6 = vector.load %arg6[%c0_7, %c0_8] : memref<64x1024xbf16, #tpu.memory_space<vmem>>, vector<64x1024xbf16>
    %cst_9 = arith.constant dense<0.000000e+00> : vector<16x1024xf32>
    %7 = tpu.matmul %5, %6, %cst_9 {dimension_numbers = #tpu.dot_dimension_numbers<[1], [0], [0], [1], [0, 0, 1, 1], [], []>} : vector<16x64xbf16>, vector<64x1024xbf16>, vector<16x1024xf32> -> vector<16x1024xf32>
    %8 = arith.addf %3, %7 : vector<16x1024xf32>
    %c0_10 = arith.constant 0 : index
    %c0_11 = arith.constant 0 : index
    %c0_12 = arith.constant 0 : index
    %9 = vector.load %arg4[%c0_10, %c0_11, %c0_12] : memref<1x16x64xbf16, #tpu.memory_space<vmem>>, vector<1x16x64xbf16>
    %10 = vector.shape_cast %9 : vector<1x16x64xbf16> to vector<16x64xbf16>
    %c0_13 = arith.constant 0 : index
    %c0_14 = arith.constant 0 : index
    %11 = vector.load %arg7[%c0_13, %c0_14] : memref<64x1024xbf16, #tpu.memory_space<vmem>>, vector<64x1024xbf16>
    %cst_15 = arith.constant dense<0.000000e+00> : vector<16x1024xf32>
    %12 = tpu.matmul %10, %11, %cst_15 {dimension_numbers = #tpu.dot_dimension_numbers<[1], [0], [0], [1], [0, 0, 1, 1], [], []>} : vector<16x64xbf16>, vector<64x1024xbf16>, vector<16x1024xf32> -> vector<16x1024xf32>
    %13 = arith.addf %8, %12 : vector<16x1024xf32>
    %c0_16 = arith.constant 0 : index
    %c0_17 = arith.constant 0 : index
    %14 = vector.load %arg8[%c0_16, %c0_17] : memref<1x1024xf32, #tpu.memory_space<vmem>>, vector<1x1024xf32>
    %15 = vector.broadcast %14 : vector<1x1024xf32> to vector<16x1024xf32>
    %16 = arith.mulf %13, %15 : vector<16x1024xf32>
    %c0_18 = arith.constant 0 : index
    %c0_19 = arith.constant 0 : index
    %17 = vector.load %arg9[%c0_18, %c0_19] : memref<1x1024xf32, #tpu.memory_space<vmem>>, vector<1x1024xf32>
    %18 = vector.broadcast %17 : vector<1x1024xf32> to vector<16x1024xf32>
    %19 = arith.addf %16, %18 : vector<16x1024xf32>
    %cst_20 = arith.constant 2.000000e-01 : f32
    %20 = vector.broadcast %cst_20 : f32 to vector<16x1024xf32>
    %21 = arith.mulf %20, %19 : vector<16x1024xf32>
    %22 = arith.maximumf %19, %21 : vector<16x1024xf32>
    %cst_21 = arith.constant dense<0xFF800000> : vector<1024xf32>
    %23 = vector.multi_reduction <maximumf>, %22, %cst_21 [0] : vector<16x1024xf32> to vector<1024xf32>
    %24 = vector.shape_cast %23 : vector<1024xf32> to vector<1x1024xf32>
    %c0_i32 = arith.constant 0 : i32
    %25 = arith.cmpi eq, %arg1, %c0_i32 : i32
    %26 = arith.extui %25 : i1 to i32
    %c0_i32_22 = arith.constant 0 : i32
    %27 = arith.cmpi ne, %26, %c0_i32_22 : i32
    scf.if %27 {
      %c0_25 = arith.constant 0 : index
      %c0_26 = arith.constant 0 : index
      %c0_27 = arith.constant 0 : index
      %31 = vector.load %arg10[%c0_25, %c0_26, %c0_27] : memref<1x1x1024xf32, #tpu.memory_space<vmem>>, vector<1x1x1024xf32>
      %32 = vector.shape_cast %31 : vector<1x1x1024xf32> to vector<1x1024xf32>
      %33 = vector.shape_cast %24 : vector<1x1024xf32> to vector<1x1x1024xf32>
      tpu.vector_store %arg10[%c0_25, %c0_26, %c0_27], %33 {strides = array<i32>} : memref<1x1x1024xf32, #tpu.memory_space<vmem>>, vector<1x1x1024xf32>,
    } else {
    }
    %c0_i32_23 = arith.constant 0 : i32
    %28 = arith.cmpi ne, %arg1, %c0_i32_23 : i32
    %29 = arith.extui %28 : i1 to i32
    %c0_i32_24 = arith.constant 0 : i32
    %30 = arith.cmpi ne, %29, %c0_i32_24 : i32
    scf.if %30 {
      %c0_25 = arith.constant 0 : index
      %c0_26 = arith.constant 0 : index
      %c0_27 = arith.constant 0 : index
      %31 = vector.load %arg10[%c0_25, %c0_26, %c0_27] : memref<1x1x1024xf32, #tpu.memory_space<vmem>>, vector<1x1x1024xf32>
      %32 = vector.shape_cast %31 : vector<1x1x1024xf32> to vector<1x1024xf32>
      %33 = arith.maximumf %32, %24 : vector<1x1024xf32>
      %c0_28 = arith.constant 0 : index
      %c0_29 = arith.constant 0 : index
      %c0_30 = arith.constant 0 : index
      %34 = vector.load %arg10[%c0_28, %c0_29, %c0_30] : memref<1x1x1024xf32, #tpu.memory_space<vmem>>, vector<1x1x1024xf32>
      %35 = vector.shape_cast %34 : vector<1x1x1024xf32> to vector<1x1024xf32>
      %36 = vector.shape_cast %33 : vector<1x1024xf32> to vector<1x1x1024xf32>
      tpu.vector_store %arg10[%c0_28, %c0_29, %c0_30], %36 {strides = array<i32>} : memref<1x1x1024xf32, #tpu.memory_space<vmem>>, vector<1x1x1024xf32>,
    } else {
    }
    return
  }
  func.func @transform_0(%arg0: i32, %arg1: i32) -> (i32, i32, i32) {
    %c0_i32 = arith.constant 0 : i32
    %c0_i32_0 = arith.constant 0 : i32
    return %arg0, %arg1, %c0_i32 : i32, i32, i32
  }
  func.func @transform_1(%arg0: i32, %arg1: i32) -> (i32, i32, i32) {
    %c0_i32 = arith.constant 0 : i32
    %c0_i32_0 = arith.constant 0 : i32
    return %arg0, %arg1, %c0_i32 : i32, i32, i32
  }
  func.func @transform_2(%arg0: i32, %arg1: i32) -> (i32, i32, i32) {
    %c0_i32 = arith.constant 0 : i32
    %c0_i32_0 = arith.constant 0 : i32
    return %arg0, %arg1, %c0_i32 : i32, i32, i32
  }
  func.func @transform_3(%arg0: i32, %arg1: i32) -> (i32, i32) {
    %c0_i32 = arith.constant 0 : i32
    %c0_i32_0 = arith.constant 0 : i32
    %c0_i32_1 = arith.constant 0 : i32
    return %c0_i32, %c0_i32_0 : i32, i32
  }
  func.func @transform_4(%arg0: i32, %arg1: i32) -> (i32, i32) {
    %c0_i32 = arith.constant 0 : i32
    %c0_i32_0 = arith.constant 0 : i32
    %c0_i32_1 = arith.constant 0 : i32
    return %c0_i32, %c0_i32_0 : i32, i32
  }
  func.func @transform_5(%arg0: i32, %arg1: i32) -> (i32, i32) {
    %c0_i32 = arith.constant 0 : i32
    %c0_i32_0 = arith.constant 0 : i32
    %c0_i32_1 = arith.constant 0 : i32
    return %c0_i32, %c0_i32_0 : i32, i32
  }
  func.func @transform_6(%arg0: i32, %arg1: i32) -> (i32, i32) {
    %c0_i32 = arith.constant 0 : i32
    %c0_i32_0 = arith.constant 0 : i32
    %c0_i32_1 = arith.constant 0 : i32
    return %c0_i32, %c0_i32_0 : i32, i32
  }
  func.func @transform_7(%arg0: i32, %arg1: i32) -> (i32, i32) {
    %c0_i32 = arith.constant 0 : i32
    %c0_i32_0 = arith.constant 0 : i32
    %c0_i32_1 = arith.constant 0 : i32
    return %c0_i32, %c0_i32_0 : i32, i32
  }
  func.func @transform_8(%arg0: i32, %arg1: i32) -> (i32, i32, i32) {
    %c0_i32 = arith.constant 0 : i32
    %c0_i32_0 = arith.constant 0 : i32
    %c0_i32_1 = arith.constant 0 : i32
    return %arg0, %c0_i32, %c0_i32_0 : i32, i32, i32
  }
}

module attributes {stable_mosaic.version = 11 : i64} {
  func.func @_mm_affine_kernel(%arg0: i32, %arg1: memref<8x16xbf16, #tpu.memory_space<vmem>>, %arg2: memref<16x64xbf16, #tpu.memory_space<vmem>>, %arg3: memref<1x64xf32, #tpu.memory_space<vmem>>, %arg4: memref<1x64xf32, #tpu.memory_space<vmem>>, %arg5: memref<8x64xf32, #tpu.memory_space<vmem>>) attributes {dimension_semantics = [#tpu.dimension_semantics<parallel>], iteration_bounds = array<i64: 1>, scalar_prefetch = 0 : i64, scratch_operands = 0 : i64, tpu.core_type = #tpu.core_type<tc>, window_params = [{transform_indices = @transform_0, window_bounds = array<i64: 8, 16>}, {pipeline_mode = #tpu.pipeline_mode<synchronous>, transform_indices = @transform_1, window_bounds = array<i64: 16, 64>}, {pipeline_mode = #tpu.pipeline_mode<synchronous>, transform_indices = @transform_2, window_bounds = array<i64: 1, 64>}, {pipeline_mode = #tpu.pipeline_mode<synchronous>, transform_indices = @transform_3, window_bounds = array<i64: 1, 64>}, {transform_indices = @transform_4, window_bounds = array<i64: 8, 64>}]} {
    %c0 = arith.constant 0 : index
    %c0_0 = arith.constant 0 : index
    %0 = vector.load %arg1[%c0, %c0_0] : memref<8x16xbf16, #tpu.memory_space<vmem>>, vector<8x16xbf16>
    %c0_1 = arith.constant 0 : index
    %c0_2 = arith.constant 0 : index
    %1 = vector.load %arg2[%c0_1, %c0_2] : memref<16x64xbf16, #tpu.memory_space<vmem>>, vector<16x64xbf16>
    %cst = arith.constant dense<0.000000e+00> : vector<8x64xf32>
    %2 = tpu.matmul %0, %1, %cst {dimension_numbers = #tpu.dot_dimension_numbers<[1], [0], [0], [1], [0, 0, 1, 1], [], []>} : vector<8x16xbf16>, vector<16x64xbf16>, vector<8x64xf32> -> vector<8x64xf32>
    %c0_3 = arith.constant 0 : index
    %c0_4 = arith.constant 0 : index
    %3 = vector.load %arg3[%c0_3, %c0_4] : memref<1x64xf32, #tpu.memory_space<vmem>>, vector<1x64xf32>
    %4 = vector.broadcast %3 : vector<1x64xf32> to vector<8x64xf32>
    %5 = arith.mulf %2, %4 : vector<8x64xf32>
    %c0_5 = arith.constant 0 : index
    %c0_6 = arith.constant 0 : index
    %6 = vector.load %arg4[%c0_5, %c0_6] : memref<1x64xf32, #tpu.memory_space<vmem>>, vector<1x64xf32>
    %7 = vector.broadcast %6 : vector<1x64xf32> to vector<8x64xf32>
    %8 = arith.addf %5, %7 : vector<8x64xf32>
    %cst_7 = arith.constant 2.000000e-01 : f32
    %9 = vector.broadcast %cst_7 : f32 to vector<8x64xf32>
    %10 = arith.mulf %9, %8 : vector<8x64xf32>
    %11 = arith.maximumf %8, %10 : vector<8x64xf32>
    %c0_8 = arith.constant 0 : index
    %c0_9 = arith.constant 0 : index
    %12 = vector.load %arg5[%c0_8, %c0_9] : memref<8x64xf32, #tpu.memory_space<vmem>>, vector<8x64xf32>
    tpu.vector_store %arg5[%c0_8, %c0_9], %11 {strides = array<i32>} : memref<8x64xf32, #tpu.memory_space<vmem>>, vector<8x64xf32>,
    return
  }
  func.func @transform_0(%arg0: i32) -> (i32, i32) {
    %c0_i32 = arith.constant 0 : i32
    %c0_i32_0 = arith.constant 0 : i32
    return %arg0, %c0_i32 : i32, i32
  }
  func.func @transform_1(%arg0: i32) -> (i32, i32) {
    %c0_i32 = arith.constant 0 : i32
    %c0_i32_0 = arith.constant 0 : i32
    %c0_i32_1 = arith.constant 0 : i32
    return %c0_i32, %c0_i32_0 : i32, i32
  }
  func.func @transform_2(%arg0: i32) -> (i32, i32) {
    %c0_i32 = arith.constant 0 : i32
    %c0_i32_0 = arith.constant 0 : i32
    %c0_i32_1 = arith.constant 0 : i32
    return %c0_i32, %c0_i32_0 : i32, i32
  }
  func.func @transform_3(%arg0: i32) -> (i32, i32) {
    %c0_i32 = arith.constant 0 : i32
    %c0_i32_0 = arith.constant 0 : i32
    %c0_i32_1 = arith.constant 0 : i32
    return %c0_i32, %c0_i32_0 : i32, i32
  }
  func.func @transform_4(%arg0: i32) -> (i32, i32) {
    %c0_i32 = arith.constant 0 : i32
    %c0_i32_0 = arith.constant 0 : i32
    return %arg0, %c0_i32 : i32, i32
  }
}

module attributes {stable_mosaic.version = 11 : i64} {
  func.func @_seg_head_kernel(%arg0: i32, %arg1: i32, %arg2: memref<1x1x1088xbf16, #tpu.memory_space<vmem>>, %arg3: memref<1x16x64xbf16, #tpu.memory_space<vmem>>, %arg4: memref<1x16x64xbf16, #tpu.memory_space<vmem>>, %arg5: memref<1x16x64xbf16, #tpu.memory_space<vmem>>, %arg6: memref<1088x256xbf16, #tpu.memory_space<vmem>>, %arg7: memref<64x256xbf16, #tpu.memory_space<vmem>>, %arg8: memref<64x256xbf16, #tpu.memory_space<vmem>>, %arg9: memref<64x256xbf16, #tpu.memory_space<vmem>>, %arg10: memref<1x256xf32, #tpu.memory_space<vmem>>, %arg11: memref<1x256xf32, #tpu.memory_space<vmem>>, %arg12: memref<256x256xbf16, #tpu.memory_space<vmem>>, %arg13: memref<1x256xf32, #tpu.memory_space<vmem>>, %arg14: memref<1x256xf32, #tpu.memory_space<vmem>>, %arg15: memref<256x128xbf16, #tpu.memory_space<vmem>>, %arg16: memref<1x128xf32, #tpu.memory_space<vmem>>, %arg17: memref<1x128xf32, #tpu.memory_space<vmem>>, %arg18: memref<128x128xbf16, #tpu.memory_space<vmem>>, %arg19: memref<1x16x128xf32, #tpu.memory_space<vmem>>) attributes {dimension_semantics = [#tpu.dimension_semantics<parallel>, #tpu.dimension_semantics<parallel>], iteration_bounds = array<i64: 2, 1>, scalar_prefetch = 0 : i64, scratch_operands = 0 : i64, tpu.core_type = #tpu.core_type<tc>, window_params = [{transform_indices = @transform_0, window_bounds = array<i64: 1, 1, 1088>}, {transform_indices = @transform_1, window_bounds = array<i64: 1, 16, 64>}, {transform_indices = @transform_2, window_bounds = array<i64: 1, 16, 64>}, {transform_indices = @transform_3, window_bounds = array<i64: 1, 16, 64>}, {pipeline_mode = #tpu.pipeline_mode<synchronous>, transform_indices = @transform_4, window_bounds = array<i64: 1088, 256>}, {pipeline_mode = #tpu.pipeline_mode<synchronous>, transform_indices = @transform_5, window_bounds = array<i64: 64, 256>}, {pipeline_mode = #tpu.pipeline_mode<synchronous>, transform_indices = @transform_6, window_bounds = array<i64: 64, 256>}, {pipeline_mode = #tpu.pipeline_mode<synchronous>, transform_indices = @transform_7, window_bounds = array<i64: 64, 256>}, {pipeline_mode = #tpu.pipeline_mode<synchronous>, transform_indices = @transform_8, window_bounds = array<i64: 1, 256>}, {pipeline_mode = #tpu.pipeline_mode<synchronous>, transform_indices = @transform_9, window_bounds = array<i64: 1, 256>}, {pipeline_mode = #tpu.pipeline_mode<synchronous>, transform_indices = @transform_10, window_bounds = array<i64: 256, 256>}, {pipeline_mode = #tpu.pipeline_mode<synchronous>, transform_indices = @transform_11, window_bounds = array<i64: 1, 256>}, {pipeline_mode = #tpu.pipeline_mode<synchronous>, transform_indices = @transform_12, window_bounds = array<i64: 1, 256>}, {pipeline_mode = #tpu.pipeline_mode<synchronous>, transform_indices = @transform_13, window_bounds = array<i64: 256, 128>}, {pipeline_mode = #tpu.pipeline_mode<synchronous>, transform_indices = @transform_14, window_bounds = array<i64: 1, 128>}, {pipeline_mode = #tpu.pipeline_mode<synchronous>, transform_indices = @transform_15, window_bounds = array<i64: 1, 128>}, {pipeline_mode = #tpu.pipeline_mode<synchronous>, transform_indices = @transform_16, window_bounds = array<i64: 128, 128>}, {transform_indices = @transform_17, window_bounds = array<i64: 1, 16, 128>}]} {
    %c0 = arith.constant 0 : index
    %c0_0 = arith.constant 0 : index
    %c0_1 = arith.constant 0 : index
    %0 = vector.load %arg3[%c0, %c0_0, %c0_1] : memref<1x16x64xbf16, #tpu.memory_space<vmem>>, vector<1x16x64xbf16>
    %1 = vector.shape_cast %0 : vector<1x16x64xbf16> to vector<16x64xbf16>
    %c0_2 = arith.constant 0 : index
    %c0_3 = arith.constant 0 : index
    %2 = vector.load %arg7[%c0_2, %c0_3] : memref<64x256xbf16, #tpu.memory_space<vmem>>, vector<64x256xbf16>
    %cst = arith.constant dense<0.000000e+00> : vector<16x256xf32>
    %3 = tpu.matmul %1, %2, %cst {dimension_numbers = #tpu.dot_dimension_numbers<[1], [0], [0], [1], [0, 0, 1, 1], [], []>} : vector<16x64xbf16>, vector<64x256xbf16>, vector<16x256xf32> -> vector<16x256xf32>
    %c0_4 = arith.constant 0 : index
    %c0_5 = arith.constant 0 : index
    %c0_6 = arith.constant 0 : index
    %4 = vector.load %arg4[%c0_4, %c0_5, %c0_6] : memref<1x16x64xbf16, #tpu.memory_space<vmem>>, vector<1x16x64xbf16>
    %5 = vector.shape_cast %4 : vector<1x16x64xbf16> to vector<16x64xbf16>
    %c0_7 = arith.constant 0 : index
    %c0_8 = arith.constant 0 : index
    %6 = vector.load %arg8[%c0_7, %c0_8] : memref<64x256xbf16, #tpu.memory_space<vmem>>, vector<64x256xbf16>
    %cst_9 = arith.constant dense<0.000000e+00> : vector<16x256xf32>
    %7 = tpu.matmul %5, %6, %cst_9 {dimension_numbers = #tpu.dot_dimension_numbers<[1], [0], [0], [1], [0, 0, 1, 1], [], []>} : vector<16x64xbf16>, vector<64x256xbf16>, vector<16x256xf32> -> vector<16x256xf32>
    %8 = arith.addf %3, %7 : vector<16x256xf32>
    %c0_10 = arith.constant 0 : index
    %c0_11 = arith.constant 0 : index
    %c0_12 = arith.constant 0 : index
    %9 = vector.load %arg5[%c0_10, %c0_11, %c0_12] : memref<1x16x64xbf16, #tpu.memory_space<vmem>>, vector<1x16x64xbf16>
    %10 = vector.shape_cast %9 : vector<1x16x64xbf16> to vector<16x64xbf16>
    %c0_13 = arith.constant 0 : index
    %c0_14 = arith.constant 0 : index
    %11 = vector.load %arg9[%c0_13, %c0_14] : memref<64x256xbf16, #tpu.memory_space<vmem>>, vector<64x256xbf16>
    %cst_15 = arith.constant dense<0.000000e+00> : vector<16x256xf32>
    %12 = tpu.matmul %10, %11, %cst_15 {dimension_numbers = #tpu.dot_dimension_numbers<[1], [0], [0], [1], [0, 0, 1, 1], [], []>} : vector<16x64xbf16>, vector<64x256xbf16>, vector<16x256xf32> -> vector<16x256xf32>
    %13 = arith.addf %8, %12 : vector<16x256xf32>
    %c0_16 = arith.constant 0 : index
    %c0_17 = arith.constant 0 : index
    %c0_18 = arith.constant 0 : index
    %14 = vector.load %arg2[%c0_16, %c0_17, %c0_18] : memref<1x1x1088xbf16, #tpu.memory_space<vmem>>, vector<1x1x1088xbf16>
    %15 = vector.shape_cast %14 : vector<1x1x1088xbf16> to vector<1x1088xbf16>
    %c0_19 = arith.constant 0 : index
    %c0_20 = arith.constant 0 : index
    %16 = vector.load %arg6[%c0_19, %c0_20] : memref<1088x256xbf16, #tpu.memory_space<vmem>>, vector<1088x256xbf16>
    %cst_21 = arith.constant dense<0.000000e+00> : vector<1x256xf32>
    %17 = tpu.matmul %15, %16, %cst_21 {dimension_numbers = #tpu.dot_dimension_numbers<[1], [0], [0], [1], [0, 0, 1, 1], [], []>} : vector<1x1088xbf16>, vector<1088x256xbf16>, vector<1x256xf32> -> vector<1x256xf32>
    %18 = vector.broadcast %17 : vector<1x256xf32> to vector<16x256xf32>
    %19 = arith.addf %13, %18 : vector<16x256xf32>
    %c0_22 = arith.constant 0 : index
    %c0_23 = arith.constant 0 : index
    %20 = vector.load %arg10[%c0_22, %c0_23] : memref<1x256xf32, #tpu.memory_space<vmem>>, vector<1x256xf32>
    %21 = vector.broadcast %20 : vector<1x256xf32> to vector<16x256xf32>
    %22 = arith.mulf %19, %21 : vector<16x256xf32>
    %c0_24 = arith.constant 0 : index
    %c0_25 = arith.constant 0 : index
    %23 = vector.load %arg11[%c0_24, %c0_25] : memref<1x256xf32, #tpu.memory_space<vmem>>, vector<1x256xf32>
    %24 = vector.broadcast %23 : vector<1x256xf32> to vector<16x256xf32>
    %25 = arith.addf %22, %24 : vector<16x256xf32>
    %cst_26 = arith.constant 2.000000e-01 : f32
    %26 = vector.broadcast %cst_26 : f32 to vector<16x256xf32>
    %27 = arith.mulf %26, %25 : vector<16x256xf32>
    %28 = arith.maximumf %25, %27 : vector<16x256xf32>
    %29 = arith.truncf %28 : vector<16x256xf32> to vector<16x256xbf16>
    %c0_27 = arith.constant 0 : index
    %c0_28 = arith.constant 0 : index
    %30 = vector.load %arg12[%c0_27, %c0_28] : memref<256x256xbf16, #tpu.memory_space<vmem>>, vector<256x256xbf16>
    %cst_29 = arith.constant dense<0.000000e+00> : vector<16x256xf32>
    %31 = tpu.matmul %29, %30, %cst_29 {dimension_numbers = #tpu.dot_dimension_numbers<[1], [0], [0], [1], [0, 0, 1, 1], [], []>} : vector<16x256xbf16>, vector<256x256xbf16>, vector<16x256xf32> -> vector<16x256xf32>
    %c0_30 = arith.constant 0 : index
    %c0_31 = arith.constant 0 : index
    %32 = vector.load %arg13[%c0_30, %c0_31] : memref<1x256xf32, #tpu.memory_space<vmem>>, vector<1x256xf32>
    %33 = vector.broadcast %32 : vector<1x256xf32> to vector<16x256xf32>
    %34 = arith.mulf %31, %33 : vector<16x256xf32>
    %c0_32 = arith.constant 0 : index
    %c0_33 = arith.constant 0 : index
    %35 = vector.load %arg14[%c0_32, %c0_33] : memref<1x256xf32, #tpu.memory_space<vmem>>, vector<1x256xf32>
    %36 = vector.broadcast %35 : vector<1x256xf32> to vector<16x256xf32>
    %37 = arith.addf %34, %36 : vector<16x256xf32>
    %cst_34 = arith.constant 2.000000e-01 : f32
    %38 = vector.broadcast %cst_34 : f32 to vector<16x256xf32>
    %39 = arith.mulf %38, %37 : vector<16x256xf32>
    %40 = arith.maximumf %37, %39 : vector<16x256xf32>
    %41 = arith.truncf %40 : vector<16x256xf32> to vector<16x256xbf16>
    %c0_35 = arith.constant 0 : index
    %c0_36 = arith.constant 0 : index
    %42 = vector.load %arg15[%c0_35, %c0_36] : memref<256x128xbf16, #tpu.memory_space<vmem>>, vector<256x128xbf16>
    %cst_37 = arith.constant dense<0.000000e+00> : vector<16x128xf32>
    %43 = tpu.matmul %41, %42, %cst_37 {dimension_numbers = #tpu.dot_dimension_numbers<[1], [0], [0], [1], [0, 0, 1, 1], [], []>} : vector<16x256xbf16>, vector<256x128xbf16>, vector<16x128xf32> -> vector<16x128xf32>
    %c0_38 = arith.constant 0 : index
    %c0_39 = arith.constant 0 : index
    %44 = vector.load %arg16[%c0_38, %c0_39] : memref<1x128xf32, #tpu.memory_space<vmem>>, vector<1x128xf32>
    %45 = vector.broadcast %44 : vector<1x128xf32> to vector<16x128xf32>
    %46 = arith.mulf %43, %45 : vector<16x128xf32>
    %c0_40 = arith.constant 0 : index
    %c0_41 = arith.constant 0 : index
    %47 = vector.load %arg17[%c0_40, %c0_41] : memref<1x128xf32, #tpu.memory_space<vmem>>, vector<1x128xf32>
    %48 = vector.broadcast %47 : vector<1x128xf32> to vector<16x128xf32>
    %49 = arith.addf %46, %48 : vector<16x128xf32>
    %cst_42 = arith.constant 2.000000e-01 : f32
    %50 = vector.broadcast %cst_42 : f32 to vector<16x128xf32>
    %51 = arith.mulf %50, %49 : vector<16x128xf32>
    %52 = arith.maximumf %49, %51 : vector<16x128xf32>
    %53 = arith.truncf %52 : vector<16x128xf32> to vector<16x128xbf16>
    %c0_43 = arith.constant 0 : index
    %c0_44 = arith.constant 0 : index
    %54 = vector.load %arg18[%c0_43, %c0_44] : memref<128x128xbf16, #tpu.memory_space<vmem>>, vector<128x128xbf16>
    %cst_45 = arith.constant dense<0.000000e+00> : vector<16x128xf32>
    %55 = tpu.matmul %53, %54, %cst_45 {dimension_numbers = #tpu.dot_dimension_numbers<[1], [0], [0], [1], [0, 0, 1, 1], [], []>} : vector<16x128xbf16>, vector<128x128xbf16>, vector<16x128xf32> -> vector<16x128xf32>
    %c0_46 = arith.constant 0 : index
    %c0_47 = arith.constant 0 : index
    %c0_48 = arith.constant 0 : index
    %56 = vector.load %arg19[%c0_46, %c0_47, %c0_48] : memref<1x16x128xf32, #tpu.memory_space<vmem>>, vector<1x16x128xf32>
    %57 = vector.shape_cast %56 : vector<1x16x128xf32> to vector<16x128xf32>
    %58 = vector.shape_cast %55 : vector<16x128xf32> to vector<1x16x128xf32>
    tpu.vector_store %arg19[%c0_46, %c0_47, %c0_48], %58 {strides = array<i32>} : memref<1x16x128xf32, #tpu.memory_space<vmem>>, vector<1x16x128xf32>,
    return
  }
  func.func @transform_0(%arg0: i32, %arg1: i32) -> (i32, i32, i32) {
    %c0_i32 = arith.constant 0 : i32
    %c0_i32_0 = arith.constant 0 : i32
    %c0_i32_1 = arith.constant 0 : i32
    return %arg0, %c0_i32, %c0_i32_0 : i32, i32, i32
  }
  func.func @transform_1(%arg0: i32, %arg1: i32) -> (i32, i32, i32) {
    %c0_i32 = arith.constant 0 : i32
    %c0_i32_0 = arith.constant 0 : i32
    return %arg0, %arg1, %c0_i32 : i32, i32, i32
  }
  func.func @transform_2(%arg0: i32, %arg1: i32) -> (i32, i32, i32) {
    %c0_i32 = arith.constant 0 : i32
    %c0_i32_0 = arith.constant 0 : i32
    return %arg0, %arg1, %c0_i32 : i32, i32, i32
  }
  func.func @transform_3(%arg0: i32, %arg1: i32) -> (i32, i32, i32) {
    %c0_i32 = arith.constant 0 : i32
    %c0_i32_0 = arith.constant 0 : i32
    return %arg0, %arg1, %c0_i32 : i32, i32, i32
  }
  func.func @transform_4(%arg0: i32, %arg1: i32) -> (i32, i32) {
    %c0_i32 = arith.constant 0 : i32
    %c0_i32_0 = arith.constant 0 : i32
    %c0_i32_1 = arith.constant 0 : i32
    return %c0_i32, %c0_i32_0 : i32, i32
  }
  func.func @transform_5(%arg0: i32, %arg1: i32) -> (i32, i32) {
    %c0_i32 = arith.constant 0 : i32
    %c0_i32_0 = arith.constant 0 : i32
    %c0_i32_1 = arith.constant 0 : i32
    return %c0_i32, %c0_i32_0 : i32, i32
  }
  func.func @transform_6(%arg0: i32, %arg1: i32) -> (i32, i32) {
    %c0_i32 = arith.constant 0 : i32
    %c0_i32_0 = arith.constant 0 : i32
    %c0_i32_1 = arith.constant 0 : i32
    return %c0_i32, %c0_i32_0 : i32, i32
  }
  func.func @transform_7(%arg0: i32, %arg1: i32) -> (i32, i32) {
    %c0_i32 = arith.constant 0 : i32
    %c0_i32_0 = arith.constant 0 : i32
    %c0_i32_1 = arith.constant 0 : i32
    return %c0_i32, %c0_i32_0 : i32, i32
  }
  func.func @transform_8(%arg0: i32, %arg1: i32) -> (i32, i32) {
    %c0_i32 = arith.constant 0 : i32
    %c0_i32_0 = arith.constant 0 : i32
    %c0_i32_1 = arith.constant 0 : i32
    return %c0_i32, %c0_i32_0 : i32, i32
  }
  func.func @transform_9(%arg0: i32, %arg1: i32) -> (i32, i32) {
    %c0_i32 = arith.constant 0 : i32
    %c0_i32_0 = arith.constant 0 : i32
    %c0_i32_1 = arith.constant 0 : i32
    return %c0_i32, %c0_i32_0 : i32, i32
  }
  func.func @transform_10(%arg0: i32, %arg1: i32) -> (i32, i32) {
    %c0_i32 = arith.constant 0 : i32
    %c0_i32_0 = arith.constant 0 : i32
    %c0_i32_1 = arith.constant 0 : i32
    return %c0_i32, %c0_i32_0 : i32, i32
  }
  func.func @transform_11(%arg0: i32, %arg1: i32) -> (i32, i32) {
    %c0_i32 = arith.constant 0 : i32
    %c0_i32_0 = arith.constant 0 : i32
    %c0_i32_1 = arith.constant 0 : i32
    return %c0_i32, %c0_i32_0 : i32, i32
  }
  func.func @transform_12(%arg0: i32, %arg1: i32) -> (i32, i32) {
    %c0_i32 = arith.constant 0 : i32
    %c0_i32_0 = arith.constant 0 : i32
    %c0_i32_1 = arith.constant 0 : i32
    return %c0_i32, %c0_i32_0 : i32, i32
  }
  func.func @transform_13(%arg0: i32, %arg1: i32) -> (i32, i32) {
    %c0_i32 = arith.constant 0 : i32
    %c0_i32_0 = arith.constant 0 : i32
    %c0_i32_1 = arith.constant 0 : i32
    return %c0_i32, %c0_i32_0 : i32, i32
  }
  func.func @transform_14(%arg0: i32, %arg1: i32) -> (i32, i32) {
    %c0_i32 = arith.constant 0 : i32
    %c0_i32_0 = arith.constant 0 : i32
    %c0_i32_1 = arith.constant 0 : i32
    return %c0_i32, %c0_i32_0 : i32, i32
  }
  func.func @transform_15(%arg0: i32, %arg1: i32) -> (i32, i32) {
    %c0_i32 = arith.constant 0 : i32
    %c0_i32_0 = arith.constant 0 : i32
    %c0_i32_1 = arith.constant 0 : i32
    return %c0_i32, %c0_i32_0 : i32, i32
  }
  func.func @transform_16(%arg0: i32, %arg1: i32) -> (i32, i32) {
    %c0_i32 = arith.constant 0 : i32
    %c0_i32_0 = arith.constant 0 : i32
    %c0_i32_1 = arith.constant 0 : i32
    return %c0_i32, %c0_i32_0 : i32, i32
  }
  func.func @transform_17(%arg0: i32, %arg1: i32) -> (i32, i32, i32) {
    %c0_i32 = arith.constant 0 : i32
    %c0_i32_0 = arith.constant 0 : i32
    return %arg0, %arg1, %c0_i32 : i32, i32, i32
  }
}

</mosaic_0001>

<bundles_post_ra>
// kernel: dgcnn_partseg_forward.15
= control target key start
LH: loop header
LB: loop body
LE: loop exit
PB: predicated region body
PF: predicated region fallthrough
CT: control target
= control target key end

     0   :  { %s574_s12 = smov 0   ;;  %s576_s13 = smov 0   ;;  %s619_s0 = inlined_call_operand.vmem [shape: f32[2,16,3], index: 0, kind: input, shape index: {}, may-alias: {0,1}]   ;;  %s620_s1 = inlined_call_operand.vmem [shape: f32[2,16,3], index: 1, kind: input, shape index: {}, may-alias: {0,1}]   ;;  %s621_s2 = inlined_call_operand.vmem [shape: f32[2,1,16], index: 2, kind: input, shape index: {}]   ;;  %s622_s3 = inlined_call_operand.vmem [shape: f32[2,16,16], index: 3, kind: output, shape index: {}]  }
   0x1   :  { %s578_s14 = smov 0  }
   0x2 LB: > { %s25_s15 = sadd.s32 1, %s548_s13  ;;  %p472_p0 = scmp.ge.s32.totalorder %s552_s14, 1  ;;  %s552_s14 = sphi %s578_s14, %s13_s14   ;;  %s548_s13 = sphi %s576_s13, %s624_s13   ;;  %s544_s12 = sphi %s574_s12, %s623_s12  }
   0x3   : > { %p27_p1 = scmp.ge.s32.totalorder %s25_s15, 2  ;;  %p176_p2 = scmp.lt.s32.totalorder %s552_s14, 3 }
   0x5   : > { %s626_s15 = smov (%p27_p1, %s25_s15), 0  ;;  %p177_p3 = pnand %p472_p0, %p176_p2 }
   0x6   : > { %p217_p4 = scmp.lt.s32.totalorder (!%p177_p3), %s544_s12, 1  ;;  %vm248_vm0 = vcmask (!%p177_p3), 23552   ;;  %vm357_vm2 = vcmask (!%p177_p3), 130048  }
   0x7   : > { %180 = sbr.rel (%p177_p3) target bundleno = 248 (0xf8), region = 32  ;;  %vm501_vm1 = vmpackc.low (!%p177_p3), %vm248_vm0, %vm248_vm0 }
   0xe   : > { %s628_s12 = smov (!%p217_p4, %s544_s12), 1 }
   0xf   : > { %s486_s16 = sshll.u32 %s628_s12, 4  ;;  %s233_s25 = scalar_lea.vmem %s621_s2, %s628_s12 }
  0x10   : > { %s230_s19 = scalar_lea.vmem %s620_s1, %s486_s16  ;;  %s224_s22 = scalar_lea.vmem %s619_s0, %s486_s16  ;;  %v483_v15 = vld [vmem:[%s233_s25] ss:$0 sm:$0xff] }
  0x11   : > { %v246_v0 = vld [vmem:[%s230_s19] sm:$0xff]  ;;  %v247_v1 = vld [vmem:[%s230_s19 + $0x8] sm:$0xff]  ;;  %s242_s28 = scalar_lea.vmem %s622_s3, %s486_s16 }
  0x12   : > { %v500_v2 = vpack.c.bf16 %v247_v1, %v246_v0  ;;  %v244_v3 = vld [vmem:[%s224_s22] sm:$0xff]  ;;  %v245_v4 = vld [vmem:[%s224_s22 + $0x8] sm:$0xff] }
  0x13   : > { %497 = vmatprep.mubr.msk.f32.mxu0 %vm248_vm0, %v244_v3  ;;  %v336_v5 = vmul.f32 %v244_v3, %v244_v3  ;;  %v337_v6 = vmul.f32 %v245_v4, %v245_v4 }
  0x14   : > { %502 = vmatprep.subr.msk.bf16.mxu0 %vm501_vm1, %v500_v2 }
  0x15   : > { %505 = vmatpush3.bf16.xpose.msk.msra.mxu0 %vm501_vm1, %v500_v2  ;;  %v338_v7 = vsel %vm248_vm0, %v336_v5, 0.0  ;;  %v341_v8 = vsel %vm248_vm0, %v337_v6, 0.0 }
  0x16   : > { %339 = vadd.xlane.f32.xlu0 %v338_v7 }
  0x1a   : > { %342 = vadd.xlane.f32.xlu0 %v341_v8 }
  0x1c   : > { %498 = vmatmul.mubr.msk.f32.vlgmr.msra.gmra.mrb[0].mxu0 %vm248_vm0, %v245_v4 }
  0xa3   : > { %v340_v9 = vpop.xlane.xlu0 %339 }
  0xa7   : > { %v343_v11 = vpop.xlane.xlu0 %342 }
  0xef   : > { %v499_v10 = vpop.f32.mrb[0].mxu0 }
  0xf0   : > { %v345_v12 = vmul.f32 2.0, %v499_v10  ;;  %v327_v13 = vpop.f32.mrb[1].mxu0 }
  0xf1   : > { %v344_v14 = vmul.f32 2.0, %v327_v13 }
  0xf2   : > { %v347_v16 = vsub.f32 %v345_v12, %v343_v11 }
  0xf3   : > { %v346_v17 = vsub.f32 %v344_v14, %v340_v9 }
  0xf4   : > { %v356_v18 = vsub.f32 %v347_v16, %v483_v15 }
  0xf5   : > { %v355_v19 = vsub.f32 %v346_v17, %v483_v15 }
  0xf6   : > { %359 = vst.msk [vmem:[%s242_s28 + $0x8] sm:$0xff] %vm357_vm2, %v356_v18 }
  0xf7   : > { %358 = vst.msk [vmem:[%s242_s28] sm:$0xff] %vm357_vm2, %v355_v19 }
  0xf8 PF: > { %s13_s14 = sadd.s32 1, %s552_s14   ;;  %s623_s12 = smov %s548_s13 }
  0xf9   : > { %p10_p5 = scmp.ge.s32.totalorder %s13_s14, 4   ;;  %s624_s13 = smov %s626_s15 }
  0xfb   :  { %12 = sbr.rel (!%p10_p5) target bundleno = 2 (0x2), region = 68 }

// kernel: dgcnn_partseg_forward.16
= control target key start
LH: loop header
LB: loop body
LE: loop exit
PB: predicated region body
PF: predicated region fallthrough
CT: control target
= control target key end

     0   :  { %14 = vsyncpa [#allocation3], 0  ;;  %s1457_s30 = smov 0   ;;  %s1459_s10 = smov 0   ;;  %s1698_s0 = inlined_call_operand.vmem [shape: bf16[2,4,16,3], index: 0, kind: input, shape index: {}]   ;;  %s1699_s1 = inlined_call_operand.vmem [shape: bf16[2,16,3], index: 1, kind: input, shape index: {}]   ;;  %s1700_s2 = inlined_call_operand.vmem [shape: bf16[3,64], index: 2, kind: input, shape index: {}]   ;;  %s1701_s3 = inlined_call_operand.vmem [shape: bf16[3,64], index: 3, kind: input, shape index: {}]   ;;  %s1702_s4 = inlined_call_operand.vmem [shape: f32[1,64], index: 4, kind: input, shape index: {}]   ;;  %s1703_s5 = inlined_call_operand.vmem [shape: f32[1,64], index: 5, kind: input, shape index: {}]   ;;  %s1704_s6 = inlined_call_operand.hbm [shape: bf16[64,128], index: 6, kind: input, shape index: {}]   ;;  %s1705_s7 = inlined_call_operand.vmem [shape: f32[1,128], index: 7, kind: input, shape index: {}]   ;;  %s1706_s8 = inlined_call_operand.vmem [shape: f32[1,128], index: 8, kind: input, shape index: {}]   ;;  %s1707_s9 = inlined_call_operand.vmem [shape: bf16[2,16,128], index: 9, kind: output, shape index: {}]  }
   0x1   :  { %s1461_s11 = smov 0  }
   0x2 LB: > { %s1133_s12 = sadd.s32 4294967295, %s1399_s11   ;;  %s32_s13 = sadd.s32 1, %s1395_s10  ;;  %s1399_s11 = sphi %s1461_s11, %s20_s11   ;;  %s1395_s10 = sphi %s1459_s10, %s1717_s10   ;;  %s1391_s30 = sphi %s1457_s30, %s1716_s30  }
   0x3   : > { %p34_p0 = scmp.ge.s32.totalorder %s32_s13, 2  ;;  %p1135_p1 = scmp.ge.s32.totalorder %s1399_s11, 1 }
   0x4   : > { %p268_p2 = scmp.lt.s32.totalorder %s1399_s11, 3  ;;  %p1482_p4 = scmp.eq.s32.totalorder %s1133_s12, 0 }
   0x5   : > { %s1719_s13 = smov (%p34_p0, %s32_s13), 0  ;;  %s1401_s16 = smov [#allocation2]  }
   0x6   : > { %p1478_p3 = pnand %p1135_p1, %p268_p2  ;;  %s292_s17 = sshll.u32 %s1401_s16, 4  ;;  %s293_s17 = int_to_ptr.vmem [resolvable:$true] %s292_s17 }
   0x7   : > { %s1712_s15 = scalar_select %p1482_p4, 1, 0 }
   0x8   : > { %s1711_s14 = scalar_select %p1478_p3, 1, 0 }
   0x9   : > { %p1300_p5 = pneg %p1478_p3  ;;  %s1345_s21 = scalar_lea.hbm %s1704_s6, 512 }
   0xa   : > { %p1346_p7 = scmp.ne.s32.totalorder %s1704_s6, %s1345_s21  ;;  %p1352_p11 = scmp.lt.u32.totalorder %s1345_s21, %s1704_s6 }
   0xb   : > { %p1490_p6 = pnand %p1482_p4, %p1300_p5 }
   0xd   : > { %p1347_p8 = pneg %p1490_p6 }
   0xf   : > { %p1348_p9 = pnand %p1347_p8, %p1346_p7 }
  0x11   : > { %p1349_p10 = pneg %p1348_p9 }
  0x13   : > { %p1354_p12 = pnand %p1352_p11, %p1349_p10 }
  0x15   : > { %1357 = shalt.err (!%p1354_p12)
}
  0x16   : > { %s1358_s26 = scalar_lea.vmem %s293_s17, 512  ;;  %p1366_p2 = scmp.lt.s32.totalorder %s293_s17, %s293_s17 }
  0x17   : > { %p1359_p13 = scmp.ne.s32.totalorder %s293_s17, %s1358_s26  ;;  %p1367_p5 = scmp.lt.s32.totalorder %s1358_s26, %s1358_s26 }
  0x19   : > { %p1361_p0 = pnand %p1359_p13, %p1347_p8  ;;  %p1368_p4 = por %p1367_p5, %p1366_p2 }
  0x1b   : > { %p1362_p1 = pneg %p1361_p0 }
  0x1d   : > { %p1369_p3 = pnand %p1368_p4, %p1362_p1 }
  0x1f   : > { %1372 = shalt.err (!%p1369_p3)
}
  0x20   : > { %s1402_s27 = smov 64   ;;  %s1403_s28 = smov 4  }
  0x21   : > { %1303 = dma.hbm_to_vmem [thread:$0]  (!%p1490_p6), %s1704_s6, 512, %s293_s17, [#allocation3], %s1402_s27, %s1402_s27, %s1403_s28  }
  0x22   : > { %p1714_p7 = scmp.ne.s32.totalorder %s1711_s14, 0 }
  0x23   : > { %p1715_p9 = scmp.ne.s32.totalorder (!%p1714_p7), %s1712_s15, 0 }
  0x24   : > { %340 = sbr.rel (%p1714_p7) target bundleno = 748 (0x2ec), region = 56 }
  0x2b   : > { %1386 = dma.done.wait (%p1715_p9), [#allocation3], 512  }
  0x2c   : > { %1388 = vsyncadd (%p1715_p9), [#allocation3], 4294966784  ;;  %vm439_vm0 = vcmask 1040384   ;;  %v1404_v0 = vmov 0.0   ;;  %p394_p3 = scmp.lt.s32.totalorder %s1391_s30, 1  ;;  %vm440_vm1 = vcmask 1041408  }
  0x2d   : > { %1218 = vmatprep.subr.bf16.mxu0 %v1404_v0  ;;  %1224 = vmatprep.subr.bf16.mxu1 %v1404_v0  ;;  %v1405_v1 = vmov 65535   ;;  %vm1406_vm2 = vmmov 0   ;;  %v424_v4 = vld [vmem:[%s1700_s2] sm:$0x3]  ;;  %vm435_vm3 = vcmask 23552   ;;  %v1568_v12 = vld [vmem:[#allocation2 + $0x8] sm:$0xff]  }
  0x2e   : > { %v441_v2 = vsel %vm439_vm0, 4294967295, %v1405_v1  ;;  %1220 = vmatprep.mubr.msk.bf16.mxu0 %vm1406_vm2, %v1404_v0  ;;  %1226 = vmatprep.mubr.msk.bf16.mxu1 %vm1406_vm2, %v1404_v0  ;;  %s1721_s30 = smov (!%p394_p3, %s1391_s30), 1  ;;  %v429_v5 = vld [vmem:[%s1701_s3] sm:$0x3]  ;;  %v1574_v13 = vld [vmem:[#allocation2 + $0x10] sm:$0xff]   ;;  %v1580_v14 = vld [vmem:[#allocation2 + $0x18] sm:$0xff]  }
  0x2f   : > { %v442_v3 = vsel %vm440_vm1, %v441_v2, 0  ;;  %s1178_s14 = sshll.u32 %s1721_s30, 5  ;;  %s1179_s15 = sshll.u32 %s1721_s30, 3  ;;  %v1562_v11 = vld [vmem:[#allocation2] sm:$0xff]   ;;  %vm596_vm4 = vcmask 523264  }
  0x30   : > { %s1531_s18 = scalar_lea.vmem %s1698_s0, %s1178_s14  ;;  %s411_s21 = scalar_lea.vmem %s1699_s1, %s1179_s15  ;;  %v444_v6 = vand.u32 %v442_v3, %v429_v5  ;;  %v1544_v7 = vand.u32 %v442_v3, %v424_v4  ;;  %v1591_v16 = vld [vmem:[%s1702_s4] ss:$0 sm:$0xff] }
  0x31   : > { %v1336_v8 = vld [vmem:[%s411_s21] sm:$0xff]   ;;  %v1338_v10 = vld [vmem:[%s1531_s18 + $0x8] sm:$0xff]   ;;  %v1343_v50 = vld [vmem:[%s1531_s18 + $0x10] sm:$0xff]   ;;  %s421_s20 = scalar_lea.vmem %s1707_s9, %s1179_s15 }
  0x32   : > { %v1337_v9 = vld [vmem:[%s1531_s18] sm:$0xff]   ;;  %1219 = vmatpush3.bf16.msra.mxu0 %v444_v6  ;;  %1225 = vmatpush3.bf16.msra.mxu1 %v1544_v7  ;;  %v1344_v52 = vld [vmem:[%s1531_s18 + $0x18] sm:$0xff]  }
  0x33   : > { %1242 = vmatprep.subr.bf16.mxu1 %v1404_v0  ;;  %1230 = vmatprep.subr.bf16.mxu0 %v1404_v0  ;;  %v1597_v21 = vld [vmem:[%s1703_s5] ss:$0 sm:$0xff] }
  0x34   : > { %v1647_v53 = vld [vmem:[%s1705_s7] ss:$0 sm:$0xff] }
  0x35   : > { %1221 = vmatmul.mubr.msk.bf16.vlgmr.msra.gmra.mrb[0].mxu0 %vm435_vm3, %v1336_v8  ;;  %1227 = vmatmul.mubr.msk.bf16.vlgmr.msra.gmra.mrb[0].mxu1 %vm435_vm3, %v1337_v9  ;;  %v1653_v58 = vld [vmem:[%s1706_s8] ss:$0 sm:$0xff] }
  0x36   : > { %1243 = vmatpush3.bf16.msra.mxu1 %v1544_v7  ;;  %1244 = vmatprep.mubr.msk.bf16.mxu1 %vm1406_vm2, %v1404_v0 }
  0x37   : > { %1248 = vmatprep.subr.bf16.mxu1 %v1404_v0  ;;  %1238 = vmatprep.mubr.msk.bf16.mxu0 %vm1406_vm2, %v1404_v0 }
  0x38   : > { %1231 = vmatpush3.bf16.msra.mxu0 %v1562_v11 }
  0x39   : > { %1232 = vmatprep.subr.bf16.mxu0 %v1404_v0 }
  0x3c   : > { %1233 = vmatpush3.bf16.msra.mxu0 %v1568_v12 }
  0x3d   : > { %1245 = vmatmul.mubr.msk.bf16.vlgmr.msra.gmra.mrb[4].mxu1 %vm435_vm3, %v1338_v10  ;;  %1234 = vmatprep.subr.bf16.mxu0 %v1404_v0 }
  0x3e   : > { %1256 = vmatprep.mubr.msk.bf16.mxu1 %vm1406_vm2, %v1404_v0  ;;  %1249 = vmatpush3.bf16.msra.mxu1 %v1562_v11 }
  0x3f   : > { %1250 = vmatprep.subr.bf16.mxu1 %v1404_v0 }
  0x40   : > { %1235 = vmatpush3.bf16.msra.mxu0 %v1574_v13 }
  0x41   : > { %1236 = vmatprep.subr.bf16.mxu0 %v1404_v0 }
  0x42   : > { %1251 = vmatpush3.bf16.msra.mxu1 %v1568_v12 }
  0x43   : > { %1252 = vmatprep.subr.bf16.mxu1 %v1404_v0 }
  0x44   : > { %1237 = vmatpush3.bf16.msra.mxu0 %v1580_v14 }
  0x45   : > { %1260 = vmatprep.subr.bf16.mxu0 %v1404_v0 }
  0x46   : > { %1253 = vmatpush3.bf16.msra.mxu1 %v1574_v13 }
  0x47   : > { %1254 = vmatprep.subr.bf16.mxu1 %v1404_v0 }
  0x4a   : > { %1255 = vmatpush3.bf16.msra.mxu1 %v1580_v14 }
  0x4b   : > { %1278 = vmatprep.subr.bf16.mxu1 %v1404_v0 }
 0x108   : > { %v1586_v15 = vpop.f32.mrb[0].mxu0  ;;  %v544_v17 = vpop.f32.mrb[0].mxu1 }
 0x109   : > { %v545_v18 = vadd.f32 %v544_v17, %v1586_v15  ;;  %v1222_v19 = vpop.f32.mrb[1].mxu0  ;;  %v1228_v20 = vpop.f32.mrb[1].mxu1 }
 0x10a   : > { %v1599_v22 = vpop.f32.mrb[2].mxu0  ;;  %v547_v23 = vpop.f32.mrb[2].mxu1 }
 0x10b   : > { %v557_v24 = vmul.f32 %v1591_v16, %v545_v18  ;;  %v548_v25 = vadd.f32 %v547_v23, %v1599_v22  ;;  %v1229_v26 = vpop.f32.mrb[3].mxu1  ;;  %v1223_v27 = vpop.f32.mrb[3].mxu0 }
 0x10d   : > { %v565_v28 = vadd.f32 %v1597_v21, %v557_v24  ;;  %v558_v29 = vmul.f32 %v1591_v16, %v548_v25 }
 0x10f   : > { %v567_v30 = vmul.f32 0.2, %v565_v28  ;;  %v566_v31 = vadd.f32 %v1597_v21, %v558_v29 }
 0x110   : > { %v706_v32 = vpop.f32.mrb[4].mxu1 }
 0x111   : > { %v568_v33 = vmul.f32 0.2, %v566_v31  ;;  %v707_v34 = vadd.f32 %v706_v32, %v1586_v15  ;;  %v1246_v35 = vpop.f32.mrb[5].mxu1  ;;  %v569_v37 = vmax.f32 %v565_v28, %v567_v30 }
 0x112   : > { %v709_v36 = vpop.f32.mrb[6].mxu1 }
 0x113   : > { %v570_v38 = vmax.f32 %v566_v31, %v568_v33  ;;  %v713_v39 = vmul.f32 %v1591_v16, %v707_v34  ;;  %v710_v40 = vadd.f32 %v709_v36, %v1599_v22  ;;  %v1247_v41 = vpop.f32.mrb[7].mxu1 }
 0x115   : > { %v571_v42 = vpack.c.bf16 %v570_v38, %v569_v37  ;;  %v715_v43 = vadd.f32 %v1597_v21, %v713_v39  ;;  %v714_v44 = vmul.f32 %v1591_v16, %v710_v40 }
 0x117   : > { %v717_v45 = vmul.f32 0.2, %v715_v43  ;;  %v716_v46 = vadd.f32 %v1597_v21, %v714_v44  ;;  %1239 = vmatmul.mubr.msk.bf16.vlgmr.msra.gmra.mrb[4].mxu0 %vm596_vm4, %v571_v42 }
 0x118   : > { %1261 = vmatpush3.bf16.msra.mxu0 %v1544_v7  ;;  %1262 = vmatprep.mubr.msk.bf16.mxu0 %vm1406_vm2, %v1404_v0 }
 0x119   : > { %v718_v47 = vmul.f32 0.2, %v716_v46  ;;  %1266 = vmatprep.subr.bf16.mxu0 %v1404_v0  ;;  %v719_v48 = vmax.f32 %v715_v43, %v717_v45 }
 0x11b   : > { %v720_v49 = vmax.f32 %v716_v46, %v718_v47 }
 0x11d   : > { %v721_v51 = vpack.c.bf16 %v720_v49, %v719_v48 }
 0x11f   : > { %1257 = vmatmul.mubr.msk.bf16.vlgmr.msra.gmra.mrb[8].mxu1 %vm596_vm4, %v721_v51  ;;  %1263 = vmatmul.mubr.msk.bf16.vlgmr.msra.gmra.mrb[8].mxu0 %vm435_vm3, %v1343_v50 }
 0x120   : > { %1279 = vmatpush3.bf16.msra.mxu1 %v1544_v7  ;;  %1280 = vmatprep.mubr.msk.bf16.mxu1 %vm1406_vm2, %v1404_v0 }
 0x121   : > { %1267 = vmatpush3.bf16.msra.mxu0 %v1562_v11  ;;  %1284 = vmatprep.subr.bf16.mxu1 %v1404_v0 }
 0x122   : > { %1268 = vmatprep.subr.bf16.mxu0 %v1404_v0  ;;  %1274 = vmatprep.mubr.msk.bf16.mxu0 %vm1406_vm2, %v1404_v0 }
 0x125   : > { %1269 = vmatpush3.bf16.msra.mxu0 %v1568_v12 }
 0x126   : > { %1270 = vmatprep.subr.bf16.mxu0 %v1404_v0 }
 0x127   : > { %1281 = vmatmul.mubr.msk.bf16.vlgmr.msra.gmra.mrb[12].mxu1 %vm435_vm3, %v1344_v52 }
 0x128   : > { %1285 = vmatpush3.bf16.msra.mxu1 %v1562_v11  ;;  %1292 = vmatprep.mubr.msk.bf16.mxu1 %vm1406_vm2, %v1404_v0 }
 0x129   : > { %1271 = vmatpush3.bf16.msra.mxu0 %v1574_v13  ;;  %1286 = vmatprep.subr.bf16.mxu1 %v1404_v0 }
 0x12a   : > { %1272 = vmatprep.subr.bf16.mxu0 %v1404_v0 }
 0x12c   : > { %1287 = vmatpush3.bf16.msra.mxu1 %v1568_v12 }
 0x12d   : > { %1273 = vmatpush3.bf16.msra.mxu0 %v1580_v14  ;;  %1288 = vmatprep.subr.bf16.mxu1 %v1404_v0 }
 0x130   : > { %1289 = vmatpush3.bf16.msra.mxu1 %v1574_v13 }
 0x131   : > { %1290 = vmatprep.subr.bf16.mxu1 %v1404_v0 }
 0x134   : > { %1291 = vmatpush3.bf16.msra.mxu1 %v1580_v14 }
 0x1ea   : > { %v634_v54 = vpop.f32.mrb[4].mxu0 }
 0x1eb   : > { %v1240_v55 = vpop.f32.mrb[5].mxu0  ;;  %v647_v56 = vmul.f32 %v1647_v53, %v634_v54 }
 0x1ec   : > { %v637_v57 = vpop.f32.mrb[6].mxu0 }
 0x1ed   : > { %v1241_v59 = vpop.f32.mrb[7].mxu0  ;;  %v648_v60 = vmul.f32 %v1647_v53, %v637_v57  ;;  %v655_v61 = vadd.f32 %v1653_v58, %v647_v56 }
 0x1ef   : > { %v656_v62 = vadd.f32 %v1653_v58, %v648_v60  ;;  %v657_v5 = vmul.f32 0.2, %v655_v61 }
 0x1f1   : > { %v658_v14 = vmul.f32 0.2, %v656_v62  ;;  %v659_v23 = vmax.f32 %v655_v61, %v657_v5 }
 0x1f2   : > { %v759_v63 = vpop.f32.mrb[8].mxu1  ;;  %v821_v0 = vpop.f32.mrb[8].mxu0 }
 0x1f3   : > { %v766_v1 = vmul.f32 %v1647_v53, %v759_v63  ;;  %v822_v2 = vadd.f32 %v821_v0, %v1586_v15  ;;  %v1258_v3 = vpop.f32.mrb[9].mxu1  ;;  %v1264_v4 = vpop.f32.mrb[9].mxu0  ;;  %v660_v29 = vmax.f32 %v656_v62, %v658_v14 }
 0x1f4   : > { %v762_v6 = vpop.f32.mrb[10].mxu1  ;;  %v824_v7 = vpop.f32.mrb[10].mxu0 }
 0x1f5   : > { %v768_v8 = vadd.f32 %v1653_v58, %v766_v1  ;;  %v828_v9 = vmul.f32 %v1591_v16, %v822_v2  ;;  %v767_v10 = vmul.f32 %v1647_v53, %v762_v6  ;;  %v825_v11 = vadd.f32 %v824_v7, %v1599_v22  ;;  %v1259_v12 = vpop.f32.mrb[11].mxu1  ;;  %v1265_v13 = vpop.f32.mrb[11].mxu0 }
 0x1f7   : > { %v770_v17 = vmul.f32 0.2, %v768_v8  ;;  %v830_v18 = vadd.f32 %v1597_v21, %v828_v9  ;;  %v769_v19 = vadd.f32 %v1653_v58, %v767_v10  ;;  %v829_v20 = vmul.f32 %v1591_v16, %v825_v11 }
 0x1f9   : > { %v772_v24 = vmax.f32 %v768_v8, %v770_v17  ;;  %v832_v25 = vmul.f32 0.2, %v830_v18  ;;  %v771_v26 = vmul.f32 0.2, %v769_v19  ;;  %v831_v27 = vadd.f32 %v1597_v21, %v829_v20 }
 0x1fa   : > { %v936_v28 = vpop.f32.mrb[12].mxu1 }
 0x1fb   : > { %v774_v30 = vmax.f32 %v659_v23, %v772_v24  ;;  %v773_v31 = vmax.f32 %v769_v19, %v771_v26  ;;  %v833_v32 = vmul.f32 0.2, %v831_v27  ;;  %v1282_v33 = vpop.f32.mrb[13].mxu1  ;;  %v937_v34 = vadd.f32 %v936_v28, %v1586_v15 }
 0x1fc   : > { %v939_v35 = vpop.f32.mrb[14].mxu1  ;;  %v834_v36 = vmax.f32 %v830_v18, %v832_v25 }
 0x1fd   : > { %v775_v37 = vmax.f32 %v660_v29, %v773_v31  ;;  %v835_v38 = vmax.f32 %v831_v27, %v833_v32  ;;  %v940_v39 = vadd.f32 %v939_v35, %v1599_v22  ;;  %v1283_v40 = vpop.f32.mrb[15].mxu1  ;;  %v943_v41 = vmul.f32 %v1591_v16, %v937_v34 }
 0x1ff   : > { %v836_v42 = vpack.c.bf16 %v835_v38, %v834_v36  ;;  %v944_v43 = vmul.f32 %v1591_v16, %v940_v39  ;;  %v945_v44 = vadd.f32 %v1597_v21, %v943_v41 }
 0x201   : > { %v946_v45 = vadd.f32 %v1597_v21, %v944_v43  ;;  %1275 = vmatmul.mubr.msk.bf16.vlgmr.msra.gmra.mrb[12].mxu0 %vm596_vm4, %v836_v42  ;;  %v947_v46 = vmul.f32 0.2, %v945_v44 }
 0x203   : > { %v948_v15 = vmul.f32 0.2, %v946_v45  ;;  %v949_v47 = vmax.f32 %v945_v44, %v947_v46 }
 0x205   : > { %v950_v48 = vmax.f32 %v946_v45, %v948_v15 }
 0x207   : > { %v951_v49 = vpack.c.bf16 %v950_v48, %v949_v47 }
 0x209   : > { %1293 = vmatmul.mubr.msk.bf16.vlgmr.msra.gmra.mrb[16].mxu1 %vm596_vm4, %v951_v49 }
 0x2d4   : > { %v874_v22 = vpop.f32.mrb[12].mxu0 }
 0x2d5   : > { %v881_v50 = vmul.f32 %v1647_v53, %v874_v22  ;;  %v1276_v51 = vpop.f32.mrb[13].mxu0 }
 0x2d6   : > { %v877_v52 = vpop.f32.mrb[14].mxu0 }
 0x2d7   : > { %v883_v16 = vadd.f32 %v1653_v58, %v881_v50  ;;  %v882_v54 = vmul.f32 %v1647_v53, %v877_v52  ;;  %v1277_v55 = vpop.f32.mrb[15].mxu0 }
 0x2d9   : > { %v885_v21 = vmul.f32 0.2, %v883_v16  ;;  %v884_v56 = vadd.f32 %v1653_v58, %v882_v54 }
 0x2db   : > { %v887_v57 = vmax.f32 %v883_v16, %v885_v21  ;;  %v886_v59 = vmul.f32 0.2, %v884_v56 }
 0x2dc   : > { %v989_v60 = vpop.f32.mrb[16].mxu1 }
 0x2dd   : > { %v889_v61 = vmax.f32 %v774_v30, %v887_v57  ;;  %v888_v62 = vmax.f32 %v884_v56, %v886_v59  ;;  %v996_v63 = vmul.f32 %v1647_v53, %v989_v60  ;;  %v1294_v0 = vpop.f32.mrb[17].mxu1 }
 0x2de   : > { %v992_v1 = vpop.f32.mrb[18].mxu1 }
 0x2df   : > { %v890_v2 = vmax.f32 %v775_v37, %v888_v62  ;;  %v998_v3 = vadd.f32 %v1653_v58, %v996_v63  ;;  %v997_v4 = vmul.f32 %v1647_v53, %v992_v1  ;;  %v1295_v5 = vpop.f32.mrb[19].mxu1 }
 0x2e1   : > { %v1000_v6 = vmul.f32 0.2, %v998_v3  ;;  %v999_v7 = vadd.f32 %v1653_v58, %v997_v4 }
 0x2e3   : > { %v1002_v8 = vmax.f32 %v998_v3, %v1000_v6  ;;  %v1001_v9 = vmul.f32 0.2, %v999_v7 }
 0x2e5   : > { %v1004_v10 = vmax.f32 %v889_v61, %v1002_v8  ;;  %v1003_v11 = vmax.f32 %v999_v7, %v1001_v9 }
 0x2e7   : > { %v1005_v12 = vmax.f32 %v890_v2, %v1003_v11 }
 0x2e9   : > { %v1186_v13 = vpack.c.bf16 %v1005_v12, %v1004_v10 }
 0x2eb   : > { %1187 = vst [vmem:[%s421_s20] sm:$0xff] %v1186_v13  }
 0x2ec PF: > { %s20_s11 = sadd.s32 1, %s1399_s11   ;;  %s1716_s30 = smov %s1395_s10 }
 0x2ed   : > { %p17_p4 = scmp.ge.s32.totalorder %s20_s11, 4   ;;  %s1717_s10 = smov %s1719_s13 }
 0x2ef   :  { %19 = sbr.rel (!%p17_p4) target bundleno = 2 (0x2), region = 97 }
 0x2f6   :  { %1046 = vsyncpa [#allocation3], 1 }
 0x2f7   :  { %1048 = vsyncpa [#allocation3 + $0x1], 1 }

// kernel: dgcnn_partseg_forward.17
= control target key start
LH: loop header
LB: loop body
LE: loop exit
PB: predicated region body
PF: predicated region fallthrough
CT: control target
= control target key end

     0   :  { %9 = vsyncpa [#allocation3], 0  ;;  %s1757_s0 = inlined_call_operand.vmem [shape: bf16[2,16,128], index: 0, kind: input, shape index: {}]   ;;  %s1758_s1 = inlined_call_operand.hbm [shape: bf16[128,1024], index: 1, kind: input, shape index: {}]   ;;  %s1759_s2 = inlined_call_operand.hbm [shape: f32[1,1024], index: 2, kind: input, shape index: {}]   ;;  %s1760_s3 = inlined_call_operand.hbm [shape: f32[1,1024], index: 3, kind: input, shape index: {}]   ;;  %s1761_s4 = inlined_call_operand.vmem [shape: f32[2,1,1024], index: 4, kind: output, shape index: {}]  }
   0x1   :  { %10 = vsyncpa [#allocation5], 0  ;;  %s1550_s15 = smov 0   ;;  %s1552_s16 = smov 0  }
   0x2   :  { %s1554_s17 = smov 0  }
   0x3 LB: > { %s1518_s18 = smov [#allocation4]   ;;  %s1260_s20 = sadd.s32 4294967295, %s1516_s17   ;;  %s1516_s17 = sphi %s1554_s17, %s16_s17   ;;  %s1512_s16 = sphi %s1552_s16, %s1774_s16   ;;  %s1508_s15 = sphi %s1550_s15, %s1773_s15  }
   0x4   : > { %s176_s19 = sshll.u32 %s1518_s18, 4  ;;  %p1262_p0 = scmp.ge.s32.totalorder %s1516_s17, 1  ;;  %s177_s19 = int_to_ptr.vmem [resolvable:$true] %s176_s19 }
   0x5   : > { %p150_p1 = scmp.lt.s32.totalorder %s1516_s17, 3  ;;  %p1568_p2 = scmp.eq.s32.totalorder %s1260_s20, 0 }
   0x6   : > { %s28_s23 = sadd.s32 1, %s1512_s16  ;;  %s1519_s26 = smov [#allocation2]  }
   0x7   : > { %s1765_s21 = scalar_select %p1568_p2, 1, 0 }
   0x8   : > { %p1572_p3 = pnand %p1262_p0, %p150_p1  ;;  %p1585_p6 = scmp.ge.s32.totalorder %s28_s23, 2 }
   0x9   : > { %s162_s27 = sshll.u32 %s1519_s26, 4  ;;  %s1402_s30 = scalar_lea.hbm %s1759_s2, 128  ;;  %s1589_s27 = int_to_ptr.vmem [resolvable:$true] %s162_s27 }
   0xa   : > { %s1766_s22 = scalar_select %p1572_p3, 1, 0 }
   0xb   : > { %p1354_p4 = pneg %p1572_p3  ;;  %p1403_p7 = scmp.ne.s32.totalorder %s1759_s2, %s1402_s30 }
   0xc   : > { %s1768_s25 = scalar_select %p1585_p6, 1, 0 }
   0xd   : > { %p1581_p5 = pnand %p1568_p2, %p1354_p4  ;;  %p1409_p11 = scmp.lt.u32.totalorder %s1402_s30, %s1759_s2 }
   0xf   : > { %p1599_p8 = pneg %p1581_p5 }
  0x11   : > { %p1405_p9 = pnand %p1599_p8, %p1403_p7 }
  0x13   : > { %p1406_p10 = pneg %p1405_p9 }
  0x15   : > { %p1411_p12 = pnand %p1409_p11, %p1406_p10 }
  0x17   : > { %1414 = shalt.err (!%p1411_p12)
}
  0x18   : > { %s1415_s10 = scalar_lea.vmem %s177_s19, 128  ;;  %p1423_p4 = scmp.lt.s32.totalorder %s177_s19, %s177_s19 }
  0x19   : > { %p1416_p13 = scmp.ne.s32.totalorder %s177_s19, %s1415_s10  ;;  %p1424_p2 = scmp.lt.s32.totalorder %s1415_s10, %s1415_s10 }
  0x1b   : > { %p1418_p0 = pnand %p1416_p13, %p1599_p8  ;;  %p1425_p3 = por %p1424_p2, %p1423_p4 }
  0x1d   : > { %p1419_p1 = pneg %p1418_p0 }
  0x1f   : > { %p1426_p6 = pnand %p1425_p3, %p1419_p1 }
  0x21   : > { %1429 = shalt.err (!%p1426_p6)
}
  0x22   : > { %1360 = dma.hbm_to_vmem [thread:$0]  (!%p1581_p5), %s1759_s2, 128, %s177_s19, [#allocation5]  }
  0x23   : > { %p1770_p7 = scmp.ne.s32.totalorder %s1768_s25, 0  ;;  %s1430_s18 = scalar_lea.hbm %s1758_s1, 8192 }
  0x24   : > { %p1431_p2 = scmp.ne.s32.totalorder %s1758_s1, %s1430_s18  ;;  %p1437_p9 = scmp.lt.u32.totalorder %s1430_s18, %s1758_s1 }
  0x25   : > { %s1776_s23 = smov (%p1770_p7, %s28_s23), 0 }
  0x26   : > { %p1433_p3 = pnand %p1431_p2, %p1599_p8 }
  0x28   : > { %p1434_p6 = pneg %p1433_p3 }
  0x2a   : > { %p1439_p10 = pnand %p1437_p9, %p1434_p6 }
  0x2c   : > { %1442 = shalt.err (!%p1439_p10)
}
  0x2d   : > { %s1443_s19 = scalar_lea.vmem %s1589_s27, 8192  ;;  %p1451_p0 = scmp.lt.s32.totalorder %s1589_s27, %s1589_s27 }
  0x2e   : > { %p1444_p11 = scmp.ne.s32.totalorder %s1589_s27, %s1443_s19  ;;  %p1452_p1 = scmp.lt.s32.totalorder %s1443_s19, %s1443_s19 }
  0x30   : > { %p1446_p12 = pnand %p1444_p11, %p1599_p8  ;;  %p1453_p4 = por %p1452_p1, %p1451_p0 }
  0x32   : > { %p1447_p13 = pneg %p1446_p12 }
  0x34   : > { %p1454_p7 = pnand %p1453_p4, %p1447_p13 }
  0x36   : > { %1457 = shalt.err (!%p1454_p7)
}
  0x37   : > { %s1520_s25 = smov 512   ;;  %s1521_s30 = smov 32  }
  0x38   : > { %1357 = dma.hbm_to_vmem [thread:$0]  (!%p1581_p5), %s1758_s1, 8192, %s1589_s27, [#allocation3], %s1520_s25, %s1520_s25, %s1521_s30  }
  0x39   : > { %s1522_s8 = smov [#allocation6]   ;;  %s1458_s12 = scalar_lea.hbm %s1760_s3, 128 }
  0x3a   : > { %s187_s9 = sshll.u32 %s1522_s8, 4  ;;  %p1459_p2 = scmp.ne.s32.totalorder %s1760_s3, %s1458_s12  ;;  %s188_s9 = int_to_ptr.vmem [resolvable:$true] %s187_s9 }
  0x3b   : > { %p1465_p9 = scmp.lt.u32.totalorder %s1458_s12, %s1760_s3 }
  0x3c   : > { %p1461_p3 = pnand %p1459_p2, %p1599_p8 }
  0x3e   : > { %p1462_p6 = pneg %p1461_p3 }
  0x40   : > { %p1467_p10 = pnand %p1465_p9, %p1462_p6 }
  0x42   : > { %1470 = shalt.err (!%p1467_p10)
}
  0x43   : > { %s1471_s27 = scalar_lea.vmem %s188_s9, 128  ;;  %p1479_p0 = scmp.lt.s32.totalorder %s188_s9, %s188_s9 }
  0x44   : > { %p1472_p11 = scmp.ne.s32.totalorder %s188_s9, %s1471_s27  ;;  %p1480_p1 = scmp.lt.s32.totalorder %s1471_s27, %s1471_s27 }
  0x46   : > { %p1474_p12 = pnand %p1472_p11, %p1599_p8  ;;  %p1481_p4 = por %p1480_p1, %p1479_p0 }
  0x48   : > { %p1475_p13 = pneg %p1474_p12 }
  0x4a   : > { %p1482_p7 = pnand %p1481_p4, %p1475_p13 }
  0x4c   : > { %1485 = shalt.err (!%p1482_p7)
}
  0x4d   : > { %1363 = dma.hbm_to_vmem [thread:$0]  (!%p1581_p5), %s1760_s3, 128, %s188_s9, [#allocation5]  }
  0x4e   : > { %p1771_p2 = scmp.ne.s32.totalorder %s1766_s22, 0 }
  0x4f   : > { %p1772_p3 = scmp.ne.s32.totalorder (!%p1771_p2), %s1765_s21, 0 }
  0x50   : > { %213 = sbr.rel (%p1771_p2) target bundleno = 406 (0x196), region = 36 }
  0x57   : > { %1499 = dma.done.wait (%p1772_p3), [#allocation3], 8192  }
  0x58   : > { %1501 = vsyncadd (%p1772_p3), [#allocation3], 4294959104 }
  0x59   : > { %1503 = dma.done.wait (%p1772_p3), [#allocation5], 256  }
  0x5a   : > { %1505 = vsyncadd (%p1772_p3), [#allocation5], 4294967040  ;;  %v1523_v0 = vmov 0   ;;  %p251_p5 = scmp.lt.s32.totalorder %s1508_s15, 1  ;;  %v267_v1 = vld [vmem:[#allocation2] sm:$0xff]  ;;  %v268_v3 = vld [vmem:[#allocation2 + $0x8] sm:$0xff] }
  0x5b   : > { %689 = vmatprep.mubr.bf16.mxu0 %v1523_v0  ;;  %732 = vmatprep.mubr.bf16.mxu1 %v1523_v0  ;;  %v271_v2 = vld [vmem:[#allocation2 + $0x20] sm:$0xff]  ;;  %v272_v5 = vld [vmem:[#allocation2 + $0x28] sm:$0xff]  ;;  %v269_v63 = vld [vmem:[#allocation2 + $0x10] sm:$0xff] }
  0x5c   : > { %v1276_v4 = vcombine.high %v267_v1, %v271_v2  ;;  %v1275_v6 = vcombine.low %v267_v1, %v271_v2  ;;  %v275_v7 = vld [vmem:[#allocation2 + $0x40] sm:$0xff]  ;;  %v1278_v9 = vcombine.high %v268_v3, %v272_v5  ;;  %v1277_v10 = vcombine.low %v268_v3, %v272_v5  ;;  %v276_v12 = vld [vmem:[#allocation2 + $0x48] sm:$0xff]  ;;  %s1778_s15 = smov (!%p251_p5, %s1508_s15), 1  ;;  %v273_v1 = vld [vmem:[#allocation2 + $0x30] sm:$0xff] }
  0x5d   : > { %v279_v8 = vld [vmem:[#allocation2 + $0x60] sm:$0xff]  ;;  %v280_v13 = vld [vmem:[#allocation2 + $0x68] sm:$0xff]  ;;  %s1341_s21 = sshll.u32 %s1778_s15, 3  ;;  %v270_v2 = vld [vmem:[#allocation2 + $0x18] sm:$0xff] }
  0x5e   : > { %v1284_v11 = vcombine.high %v275_v7, %v279_v8  ;;  %v283_v14 = vld [vmem:[#allocation2 + $0x80] sm:$0xff]  ;;  %657 = vmatprep.subr.bf16.mxu0 %v1276_v4  ;;  %v1286_v15 = vcombine.high %v276_v12, %v280_v13  ;;  %v284_v17 = vld [vmem:[#allocation2 + $0x88] sm:$0xff]  ;;  %700 = vmatprep.subr.bf16.mxu1 %v1278_v9  ;;  %v1283_v19 = vcombine.low %v275_v7, %v279_v8  ;;  %s1684_s7 = scalar_lea.vmem %s1757_s0, %s1341_s21  ;;  %v274_v3 = vld [vmem:[#allocation2 + $0x38] sm:$0xff]  ;;  %s263_s25 = scalar_lea.vmem %s1761_s4, %s1341_s21 }
  0x5f   : > { %v287_v16 = vld [vmem:[#allocation2 + $0xa0] sm:$0xff]  ;;  %v288_v18 = vld [vmem:[#allocation2 + $0xa8] sm:$0xff]  ;;  %658 = vmatpush1.bf16.msra.mxu0 %v1275_v6  ;;  %701 = vmatpush1.bf16.msra.mxu1 %v1277_v10  ;;  %v1285_v20 = vcombine.low %v276_v12, %v280_v13  ;;  %v1280_v6 = vcombine.high %v269_v63, %v273_v1  ;;  %v1282_v7 = vcombine.high %v270_v2, %v274_v3  ;;  %v277_v8 = vld [vmem:[#allocation2 + $0x50] sm:$0xff] }
  0x60   : > { %659 = vmatprep.subr.bf16.mxu0 %v1284_v11  ;;  %v1292_v21 = vcombine.high %v283_v14, %v287_v16  ;;  %702 = vmatprep.subr.bf16.mxu1 %v1286_v15  ;;  %v1294_v22 = vcombine.high %v284_v17, %v288_v18  ;;  %v291_v23 = vld [vmem:[#allocation2 + $0xc0] sm:$0xff]  ;;  %v292_v25 = vld [vmem:[#allocation2 + $0xc8] sm:$0xff]  ;;  %v1291_v27 = vcombine.low %v283_v14, %v287_v16  ;;  %v281_v9 = vld [vmem:[#allocation2 + $0x70] sm:$0xff] }
  0x61   : > { %v295_v24 = vld [vmem:[#allocation2 + $0xe0] sm:$0xff]  ;;  %v296_v26 = vld [vmem:[#allocation2 + $0xe8] sm:$0xff]  ;;  %v1293_v28 = vcombine.low %v284_v17, %v288_v18  ;;  %v278_v11 = vld [vmem:[#allocation2 + $0x58] sm:$0xff]  ;;  %v1279_v13 = vcombine.low %v269_v63, %v273_v1  ;;  %v1281_v14 = vcombine.low %v270_v2, %v274_v3  ;;  %v1288_v15 = vcombine.high %v277_v8, %v281_v9 }
  0x62   : > { %v1300_v29 = vcombine.high %v291_v23, %v295_v24  ;;  %v1302_v30 = vcombine.high %v292_v25, %v296_v26  ;;  %v299_v31 = vld [vmem:[#allocation2 + $0x100] sm:$0xff]  ;;  %v300_v33 = vld [vmem:[#allocation2 + $0x108] sm:$0xff]  ;;  %v1299_v35 = vcombine.low %v291_v23, %v295_v24  ;;  %v1301_v36 = vcombine.low %v292_v25, %v296_v26  ;;  %v282_v12 = vld [vmem:[#allocation2 + $0x78] sm:$0xff] }
  0x63   : > { %660 = vmatpush1.bf16.msra.mxu0 %v1283_v19  ;;  %703 = vmatpush1.bf16.msra.mxu1 %v1285_v20  ;;  %v303_v32 = vld [vmem:[#allocation2 + $0x120] sm:$0xff]  ;;  %v304_v34 = vld [vmem:[#allocation2 + $0x128] sm:$0xff]  ;;  %v1290_v16 = vcombine.high %v278_v11, %v282_v12  ;;  %v285_v17 = vld [vmem:[#allocation2 + $0x90] sm:$0xff]  ;;  %v831_v3 = vlaneseq }
  0x64   : > { %661 = vmatprep.subr.bf16.mxu0 %v1292_v21  ;;  %704 = vmatprep.subr.bf16.mxu1 %v1294_v22  ;;  %v1308_v37 = vcombine.high %v299_v31, %v303_v32  ;;  %v1310_v38 = vcombine.high %v300_v33, %v304_v34  ;;  %v307_v39 = vld [vmem:[#allocation2 + $0x140] sm:$0xff]  ;;  %v308_v41 = vld [vmem:[#allocation2 + $0x148] sm:$0xff]  ;;  %v1307_v43 = vcombine.low %v299_v31, %v303_v32  ;;  %v289_v18 = vld [vmem:[#allocation2 + $0xb0] sm:$0xff] }
  0x65   : > { %v311_v40 = vld [vmem:[#allocation2 + $0x160] sm:$0xff]  ;;  %v312_v42 = vld [vmem:[#allocation2 + $0x168] sm:$0xff]  ;;  %v1309_v44 = vcombine.low %v300_v33, %v304_v34  ;;  %v286_v19 = vld [vmem:[#allocation2 + $0x98] sm:$0xff]  ;;  %v1287_v21 = vcombine.low %v277_v8, %v281_v9  ;;  %v1289_v22 = vcombine.low %v278_v11, %v282_v12  ;;  %v1296_v23 = vcombine.high %v285_v17, %v289_v18 }
  0x66   : > { %v1316_v45 = vcombine.high %v307_v39, %v311_v40  ;;  %v1318_v46 = vcombine.high %v308_v41, %v312_v42  ;;  %v315_v47 = vld [vmem:[#allocation2 + $0x180] sm:$0xff]  ;;  %v316_v49 = vld [vmem:[#allocation2 + $0x188] sm:$0xff]  ;;  %v1315_v51 = vcombine.low %v307_v39, %v311_v40  ;;  %v1317_v52 = vcombine.low %v308_v41, %v312_v42  ;;  %v290_v20 = vld [vmem:[#allocation2 + $0xb8] sm:$0xff] }
  0x67   : > { %662 = vmatpush1.bf16.msra.mxu0 %v1291_v27  ;;  %705 = vmatpush1.bf16.msra.mxu1 %v1293_v28  ;;  %v319_v48 = vld [vmem:[#allocation2 + $0x1a0] sm:$0xff]  ;;  %v320_v50 = vld [vmem:[#allocation2 + $0x1a8] sm:$0xff]  ;;  %v1298_v24 = vcombine.high %v286_v19, %v290_v20  ;;  %v293_v25 = vld [vmem:[#allocation2 + $0xd0] sm:$0xff] }
  0x68   : > { %663 = vmatprep.subr.bf16.mxu0 %v1300_v29  ;;  %706 = vmatprep.subr.bf16.mxu1 %v1302_v30  ;;  %v1324_v53 = vcombine.high %v315_v47, %v319_v48  ;;  %v1326_v54 = vcombine.high %v316_v49, %v320_v50  ;;  %v323_v55 = vld [vmem:[#allocation2 + $0x1c0] sm:$0xff]  ;;  %v324_v57 = vld [vmem:[#allocation2 + $0x1c8] sm:$0xff]  ;;  %v1323_v59 = vcombine.low %v315_v47, %v319_v48  ;;  %v297_v26 = vld [vmem:[#allocation2 + $0xf0] sm:$0xff] }
  0x69   : > { %v327_v56 = vld [vmem:[#allocation2 + $0x1e0] sm:$0xff]  ;;  %v328_v58 = vld [vmem:[#allocation2 + $0x1e8] sm:$0xff]  ;;  %v1325_v60 = vcombine.low %v316_v49, %v320_v50  ;;  %v294_v27 = vld [vmem:[#allocation2 + $0xd8] sm:$0xff]  ;;  %v1295_v29 = vcombine.low %v285_v17, %v289_v18  ;;  %v1297_v30 = vcombine.low %v286_v19, %v290_v20  ;;  %v1304_v31 = vcombine.high %v293_v25, %v297_v26 }
  0x6a   : > { %v1332_v61 = vcombine.high %v323_v55, %v327_v56  ;;  %v1334_v62 = vcombine.high %v324_v57, %v328_v58  ;;  %v1331_v4 = vcombine.low %v323_v55, %v327_v56  ;;  %v1333_v5 = vcombine.low %v324_v57, %v328_v58  ;;  %v1687_v10 = vld [vmem:[%s1684_s7] sm:$0xff]   ;;  %v298_v28 = vld [vmem:[#allocation2 + $0xf8] sm:$0xff]  ;;  %v301_v33 = vld [vmem:[#allocation2 + $0x110] sm:$0xff] }
  0x6b   : > { %664 = vmatpush1.bf16.msra.mxu0 %v1299_v35  ;;  %707 = vmatpush1.bf16.msra.mxu1 %v1301_v36  ;;  %v1306_v32 = vcombine.high %v294_v27, %v298_v28  ;;  %v305_v34 = vld [vmem:[#allocation2 + $0x130] sm:$0xff]  ;;  %v302_v35 = vld [vmem:[#allocation2 + $0x118] sm:$0xff]  ;;  %v1703_v11 = vld [vmem:[#allocation6] sm:$0xff] }
  0x6c   : > { %665 = vmatprep.subr.bf16.mxu0 %v1308_v37  ;;  %708 = vmatprep.subr.bf16.mxu1 %v1310_v38  ;;  %v306_v36 = vld [vmem:[#allocation2 + $0x138] sm:$0xff]  ;;  %v1303_v37 = vcombine.low %v293_v25, %v297_v26  ;;  %v1305_v38 = vcombine.low %v294_v27, %v298_v28  ;;  %v1312_v39 = vcombine.high %v301_v33, %v305_v34  ;;  %v309_v40 = vld [vmem:[#allocation2 + $0x150] sm:$0xff] }
  0x6d   : > { %v313_v41 = vld [vmem:[#allocation2 + $0x170] sm:$0xff]  ;;  %v310_v42 = vld [vmem:[#allocation2 + $0x158] sm:$0xff] }
  0x6e   : > { %v317_v48 = vld [vmem:[#allocation2 + $0x190] sm:$0xff]  ;;  %v318_v50 = vld [vmem:[#allocation2 + $0x198] sm:$0xff] }
  0x6f   : > { %666 = vmatpush1.bf16.msra.mxu0 %v1307_v43  ;;  %709 = vmatpush1.bf16.msra.mxu1 %v1309_v44  ;;  %v314_v43 = vld [vmem:[#allocation2 + $0x178] sm:$0xff]  ;;  %v1311_v44 = vcombine.low %v301_v33, %v305_v34  ;;  %v321_v49 = vld [vmem:[#allocation2 + $0x1b0] sm:$0xff] }
  0x70   : > { %667 = vmatprep.subr.bf16.mxu0 %v1316_v45  ;;  %710 = vmatprep.subr.bf16.mxu1 %v1318_v46  ;;  %v1313_v45 = vcombine.low %v302_v35, %v306_v36  ;;  %v1320_v46 = vcombine.high %v309_v40, %v313_v41  ;;  %v1322_v47 = vcombine.high %v310_v42, %v314_v43  ;;  %v325_v56 = vld [vmem:[#allocation2 + $0x1d0] sm:$0xff]  ;;  %v326_v58 = vld [vmem:[#allocation2 + $0x1d8] sm:$0xff] }
  0x71   : > { %v329_v57 = vld [vmem:[#allocation2 + $0x1f0] sm:$0xff] }
  0x72   : > { %v1335_v1 = vcombine.low %v325_v56, %v329_v57 }
  0x73   : > { %668 = vmatpush1.bf16.msra.mxu0 %v1315_v51  ;;  %711 = vmatpush1.bf16.msra.mxu1 %v1317_v52  ;;  %v322_v51 = vld [vmem:[#allocation2 + $0x1b8] sm:$0xff]  ;;  %v1319_v52 = vcombine.low %v309_v40, %v313_v41 }
  0x74   : > { %669 = vmatprep.subr.bf16.mxu0 %v1324_v53  ;;  %712 = vmatprep.subr.bf16.mxu1 %v1326_v54  ;;  %v1321_v53 = vcombine.low %v310_v42, %v314_v43  ;;  %v1328_v54 = vcombine.high %v317_v48, %v321_v49  ;;  %v1330_v55 = vcombine.high %v318_v50, %v322_v51 }
  0x77   : > { %670 = vmatpush1.bf16.msra.mxu0 %v1323_v59  ;;  %713 = vmatpush1.bf16.msra.mxu1 %v1325_v60  ;;  %v330_v59 = vld [vmem:[#allocation2 + $0x1f8] sm:$0xff]  ;;  %v1327_v60 = vcombine.low %v317_v48, %v321_v49 }
  0x78   : > { %671 = vmatprep.subr.bf16.mxu0 %v1332_v61  ;;  %714 = vmatprep.subr.bf16.mxu1 %v1334_v62  ;;  %v1329_v61 = vcombine.low %v318_v50, %v322_v51  ;;  %v1336_v62 = vcombine.high %v325_v56, %v329_v57  ;;  %v1338_v63 = vcombine.high %v326_v58, %v330_v59 }
  0x79   : > { %v1337_v2 = vcombine.low %v326_v58, %v330_v59 }
  0x7b   : > { %672 = vmatpush1.bf16.msra.mxu0 %v1331_v4  ;;  %715 = vmatpush1.bf16.msra.mxu1 %v1333_v5  ;;  %v1695_v4 = vshrl.u32 %v831_v3, 7 }
  0x7c   : > { %743 = vmatprep.subr.bf16.mxu0 %v1280_v6  ;;  %786 = vmatprep.subr.bf16.mxu1 %v1282_v7  ;;  %v1698_v6 = vld [vmem:[#allocation4] sm:$0xff] }
  0x7d   : > { %v833_v5 = vsub.s32 0, %v1695_v4  ;;  %v841_v7 = vsub.s32 2, %v1695_v4  ;;  %v837_v8 = vsub.s32 1, %v1695_v4  ;;  %v845_v9 = vsub.s32 3, %v1695_v4 }
  0x7e   : > { %690 = vmatmul.mubr.bf16.vlgmr.msra.gmra.mrb[0].mxu0 %v1687_v10  ;;  %733 = vmatmul.mubr.bf16.vlgmr.msra.gmra.mrb[0].mxu1 %v1687_v10 }
  0x7f   : > { %744 = vmatpush1.bf16.msra.mxu0 %v1279_v13  ;;  %787 = vmatpush1.bf16.msra.mxu1 %v1281_v14  ;;  %v834_v12 = vrot.slane %v1698_v6, %v833_v5  ;;  %v842_v13 = vrot.slane %v1698_v6, %v841_v7  ;;  %v892_v14 = vrot.slane %v1703_v11, %v833_v5 }
  0x80   : > { %745 = vmatprep.subr.bf16.mxu0 %v1288_v15  ;;  %788 = vmatprep.subr.bf16.mxu1 %v1290_v16  ;;  %v846_v15 = vrot.slane %v1698_v6, %v845_v9  ;;  %v900_v17 = vrot.slane %v1703_v11, %v841_v7  ;;  %v896_v18 = vrot.slane %v1703_v11, %v837_v8 }
  0x81   : > { %775 = vmatprep.mubr.bf16.mxu0 %v1523_v0  ;;  %818 = vmatprep.mubr.bf16.mxu1 %v1523_v0  ;;  %v1314_v0 = vcombine.high %v302_v35, %v306_v36 }
  0x83   : > { %746 = vmatpush1.bf16.msra.mxu0 %v1287_v21  ;;  %789 = vmatpush1.bf16.msra.mxu1 %v1289_v22  ;;  %v904_v22 = vrot.slane %v1703_v11, %v845_v9 }
  0x84   : > { %747 = vmatprep.subr.bf16.mxu0 %v1296_v23  ;;  %790 = vmatprep.subr.bf16.mxu1 %v1298_v24 }
  0x87   : > { %748 = vmatpush1.bf16.msra.mxu0 %v1295_v29  ;;  %791 = vmatpush1.bf16.msra.mxu1 %v1297_v30 }
  0x88   : > { %749 = vmatprep.subr.bf16.mxu0 %v1304_v31  ;;  %792 = vmatprep.subr.bf16.mxu1 %v1306_v32 }
  0x8b   : > { %750 = vmatpush1.bf16.msra.mxu0 %v1303_v37  ;;  %793 = vmatpush1.bf16.msra.mxu1 %v1305_v38 }
  0x8c   : > { %751 = vmatprep.subr.bf16.mxu0 %v1312_v39  ;;  %794 = vmatprep.subr.bf16.mxu1 %v1314_v0 }
  0x8f   : > { %752 = vmatpush1.bf16.msra.mxu0 %v1311_v44  ;;  %795 = vmatpush1.bf16.msra.mxu1 %v1313_v45 }
  0x90   : > { %753 = vmatprep.subr.bf16.mxu0 %v1320_v46  ;;  %796 = vmatprep.subr.bf16.mxu1 %v1322_v47 }
  0x93   : > { %754 = vmatpush1.bf16.msra.mxu0 %v1319_v52  ;;  %797 = vmatpush1.bf16.msra.mxu1 %v1321_v53 }
  0x94   : > { %755 = vmatprep.subr.bf16.mxu0 %v1328_v54  ;;  %798 = vmatprep.subr.bf16.mxu1 %v1330_v55 }
  0x97   : > { %756 = vmatpush1.bf16.msra.mxu0 %v1327_v60  ;;  %799 = vmatpush1.bf16.msra.mxu1 %v1329_v61 }
  0x98   : > { %757 = vmatprep.subr.bf16.mxu0 %v1336_v62  ;;  %800 = vmatprep.subr.bf16.mxu1 %v1338_v63 }
  0x9b   : > { %758 = vmatpush1.bf16.msra.mxu0 %v1335_v1  ;;  %801 = vmatpush1.bf16.msra.mxu1 %v1337_v2 }
  0x9e   : > { %776 = vmatmul.mubr.bf16.vlgmr.msra.gmra.mrb[4].mxu0 %v1687_v10  ;;  %819 = vmatmul.mubr.bf16.vlgmr.msra.gmra.mrb[4].mxu1 %v1687_v10  ;;  %v838_v10 = vrot.slane %v1698_v6, %v837_v8  ;;  %v1524_v8 = vmov 1966171168  }
  0x9f   : > { %v1050_v9 = vunpack.c.l.s4 %v1524_v8 }
 0x151   : > { %v691_v16 = vpop.f32.mrb[0].mxu0  ;;  %v734_v20 = vpop.f32.mrb[0].mxu1 }
 0x152   : > { %v871_v19 = vmul.f32 %v834_v12, %v691_v16  ;;  %v693_v21 = vpop.f32.mrb[1].mxu0  ;;  %v873_v23 = vmul.f32 %v842_v13, %v734_v20  ;;  %v736_v25 = vpop.f32.mrb[1].mxu1 }
 0x153   : > { %v872_v24 = vmul.f32 %v838_v10, %v693_v21  ;;  %v695_v26 = vpop.f32.mrb[2].mxu0  ;;  %v874_v28 = vmul.f32 %v846_v15, %v736_v25  ;;  %v738_v30 = vpop.f32.mrb[2].mxu1 }
 0x154   : > { %v929_v27 = vadd.f32 %v892_v14, %v871_v19  ;;  %v879_v29 = vmul.f32 %v834_v12, %v695_v26  ;;  %v697_v31 = vpop.f32.mrb[3].mxu0  ;;  %v931_v32 = vadd.f32 %v900_v17, %v873_v23  ;;  %v881_v34 = vmul.f32 %v842_v13, %v738_v30  ;;  %v740_v36 = vpop.f32.mrb[3].mxu1 }
 0x155   : > { %v930_v33 = vadd.f32 %v896_v18, %v872_v24  ;;  %v880_v35 = vmul.f32 %v838_v10, %v697_v31  ;;  %v932_v38 = vadd.f32 %v904_v22, %v874_v28  ;;  %v882_v0 = vmul.f32 %v846_v15, %v740_v36 }
 0x156   : > { %v945_v37 = vmul.f32 0.2, %v929_v27  ;;  %v937_v39 = vadd.f32 %v892_v14, %v879_v29  ;;  %v947_v40 = vmul.f32 0.2, %v931_v32  ;;  %v939_v42 = vadd.f32 %v900_v17, %v881_v34 }
 0x157   : > { %v946_v41 = vmul.f32 0.2, %v930_v33  ;;  %v938_v43 = vadd.f32 %v896_v18, %v880_v35  ;;  %v948_v44 = vmul.f32 0.2, %v932_v38  ;;  %v940_v46 = vadd.f32 %v904_v22, %v882_v0 }
 0x158   : > { %v953_v45 = vmul.f32 0.2, %v937_v39  ;;  %v955_v47 = vmul.f32 0.2, %v939_v42  ;;  %v961_v49 = vmax.f32 %v929_v27, %v945_v37  ;;  %v963_v52 = vmax.f32 %v931_v32, %v947_v40 }
 0x159   : > { %v954_v48 = vmul.f32 0.2, %v938_v43  ;;  %v956_v51 = vmul.f32 0.2, %v940_v46  ;;  %v962_v53 = vmax.f32 %v930_v33, %v946_v41  ;;  %v964_v56 = vmax.f32 %v932_v38, %v948_v44 }
 0x15a   : > { %v969_v50 = vmax.f32 %v937_v39, %v953_v45  ;;  %v971_v54 = vmax.f32 %v939_v42, %v955_v47  ;;  %v1051_v19 = vunpack.c.0.s8 %v1050_v9  ;;  %v849_v30 = vsub.s32 4, %v1695_v4 }
 0x15b   : > { %v970_v55 = vmax.f32 %v938_v43, %v954_v48  ;;  %v972_v58 = vmax.f32 %v940_v46, %v956_v51  ;;  %v857_v32 = vsub.s32 6, %v1695_v4  ;;  %v853_v33 = vsub.s32 5, %v1695_v4 }
 0x15c   : > { %v977_v57 = vmax.f32 %v961_v49, %v969_v50  ;;  %v991_v59 = vmax.f32 %v963_v52, %v971_v54  ;;  %v1714_v28 = vsub.s32 %v1051_v19, %v1695_v4  ;;  %v861_v35 = vsub.s32 7, %v1695_v4 }
 0x15d   : > { %v984_v60 = vmax.f32 %v962_v53, %v970_v55  ;;  %v998_v62 = vmax.f32 %v964_v56, %v972_v58  ;;  %v850_v38 = vrot.slane %v1698_v6, %v849_v30  ;;  %v858_v39 = vrot.slane %v1698_v6, %v857_v32 }
 0x15e   : > { %v978_v61 = vrot.slane %v977_v57, 4  ;;  %v992_v63 = vrot.slane %v991_v59, 4  ;;  %v854_v0 = vrot.slane %v1698_v6, %v853_v33  ;;  %v908_v41 = vrot.slane %v1703_v11, %v849_v30 }
 0x15f   : > { %v985_v1 = vrot.slane %v984_v60, 4  ;;  %v999_v3 = vrot.slane %v998_v62, 4  ;;  %v862_v42 = vrot.slane %v1698_v6, %v861_v35  ;;  %v916_v43 = vrot.slane %v1703_v11, %v857_v32 }
 0x160   : > { %v979_v2 = vmax.f32 %v977_v57, %v978_v61  ;;  %v993_v5 = vmax.f32 %v991_v59, %v992_v63  ;;  %v912_v44 = vrot.slane %v1703_v11, %v853_v33  ;;  %v920_v48 = vrot.slane %v1703_v11, %v861_v35 }
 0x161   : > { %v986_v7 = vmax.f32 %v984_v60, %v985_v1  ;;  %v1000_v13 = vmax.f32 %v998_v62, %v999_v3 }
 0x162   : > { %v980_v12 = vrot.slane %v979_v2, 2  ;;  %v994_v10 = vrot.slane %v993_v5, 2 }
 0x163   : > { %v987_v14 = vrot.slane %v986_v7, 2  ;;  %v1001_v16 = vrot.slane %v1000_v13, 2 }
 0x164   : > { %v981_v15 = vmax.f32 %v979_v2, %v980_v12  ;;  %v995_v17 = vmax.f32 %v993_v5, %v994_v10 }
 0x165   : > { %v988_v18 = vmax.f32 %v986_v7, %v987_v14  ;;  %v1002_v21 = vmax.f32 %v1000_v13, %v1001_v16 }
 0x166   : > { %v982_v20 = vrot.slane %v981_v15, 1  ;;  %v996_v22 = vrot.slane %v995_v17, 1 }
 0x167   : > { %v989_v23 = vrot.slane %v988_v18, 1  ;;  %v1003_v25 = vrot.slane %v1002_v21, 1 }
 0x168   : > { %v983_v24 = vmax.f32 %v981_v15, %v982_v20  ;;  %v997_v26 = vmax.f32 %v995_v17, %v996_v22 }
 0x169   : > { %v990_v27 = vmax.f32 %v988_v18, %v989_v23  ;;  %v1004_v29 = vmax.f32 %v1002_v21, %v1003_v25 }
 0x16b   : > { %v1045_v31 = vcombine.low %v983_v24, %v990_v27  ;;  %v1046_v34 = vcombine.low %v997_v26, %v1004_v29 }
 0x16d   : > { %v1721_v36 = vrot.slane %v1045_v31, %v1714_v28  ;;  %v1724_v37 = vrot.slane %v1046_v34, %v1714_v28 }
 0x16f   : > { %v1077_v40 = vcombine.low %v1721_v36, %v1724_v37 }
 0x171   : > { %v777_v4 = vpop.f32.mrb[4].mxu0  ;;  %v820_v46 = vpop.f32.mrb[4].mxu1 }
 0x172   : > { %v875_v45 = vmul.f32 %v850_v38, %v777_v4  ;;  %v779_v47 = vpop.f32.mrb[5].mxu0  ;;  %v877_v49 = vmul.f32 %v858_v39, %v820_v46  ;;  %v822_v51 = vpop.f32.mrb[5].mxu1 }
 0x173   : > { %v876_v50 = vmul.f32 %v854_v0, %v779_v47  ;;  %v781_v52 = vpop.f32.mrb[6].mxu0  ;;  %v878_v54 = vmul.f32 %v862_v42, %v822_v51  ;;  %v824_v56 = vpop.f32.mrb[6].mxu1 }
 0x174   : > { %v933_v53 = vadd.f32 %v908_v41, %v875_v45  ;;  %v883_v55 = vmul.f32 %v850_v38, %v781_v52  ;;  %v783_v57 = vpop.f32.mrb[7].mxu0  ;;  %v935_v6 = vadd.f32 %v916_v43, %v877_v49  ;;  %v885_v59 = vmul.f32 %v858_v39, %v824_v56  ;;  %v826_v61 = vpop.f32.mrb[7].mxu1 }
 0x175   : > { %v934_v58 = vadd.f32 %v912_v44, %v876_v50  ;;  %v884_v60 = vmul.f32 %v854_v0, %v783_v57  ;;  %v936_v63 = vadd.f32 %v920_v48, %v878_v54  ;;  %v886_v2 = vmul.f32 %v862_v42, %v826_v61 }
 0x176   : > { %v949_v62 = vmul.f32 0.2, %v933_v53  ;;  %v941_v1 = vadd.f32 %v908_v41, %v883_v55  ;;  %v951_v3 = vmul.f32 0.2, %v935_v6  ;;  %v943_v5 = vadd.f32 %v916_v43, %v885_v59 }
 0x177   : > { %v950_v11 = vmul.f32 0.2, %v934_v58  ;;  %v942_v7 = vadd.f32 %v912_v44, %v884_v60  ;;  %v952_v8 = vmul.f32 0.2, %v936_v63  ;;  %v944_v12 = vadd.f32 %v920_v48, %v886_v2 }
 0x178   : > { %v957_v9 = vmul.f32 0.2, %v941_v1  ;;  %v959_v13 = vmul.f32 0.2, %v943_v5  ;;  %v965_v14 = vmax.f32 %v933_v53, %v949_v62  ;;  %v967_v17 = vmax.f32 %v935_v6, %v951_v3 }
 0x179   : > { %v958_v10 = vmul.f32 0.2, %v942_v7  ;;  %v960_v16 = vmul.f32 0.2, %v944_v12  ;;  %v966_v18 = vmax.f32 %v934_v58, %v950_v11  ;;  %v968_v21 = vmax.f32 %v936_v63, %v952_v8 }
 0x17a   : > { %v973_v15 = vmax.f32 %v941_v1, %v957_v9  ;;  %v975_v19 = vmax.f32 %v943_v5, %v959_v13  ;;  %v1085_v6 = vrot.slane %v1077_v40, %v1714_v28 }
 0x17b   : > { %v974_v20 = vmax.f32 %v942_v7, %v958_v10  ;;  %v976_v23 = vmax.f32 %v944_v12, %v960_v16 }
 0x17c   : > { %v1005_v22 = vmax.f32 %v965_v14, %v973_v15  ;;  %v1019_v24 = vmax.f32 %v967_v17, %v975_v19 }
 0x17d   : > { %v1012_v25 = vmax.f32 %v966_v18, %v974_v20  ;;  %v1026_v27 = vmax.f32 %v968_v21, %v976_v23 }
 0x17e   : > { %v1006_v26 = vrot.slane %v1005_v22, 4  ;;  %v1020_v29 = vrot.slane %v1019_v24, 4 }
 0x17f   : > { %v1013_v30 = vrot.slane %v1012_v25, 4  ;;  %v1027_v32 = vrot.slane %v1026_v27, 4 }
 0x180   : > { %v1007_v31 = vmax.f32 %v1005_v22, %v1006_v26  ;;  %v1021_v33 = vmax.f32 %v1019_v24, %v1020_v29 }
 0x181   : > { %v1014_v34 = vmax.f32 %v1012_v25, %v1013_v30  ;;  %v1028_v38 = vmax.f32 %v1026_v27, %v1027_v32 }
 0x182   : > { %v1008_v35 = vrot.slane %v1007_v31, 2  ;;  %v1022_v39 = vrot.slane %v1021_v33, 2 }
 0x183   : > { %v1015_v0 = vrot.slane %v1014_v34, 2  ;;  %v1029_v42 = vrot.slane %v1028_v38, 2 }
 0x184   : > { %v1009_v41 = vmax.f32 %v1007_v31, %v1008_v35  ;;  %v1023_v4 = vmax.f32 %v1021_v33, %v1022_v39 }
 0x185   : > { %v1016_v43 = vmax.f32 %v1014_v34, %v1015_v0  ;;  %v1030_v45 = vmax.f32 %v1028_v38, %v1029_v42 }
 0x186   : > { %v1010_v44 = vrot.slane %v1009_v41, 1  ;;  %v1024_v46 = vrot.slane %v1023_v4, 1 }
 0x187   : > { %v1017_v47 = vrot.slane %v1016_v43, 1  ;;  %v1031_v49 = vrot.slane %v1030_v45, 1 }
 0x188   : > { %v1011_v48 = vmax.f32 %v1009_v41, %v1010_v44  ;;  %v1025_v50 = vmax.f32 %v1023_v4, %v1024_v46 }
 0x189   : > { %v1018_v51 = vmax.f32 %v1016_v43, %v1017_v47  ;;  %v1032_v52 = vmax.f32 %v1030_v45, %v1031_v49 }
 0x18b   : > { %v1047_v53 = vcombine.low %v1011_v48, %v1018_v51  ;;  %v1048_v54 = vcombine.low %v1025_v50, %v1032_v52 }
 0x18d   : > { %v1069_v55 = vrot.slane %v1047_v53, %v1714_v28  ;;  %v1076_v56 = vrot.slane %v1048_v54, %v1714_v28 }
 0x18f   : > { %v1078_v57 = vcombine.low %v1069_v55, %v1076_v56 }
 0x191   : > { %v1092_v58 = vrot.slane %v1078_v57, %v1714_v28 }
 0x193   : > { %v1093_v59 = vcombine.low %v1085_v6, %v1092_v58 }
 0x195   : > { %1095 = vst [vmem:[%s263_s25] sm:$0xff] %v1093_v59 }
 0x196 PF: > { %s16_s17 = sadd.s32 1, %s1516_s17   ;;  %s1773_s15 = smov %s1512_s16 }
 0x197   : > { %p13_p8 = scmp.ge.s32.totalorder %s16_s17, 4   ;;  %s1774_s16 = smov %s1776_s23 }
 0x199   :  { %15 = sbr.rel (!%p13_p8) target bundleno = 3 (0x3), region = 87 }
 0x1a0   :  { %1180 = vsyncpa [#allocation3], 1 }
 0x1a1   :  { %1182 = vsyncpa [#allocation3 + $0x1], 1 }
 0x1a2   :  { %1183 = vsyncpa [#allocation5], 1 }

// kernel: dgcnn_partseg_forward.19
= control target key start
LH: loop header
LB: loop body
LE: loop exit
PB: predicated region body
PF: predicated region fallthrough
CT: control target
= control target key end

     0   :  { %s942_s1 = inlined_call_operand.vmem [shape: bf16[512,256], index: 1, kind: input, shape index: {}]   ;;  %s943_s0 = inlined_call_operand.vmem [shape: bf16[8,512], index: 0, kind: input, shape index: {}]   ;;  %s944_s2 = inlined_call_operand.vmem [shape: f32[1,256], index: 2, kind: input, shape index: {}]   ;;  %s945_s3 = inlined_call_operand.vmem [shape: f32[1,256], index: 3, kind: input, shape index: {}]   ;;  %s946_s4 = inlined_call_operand.vmem [shape: f32[8,256], index: 4, kind: output, shape index: {}]  }
   0x1   :  { %v607_v0 = vld [vmem:[%s942_s1 + $0x4] ss:$8 sps:$4 sm:$0xff]   ;;  %v611_v2 = vld [vmem:[%s942_s1] ss:$8 sps:$4 sm:$0xff]   ;;  %v613_v4 = vld [vmem:[%s942_s1 + $0x14] ss:$8 sps:$4 sm:$0xff]  }
   0x2   :  { %v609_v1 = vld [vmem:[%s942_s1 + $0x104] ss:$8 sps:$4 sm:$0xff]   ;;  %417 = vmatprep.subr.bf16.mxu1 %v607_v0  ;;  %v612_v3 = vld [vmem:[%s942_s1 + $0x100] ss:$8 sps:$4 sm:$0xff]   ;;  %v615_v5 = vld [vmem:[%s942_s1 + $0x114] ss:$8 sps:$4 sm:$0xff]  }
   0x3   :  { %458 = vmatprep.subr.bf16.mxu0 %v609_v1  ;;  %418 = vmatpush1.bf16.msra.mxu1 %v611_v2  ;;  %v617_v6 = vld [vmem:[%s942_s1 + $0x10] ss:$8 sps:$4 sm:$0xff]   ;;  %v619_v8 = vld [vmem:[%s942_s1 + $0x24] ss:$8 sps:$4 sm:$0xff]   ;;  %v623_v10 = vld [vmem:[%s942_s1 + $0x20] ss:$8 sps:$4 sm:$0xff]  }
   0x4   :  { %459 = vmatpush1.bf16.msra.mxu0 %v612_v3  ;;  %419 = vmatprep.subr.bf16.mxu1 %v613_v4  ;;  %v618_v7 = vld [vmem:[%s942_s1 + $0x110] ss:$8 sps:$4 sm:$0xff]   ;;  %v621_v9 = vld [vmem:[%s942_s1 + $0x124] ss:$8 sps:$4 sm:$0xff]   ;;  %v624_v11 = vld [vmem:[%s942_s1 + $0x120] ss:$8 sps:$4 sm:$0xff]  }
   0x5   :  { %460 = vmatprep.subr.bf16.mxu0 %v615_v5  ;;  %v625_v12 = vld [vmem:[%s942_s1 + $0x34] ss:$8 sps:$4 sm:$0xff]   ;;  %v629_v14 = vld [vmem:[%s942_s1 + $0x30] ss:$8 sps:$4 sm:$0xff]   ;;  %v631_v16 = vld [vmem:[%s942_s1 + $0x44] ss:$8 sps:$4 sm:$0xff]  }
   0x6   :  { %v627_v13 = vld [vmem:[%s942_s1 + $0x134] ss:$8 sps:$4 sm:$0xff]   ;;  %v630_v15 = vld [vmem:[%s942_s1 + $0x130] ss:$8 sps:$4 sm:$0xff]   ;;  %v633_v17 = vld [vmem:[%s942_s1 + $0x144] ss:$8 sps:$4 sm:$0xff]  }
   0x7   :  { %420 = vmatpush1.bf16.msra.mxu1 %v617_v6  ;;  %v635_v18 = vld [vmem:[%s942_s1 + $0x40] ss:$8 sps:$4 sm:$0xff]   ;;  %v637_v20 = vld [vmem:[%s942_s1 + $0x54] ss:$8 sps:$4 sm:$0xff]   ;;  %v641_v22 = vld [vmem:[%s942_s1 + $0x50] ss:$8 sps:$4 sm:$0xff]   ;;  %v501_v6 = vlaneseq }
   0x8   :  { %461 = vmatpush1.bf16.msra.mxu0 %v618_v7  ;;  %421 = vmatprep.subr.bf16.mxu1 %v619_v8  ;;  %v636_v19 = vld [vmem:[%s942_s1 + $0x140] ss:$8 sps:$4 sm:$0xff]   ;;  %v639_v21 = vld [vmem:[%s942_s1 + $0x154] ss:$8 sps:$4 sm:$0xff]   ;;  %v642_v23 = vld [vmem:[%s942_s1 + $0x150] ss:$8 sps:$4 sm:$0xff]  }
   0x9   :  { %462 = vmatprep.subr.bf16.mxu0 %v621_v9  ;;  %v643_v24 = vld [vmem:[%s942_s1 + $0x64] ss:$8 sps:$4 sm:$0xff]   ;;  %v647_v26 = vld [vmem:[%s942_s1 + $0x60] ss:$8 sps:$4 sm:$0xff]   ;;  %v649_v28 = vld [vmem:[%s942_s1 + $0x74] ss:$8 sps:$4 sm:$0xff]  }
   0xa   :  { %v645_v25 = vld [vmem:[%s942_s1 + $0x164] ss:$8 sps:$4 sm:$0xff]   ;;  %v648_v27 = vld [vmem:[%s942_s1 + $0x160] ss:$8 sps:$4 sm:$0xff]   ;;  %v651_v29 = vld [vmem:[%s942_s1 + $0x174] ss:$8 sps:$4 sm:$0xff]  }
   0xb   :  { %422 = vmatpush1.bf16.msra.mxu1 %v623_v10  ;;  %v653_v30 = vld [vmem:[%s942_s1 + $0x70] ss:$8 sps:$4 sm:$0xff]   ;;  %v655_v32 = vld [vmem:[%s942_s1 + $0x84] ss:$8 sps:$4 sm:$0xff]   ;;  %v659_v34 = vld [vmem:[%s942_s1 + $0x80] ss:$8 sps:$4 sm:$0xff]  }
   0xc   :  { %463 = vmatpush1.bf16.msra.mxu0 %v624_v11  ;;  %423 = vmatprep.subr.bf16.mxu1 %v625_v12  ;;  %v654_v31 = vld [vmem:[%s942_s1 + $0x170] ss:$8 sps:$4 sm:$0xff]   ;;  %v657_v33 = vld [vmem:[%s942_s1 + $0x184] ss:$8 sps:$4 sm:$0xff]   ;;  %v660_v35 = vld [vmem:[%s942_s1 + $0x180] ss:$8 sps:$4 sm:$0xff]  }
   0xd   :  { %464 = vmatprep.subr.bf16.mxu0 %v627_v13  ;;  %v661_v36 = vld [vmem:[%s942_s1 + $0x94] ss:$8 sps:$4 sm:$0xff]   ;;  %v665_v38 = vld [vmem:[%s942_s1 + $0x90] ss:$8 sps:$4 sm:$0xff]   ;;  %v667_v40 = vld [vmem:[%s942_s1 + $0xa4] ss:$8 sps:$4 sm:$0xff]  }
   0xe   :  { %v663_v37 = vld [vmem:[%s942_s1 + $0x194] ss:$8 sps:$4 sm:$0xff]   ;;  %v666_v39 = vld [vmem:[%s942_s1 + $0x190] ss:$8 sps:$4 sm:$0xff]   ;;  %v669_v41 = vld [vmem:[%s942_s1 + $0x1a4] ss:$8 sps:$4 sm:$0xff]  }
   0xf   :  { %424 = vmatpush1.bf16.msra.mxu1 %v629_v14  ;;  %v671_v42 = vld [vmem:[%s942_s1 + $0xa0] ss:$8 sps:$4 sm:$0xff]   ;;  %v673_v44 = vld [vmem:[%s942_s1 + $0xb4] ss:$8 sps:$4 sm:$0xff]   ;;  %v677_v49 = vld [vmem:[%s942_s1 + $0xb0] ss:$8 sps:$4 sm:$0xff]  }
  0x10   :  { %465 = vmatpush1.bf16.msra.mxu0 %v630_v15  ;;  %425 = vmatprep.subr.bf16.mxu1 %v631_v16  ;;  %v672_v43 = vld [vmem:[%s942_s1 + $0x1a0] ss:$8 sps:$4 sm:$0xff]   ;;  %v675_v45 = vld [vmem:[%s942_s1 + $0x1b4] ss:$8 sps:$4 sm:$0xff]   ;;  %v678_v50 = vld [vmem:[%s942_s1 + $0x1b0] ss:$8 sps:$4 sm:$0xff]  }
  0x11   :  { %466 = vmatprep.subr.bf16.mxu0 %v633_v17  ;;  %v17_v46 = vld [vmem:[%s943_s0] sm:$0xff]  ;;  %v18_v48 = vld [vmem:[%s943_s0 + $0x8] sm:$0xff]  ;;  %v685_v56 = vld [vmem:[%s942_s1 + $0xd4] ss:$8 sps:$4 sm:$0xff]   ;;  %v502_v7 = vshrl.u32 %v501_v6, 7 }
  0x12   :  { %v538_v47 = vcombine.high %v17_v46, %v17_v46  ;;  %v540_v51 = vcombine.high %v18_v48, %v18_v48  ;;  %v679_v52 = vld [vmem:[%s942_s1 + $0xc4] ss:$8 sps:$4 sm:$0xff]   ;;  %v683_v54 = vld [vmem:[%s942_s1 + $0xc0] ss:$8 sps:$4 sm:$0xff]   ;;  %v687_v57 = vld [vmem:[%s942_s1 + $0x1d4] ss:$8 sps:$4 sm:$0xff]   ;;  %v537_v4 = vcombine.low %v17_v46, %v17_v46  ;;  %v539_v5 = vcombine.low %v18_v48, %v18_v48 }
  0x13   :  { %426 = vmatpush1.bf16.msra.mxu1 %v635_v18  ;;  %v681_v53 = vld [vmem:[%s942_s1 + $0x1c4] ss:$8 sps:$4 sm:$0xff]   ;;  %v684_v55 = vld [vmem:[%s942_s1 + $0x1c0] ss:$8 sps:$4 sm:$0xff]   ;;  %v689_v58 = vld [vmem:[%s942_s1 + $0xd0] ss:$8 sps:$4 sm:$0xff]  }
  0x14   :  { %467 = vmatpush1.bf16.msra.mxu0 %v636_v19  ;;  %427 = vmatprep.subr.bf16.mxu1 %v637_v20  ;;  %v690_v59 = vld [vmem:[%s942_s1 + $0x1d0] ss:$8 sps:$4 sm:$0xff]   ;;  %v691_v60 = vld [vmem:[%s942_s1 + $0xe4] ss:$8 sps:$4 sm:$0xff]   ;;  %v695_v62 = vld [vmem:[%s942_s1 + $0xe0] ss:$8 sps:$4 sm:$0xff]  }
  0x15   :  { %468 = vmatprep.subr.bf16.mxu0 %v639_v21  ;;  %449 = vmatprep.mubr.bf16.mxu1 %v538_v47  ;;  %v693_v61 = vld [vmem:[%s942_s1 + $0x1e4] ss:$8 sps:$4 sm:$0xff]   ;;  %v696_v63 = vld [vmem:[%s942_s1 + $0x1e0] ss:$8 sps:$4 sm:$0xff]   ;;  %v697_v0 = vld [vmem:[%s942_s1 + $0xf4] ss:$8 sps:$4 sm:$0xff]  }
  0x16   :  { %490 = vmatprep.mubr.bf16.mxu0 %v540_v51  ;;  %v699_v1 = vld [vmem:[%s942_s1 + $0x1f4] ss:$8 sps:$4 sm:$0xff]   ;;  %v701_v2 = vld [vmem:[%s942_s1 + $0xf0] ss:$8 sps:$4 sm:$0xff]   ;;  %v503_v8 = vsub.s32 0, %v502_v7  ;;  %v507_v10 = vsub.s32 1, %v502_v7 }
  0x17   :  { %428 = vmatpush1.bf16.msra.mxu1 %v641_v22  ;;  %v702_v3 = vld [vmem:[%s942_s1 + $0x1f0] ss:$8 sps:$4 sm:$0xff]   ;;  %v499_v9 = vld [vmem:[%s944_s2] sm:$0x3] }
  0x18   :  { %469 = vmatpush1.bf16.msra.mxu0 %v642_v23  ;;  %429 = vmatprep.subr.bf16.mxu1 %v643_v24  ;;  %v513_v11 = vld [vmem:[%s945_s3] sm:$0x3]  ;;  %v504_v12 = vrot.slane %v499_v9, %v503_v8  ;;  %v508_v15 = vrot.slane %v499_v9, %v507_v10 }
  0x19   :  { %470 = vmatprep.subr.bf16.mxu0 %v645_v25  ;;  %v518_v17 = vrot.slane %v513_v11, %v503_v8  ;;  %v522_v21 = vrot.slane %v513_v11, %v507_v10 }
  0x1b   :  { %430 = vmatpush1.bf16.msra.mxu1 %v647_v26 }
  0x1c   :  { %471 = vmatpush1.bf16.msra.mxu0 %v648_v27  ;;  %431 = vmatprep.subr.bf16.mxu1 %v649_v28 }
  0x1d   :  { %472 = vmatprep.subr.bf16.mxu0 %v651_v29 }
  0x1f   :  { %432 = vmatpush1.bf16.msra.mxu1 %v653_v30 }
  0x20   :  { %473 = vmatpush1.bf16.msra.mxu0 %v654_v31  ;;  %433 = vmatprep.subr.bf16.mxu1 %v655_v32 }
  0x21   :  { %474 = vmatprep.subr.bf16.mxu0 %v657_v33 }
  0x23   :  { %434 = vmatpush1.bf16.msra.mxu1 %v659_v34 }
  0x24   :  { %475 = vmatpush1.bf16.msra.mxu0 %v660_v35  ;;  %435 = vmatprep.subr.bf16.mxu1 %v661_v36 }
  0x25   :  { %476 = vmatprep.subr.bf16.mxu0 %v663_v37 }
  0x27   :  { %436 = vmatpush1.bf16.msra.mxu1 %v665_v38 }
  0x28   :  { %477 = vmatpush1.bf16.msra.mxu0 %v666_v39  ;;  %437 = vmatprep.subr.bf16.mxu1 %v667_v40 }
  0x29   :  { %478 = vmatprep.subr.bf16.mxu0 %v669_v41 }
  0x2b   :  { %438 = vmatpush1.bf16.msra.mxu1 %v671_v42 }
  0x2c   :  { %479 = vmatpush1.bf16.msra.mxu0 %v672_v43  ;;  %439 = vmatprep.subr.bf16.mxu1 %v673_v44 }
  0x2d   :  { %480 = vmatprep.subr.bf16.mxu0 %v675_v45 }
  0x2f   :  { %440 = vmatpush1.bf16.msra.mxu1 %v677_v49 }
  0x30   :  { %481 = vmatpush1.bf16.msra.mxu0 %v678_v50  ;;  %441 = vmatprep.subr.bf16.mxu1 %v679_v52 }
  0x31   :  { %482 = vmatprep.subr.bf16.mxu0 %v681_v53 }
  0x33   :  { %442 = vmatpush1.bf16.msra.mxu1 %v683_v54 }
  0x34   :  { %483 = vmatpush1.bf16.msra.mxu0 %v684_v55  ;;  %443 = vmatprep.subr.bf16.mxu1 %v685_v56 }
  0x35   :  { %484 = vmatprep.subr.bf16.mxu0 %v687_v57 }
  0x37   :  { %444 = vmatpush1.bf16.msra.mxu1 %v689_v58 }
  0x38   :  { %485 = vmatpush1.bf16.msra.mxu0 %v690_v59  ;;  %445 = vmatprep.subr.bf16.mxu1 %v691_v60 }
  0x39   :  { %486 = vmatprep.subr.bf16.mxu0 %v693_v61 }
  0x3b   :  { %446 = vmatpush1.bf16.msra.mxu1 %v695_v62 }
  0x3c   :  { %487 = vmatpush1.bf16.msra.mxu0 %v696_v63  ;;  %447 = vmatprep.subr.bf16.mxu1 %v697_v0 }
  0x3d   :  { %488 = vmatprep.subr.bf16.mxu0 %v699_v1 }
  0x3f   :  { %448 = vmatpush1.bf16.msra.mxu1 %v701_v2 }
  0x40   :  { %489 = vmatpush1.bf16.msra.mxu0 %v702_v3 }
  0x42   :  { %450 = vmatmul.mubr.bf16.vlgmr.msra.gmra.mrb[0].mxu1 %v537_v4 }
  0x43   :  { %491 = vmatmul.mubr.bf16.vlgmr.msra.gmra.mrb[0].mxu0 %v539_v5 }
 0x115   :  { %v451_v13 = vpop.f32.mrb[0].mxu1 }
 0x116   :  { %v492_v14 = vpop.f32.mrb[0].mxu0  ;;  %v453_v18 = vpop.f32.mrb[1].mxu1 }
 0x117   :  { %v493_v16 = vadd.f32 %v492_v14, %v451_v13  ;;  %v494_v19 = vpop.f32.mrb[1].mxu0  ;;  %v455_v22 = vpop.f32.mrb[2].mxu1 }
 0x118   :  { %v495_v20 = vadd.f32 %v494_v19, %v453_v18  ;;  %v496_v23 = vpop.f32.mrb[2].mxu0  ;;  %v456_v25 = vpop.f32.mrb[3].mxu1 }
 0x119   :  { %v511_v24 = vmul.f32 %v504_v12, %v493_v16  ;;  %v497_v26 = vpop.f32.mrb[3].mxu0 }
 0x11a   :  { %v512_v27 = vmul.f32 %v508_v15, %v495_v20 }
 0x11b   :  { %v525_v28 = vadd.f32 %v518_v17, %v511_v24 }
 0x11c   :  { %v526_v29 = vadd.f32 %v522_v21, %v512_v27 }
 0x11d   :  { %v527_v30 = vmul.f32 0.2, %v525_v28 }
 0x11e   :  { %v528_v31 = vmul.f32 0.2, %v526_v29 }
 0x11f   :  { %v529_v32 = vmax.f32 %v525_v28, %v527_v30 }
 0x120   :  { %v530_v33 = vmax.f32 %v526_v29, %v528_v31 }
 0x121   :  { %531 = vst [vmem:[%s946_s4] sm:$0xff] %v529_v32 }
 0x122   :  { %532 = vst [vmem:[%s946_s4 + $0x8] sm:$0xff] %v530_v33 }

// kernel: dgcnn_partseg_forward.18
= control target key start
LH: loop header
LB: loop body
LE: loop exit
PB: predicated region body
PF: predicated region fallthrough
CT: control target
= control target key end

     0   :  { %s3502_s1 = inlined_call_operand.vmem [shape: bf16[1024,512], index: 1, kind: input, shape index: {}]   ;;  %s3503_s0 = inlined_call_operand.vmem [shape: bf16[8,1024], index: 0, kind: input, shape index: {}]   ;;  %s3504_s2 = inlined_call_operand.vmem [shape: f32[1,512], index: 2, kind: input, shape index: {}]   ;;  %s3505_s3 = inlined_call_operand.vmem [shape: f32[1,512], index: 3, kind: input, shape index: {}]   ;;  %s3506_s4 = inlined_call_operand.vmem [shape: f32[8,512], index: 4, kind: output, shape index: {}]  }
   0x1   :  { %v2269_v0 = vld [vmem:[%s3502_s1 + $0x4] ss:$16 sps:$4 sm:$0xff]   ;;  %v2271_v1 = vld [vmem:[%s3502_s1 + $0xc] ss:$16 sps:$4 sm:$0xff]   ;;  %v2273_v2 = vld [vmem:[%s3502_s1] ss:$16 sps:$4 sm:$0xff]  }
   0x2   :  { %1585 = vmatprep.subr.bf16.mxu0 %v2269_v0  ;;  %v2274_v3 = vld [vmem:[%s3502_s1 + $0x8] ss:$16 sps:$4 sm:$0xff]   ;;  %1749 = vmatprep.subr.bf16.mxu1 %v2271_v1  ;;  %v2275_v4 = vld [vmem:[%s3502_s1 + $0x24] ss:$16 sps:$4 sm:$0xff]   ;;  %v2277_v5 = vld [vmem:[%s3502_s1 + $0x2c] ss:$16 sps:$4 sm:$0xff]  }
   0x3   :  { %1586 = vmatpush1.bf16.msra.mxu0 %v2273_v2  ;;  %1750 = vmatpush1.bf16.msra.mxu1 %v2274_v3  ;;  %v2279_v6 = vld [vmem:[%s3502_s1 + $0x20] ss:$16 sps:$4 sm:$0xff]   ;;  %v2280_v7 = vld [vmem:[%s3502_s1 + $0x28] ss:$16 sps:$4 sm:$0xff]   ;;  %v2281_v8 = vld [vmem:[%s3502_s1 + $0x44] ss:$16 sps:$4 sm:$0xff]  }
   0x4   :  { %1587 = vmatprep.subr.bf16.mxu0 %v2275_v4  ;;  %1751 = vmatprep.subr.bf16.mxu1 %v2277_v5  ;;  %v2283_v9 = vld [vmem:[%s3502_s1 + $0x4c] ss:$16 sps:$4 sm:$0xff]   ;;  %v2285_v10 = vld [vmem:[%s3502_s1 + $0x40] ss:$16 sps:$4 sm:$0xff]   ;;  %v2286_v11 = vld [vmem:[%s3502_s1 + $0x48] ss:$16 sps:$4 sm:$0xff]  }
   0x5   :  { %v2287_v12 = vld [vmem:[%s3502_s1 + $0x64] ss:$16 sps:$4 sm:$0xff]   ;;  %v2289_v13 = vld [vmem:[%s3502_s1 + $0x6c] ss:$16 sps:$4 sm:$0xff]   ;;  %v2291_v14 = vld [vmem:[%s3502_s1 + $0x60] ss:$16 sps:$4 sm:$0xff]  }
   0x6   :  { %v2292_v15 = vld [vmem:[%s3502_s1 + $0x68] ss:$16 sps:$4 sm:$0xff]   ;;  %v2293_v16 = vld [vmem:[%s3502_s1 + $0x84] ss:$16 sps:$4 sm:$0xff]   ;;  %v2295_v17 = vld [vmem:[%s3502_s1 + $0x8c] ss:$16 sps:$4 sm:$0xff]  }
   0x7   :  { %1588 = vmatpush1.bf16.msra.mxu0 %v2279_v6  ;;  %1752 = vmatpush1.bf16.msra.mxu1 %v2280_v7  ;;  %v2297_v18 = vld [vmem:[%s3502_s1 + $0x80] ss:$16 sps:$4 sm:$0xff]   ;;  %v2298_v19 = vld [vmem:[%s3502_s1 + $0x88] ss:$16 sps:$4 sm:$0xff]   ;;  %v2299_v20 = vld [vmem:[%s3502_s1 + $0xa4] ss:$16 sps:$4 sm:$0xff]  }
   0x8   :  { %1589 = vmatprep.subr.bf16.mxu0 %v2281_v8  ;;  %1753 = vmatprep.subr.bf16.mxu1 %v2283_v9  ;;  %v2301_v21 = vld [vmem:[%s3502_s1 + $0xac] ss:$16 sps:$4 sm:$0xff]   ;;  %v2303_v22 = vld [vmem:[%s3502_s1 + $0xa0] ss:$16 sps:$4 sm:$0xff]   ;;  %v2304_v23 = vld [vmem:[%s3502_s1 + $0xa8] ss:$16 sps:$4 sm:$0xff]  }
   0x9   :  { %v2305_v24 = vld [vmem:[%s3502_s1 + $0xc4] ss:$16 sps:$4 sm:$0xff]   ;;  %v2307_v25 = vld [vmem:[%s3502_s1 + $0xcc] ss:$16 sps:$4 sm:$0xff]   ;;  %v2309_v26 = vld [vmem:[%s3502_s1 + $0xc0] ss:$16 sps:$4 sm:$0xff]  }
   0xa   :  { %v2310_v27 = vld [vmem:[%s3502_s1 + $0xc8] ss:$16 sps:$4 sm:$0xff]   ;;  %v2311_v28 = vld [vmem:[%s3502_s1 + $0xe4] ss:$16 sps:$4 sm:$0xff]   ;;  %v2313_v29 = vld [vmem:[%s3502_s1 + $0xec] ss:$16 sps:$4 sm:$0xff]  }
   0xb   :  { %1590 = vmatpush1.bf16.msra.mxu0 %v2285_v10  ;;  %1754 = vmatpush1.bf16.msra.mxu1 %v2286_v11  ;;  %v2315_v30 = vld [vmem:[%s3502_s1 + $0xe0] ss:$16 sps:$4 sm:$0xff]   ;;  %v2316_v31 = vld [vmem:[%s3502_s1 + $0xe8] ss:$16 sps:$4 sm:$0xff]   ;;  %v2317_v32 = vld [vmem:[%s3502_s1 + $0x104] ss:$16 sps:$4 sm:$0xff]  }
   0xc   :  { %1591 = vmatprep.subr.bf16.mxu0 %v2287_v12  ;;  %1755 = vmatprep.subr.bf16.mxu1 %v2289_v13  ;;  %v2319_v33 = vld [vmem:[%s3502_s1 + $0x10c] ss:$16 sps:$4 sm:$0xff]   ;;  %v2321_v34 = vld [vmem:[%s3502_s1 + $0x100] ss:$16 sps:$4 sm:$0xff]   ;;  %v2322_v35 = vld [vmem:[%s3502_s1 + $0x108] ss:$16 sps:$4 sm:$0xff]  }
   0xd   :  { %v2323_v36 = vld [vmem:[%s3502_s1 + $0x124] ss:$16 sps:$4 sm:$0xff]   ;;  %v2325_v37 = vld [vmem:[%s3502_s1 + $0x12c] ss:$16 sps:$4 sm:$0xff]   ;;  %v2327_v38 = vld [vmem:[%s3502_s1 + $0x120] ss:$16 sps:$4 sm:$0xff]  }
   0xe   :  { %v2328_v39 = vld [vmem:[%s3502_s1 + $0x128] ss:$16 sps:$4 sm:$0xff]   ;;  %v2329_v40 = vld [vmem:[%s3502_s1 + $0x144] ss:$16 sps:$4 sm:$0xff]   ;;  %v2331_v41 = vld [vmem:[%s3502_s1 + $0x14c] ss:$16 sps:$4 sm:$0xff]  }
   0xf   :  { %1592 = vmatpush1.bf16.msra.mxu0 %v2291_v14  ;;  %1756 = vmatpush1.bf16.msra.mxu1 %v2292_v15  ;;  %v2333_v42 = vld [vmem:[%s3502_s1 + $0x140] ss:$16 sps:$4 sm:$0xff]   ;;  %v2334_v43 = vld [vmem:[%s3502_s1 + $0x148] ss:$16 sps:$4 sm:$0xff]   ;;  %v2335_v44 = vld [vmem:[%s3502_s1 + $0x164] ss:$16 sps:$4 sm:$0xff]  }
  0x10   :  { %1593 = vmatprep.subr.bf16.mxu0 %v2293_v16  ;;  %1757 = vmatprep.subr.bf16.mxu1 %v2295_v17  ;;  %v2337_v45 = vld [vmem:[%s3502_s1 + $0x16c] ss:$16 sps:$4 sm:$0xff]   ;;  %v17_v46 = vld [vmem:[%s3503_s0] sm:$0xff]  ;;  %v2340_v49 = vld [vmem:[%s3502_s1 + $0x168] ss:$16 sps:$4 sm:$0xff]  }
  0x11   :  { %v2339_v47 = vld [vmem:[%s3502_s1 + $0x160] ss:$16 sps:$4 sm:$0xff]   ;;  %v1982_v48 = vcombine.high %v17_v46, %v17_v46  ;;  %v2341_v50 = vld [vmem:[%s3502_s1 + $0x184] ss:$16 sps:$4 sm:$0xff]   ;;  %v2343_v51 = vld [vmem:[%s3502_s1 + $0x18c] ss:$16 sps:$4 sm:$0xff]   ;;  %v1981_v4 = vcombine.low %v17_v46, %v17_v46 }
  0x12   :  { %v2345_v52 = vld [vmem:[%s3502_s1 + $0x180] ss:$16 sps:$4 sm:$0xff]   ;;  %v2346_v53 = vld [vmem:[%s3502_s1 + $0x188] ss:$16 sps:$4 sm:$0xff]   ;;  %v2347_v54 = vld [vmem:[%s3502_s1 + $0x1a4] ss:$16 sps:$4 sm:$0xff]  }
  0x13   :  { %1594 = vmatpush1.bf16.msra.mxu0 %v2297_v18  ;;  %1758 = vmatpush1.bf16.msra.mxu1 %v2298_v19  ;;  %v2349_v55 = vld [vmem:[%s3502_s1 + $0x1ac] ss:$16 sps:$4 sm:$0xff]   ;;  %v2351_v56 = vld [vmem:[%s3502_s1 + $0x1a0] ss:$16 sps:$4 sm:$0xff]   ;;  %v2352_v57 = vld [vmem:[%s3502_s1 + $0x1a8] ss:$16 sps:$4 sm:$0xff]  }
  0x14   :  { %1595 = vmatprep.subr.bf16.mxu0 %v2299_v20  ;;  %1759 = vmatprep.subr.bf16.mxu1 %v2301_v21  ;;  %v2353_v58 = vld [vmem:[%s3502_s1 + $0x1c4] ss:$16 sps:$4 sm:$0xff]   ;;  %v2355_v59 = vld [vmem:[%s3502_s1 + $0x1cc] ss:$16 sps:$4 sm:$0xff]   ;;  %v2357_v60 = vld [vmem:[%s3502_s1 + $0x1c0] ss:$16 sps:$4 sm:$0xff]  }
  0x15   :  { %1617 = vmatprep.mubr.bf16.mxu0 %v1982_v48  ;;  %1781 = vmatprep.mubr.bf16.mxu1 %v1982_v48  ;;  %v2358_v61 = vld [vmem:[%s3502_s1 + $0x1c8] ss:$16 sps:$4 sm:$0xff]   ;;  %v2359_v62 = vld [vmem:[%s3502_s1 + $0x1e4] ss:$16 sps:$4 sm:$0xff]   ;;  %v2361_v63 = vld [vmem:[%s3502_s1 + $0x1ec] ss:$16 sps:$4 sm:$0xff]  }
  0x16   :  { %v2363_v0 = vld [vmem:[%s3502_s1 + $0x1e0] ss:$16 sps:$4 sm:$0xff]   ;;  %v2364_v1 = vld [vmem:[%s3502_s1 + $0x1e8] ss:$16 sps:$4 sm:$0xff]   ;;  %v2369_v2 = vld [vmem:[%s3502_s1 + $0x204] ss:$16 sps:$4 sm:$0xff]  }
  0x17   :  { %1596 = vmatpush1.bf16.msra.mxu0 %v2303_v22  ;;  %1760 = vmatpush1.bf16.msra.mxu1 %v2304_v23  ;;  %v2372_v3 = vld [vmem:[%s3502_s1 + $0x20c] ss:$16 sps:$4 sm:$0xff]   ;;  %v2367_v5 = vld [vmem:[%s3502_s1 + $0x200] ss:$16 sps:$4 sm:$0xff]   ;;  %v2370_v6 = vld [vmem:[%s3502_s1 + $0x208] ss:$16 sps:$4 sm:$0xff]  }
  0x18   :  { %1597 = vmatprep.subr.bf16.mxu0 %v2305_v24  ;;  %1761 = vmatprep.subr.bf16.mxu1 %v2307_v25  ;;  %v2375_v7 = vld [vmem:[%s3502_s1 + $0x224] ss:$16 sps:$4 sm:$0xff]   ;;  %v2378_v8 = vld [vmem:[%s3502_s1 + $0x22c] ss:$16 sps:$4 sm:$0xff]   ;;  %v2373_v9 = vld [vmem:[%s3502_s1 + $0x220] ss:$16 sps:$4 sm:$0xff]  }
  0x19   :  { %v2376_v10 = vld [vmem:[%s3502_s1 + $0x228] ss:$16 sps:$4 sm:$0xff]   ;;  %v2381_v11 = vld [vmem:[%s3502_s1 + $0x244] ss:$16 sps:$4 sm:$0xff]   ;;  %v2384_v12 = vld [vmem:[%s3502_s1 + $0x24c] ss:$16 sps:$4 sm:$0xff]  }
  0x1a   :  { %v2379_v13 = vld [vmem:[%s3502_s1 + $0x240] ss:$16 sps:$4 sm:$0xff]   ;;  %v2382_v14 = vld [vmem:[%s3502_s1 + $0x248] ss:$16 sps:$4 sm:$0xff]   ;;  %v2387_v15 = vld [vmem:[%s3502_s1 + $0x264] ss:$16 sps:$4 sm:$0xff]  }
  0x1b   :  { %1598 = vmatpush1.bf16.msra.mxu0 %v2309_v26  ;;  %1762 = vmatpush1.bf16.msra.mxu1 %v2310_v27  ;;  %v2390_v16 = vld [vmem:[%s3502_s1 + $0x26c] ss:$16 sps:$4 sm:$0xff]   ;;  %v2385_v17 = vld [vmem:[%s3502_s1 + $0x260] ss:$16 sps:$4 sm:$0xff]   ;;  %v2388_v18 = vld [vmem:[%s3502_s1 + $0x268] ss:$16 sps:$4 sm:$0xff]  }
  0x1c   :  { %1599 = vmatprep.subr.bf16.mxu0 %v2311_v28  ;;  %1763 = vmatprep.subr.bf16.mxu1 %v2313_v29  ;;  %v2393_v19 = vld [vmem:[%s3502_s1 + $0x284] ss:$16 sps:$4 sm:$0xff]   ;;  %v2396_v20 = vld [vmem:[%s3502_s1 + $0x28c] ss:$16 sps:$4 sm:$0xff]   ;;  %v2391_v21 = vld [vmem:[%s3502_s1 + $0x280] ss:$16 sps:$4 sm:$0xff]  }
  0x1d   :  { %v2394_v22 = vld [vmem:[%s3502_s1 + $0x288] ss:$16 sps:$4 sm:$0xff]   ;;  %v2399_v23 = vld [vmem:[%s3502_s1 + $0x2a4] ss:$16 sps:$4 sm:$0xff]   ;;  %v2402_v24 = vld [vmem:[%s3502_s1 + $0x2ac] ss:$16 sps:$4 sm:$0xff]  }
  0x1e   :  { %v2397_v25 = vld [vmem:[%s3502_s1 + $0x2a0] ss:$16 sps:$4 sm:$0xff]   ;;  %v2400_v26 = vld [vmem:[%s3502_s1 + $0x2a8] ss:$16 sps:$4 sm:$0xff]   ;;  %v2405_v27 = vld [vmem:[%s3502_s1 + $0x2c4] ss:$16 sps:$4 sm:$0xff]  }
  0x1f   :  { %1600 = vmatpush1.bf16.msra.mxu0 %v2315_v30  ;;  %1764 = vmatpush1.bf16.msra.mxu1 %v2316_v31  ;;  %v2408_v28 = vld [vmem:[%s3502_s1 + $0x2cc] ss:$16 sps:$4 sm:$0xff]   ;;  %v2403_v31 = vld [vmem:[%s3502_s1 + $0x2c0] ss:$16 sps:$4 sm:$0xff]   ;;  %v2430_v48 = vld [vmem:[%s3502_s1 + $0x348] ss:$16 sps:$4 sm:$0xff]  }
  0x20   :  { %1601 = vmatprep.subr.bf16.mxu0 %v2317_v32  ;;  %1765 = vmatprep.subr.bf16.mxu1 %v2319_v33  ;;  %v2962_v29 = vld [vmem:[%s3503_s0 + $0x8] sm:$0xff]  ;;  %v2411_v33 = vld [vmem:[%s3502_s1 + $0x2e4] ss:$16 sps:$4 sm:$0xff]  }
  0x21   :  { %v1984_v30 = vcombine.high %v2962_v29, %v2962_v29  ;;  %v2406_v32 = vld [vmem:[%s3502_s1 + $0x2c8] ss:$16 sps:$4 sm:$0xff]   ;;  %v2432_v46 = vld [vmem:[%s3502_s1 + $0x34c] ss:$16 sps:$4 sm:$0xff]  }
  0x23   :  { %1602 = vmatpush1.bf16.msra.mxu0 %v2321_v34  ;;  %1766 = vmatpush1.bf16.msra.mxu1 %v2322_v35  ;;  %v2414_v34 = vld [vmem:[%s3502_s1 + $0x2ec] ss:$16 sps:$4 sm:$0xff]   ;;  %v2409_v35 = vld [vmem:[%s3502_s1 + $0x2e0] ss:$16 sps:$4 sm:$0xff]  }
  0x24   :  { %1603 = vmatprep.subr.bf16.mxu0 %v2323_v36  ;;  %1767 = vmatprep.subr.bf16.mxu1 %v2325_v37  ;;  %v2412_v36 = vld [vmem:[%s3502_s1 + $0x2e8] ss:$16 sps:$4 sm:$0xff]   ;;  %v2417_v37 = vld [vmem:[%s3502_s1 + $0x304] ss:$16 sps:$4 sm:$0xff]  }
  0x27   :  { %1604 = vmatpush1.bf16.msra.mxu0 %v2327_v38  ;;  %1768 = vmatpush1.bf16.msra.mxu1 %v2328_v39  ;;  %v2420_v38 = vld [vmem:[%s3502_s1 + $0x30c] ss:$16 sps:$4 sm:$0xff]   ;;  %v2415_v39 = vld [vmem:[%s3502_s1 + $0x300] ss:$16 sps:$4 sm:$0xff]  }
  0x28   :  { %1605 = vmatprep.subr.bf16.mxu0 %v2329_v40  ;;  %1769 = vmatprep.subr.bf16.mxu1 %v2331_v41  ;;  %v2418_v40 = vld [vmem:[%s3502_s1 + $0x308] ss:$16 sps:$4 sm:$0xff]   ;;  %v2423_v41 = vld [vmem:[%s3502_s1 + $0x324] ss:$16 sps:$4 sm:$0xff]  }
  0x2b   :  { %1606 = vmatpush1.bf16.msra.mxu0 %v2333_v42  ;;  %1770 = vmatpush1.bf16.msra.mxu1 %v2334_v43  ;;  %v2426_v42 = vld [vmem:[%s3502_s1 + $0x32c] ss:$16 sps:$4 sm:$0xff]   ;;  %v2421_v43 = vld [vmem:[%s3502_s1 + $0x320] ss:$16 sps:$4 sm:$0xff]  }
  0x2c   :  { %1607 = vmatprep.subr.bf16.mxu0 %v2335_v44  ;;  %1771 = vmatprep.subr.bf16.mxu1 %v2337_v45  ;;  %v2424_v44 = vld [vmem:[%s3502_s1 + $0x328] ss:$16 sps:$4 sm:$0xff]   ;;  %v2429_v45 = vld [vmem:[%s3502_s1 + $0x344] ss:$16 sps:$4 sm:$0xff]  }
  0x2f   :  { %1608 = vmatpush1.bf16.msra.mxu0 %v2339_v47  ;;  %1772 = vmatpush1.bf16.msra.mxu1 %v2340_v49  ;;  %v2427_v47 = vld [vmem:[%s3502_s1 + $0x340] ss:$16 sps:$4 sm:$0xff]   ;;  %v2435_v49 = vld [vmem:[%s3502_s1 + $0x364] ss:$16 sps:$4 sm:$0xff]  }
  0x30   :  { %1609 = vmatprep.subr.bf16.mxu0 %v2341_v50  ;;  %1773 = vmatprep.subr.bf16.mxu1 %v2343_v51  ;;  %v2438_v50 = vld [vmem:[%s3502_s1 + $0x36c] ss:$16 sps:$4 sm:$0xff]   ;;  %v2433_v51 = vld [vmem:[%s3502_s1 + $0x360] ss:$16 sps:$4 sm:$0xff]  }
  0x33   :  { %1610 = vmatpush1.bf16.msra.mxu0 %v2345_v52  ;;  %1774 = vmatpush1.bf16.msra.mxu1 %v2346_v53  ;;  %v2436_v52 = vld [vmem:[%s3502_s1 + $0x368] ss:$16 sps:$4 sm:$0xff]   ;;  %v2441_v53 = vld [vmem:[%s3502_s1 + $0x384] ss:$16 sps:$4 sm:$0xff]  }
  0x34   :  { %1611 = vmatprep.subr.bf16.mxu0 %v2347_v54  ;;  %1775 = vmatprep.subr.bf16.mxu1 %v2349_v55  ;;  %v2444_v54 = vld [vmem:[%s3502_s1 + $0x38c] ss:$16 sps:$4 sm:$0xff]   ;;  %v2439_v55 = vld [vmem:[%s3502_s1 + $0x380] ss:$16 sps:$4 sm:$0xff]  }
  0x37   :  { %1612 = vmatpush1.bf16.msra.mxu0 %v2351_v56  ;;  %1776 = vmatpush1.bf16.msra.mxu1 %v2352_v57  ;;  %v2442_v56 = vld [vmem:[%s3502_s1 + $0x388] ss:$16 sps:$4 sm:$0xff]   ;;  %v2447_v57 = vld [vmem:[%s3502_s1 + $0x3a4] ss:$16 sps:$4 sm:$0xff]  }
  0x38   :  { %1613 = vmatprep.subr.bf16.mxu0 %v2353_v58  ;;  %1777 = vmatprep.subr.bf16.mxu1 %v2355_v59  ;;  %v2450_v58 = vld [vmem:[%s3502_s1 + $0x3ac] ss:$16 sps:$4 sm:$0xff]   ;;  %v2445_v59 = vld [vmem:[%s3502_s1 + $0x3a0] ss:$16 sps:$4 sm:$0xff]  }
  0x3b   :  { %1614 = vmatpush1.bf16.msra.mxu0 %v2357_v60  ;;  %1778 = vmatpush1.bf16.msra.mxu1 %v2358_v61  ;;  %v2448_v60 = vld [vmem:[%s3502_s1 + $0x3a8] ss:$16 sps:$4 sm:$0xff]   ;;  %v2453_v61 = vld [vmem:[%s3502_s1 + $0x3c4] ss:$16 sps:$4 sm:$0xff]  }
  0x3c   :  { %1615 = vmatprep.subr.bf16.mxu0 %v2359_v62  ;;  %1779 = vmatprep.subr.bf16.mxu1 %v2361_v63  ;;  %v2456_v62 = vld [vmem:[%s3502_s1 + $0x3cc] ss:$16 sps:$4 sm:$0xff]   ;;  %v2451_v63 = vld [vmem:[%s3502_s1 + $0x3c0] ss:$16 sps:$4 sm:$0xff]  }
  0x3f   :  { %1616 = vmatpush1.bf16.msra.mxu0 %v2363_v0  ;;  %1780 = vmatpush1.bf16.msra.mxu1 %v2364_v1  ;;  %v2454_v0 = vld [vmem:[%s3502_s1 + $0x3c8] ss:$16 sps:$4 sm:$0xff]   ;;  %v2459_v1 = vld [vmem:[%s3502_s1 + $0x3e4] ss:$16 sps:$4 sm:$0xff]  }
  0x40   :  { %1626 = vmatprep.subr.bf16.mxu0 %v2369_v2  ;;  %1790 = vmatprep.subr.bf16.mxu1 %v2372_v3  ;;  %v2462_v2 = vld [vmem:[%s3502_s1 + $0x3ec] ss:$16 sps:$4 sm:$0xff]   ;;  %v2457_v3 = vld [vmem:[%s3502_s1 + $0x3e0] ss:$16 sps:$4 sm:$0xff]  }
  0x42   :  { %1618 = vmatmul.mubr.bf16.vlgmr.msra.gmra.mrb[0].mxu0 %v1981_v4  ;;  %1782 = vmatmul.mubr.bf16.vlgmr.msra.gmra.mrb[0].mxu1 %v1981_v4  ;;  %v2460_v4 = vld [vmem:[%s3502_s1 + $0x3e8] ss:$16 sps:$4 sm:$0xff]  }
  0x43   :  { %1627 = vmatpush1.bf16.msra.mxu0 %v2367_v5  ;;  %1791 = vmatpush1.bf16.msra.mxu1 %v2370_v6  ;;  %v2467_v5 = vld [vmem:[%s3502_s1 + $0x404] ss:$16 sps:$4 sm:$0xff]   ;;  %v2470_v6 = vld [vmem:[%s3502_s1 + $0x40c] ss:$16 sps:$4 sm:$0xff]  }
  0x44   :  { %1628 = vmatprep.subr.bf16.mxu0 %v2375_v7  ;;  %1792 = vmatprep.subr.bf16.mxu1 %v2378_v8  ;;  %v1983_v7 = vcombine.low %v2962_v29, %v2962_v29  ;;  %v2465_v8 = vld [vmem:[%s3502_s1 + $0x400] ss:$16 sps:$4 sm:$0xff]   ;;  %v2500_v29 = vld [vmem:[%s3502_s1 + $0x4ac] ss:$16 sps:$4 sm:$0xff]  }
  0x45   :  { %1658 = vmatprep.mubr.bf16.mxu0 %v1984_v30  ;;  %1822 = vmatprep.mubr.bf16.mxu1 %v1984_v30  ;;  %v2495_v30 = vld [vmem:[%s3502_s1 + $0x4a0] ss:$16 sps:$4 sm:$0xff]  }
  0x47   :  { %1629 = vmatpush1.bf16.msra.mxu0 %v2373_v9  ;;  %1793 = vmatpush1.bf16.msra.mxu1 %v2376_v10  ;;  %v2468_v9 = vld [vmem:[%s3502_s1 + $0x408] ss:$16 sps:$4 sm:$0xff]   ;;  %v2473_v10 = vld [vmem:[%s3502_s1 + $0x424] ss:$16 sps:$4 sm:$0xff]  }
  0x48   :  { %1630 = vmatprep.subr.bf16.mxu0 %v2381_v11  ;;  %1794 = vmatprep.subr.bf16.mxu1 %v2384_v12  ;;  %v3100_v11 = vld [vmem:[%s3503_s0 + $0x10] sm:$0xff]  ;;  %v2476_v12 = vld [vmem:[%s3502_s1 + $0x42c] ss:$16 sps:$4 sm:$0xff]  }
  0x4b   :  { %1631 = vmatpush1.bf16.msra.mxu0 %v2379_v13  ;;  %1795 = vmatpush1.bf16.msra.mxu1 %v2382_v14  ;;  %v1986_v13 = vcombine.high %v3100_v11, %v3100_v11  ;;  %v2471_v14 = vld [vmem:[%s3502_s1 + $0x420] ss:$16 sps:$4 sm:$0xff]  }
  0x4c   :  { %1632 = vmatprep.subr.bf16.mxu0 %v2387_v15  ;;  %1796 = vmatprep.subr.bf16.mxu1 %v2390_v16  ;;  %v2474_v15 = vld [vmem:[%s3502_s1 + $0x428] ss:$16 sps:$4 sm:$0xff]   ;;  %v2479_v16 = vld [vmem:[%s3502_s1 + $0x444] ss:$16 sps:$4 sm:$0xff]  }
  0x4f   :  { %1633 = vmatpush1.bf16.msra.mxu0 %v2385_v17  ;;  %1797 = vmatpush1.bf16.msra.mxu1 %v2388_v18  ;;  %v2482_v17 = vld [vmem:[%s3502_s1 + $0x44c] ss:$16 sps:$4 sm:$0xff]   ;;  %v2477_v18 = vld [vmem:[%s3502_s1 + $0x440] ss:$16 sps:$4 sm:$0xff]  }
  0x50   :  { %1634 = vmatprep.subr.bf16.mxu0 %v2393_v19  ;;  %1798 = vmatprep.subr.bf16.mxu1 %v2396_v20  ;;  %v2480_v19 = vld [vmem:[%s3502_s1 + $0x448] ss:$16 sps:$4 sm:$0xff]   ;;  %v2485_v20 = vld [vmem:[%s3502_s1 + $0x464] ss:$16 sps:$4 sm:$0xff]  }
  0x53   :  { %1635 = vmatpush1.bf16.msra.mxu0 %v2391_v21  ;;  %1799 = vmatpush1.bf16.msra.mxu1 %v2394_v22  ;;  %v2488_v21 = vld [vmem:[%s3502_s1 + $0x46c] ss:$16 sps:$4 sm:$0xff]   ;;  %v2483_v22 = vld [vmem:[%s3502_s1 + $0x460] ss:$16 sps:$4 sm:$0xff]  }
  0x54   :  { %1636 = vmatprep.subr.bf16.mxu0 %v2399_v23  ;;  %1800 = vmatprep.subr.bf16.mxu1 %v2402_v24  ;;  %v2486_v23 = vld [vmem:[%s3502_s1 + $0x468] ss:$16 sps:$4 sm:$0xff]   ;;  %v2491_v24 = vld [vmem:[%s3502_s1 + $0x484] ss:$16 sps:$4 sm:$0xff]  }
  0x57   :  { %1637 = vmatpush1.bf16.msra.mxu0 %v2397_v25  ;;  %1801 = vmatpush1.bf16.msra.mxu1 %v2400_v26  ;;  %v2494_v25 = vld [vmem:[%s3502_s1 + $0x48c] ss:$16 sps:$4 sm:$0xff]   ;;  %v2489_v26 = vld [vmem:[%s3502_s1 + $0x480] ss:$16 sps:$4 sm:$0xff]  }
  0x58   :  { %1638 = vmatprep.subr.bf16.mxu0 %v2405_v27  ;;  %1802 = vmatprep.subr.bf16.mxu1 %v2408_v28  ;;  %v2492_v27 = vld [vmem:[%s3502_s1 + $0x488] ss:$16 sps:$4 sm:$0xff]   ;;  %v2497_v28 = vld [vmem:[%s3502_s1 + $0x4a4] ss:$16 sps:$4 sm:$0xff]  }
  0x5b   :  { %1639 = vmatpush1.bf16.msra.mxu0 %v2403_v31  ;;  %1803 = vmatpush1.bf16.msra.mxu1 %v2406_v32  ;;  %v2498_v31 = vld [vmem:[%s3502_s1 + $0x4a8] ss:$16 sps:$4 sm:$0xff]   ;;  %v2503_v32 = vld [vmem:[%s3502_s1 + $0x4c4] ss:$16 sps:$4 sm:$0xff]  }
  0x5c   :  { %1640 = vmatprep.subr.bf16.mxu0 %v2411_v33  ;;  %1804 = vmatprep.subr.bf16.mxu1 %v2414_v34  ;;  %v2506_v33 = vld [vmem:[%s3502_s1 + $0x4cc] ss:$16 sps:$4 sm:$0xff]   ;;  %v2501_v34 = vld [vmem:[%s3502_s1 + $0x4c0] ss:$16 sps:$4 sm:$0xff]  }
  0x5f   :  { %1641 = vmatpush1.bf16.msra.mxu0 %v2409_v35  ;;  %1805 = vmatpush1.bf16.msra.mxu1 %v2412_v36  ;;  %v2504_v35 = vld [vmem:[%s3502_s1 + $0x4c8] ss:$16 sps:$4 sm:$0xff]   ;;  %v2509_v36 = vld [vmem:[%s3502_s1 + $0x4e4] ss:$16 sps:$4 sm:$0xff]  }
  0x60   :  { %1642 = vmatprep.subr.bf16.mxu0 %v2417_v37  ;;  %1806 = vmatprep.subr.bf16.mxu1 %v2420_v38  ;;  %v2512_v37 = vld [vmem:[%s3502_s1 + $0x4ec] ss:$16 sps:$4 sm:$0xff]   ;;  %v2507_v38 = vld [vmem:[%s3502_s1 + $0x4e0] ss:$16 sps:$4 sm:$0xff]  }
  0x63   :  { %1643 = vmatpush1.bf16.msra.mxu0 %v2415_v39  ;;  %1807 = vmatpush1.bf16.msra.mxu1 %v2418_v40  ;;  %v2510_v39 = vld [vmem:[%s3502_s1 + $0x4e8] ss:$16 sps:$4 sm:$0xff]   ;;  %v2515_v40 = vld [vmem:[%s3502_s1 + $0x504] ss:$16 sps:$4 sm:$0xff]  }
  0x64   :  { %1644 = vmatprep.subr.bf16.mxu0 %v2423_v41  ;;  %1808 = vmatprep.subr.bf16.mxu1 %v2426_v42  ;;  %v2518_v41 = vld [vmem:[%s3502_s1 + $0x50c] ss:$16 sps:$4 sm:$0xff]   ;;  %v2513_v42 = vld [vmem:[%s3502_s1 + $0x500] ss:$16 sps:$4 sm:$0xff]  }
  0x67   :  { %1645 = vmatpush1.bf16.msra.mxu0 %v2421_v43  ;;  %1809 = vmatpush1.bf16.msra.mxu1 %v2424_v44  ;;  %v2516_v43 = vld [vmem:[%s3502_s1 + $0x508] ss:$16 sps:$4 sm:$0xff]   ;;  %v2521_v44 = vld [vmem:[%s3502_s1 + $0x524] ss:$16 sps:$4 sm:$0xff]  }
  0x68   :  { %1646 = vmatprep.subr.bf16.mxu0 %v2429_v45  ;;  %1810 = vmatprep.subr.bf16.mxu1 %v2432_v46  ;;  %v2524_v45 = vld [vmem:[%s3502_s1 + $0x52c] ss:$16 sps:$4 sm:$0xff]   ;;  %v2519_v46 = vld [vmem:[%s3502_s1 + $0x520] ss:$16 sps:$4 sm:$0xff]  }
  0x6b   :  { %1647 = vmatpush1.bf16.msra.mxu0 %v2427_v47  ;;  %1811 = vmatpush1.bf16.msra.mxu1 %v2430_v48  ;;  %v2522_v47 = vld [vmem:[%s3502_s1 + $0x528] ss:$16 sps:$4 sm:$0xff]   ;;  %v2527_v48 = vld [vmem:[%s3502_s1 + $0x544] ss:$16 sps:$4 sm:$0xff]  }
  0x6c   :  { %1648 = vmatprep.subr.bf16.mxu0 %v2435_v49  ;;  %1812 = vmatprep.subr.bf16.mxu1 %v2438_v50  ;;  %v2530_v49 = vld [vmem:[%s3502_s1 + $0x54c] ss:$16 sps:$4 sm:$0xff]   ;;  %v2525_v50 = vld [vmem:[%s3502_s1 + $0x540] ss:$16 sps:$4 sm:$0xff]  }
  0x6f   :  { %1649 = vmatpush1.bf16.msra.mxu0 %v2433_v51  ;;  %1813 = vmatpush1.bf16.msra.mxu1 %v2436_v52  ;;  %v2528_v51 = vld [vmem:[%s3502_s1 + $0x548] ss:$16 sps:$4 sm:$0xff]   ;;  %v2533_v52 = vld [vmem:[%s3502_s1 + $0x564] ss:$16 sps:$4 sm:$0xff]  }
  0x70   :  { %1650 = vmatprep.subr.bf16.mxu0 %v2441_v53  ;;  %1814 = vmatprep.subr.bf16.mxu1 %v2444_v54  ;;  %v2536_v53 = vld [vmem:[%s3502_s1 + $0x56c] ss:$16 sps:$4 sm:$0xff]   ;;  %v2531_v54 = vld [vmem:[%s3502_s1 + $0x560] ss:$16 sps:$4 sm:$0xff]  }
  0x73   :  { %1651 = vmatpush1.bf16.msra.mxu0 %v2439_v55  ;;  %1815 = vmatpush1.bf16.msra.mxu1 %v2442_v56  ;;  %v2534_v55 = vld [vmem:[%s3502_s1 + $0x568] ss:$16 sps:$4 sm:$0xff]   ;;  %v2539_v56 = vld [vmem:[%s3502_s1 + $0x584] ss:$16 sps:$4 sm:$0xff]  }
  0x74   :  { %1652 = vmatprep.subr.bf16.mxu0 %v2447_v57  ;;  %1816 = vmatprep.subr.bf16.mxu1 %v2450_v58  ;;  %v2542_v57 = vld [vmem:[%s3502_s1 + $0x58c] ss:$16 sps:$4 sm:$0xff]   ;;  %v2537_v58 = vld [vmem:[%s3502_s1 + $0x580] ss:$16 sps:$4 sm:$0xff]  }
  0x77   :  { %1653 = vmatpush1.bf16.msra.mxu0 %v2445_v59  ;;  %1817 = vmatpush1.bf16.msra.mxu1 %v2448_v60  ;;  %v2540_v59 = vld [vmem:[%s3502_s1 + $0x588] ss:$16 sps:$4 sm:$0xff]   ;;  %v2545_v60 = vld [vmem:[%s3502_s1 + $0x5a4] ss:$16 sps:$4 sm:$0xff]  }
  0x78   :  { %1654 = vmatprep.subr.bf16.mxu0 %v2453_v61  ;;  %1818 = vmatprep.subr.bf16.mxu1 %v2456_v62  ;;  %v2548_v61 = vld [vmem:[%s3502_s1 + $0x5ac] ss:$16 sps:$4 sm:$0xff]   ;;  %v2543_v62 = vld [vmem:[%s3502_s1 + $0x5a0] ss:$16 sps:$4 sm:$0xff]  }
  0x7b   :  { %1655 = vmatpush1.bf16.msra.mxu0 %v2451_v63  ;;  %1819 = vmatpush1.bf16.msra.mxu1 %v2454_v0  ;;  %v2546_v63 = vld [vmem:[%s3502_s1 + $0x5a8] ss:$16 sps:$4 sm:$0xff]   ;;  %v2551_v0 = vld [vmem:[%s3502_s1 + $0x5c4] ss:$16 sps:$4 sm:$0xff]  }
  0x7c   :  { %1656 = vmatprep.subr.bf16.mxu0 %v2459_v1  ;;  %1820 = vmatprep.subr.bf16.mxu1 %v2462_v2  ;;  %v2554_v1 = vld [vmem:[%s3502_s1 + $0x5cc] ss:$16 sps:$4 sm:$0xff]   ;;  %v2549_v2 = vld [vmem:[%s3502_s1 + $0x5c0] ss:$16 sps:$4 sm:$0xff]  }
  0x7f   :  { %1657 = vmatpush1.bf16.msra.mxu0 %v2457_v3  ;;  %1821 = vmatpush1.bf16.msra.mxu1 %v2460_v4  ;;  %v2552_v3 = vld [vmem:[%s3502_s1 + $0x5c8] ss:$16 sps:$4 sm:$0xff]   ;;  %v2557_v4 = vld [vmem:[%s3502_s1 + $0x5e4] ss:$16 sps:$4 sm:$0xff]  }
  0x80   :  { %1667 = vmatprep.subr.bf16.mxu0 %v2467_v5  ;;  %1831 = vmatprep.subr.bf16.mxu1 %v2470_v6  ;;  %v2560_v5 = vld [vmem:[%s3502_s1 + $0x5ec] ss:$16 sps:$4 sm:$0xff]   ;;  %v2555_v6 = vld [vmem:[%s3502_s1 + $0x5e0] ss:$16 sps:$4 sm:$0xff]  }
  0x82   :  { %1659 = vmatmul.mubr.bf16.vlgmr.msra.gmra.mrb[0].mxu0 %v1983_v7  ;;  %1823 = vmatmul.mubr.bf16.vlgmr.msra.gmra.mrb[0].mxu1 %v1983_v7  ;;  %v2558_v7 = vld [vmem:[%s3502_s1 + $0x5e8] ss:$16 sps:$4 sm:$0xff]  }
  0x83   :  { %1668 = vmatpush1.bf16.msra.mxu0 %v2465_v8  ;;  %1832 = vmatpush1.bf16.msra.mxu1 %v2468_v9  ;;  %v2565_v8 = vld [vmem:[%s3502_s1 + $0x604] ss:$16 sps:$4 sm:$0xff]   ;;  %v2568_v9 = vld [vmem:[%s3502_s1 + $0x60c] ss:$16 sps:$4 sm:$0xff]  }
  0x84   :  { %1669 = vmatprep.subr.bf16.mxu0 %v2473_v10  ;;  %1833 = vmatprep.subr.bf16.mxu1 %v2476_v12  ;;  %v1985_v10 = vcombine.low %v3100_v11, %v3100_v11  ;;  %v3292_v12 = vld [vmem:[%s3503_s0 + $0x18] sm:$0xff]  ;;  %v2571_v11 = vld [vmem:[%s3502_s1 + $0x624] ss:$16 sps:$4 sm:$0xff]  }
  0x85   :  { %1699 = vmatprep.mubr.bf16.mxu0 %v1986_v13  ;;  %1863 = vmatprep.mubr.bf16.mxu1 %v1986_v13  ;;  %v2563_v13 = vld [vmem:[%s3502_s1 + $0x600] ss:$16 sps:$4 sm:$0xff]  }
  0x87   :  { %1670 = vmatpush1.bf16.msra.mxu0 %v2471_v14  ;;  %1834 = vmatpush1.bf16.msra.mxu1 %v2474_v15  ;;  %v2566_v14 = vld [vmem:[%s3502_s1 + $0x608] ss:$16 sps:$4 sm:$0xff]   ;;  %v2574_v15 = vld [vmem:[%s3502_s1 + $0x62c] ss:$16 sps:$4 sm:$0xff]  }
  0x88   :  { %1671 = vmatprep.subr.bf16.mxu0 %v2479_v16  ;;  %1835 = vmatprep.subr.bf16.mxu1 %v2482_v17  ;;  %v1988_v16 = vcombine.high %v3292_v12, %v3292_v12  ;;  %v2569_v17 = vld [vmem:[%s3502_s1 + $0x620] ss:$16 sps:$4 sm:$0xff]  }
  0x8b   :  { %1672 = vmatpush1.bf16.msra.mxu0 %v2477_v18  ;;  %1836 = vmatpush1.bf16.msra.mxu1 %v2480_v19  ;;  %v2572_v18 = vld [vmem:[%s3502_s1 + $0x628] ss:$16 sps:$4 sm:$0xff]   ;;  %v2577_v19 = vld [vmem:[%s3502_s1 + $0x644] ss:$16 sps:$4 sm:$0xff]  }
  0x8c   :  { %1673 = vmatprep.subr.bf16.mxu0 %v2485_v20  ;;  %1837 = vmatprep.subr.bf16.mxu1 %v2488_v21  ;;  %v2580_v20 = vld [vmem:[%s3502_s1 + $0x64c] ss:$16 sps:$4 sm:$0xff]   ;;  %v2575_v21 = vld [vmem:[%s3502_s1 + $0x640] ss:$16 sps:$4 sm:$0xff]  }
  0x8f   :  { %1674 = vmatpush1.bf16.msra.mxu0 %v2483_v22  ;;  %1838 = vmatpush1.bf16.msra.mxu1 %v2486_v23  ;;  %v2578_v22 = vld [vmem:[%s3502_s1 + $0x648] ss:$16 sps:$4 sm:$0xff]   ;;  %v2583_v23 = vld [vmem:[%s3502_s1 + $0x664] ss:$16 sps:$4 sm:$0xff]  }
  0x90   :  { %1675 = vmatprep.subr.bf16.mxu0 %v2491_v24  ;;  %1839 = vmatprep.subr.bf16.mxu1 %v2494_v25  ;;  %v2586_v24 = vld [vmem:[%s3502_s1 + $0x66c] ss:$16 sps:$4 sm:$0xff]   ;;  %v2581_v25 = vld [vmem:[%s3502_s1 + $0x660] ss:$16 sps:$4 sm:$0xff]  }
  0x93   :  { %1676 = vmatpush1.bf16.msra.mxu0 %v2489_v26  ;;  %1840 = vmatpush1.bf16.msra.mxu1 %v2492_v27  ;;  %v2584_v26 = vld [vmem:[%s3502_s1 + $0x668] ss:$16 sps:$4 sm:$0xff]   ;;  %v2589_v27 = vld [vmem:[%s3502_s1 + $0x684] ss:$16 sps:$4 sm:$0xff]  }
  0x94   :  { %1677 = vmatprep.subr.bf16.mxu0 %v2497_v28  ;;  %1841 = vmatprep.subr.bf16.mxu1 %v2500_v29  ;;  %v2592_v28 = vld [vmem:[%s3502_s1 + $0x68c] ss:$16 sps:$4 sm:$0xff]   ;;  %v2587_v29 = vld [vmem:[%s3502_s1 + $0x680] ss:$16 sps:$4 sm:$0xff]  }
  0x97   :  { %1678 = vmatpush1.bf16.msra.mxu0 %v2495_v30  ;;  %1842 = vmatpush1.bf16.msra.mxu1 %v2498_v31  ;;  %v2590_v30 = vld [vmem:[%s3502_s1 + $0x688] ss:$16 sps:$4 sm:$0xff]   ;;  %v2595_v31 = vld [vmem:[%s3502_s1 + $0x6a4] ss:$16 sps:$4 sm:$0xff]  }
  0x98   :  { %1679 = vmatprep.subr.bf16.mxu0 %v2503_v32  ;;  %1843 = vmatprep.subr.bf16.mxu1 %v2506_v33  ;;  %v2598_v32 = vld [vmem:[%s3502_s1 + $0x6ac] ss:$16 sps:$4 sm:$0xff]   ;;  %v2593_v33 = vld [vmem:[%s3502_s1 + $0x6a0] ss:$16 sps:$4 sm:$0xff]  }
  0x9b   :  { %1680 = vmatpush1.bf16.msra.mxu0 %v2501_v34  ;;  %1844 = vmatpush1.bf16.msra.mxu1 %v2504_v35  ;;  %v2596_v34 = vld [vmem:[%s3502_s1 + $0x6a8] ss:$16 sps:$4 sm:$0xff]   ;;  %v2601_v35 = vld [vmem:[%s3502_s1 + $0x6c4] ss:$16 sps:$4 sm:$0xff]  }
  0x9c   :  { %1681 = vmatprep.subr.bf16.mxu0 %v2509_v36  ;;  %1845 = vmatprep.subr.bf16.mxu1 %v2512_v37  ;;  %v2604_v36 = vld [vmem:[%s3502_s1 + $0x6cc] ss:$16 sps:$4 sm:$0xff]   ;;  %v2599_v37 = vld [vmem:[%s3502_s1 + $0x6c0] ss:$16 sps:$4 sm:$0xff]  }
  0x9f   :  { %1682 = vmatpush1.bf16.msra.mxu0 %v2507_v38  ;;  %1846 = vmatpush1.bf16.msra.mxu1 %v2510_v39  ;;  %v2602_v38 = vld [vmem:[%s3502_s1 + $0x6c8] ss:$16 sps:$4 sm:$0xff]   ;;  %v2607_v39 = vld [vmem:[%s3502_s1 + $0x6e4] ss:$16 sps:$4 sm:$0xff]  }
  0xa0   :  { %1683 = vmatprep.subr.bf16.mxu0 %v2515_v40  ;;  %1847 = vmatprep.subr.bf16.mxu1 %v2518_v41  ;;  %v2610_v40 = vld [vmem:[%s3502_s1 + $0x6ec] ss:$16 sps:$4 sm:$0xff]   ;;  %v2605_v41 = vld [vmem:[%s3502_s1 + $0x6e0] ss:$16 sps:$4 sm:$0xff]  }
  0xa3   :  { %1684 = vmatpush1.bf16.msra.mxu0 %v2513_v42  ;;  %1848 = vmatpush1.bf16.msra.mxu1 %v2516_v43  ;;  %v2608_v42 = vld [vmem:[%s3502_s1 + $0x6e8] ss:$16 sps:$4 sm:$0xff]   ;;  %v2613_v43 = vld [vmem:[%s3502_s1 + $0x704] ss:$16 sps:$4 sm:$0xff]  }
  0xa4   :  { %1685 = vmatprep.subr.bf16.mxu0 %v2521_v44  ;;  %1849 = vmatprep.subr.bf16.mxu1 %v2524_v45  ;;  %v2616_v44 = vld [vmem:[%s3502_s1 + $0x70c] ss:$16 sps:$4 sm:$0xff]   ;;  %v2611_v45 = vld [vmem:[%s3502_s1 + $0x700] ss:$16 sps:$4 sm:$0xff]  }
  0xa7   :  { %1686 = vmatpush1.bf16.msra.mxu0 %v2519_v46  ;;  %1850 = vmatpush1.bf16.msra.mxu1 %v2522_v47  ;;  %v2614_v46 = vld [vmem:[%s3502_s1 + $0x708] ss:$16 sps:$4 sm:$0xff]   ;;  %v2619_v47 = vld [vmem:[%s3502_s1 + $0x724] ss:$16 sps:$4 sm:$0xff]  }
  0xa8   :  { %1687 = vmatprep.subr.bf16.mxu0 %v2527_v48  ;;  %1851 = vmatprep.subr.bf16.mxu1 %v2530_v49  ;;  %v2622_v48 = vld [vmem:[%s3502_s1 + $0x72c] ss:$16 sps:$4 sm:$0xff]   ;;  %v2617_v49 = vld [vmem:[%s3502_s1 + $0x720] ss:$16 sps:$4 sm:$0xff]  }
  0xab   :  { %1688 = vmatpush1.bf16.msra.mxu0 %v2525_v50  ;;  %1852 = vmatpush1.bf16.msra.mxu1 %v2528_v51  ;;  %v2620_v50 = vld [vmem:[%s3502_s1 + $0x728] ss:$16 sps:$4 sm:$0xff]   ;;  %v2625_v51 = vld [vmem:[%s3502_s1 + $0x744] ss:$16 sps:$4 sm:$0xff]  }
  0xac   :  { %1689 = vmatprep.subr.bf16.mxu0 %v2533_v52  ;;  %1853 = vmatprep.subr.bf16.mxu1 %v2536_v53  ;;  %v2628_v52 = vld [vmem:[%s3502_s1 + $0x74c] ss:$16 sps:$4 sm:$0xff]   ;;  %v2623_v53 = vld [vmem:[%s3502_s1 + $0x740] ss:$16 sps:$4 sm:$0xff]  }
  0xaf   :  { %1690 = vmatpush1.bf16.msra.mxu0 %v2531_v54  ;;  %1854 = vmatpush1.bf16.msra.mxu1 %v2534_v55  ;;  %v2626_v54 = vld [vmem:[%s3502_s1 + $0x748] ss:$16 sps:$4 sm:$0xff]   ;;  %v2631_v55 = vld [vmem:[%s3502_s1 + $0x764] ss:$16 sps:$4 sm:$0xff]  }
  0xb0   :  { %1691 = vmatprep.subr.bf16.mxu0 %v2539_v56  ;;  %1855 = vmatprep.subr.bf16.mxu1 %v2542_v57  ;;  %v2634_v56 = vld [vmem:[%s3502_s1 + $0x76c] ss:$16 sps:$4 sm:$0xff]   ;;  %v2629_v57 = vld [vmem:[%s3502_s1 + $0x760] ss:$16 sps:$4 sm:$0xff]  }
  0xb3   :  { %1692 = vmatpush1.bf16.msra.mxu0 %v2537_v58  ;;  %1856 = vmatpush1.bf16.msra.mxu1 %v2540_v59  ;;  %v2632_v58 = vld [vmem:[%s3502_s1 + $0x768] ss:$16 sps:$4 sm:$0xff]   ;;  %v2637_v59 = vld [vmem:[%s3502_s1 + $0x784] ss:$16 sps:$4 sm:$0xff]  }
  0xb4   :  { %1693 = vmatprep.subr.bf16.mxu0 %v2545_v60  ;;  %1857 = vmatprep.subr.bf16.mxu1 %v2548_v61  ;;  %v2640_v60 = vld [vmem:[%s3502_s1 + $0x78c] ss:$16 sps:$4 sm:$0xff]   ;;  %v2635_v61 = vld [vmem:[%s3502_s1 + $0x780] ss:$16 sps:$4 sm:$0xff]  }
  0xb7   :  { %1694 = vmatpush1.bf16.msra.mxu0 %v2543_v62  ;;  %1858 = vmatpush1.bf16.msra.mxu1 %v2546_v63  ;;  %v2638_v62 = vld [vmem:[%s3502_s1 + $0x788] ss:$16 sps:$4 sm:$0xff]   ;;  %v2643_v63 = vld [vmem:[%s3502_s1 + $0x7a4] ss:$16 sps:$4 sm:$0xff]  }
  0xb8   :  { %1695 = vmatprep.subr.bf16.mxu0 %v2551_v0  ;;  %1859 = vmatprep.subr.bf16.mxu1 %v2554_v1  ;;  %v2646_v0 = vld [vmem:[%s3502_s1 + $0x7ac] ss:$16 sps:$4 sm:$0xff]   ;;  %v2641_v1 = vld [vmem:[%s3502_s1 + $0x7a0] ss:$16 sps:$4 sm:$0xff]  }
  0xbb   :  { %1696 = vmatpush1.bf16.msra.mxu0 %v2549_v2  ;;  %1860 = vmatpush1.bf16.msra.mxu1 %v2552_v3  ;;  %v2644_v2 = vld [vmem:[%s3502_s1 + $0x7a8] ss:$16 sps:$4 sm:$0xff]   ;;  %v2649_v3 = vld [vmem:[%s3502_s1 + $0x7c4] ss:$16 sps:$4 sm:$0xff]  }
  0xbc   :  { %1697 = vmatprep.subr.bf16.mxu0 %v2557_v4  ;;  %1861 = vmatprep.subr.bf16.mxu1 %v2560_v5  ;;  %v2652_v4 = vld [vmem:[%s3502_s1 + $0x7cc] ss:$16 sps:$4 sm:$0xff]   ;;  %v2647_v5 = vld [vmem:[%s3502_s1 + $0x7c0] ss:$16 sps:$4 sm:$0xff]  }
  0xbf   :  { %1698 = vmatpush1.bf16.msra.mxu0 %v2555_v6  ;;  %1862 = vmatpush1.bf16.msra.mxu1 %v2558_v7  ;;  %v2650_v6 = vld [vmem:[%s3502_s1 + $0x7c8] ss:$16 sps:$4 sm:$0xff]   ;;  %v2655_v7 = vld [vmem:[%s3502_s1 + $0x7e4] ss:$16 sps:$4 sm:$0xff]  }
  0xc0   :  { %1708 = vmatprep.subr.bf16.mxu0 %v2565_v8  ;;  %1872 = vmatprep.subr.bf16.mxu1 %v2568_v9  ;;  %v2658_v8 = vld [vmem:[%s3502_s1 + $0x7ec] ss:$16 sps:$4 sm:$0xff]   ;;  %v2653_v9 = vld [vmem:[%s3502_s1 + $0x7e0] ss:$16 sps:$4 sm:$0xff]  }
  0xc2   :  { %1700 = vmatmul.mubr.bf16.vlgmr.msra.gmra.mrb[0].mxu0 %v1985_v10  ;;  %1864 = vmatmul.mubr.bf16.vlgmr.msra.gmra.mrb[0].mxu1 %v1985_v10  ;;  %v2656_v10 = vld [vmem:[%s3502_s1 + $0x7e8] ss:$16 sps:$4 sm:$0xff]  }
  0xc3   :  { %1709 = vmatpush1.bf16.msra.mxu0 %v2563_v13  ;;  %1873 = vmatpush1.bf16.msra.mxu1 %v2566_v14  ;;  %v1987_v13 = vcombine.low %v3292_v12, %v3292_v12  ;;  %v1915_v14 = vlaneseq }
  0xc4   :  { %1710 = vmatprep.subr.bf16.mxu0 %v2571_v11  ;;  %1874 = vmatprep.subr.bf16.mxu1 %v2574_v15 }
  0xc5   :  { %1740 = vmatprep.mubr.bf16.mxu0 %v1988_v16  ;;  %1904 = vmatprep.mubr.bf16.mxu1 %v1988_v16  ;;  %v1916_v11 = vshrl.u32 %v1915_v14, 7 }
  0xc7   :  { %1711 = vmatpush1.bf16.msra.mxu0 %v2569_v17  ;;  %1875 = vmatpush1.bf16.msra.mxu1 %v2572_v18  ;;  %v1917_v15 = vsub.s32 0, %v1916_v11  ;;  %v1925_v16 = vsub.s32 2, %v1916_v11  ;;  %v1913_v17 = vld [vmem:[%s3504_s2] sm:$0xf]  ;;  %v1921_v18 = vsub.s32 1, %v1916_v11 }
  0xc8   :  { %1712 = vmatprep.subr.bf16.mxu0 %v2577_v19  ;;  %1876 = vmatprep.subr.bf16.mxu1 %v2580_v20  ;;  %v1929_v19 = vsub.s32 3, %v1916_v11  ;;  %v1939_v20 = vld [vmem:[%s3505_s3] sm:$0xf] }
  0xc9   :  { %v1926_v12 = vrot.slane %v1913_v17, %v1925_v16 }
  0xcb   :  { %1713 = vmatpush1.bf16.msra.mxu0 %v2575_v21  ;;  %1877 = vmatpush1.bf16.msra.mxu1 %v2578_v22  ;;  %v1918_v21 = vrot.slane %v1913_v17, %v1917_v15  ;;  %v1922_v22 = vrot.slane %v1913_v17, %v1921_v18 }
  0xcc   :  { %1714 = vmatprep.subr.bf16.mxu0 %v2583_v23  ;;  %1878 = vmatprep.subr.bf16.mxu1 %v2586_v24  ;;  %v1930_v23 = vrot.slane %v1913_v17, %v1929_v19  ;;  %v1944_v24 = vrot.slane %v1939_v20, %v1917_v15 }
  0xcf   :  { %1715 = vmatpush1.bf16.msra.mxu0 %v2581_v25  ;;  %1879 = vmatpush1.bf16.msra.mxu1 %v2584_v26  ;;  %v1952_v25 = vrot.slane %v1939_v20, %v1925_v16 }
  0xd0   :  { %1716 = vmatprep.subr.bf16.mxu0 %v2589_v27  ;;  %1880 = vmatprep.subr.bf16.mxu1 %v2592_v28  ;;  %v1948_v28 = vrot.slane %v1939_v20, %v1921_v18 }
  0xd3   :  { %1717 = vmatpush1.bf16.msra.mxu0 %v2587_v29  ;;  %1881 = vmatpush1.bf16.msra.mxu1 %v2590_v30  ;;  %v1956_v29 = vrot.slane %v1939_v20, %v1929_v19 }
  0xd4   :  { %1718 = vmatprep.subr.bf16.mxu0 %v2595_v31  ;;  %1882 = vmatprep.subr.bf16.mxu1 %v2598_v32 }
  0xd7   :  { %1719 = vmatpush1.bf16.msra.mxu0 %v2593_v33  ;;  %1883 = vmatpush1.bf16.msra.mxu1 %v2596_v34 }
  0xd8   :  { %1720 = vmatprep.subr.bf16.mxu0 %v2601_v35  ;;  %1884 = vmatprep.subr.bf16.mxu1 %v2604_v36 }
  0xdb   :  { %1721 = vmatpush1.bf16.msra.mxu0 %v2599_v37  ;;  %1885 = vmatpush1.bf16.msra.mxu1 %v2602_v38 }
  0xdc   :  { %1722 = vmatprep.subr.bf16.mxu0 %v2607_v39  ;;  %1886 = vmatprep.subr.bf16.mxu1 %v2610_v40 }
  0xdf   :  { %1723 = vmatpush1.bf16.msra.mxu0 %v2605_v41  ;;  %1887 = vmatpush1.bf16.msra.mxu1 %v2608_v42 }
  0xe0   :  { %1724 = vmatprep.subr.bf16.mxu0 %v2613_v43  ;;  %1888 = vmatprep.subr.bf16.mxu1 %v2616_v44 }
  0xe3   :  { %1725 = vmatpush1.bf16.msra.mxu0 %v2611_v45  ;;  %1889 = vmatpush1.bf16.msra.mxu1 %v2614_v46 }
  0xe4   :  { %1726 = vmatprep.subr.bf16.mxu0 %v2619_v47  ;;  %1890 = vmatprep.subr.bf16.mxu1 %v2622_v48 }
  0xe7   :  { %1727 = vmatpush1.bf16.msra.mxu0 %v2617_v49  ;;  %1891 = vmatpush1.bf16.msra.mxu1 %v2620_v50 }
  0xe8   :  { %1728 = vmatprep.subr.bf16.mxu0 %v2625_v51  ;;  %1892 = vmatprep.subr.bf16.mxu1 %v2628_v52 }
  0xeb   :  { %1729 = vmatpush1.bf16.msra.mxu0 %v2623_v53  ;;  %1893 = vmatpush1.bf16.msra.mxu1 %v2626_v54 }
  0xec   :  { %1730 = vmatprep.subr.bf16.mxu0 %v2631_v55  ;;  %1894 = vmatprep.subr.bf16.mxu1 %v2634_v56 }
  0xef   :  { %1731 = vmatpush1.bf16.msra.mxu0 %v2629_v57  ;;  %1895 = vmatpush1.bf16.msra.mxu1 %v2632_v58 }
  0xf0   :  { %1732 = vmatprep.subr.bf16.mxu0 %v2637_v59  ;;  %1896 = vmatprep.subr.bf16.mxu1 %v2640_v60 }
  0xf3   :  { %1733 = vmatpush1.bf16.msra.mxu0 %v2635_v61  ;;  %1897 = vmatpush1.bf16.msra.mxu1 %v2638_v62 }
  0xf4   :  { %1734 = vmatprep.subr.bf16.mxu0 %v2643_v63  ;;  %1898 = vmatprep.subr.bf16.mxu1 %v2646_v0 }
  0xf7   :  { %1735 = vmatpush1.bf16.msra.mxu0 %v2641_v1  ;;  %1899 = vmatpush1.bf16.msra.mxu1 %v2644_v2 }
  0xf8   :  { %1736 = vmatprep.subr.bf16.mxu0 %v2649_v3  ;;  %1900 = vmatprep.subr.bf16.mxu1 %v2652_v4 }
  0xfb   :  { %1737 = vmatpush1.bf16.msra.mxu0 %v2647_v5  ;;  %1901 = vmatpush1.bf16.msra.mxu1 %v2650_v6 }
  0xfc   :  { %1738 = vmatprep.subr.bf16.mxu0 %v2655_v7  ;;  %1902 = vmatprep.subr.bf16.mxu1 %v2658_v8 }
  0xff   :  { %1739 = vmatpush1.bf16.msra.mxu0 %v2653_v9  ;;  %1903 = vmatpush1.bf16.msra.mxu1 %v2656_v10 }
 0x102   :  { %1741 = vmatmul.mubr.bf16.vlgmr.msra.gmra.mrb[0].mxu0 %v1987_v13  ;;  %1905 = vmatmul.mubr.bf16.vlgmr.msra.gmra.mrb[0].mxu1 %v1987_v13 }
 0x1d5   :  { %v1742_v26 = vpop.f32.mrb[0].mxu0  ;;  %v1906_v27 = vpop.f32.mrb[0].mxu1 }
 0x1d6   :  { %v1935_v30 = vmul.f32 %v1918_v21, %v1742_v26  ;;  %v1937_v31 = vmul.f32 %v1926_v12, %v1906_v27  ;;  %v1744_v32 = vpop.f32.mrb[1].mxu0  ;;  %v1908_v33 = vpop.f32.mrb[1].mxu1 }
 0x1d7   :  { %v1936_v34 = vmul.f32 %v1922_v22, %v1744_v32  ;;  %v1938_v35 = vmul.f32 %v1930_v23, %v1908_v33  ;;  %v1746_v36 = vpop.f32.mrb[2].mxu0  ;;  %v1910_v37 = vpop.f32.mrb[2].mxu1 }
 0x1d8   :  { %v1961_v38 = vadd.f32 %v1944_v24, %v1935_v30  ;;  %v1963_v39 = vadd.f32 %v1952_v25, %v1937_v31  ;;  %v1747_v40 = vpop.f32.mrb[3].mxu0  ;;  %v1911_v41 = vpop.f32.mrb[3].mxu1 }
 0x1d9   :  { %v1962_v42 = vadd.f32 %v1948_v28, %v1936_v34  ;;  %v1964_v43 = vadd.f32 %v1956_v29, %v1938_v35 }
 0x1da   :  { %v1965_v44 = vmul.f32 0.2, %v1961_v38  ;;  %v1967_v45 = vmul.f32 0.2, %v1963_v39 }
 0x1db   :  { %v1966_v46 = vmul.f32 0.2, %v1962_v42  ;;  %v1968_v47 = vmul.f32 0.2, %v1964_v43 }
 0x1dc   :  { %v1969_v48 = vmax.f32 %v1961_v38, %v1965_v44  ;;  %v1971_v49 = vmax.f32 %v1963_v39, %v1967_v45 }
 0x1dd   :  { %v1970_v50 = vmax.f32 %v1962_v42, %v1966_v46  ;;  %v1972_v51 = vmax.f32 %v1964_v43, %v1968_v47 }
 0x1de   :  { %1973 = vst [vmem:[%s3506_s4] sm:$0xff] %v1969_v48  ;;  %1975 = vst [vmem:[%s3506_s4 + $0x10] sm:$0xff] %v1971_v49 }
 0x1df   :  { %1974 = vst [vmem:[%s3506_s4 + $0x8] sm:$0xff] %v1970_v50  ;;  %1976 = vst [vmem:[%s3506_s4 + $0x18] sm:$0xff] %v1972_v51 }

// kernel: dgcnn_partseg_forward.20
= control target key start
LH: loop header
LB: loop body
LE: loop exit
PB: predicated region body
PF: predicated region fallthrough
CT: control target
= control target key end

     0   :  { %vm210_vm0 = vcmask 72704   ;;  %s361_s1 = inlined_call_operand.vmem [shape: bf16[256,9], index: 1, kind: input, shape index: {}]   ;;  %s362_s0 = inlined_call_operand.vmem [shape: bf16[8,256], index: 0, kind: input, shape index: {}]   ;;  %s363_s2 = inlined_call_operand.vmem [shape: f32[1,9], index: 2, kind: input, shape index: {}]   ;;  %s364_s3 = inlined_call_operand.vmem [shape: f32[1,9], index: 3, kind: input, shape index: {}]   ;;  %s365_s4 = inlined_call_operand.vmem [shape: f32[8,9], index: 4, kind: output, shape index: {}]  }
   0x1   :  { %v258_v0 = vld [vmem:[%s361_s1 + $0x40] sm:$0xff]   ;;  %v260_v2 = vld [vmem:[%s361_s1 + $0x48] sm:$0xff]   ;;  %v262_v4 = vld [vmem:[%s361_s1 + $0x50] sm:$0xff]  }
   0x2   :  { %v259_v1 = vld [vmem:[%s361_s1] sm:$0xff]   ;;  %236 = vmatprep.subr.bf16.mxu0 %v258_v0  ;;  %v261_v3 = vld [vmem:[%s361_s1 + $0x8] sm:$0xff]   ;;  %v263_v5 = vld [vmem:[%s361_s1 + $0x10] sm:$0xff]  }
   0x3   :  { %237 = vmatpush3.bf16.msra.mxu0 %v259_v1  ;;  %v264_v6 = vld [vmem:[%s361_s1 + $0x58] sm:$0xff]   ;;  %v266_v8 = vld [vmem:[%s361_s1 + $0x60] sm:$0xff]   ;;  %v268_v10 = vld [vmem:[%s361_s1 + $0x68] sm:$0xff]  }
   0x4   :  { %238 = vmatprep.subr.bf16.mxu0 %v260_v2  ;;  %v265_v7 = vld [vmem:[%s361_s1 + $0x18] sm:$0xff]   ;;  %v267_v9 = vld [vmem:[%s361_s1 + $0x20] sm:$0xff]   ;;  %v269_v13 = vld [vmem:[%s361_s1 + $0x28] sm:$0xff]  }
   0x5   :  { %v18_v11 = vld [vmem:[%s362_s0] sm:$0xff]  ;;  %v270_v14 = vld [vmem:[%s361_s1 + $0x70] sm:$0xff]   ;;  %v272_v16 = vld [vmem:[%s361_s1 + $0x78] sm:$0xff]  }
   0x6   :  { %v217_v12 = vcombine.high %v18_v11, %v18_v11  ;;  %v271_v15 = vld [vmem:[%s361_s1 + $0x30] sm:$0xff]   ;;  %v273_v17 = vld [vmem:[%s361_s1 + $0x38] sm:$0xff]   ;;  %v216_v18 = vcombine.low %v18_v11, %v18_v11  ;;  %v234_v21 = vld [vmem:[%s363_s2] ss:$0 sm:$0xff] }
   0x7   :  { %239 = vmatpush3.bf16.msra.mxu0 %v261_v3  ;;  %v235_v24 = vld [vmem:[%s364_s3] ss:$0 sm:$0xff] }
   0x8   :  { %240 = vmatprep.subr.bf16.mxu0 %v262_v4  ;;  %186 = vmatprep.mubr.bf16.mxu0 %v217_v12 }
   0xb   :  { %241 = vmatpush3.bf16.msra.mxu0 %v263_v5 }
   0xc   :  { %242 = vmatprep.subr.bf16.mxu0 %v264_v6 }
   0xf   :  { %243 = vmatpush3.bf16.msra.mxu0 %v265_v7 }
  0x10   :  { %244 = vmatprep.subr.bf16.mxu0 %v266_v8 }
  0x13   :  { %245 = vmatpush3.bf16.msra.mxu0 %v267_v9 }
  0x14   :  { %246 = vmatprep.subr.bf16.mxu0 %v268_v10 }
  0x17   :  { %247 = vmatpush3.bf16.msra.mxu0 %v269_v13 }
  0x18   :  { %248 = vmatprep.subr.bf16.mxu0 %v270_v14 }
  0x1b   :  { %249 = vmatpush3.bf16.msra.mxu0 %v271_v15 }
  0x1c   :  { %250 = vmatprep.subr.bf16.mxu0 %v272_v16 }
  0x1f   :  { %251 = vmatpush3.bf16.msra.mxu0 %v273_v17 }
  0x22   :  { %187 = vmatmul.mubr.bf16.vlgmr.msra.gmra.mrb[0].mxu0 %v216_v18 }
  0xf5   :  { %v252_v19 = vpop.f32.mrb[0].mxu0 }
  0xf6   :  { %v253_v20 = vpop.f32.mrb[1].mxu0 }
  0xf7   :  { %v254_v22 = vadd.f32 %v253_v20, %v252_v19  ;;  %v255_v23 = vpop.f32.mrb[2].mxu0 }
  0xf8   :  { %v256_v25 = vpop.f32.mrb[3].mxu0 }
  0xf9   :  { %v201_v26 = vmul.f32 %v254_v22, %v234_v21 }
  0xfb   :  { %v209_v27 = vadd.f32 %v235_v24, %v201_v26 }
  0xfd   :  { %211 = vst.msk [vmem:[%s365_s4] sm:$0xff] %vm210_vm0, %v209_v27 }

// kernel: dgcnn_partseg_forward.22
= control target key start
LH: loop header
LB: loop body
LE: loop exit
PB: predicated region body
PF: predicated region fallthrough
CT: control target
= control target key end

     0   :  { %s1376_s30 = smov 0   ;;  %s1378_s10 = smov 0   ;;  %s1586_s0 = inlined_call_operand.vmem [shape: bf16[2,4,16,3], index: 0, kind: input, shape index: {}]   ;;  %s1587_s1 = inlined_call_operand.vmem [shape: bf16[2,16,3], index: 1, kind: input, shape index: {}]   ;;  %s1588_s2 = inlined_call_operand.vmem [shape: bf16[3,64], index: 2, kind: input, shape index: {}]   ;;  %s1589_s3 = inlined_call_operand.vmem [shape: bf16[3,64], index: 3, kind: input, shape index: {}]   ;;  %s1590_s4 = inlined_call_operand.vmem [shape: f32[1,64], index: 4, kind: input, shape index: {}]   ;;  %s1591_s5 = inlined_call_operand.vmem [shape: f32[1,64], index: 5, kind: input, shape index: {}]   ;;  %s1592_s6 = inlined_call_operand.vmem [shape: bf16[64,64], index: 6, kind: input, shape index: {}]   ;;  %s1593_s7 = inlined_call_operand.vmem [shape: f32[1,64], index: 7, kind: input, shape index: {}]   ;;  %s1594_s8 = inlined_call_operand.vmem [shape: f32[1,64], index: 8, kind: input, shape index: {}]   ;;  %s1595_s9 = inlined_call_operand.vmem [shape: bf16[2,16,64], index: 9, kind: output, shape index: {}]  }
   0x1   :  { %s1380_s11 = smov 0  }
   0x2 LB: > { %s31_s12 = sadd.s32 1, %s1317_s10  ;;  %p1111_p0 = scmp.ge.s32.totalorder %s1321_s11, 1  ;;  %s1321_s11 = sphi %s1380_s11, %s19_s11   ;;  %s1317_s10 = sphi %s1378_s10, %s1597_s10   ;;  %s1313_s30 = sphi %s1376_s30, %s1596_s30  }
   0x3   : > { %p33_p1 = scmp.ge.s32.totalorder %s31_s12, 2  ;;  %p325_p2 = scmp.lt.s32.totalorder %s1321_s11, 3 }
   0x5   : > { %s1599_s12 = smov (%p33_p1, %s31_s12), 0  ;;  %p326_p3 = pnand %p1111_p0, %p325_p2 }
   0x6   : > { %v409_v0 = vld [vmem:[%s1588_s2] sm:$0x3] (!%p326_p3)  ;;  %vm424_vm0 = vcmask (!%p326_p3), 1040384   ;;  %vm425_vm1 = vcmask (!%p326_p3), 1041408   ;;  %v1323_v1 = vmov (!%p326_p3), 0.0   ;;  %v1324_v2 = vmov (!%p326_p3), 65535  }
   0x7   : > { %329 = sbr.rel (%p326_p3) target bundleno = 714 (0x2ca), region = 56  ;;  %1191 = vmatprep.subr.bf16.mxu1 (!%p326_p3), %v1323_v1  ;;  %1185 = vmatprep.subr.bf16.mxu0 (!%p326_p3), %v1323_v1  ;;  %v426_v3 = vsel (!%p326_p3), %vm424_vm0, 4294967295, %v1324_v2  ;;  %v414_v4 = vld [vmem:[%s1589_s3] sm:$0x3] (!%p326_p3)  ;;  %p379_p4 = scmp.lt.s32.totalorder (!%p326_p3), %s1313_s30, 1  ;;  %vm1325_vm2 = vmmov (!%p326_p3), 0  }
   0x8   : > { %v427_v5 = vsel (!%p326_p3), %vm425_vm1, %v426_v3, 0  ;;  %1187 = vmatprep.mubr.msk.bf16.mxu0 (!%p326_p3), %vm1325_vm2, %v1323_v1  ;;  %1193 = vmatprep.mubr.msk.bf16.mxu1 (!%p326_p3), %vm1325_vm2, %v1323_v1  ;;  %vm420_vm3 = vcmask (!%p326_p3), 23552   ;;  %v1441_v11 = vld [vmem:[%s1592_s6] sm:$0xff] (!%p326_p3)   ;;  %v1450_v12 = vld [vmem:[%s1592_s6 + $0x8] sm:$0xff] (!%p326_p3)   ;;  %v1459_v13 = vld [vmem:[%s1592_s6 + $0x10] sm:$0xff] (!%p326_p3)   ;;  %vm581_vm4 = vcmask (!%p326_p3), 523264  }
   0x9   : > { %v1406_v6 = vand.u32 (!%p326_p3), %v427_v5, %v409_v0  ;;  %v429_v7 = vand.u32 (!%p326_p3), %v427_v5, %v414_v4  ;;  %v1468_v14 = vld [vmem:[%s1592_s6 + $0x18] sm:$0xff] (!%p326_p3)   ;;  %v1479_v16 = vld [vmem:[%s1590_s4] ss:$0 sm:$0xff] (!%p326_p3)  ;;  %vm999_vm5 = vcmask (!%p326_p3), 519168  }
   0xa   : > { %v1487_v22 = vld [vmem:[%s1591_s5] ss:$0 sm:$0xff] (!%p326_p3) }
   0xb   : > { %1192 = vmatpush3.bf16.msra.mxu1 (!%p326_p3), %v1406_v6  ;;  %1186 = vmatpush3.bf16.msra.mxu0 (!%p326_p3), %v429_v7  ;;  %v1535_v53 = vld [vmem:[%s1593_s7] ss:$0 sm:$0xff] (!%p326_p3) }
   0xc   : > { %1209 = vmatprep.subr.bf16.mxu1 (!%p326_p3), %v1323_v1  ;;  %1197 = vmatprep.subr.bf16.mxu0 (!%p326_p3), %v1323_v1  ;;  %v1541_v58 = vld [vmem:[%s1594_s8] ss:$0 sm:$0xff] (!%p326_p3) }
   0xe   : > { %s1601_s30 = smov (!%p379_p4, %s1313_s30), 1 }
   0xf   : > { %s1150_s17 = sshll.u32 %s1601_s30, 5  ;;  %s1151_s18 = sshll.u32 %s1601_s30, 3 }
  0x10   : > { %s1417_s21 = scalar_lea.vmem %s1586_s0, %s1150_s17  ;;  %s396_s24 = scalar_lea.vmem %s1587_s1, %s1151_s18 }
  0x11   : > { %v1290_v8 = vld [vmem:[%s396_s24] sm:$0xff]   ;;  %v1292_v10 = vld [vmem:[%s1417_s21 + $0x8] sm:$0xff]   ;;  %v1297_v50 = vld [vmem:[%s1417_s21 + $0x10] sm:$0xff]   ;;  %s406_s27 = scalar_lea.vmem %s1595_s9, %s1151_s18 }
  0x12   : > { %v1291_v9 = vld [vmem:[%s1417_s21] sm:$0xff]   ;;  %1188 = vmatmul.mubr.msk.bf16.vlgmr.msra.gmra.mrb[0].mxu0 %vm420_vm3, %v1290_v8  ;;  %v1298_v52 = vld [vmem:[%s1417_s21 + $0x18] sm:$0xff]  }
  0x13   : > { %1194 = vmatmul.mubr.msk.bf16.vlgmr.msra.gmra.mrb[0].mxu1 %vm420_vm3, %v1291_v9  ;;  %1205 = vmatprep.mubr.msk.bf16.mxu0 %vm1325_vm2, %v1323_v1 }
  0x14   : > { %1210 = vmatpush3.bf16.msra.mxu1 %v1406_v6  ;;  %1211 = vmatprep.mubr.msk.bf16.mxu1 %vm1325_vm2, %v1323_v1 }
  0x15   : > { %1215 = vmatprep.subr.bf16.mxu1 %v1323_v1  ;;  %1198 = vmatpush3.bf16.msra.mxu0 %v1441_v11 }
  0x16   : > { %1199 = vmatprep.subr.bf16.mxu0 %v1323_v1 }
  0x19   : > { %1200 = vmatpush3.bf16.msra.mxu0 %v1450_v12 }
  0x1a   : > { %1201 = vmatprep.subr.bf16.mxu0 %v1323_v1 }
  0x1b   : > { %1212 = vmatmul.mubr.msk.bf16.vlgmr.msra.gmra.mrb[4].mxu1 %vm420_vm3, %v1292_v10 }
  0x1c   : > { %1223 = vmatprep.mubr.msk.bf16.mxu1 %vm1325_vm2, %v1323_v1  ;;  %1216 = vmatpush3.bf16.msra.mxu1 %v1441_v11 }
  0x1d   : > { %1217 = vmatprep.subr.bf16.mxu1 %v1323_v1  ;;  %1202 = vmatpush3.bf16.msra.mxu0 %v1459_v13 }
  0x1e   : > { %1203 = vmatprep.subr.bf16.mxu0 %v1323_v1 }
  0x20   : > { %1218 = vmatpush3.bf16.msra.mxu1 %v1450_v12 }
  0x21   : > { %1219 = vmatprep.subr.bf16.mxu1 %v1323_v1  ;;  %1204 = vmatpush3.bf16.msra.mxu0 %v1468_v14 }
  0x22   : > { %1227 = vmatprep.subr.bf16.mxu0 %v1323_v1 }
  0x24   : > { %1220 = vmatpush3.bf16.msra.mxu1 %v1459_v13 }
  0x25   : > { %1221 = vmatprep.subr.bf16.mxu1 %v1323_v1 }
  0x28   : > { %1222 = vmatpush3.bf16.msra.mxu1 %v1468_v14 }
  0x29   : > { %1245 = vmatprep.subr.bf16.mxu1 %v1323_v1 }
  0xe5   : > { %v1474_v15 = vpop.f32.mrb[0].mxu0 }
  0xe6   : > { %v529_v17 = vpop.f32.mrb[0].mxu1  ;;  %v1189_v18 = vpop.f32.mrb[1].mxu0 }
  0xe7   : > { %v530_v19 = vadd.f32 %v529_v17, %v1474_v15  ;;  %v1195_v20 = vpop.f32.mrb[1].mxu1  ;;  %v1482_v21 = vpop.f32.mrb[2].mxu0 }
  0xe8   : > { %v532_v23 = vpop.f32.mrb[2].mxu1  ;;  %v1190_v24 = vpop.f32.mrb[3].mxu0 }
  0xe9   : > { %v542_v25 = vmul.f32 %v1479_v16, %v530_v19  ;;  %v533_v26 = vadd.f32 %v532_v23, %v1482_v21  ;;  %v1196_v27 = vpop.f32.mrb[3].mxu1 }
  0xeb   : > { %v550_v28 = vadd.f32 %v1487_v22, %v542_v25  ;;  %v543_v29 = vmul.f32 %v1479_v16, %v533_v26 }
  0xed   : > { %v552_v30 = vmul.f32 0.2, %v550_v28  ;;  %v551_v31 = vadd.f32 %v1487_v22, %v543_v29 }
  0xee   : > { %v691_v32 = vpop.f32.mrb[4].mxu1 }
  0xef   : > { %v553_v33 = vmul.f32 0.2, %v551_v31  ;;  %v692_v34 = vadd.f32 %v691_v32, %v1474_v15  ;;  %v1213_v35 = vpop.f32.mrb[5].mxu1  ;;  %v554_v37 = vmax.f32 %v550_v28, %v552_v30 }
  0xf0   : > { %v694_v36 = vpop.f32.mrb[6].mxu1 }
  0xf1   : > { %v555_v38 = vmax.f32 %v551_v31, %v553_v33  ;;  %v698_v39 = vmul.f32 %v1479_v16, %v692_v34  ;;  %v695_v40 = vadd.f32 %v694_v36, %v1482_v21  ;;  %v1214_v41 = vpop.f32.mrb[7].mxu1 }
  0xf3   : > { %v556_v42 = vpack.c.bf16 %v555_v38, %v554_v37  ;;  %v700_v43 = vadd.f32 %v1487_v22, %v698_v39  ;;  %v699_v44 = vmul.f32 %v1479_v16, %v695_v40 }
  0xf5   : > { %v702_v45 = vmul.f32 0.2, %v700_v43  ;;  %v701_v46 = vadd.f32 %v1487_v22, %v699_v44  ;;  %1206 = vmatmul.mubr.msk.bf16.vlgmr.msra.gmra.mrb[4].mxu0 %vm581_vm4, %v556_v42 }
  0xf6   : > { %1228 = vmatpush3.bf16.msra.mxu0 %v1406_v6  ;;  %1229 = vmatprep.mubr.msk.bf16.mxu0 %vm1325_vm2, %v1323_v1 }
  0xf7   : > { %v703_v47 = vmul.f32 0.2, %v701_v46  ;;  %1233 = vmatprep.subr.bf16.mxu0 %v1323_v1  ;;  %v704_v48 = vmax.f32 %v700_v43, %v702_v45 }
  0xf9   : > { %v705_v49 = vmax.f32 %v701_v46, %v703_v47 }
  0xfb   : > { %v706_v51 = vpack.c.bf16 %v705_v49, %v704_v48 }
  0xfd   : > { %1224 = vmatmul.mubr.msk.bf16.vlgmr.msra.gmra.mrb[8].mxu1 %vm581_vm4, %v706_v51  ;;  %1230 = vmatmul.mubr.msk.bf16.vlgmr.msra.gmra.mrb[8].mxu0 %vm420_vm3, %v1297_v50 }
  0xfe   : > { %1246 = vmatpush3.bf16.msra.mxu1 %v1406_v6  ;;  %1247 = vmatprep.mubr.msk.bf16.mxu1 %vm1325_vm2, %v1323_v1 }
  0xff   : > { %1234 = vmatpush3.bf16.msra.mxu0 %v1441_v11  ;;  %1251 = vmatprep.subr.bf16.mxu1 %v1323_v1 }
 0x100   : > { %1235 = vmatprep.subr.bf16.mxu0 %v1323_v1  ;;  %1241 = vmatprep.mubr.msk.bf16.mxu0 %vm1325_vm2, %v1323_v1 }
 0x103   : > { %1236 = vmatpush3.bf16.msra.mxu0 %v1450_v12 }
 0x104   : > { %1237 = vmatprep.subr.bf16.mxu0 %v1323_v1 }
 0x105   : > { %1248 = vmatmul.mubr.msk.bf16.vlgmr.msra.gmra.mrb[12].mxu1 %vm420_vm3, %v1298_v52 }
 0x106   : > { %1252 = vmatpush3.bf16.msra.mxu1 %v1441_v11  ;;  %1259 = vmatprep.mubr.msk.bf16.mxu1 %vm1325_vm2, %v1323_v1 }
 0x107   : > { %1238 = vmatpush3.bf16.msra.mxu0 %v1459_v13  ;;  %1253 = vmatprep.subr.bf16.mxu1 %v1323_v1 }
 0x108   : > { %1239 = vmatprep.subr.bf16.mxu0 %v1323_v1 }
 0x10a   : > { %1254 = vmatpush3.bf16.msra.mxu1 %v1450_v12 }
 0x10b   : > { %1240 = vmatpush3.bf16.msra.mxu0 %v1468_v14  ;;  %1255 = vmatprep.subr.bf16.mxu1 %v1323_v1 }
 0x10e   : > { %1256 = vmatpush3.bf16.msra.mxu1 %v1459_v13 }
 0x10f   : > { %1257 = vmatprep.subr.bf16.mxu1 %v1323_v1 }
 0x112   : > { %1258 = vmatpush3.bf16.msra.mxu1 %v1468_v14 }
 0x1c8   : > { %v619_v54 = vpop.f32.mrb[4].mxu0 }
 0x1c9   : > { %v1207_v55 = vpop.f32.mrb[5].mxu0  ;;  %v632_v56 = vmul.f32 %v1535_v53, %v619_v54 }
 0x1ca   : > { %v622_v57 = vpop.f32.mrb[6].mxu0 }
 0x1cb   : > { %v1208_v59 = vpop.f32.mrb[7].mxu0  ;;  %v633_v60 = vmul.f32 %v1535_v53, %v622_v57  ;;  %v640_v61 = vadd.f32 %v1541_v58, %v632_v56 }
 0x1cd   : > { %v641_v62 = vadd.f32 %v1541_v58, %v633_v60  ;;  %v642_v5 = vmul.f32 0.2, %v640_v61 }
 0x1cf   : > { %v643_v14 = vmul.f32 0.2, %v641_v62  ;;  %v644_v23 = vmax.f32 %v640_v61, %v642_v5 }
 0x1d0   : > { %v744_v63 = vpop.f32.mrb[8].mxu1  ;;  %v806_v0 = vpop.f32.mrb[8].mxu0 }
 0x1d1   : > { %v751_v1 = vmul.f32 %v1535_v53, %v744_v63  ;;  %v807_v2 = vadd.f32 %v806_v0, %v1474_v15  ;;  %v1225_v3 = vpop.f32.mrb[9].mxu1  ;;  %v1231_v4 = vpop.f32.mrb[9].mxu0  ;;  %v645_v29 = vmax.f32 %v641_v62, %v643_v14 }
 0x1d2   : > { %v747_v6 = vpop.f32.mrb[10].mxu1  ;;  %v809_v7 = vpop.f32.mrb[10].mxu0 }
 0x1d3   : > { %v753_v8 = vadd.f32 %v1541_v58, %v751_v1  ;;  %v813_v9 = vmul.f32 %v1479_v16, %v807_v2  ;;  %v752_v10 = vmul.f32 %v1535_v53, %v747_v6  ;;  %v810_v11 = vadd.f32 %v809_v7, %v1482_v21  ;;  %v1226_v12 = vpop.f32.mrb[11].mxu1  ;;  %v1232_v13 = vpop.f32.mrb[11].mxu0 }
 0x1d5   : > { %v755_v17 = vmul.f32 0.2, %v753_v8  ;;  %v815_v18 = vadd.f32 %v1487_v22, %v813_v9  ;;  %v754_v19 = vadd.f32 %v1541_v58, %v752_v10  ;;  %v814_v20 = vmul.f32 %v1479_v16, %v810_v11 }
 0x1d7   : > { %v757_v24 = vmax.f32 %v753_v8, %v755_v17  ;;  %v817_v25 = vmul.f32 0.2, %v815_v18  ;;  %v756_v26 = vmul.f32 0.2, %v754_v19  ;;  %v816_v27 = vadd.f32 %v1487_v22, %v814_v20 }
 0x1d8   : > { %v921_v28 = vpop.f32.mrb[12].mxu1 }
 0x1d9   : > { %v759_v30 = vmax.f32 %v644_v23, %v757_v24  ;;  %v758_v31 = vmax.f32 %v754_v19, %v756_v26  ;;  %v818_v32 = vmul.f32 0.2, %v816_v27  ;;  %v1249_v33 = vpop.f32.mrb[13].mxu1  ;;  %v922_v34 = vadd.f32 %v921_v28, %v1474_v15 }
 0x1da   : > { %v924_v35 = vpop.f32.mrb[14].mxu1  ;;  %v819_v36 = vmax.f32 %v815_v18, %v817_v25 }
 0x1db   : > { %v760_v37 = vmax.f32 %v645_v29, %v758_v31  ;;  %v820_v38 = vmax.f32 %v816_v27, %v818_v32  ;;  %v925_v39 = vadd.f32 %v924_v35, %v1482_v21  ;;  %v1250_v40 = vpop.f32.mrb[15].mxu1  ;;  %v928_v41 = vmul.f32 %v1479_v16, %v922_v34 }
 0x1dd   : > { %v821_v42 = vpack.c.bf16 %v820_v38, %v819_v36  ;;  %v929_v43 = vmul.f32 %v1479_v16, %v925_v39  ;;  %v930_v44 = vadd.f32 %v1487_v22, %v928_v41 }
 0x1df   : > { %v931_v45 = vadd.f32 %v1487_v22, %v929_v43  ;;  %1242 = vmatmul.mubr.msk.bf16.vlgmr.msra.gmra.mrb[12].mxu0 %vm581_vm4, %v821_v42  ;;  %v932_v46 = vmul.f32 0.2, %v930_v44 }
 0x1e1   : > { %v933_v15 = vmul.f32 0.2, %v931_v45  ;;  %v934_v47 = vmax.f32 %v930_v44, %v932_v46 }
 0x1e3   : > { %v935_v48 = vmax.f32 %v931_v45, %v933_v15 }
 0x1e5   : > { %v936_v49 = vpack.c.bf16 %v935_v48, %v934_v47 }
 0x1e7   : > { %1260 = vmatmul.mubr.msk.bf16.vlgmr.msra.gmra.mrb[16].mxu1 %vm581_vm4, %v936_v49 }
 0x2b2   : > { %v859_v21 = vpop.f32.mrb[12].mxu0 }
 0x2b3   : > { %v866_v50 = vmul.f32 %v1535_v53, %v859_v21  ;;  %v1243_v51 = vpop.f32.mrb[13].mxu0 }
 0x2b4   : > { %v862_v52 = vpop.f32.mrb[14].mxu0 }
 0x2b5   : > { %v868_v16 = vadd.f32 %v1541_v58, %v866_v50  ;;  %v867_v54 = vmul.f32 %v1535_v53, %v862_v52  ;;  %v1244_v55 = vpop.f32.mrb[15].mxu0 }
 0x2b7   : > { %v870_v22 = vmul.f32 0.2, %v868_v16  ;;  %v869_v56 = vadd.f32 %v1541_v58, %v867_v54 }
 0x2b9   : > { %v872_v57 = vmax.f32 %v868_v16, %v870_v22  ;;  %v871_v59 = vmul.f32 0.2, %v869_v56 }
 0x2ba   : > { %v974_v60 = vpop.f32.mrb[16].mxu1 }
 0x2bb   : > { %v874_v61 = vmax.f32 %v759_v30, %v872_v57  ;;  %v873_v62 = vmax.f32 %v869_v56, %v871_v59  ;;  %v981_v63 = vmul.f32 %v1535_v53, %v974_v60  ;;  %v1261_v0 = vpop.f32.mrb[17].mxu1 }
 0x2bc   : > { %v977_v1 = vpop.f32.mrb[18].mxu1 }
 0x2bd   : > { %v875_v2 = vmax.f32 %v760_v37, %v873_v62  ;;  %v983_v3 = vadd.f32 %v1541_v58, %v981_v63  ;;  %v982_v4 = vmul.f32 %v1535_v53, %v977_v1  ;;  %v1262_v5 = vpop.f32.mrb[19].mxu1 }
 0x2bf   : > { %v985_v6 = vmul.f32 0.2, %v983_v3  ;;  %v984_v7 = vadd.f32 %v1541_v58, %v982_v4 }
 0x2c1   : > { %v987_v8 = vmax.f32 %v983_v3, %v985_v6  ;;  %v986_v9 = vmul.f32 0.2, %v984_v7 }
 0x2c3   : > { %v989_v10 = vmax.f32 %v874_v61, %v987_v8  ;;  %v988_v11 = vmax.f32 %v984_v7, %v986_v9 }
 0x2c5   : > { %v1153_v12 = vpack.c.bf16 %v989_v10, %v989_v10  ;;  %v990_v13 = vmax.f32 %v875_v2, %v988_v11 }
 0x2c7   : > { %1000 = vst.msk [vmem:[%s406_s27] sm:$0xf] %vm999_vm5, %v1153_v12  ;;  %v1154_v14 = vpack.c.bf16 %v990_v13, %v990_v13 }
 0x2c9   : > { %1001 = vst.msk [vmem:[%s406_s27 + $0x4] sm:$0xf] %vm999_vm5, %v1154_v14 }
 0x2ca PF: > { %s19_s11 = sadd.s32 1, %s1321_s11   ;;  %s1596_s30 = smov %s1317_s10 }
 0x2cb   : > { %p16_p5 = scmp.ge.s32.totalorder %s19_s11, 4   ;;  %s1597_s10 = smov %s1599_s12 }
 0x2cd   :  { %18 = sbr.rel (!%p16_p5) target bundleno = 2 (0x2), region = 92 }

// kernel: dgcnn_partseg_forward.23
= control target key start
LH: loop header
LB: loop body
LE: loop exit
PB: predicated region body
PF: predicated region fallthrough
CT: control target
= control target key end

     0   :  { %s586_s12 = smov 0   ;;  %s588_s13 = smov 0   ;;  %s636_s0 = inlined_call_operand.vmem [shape: bf16[2,16,64], index: 0, kind: input, shape index: {}, may-alias: {0,1}]   ;;  %s637_s1 = inlined_call_operand.vmem [shape: bf16[2,16,64], index: 1, kind: input, shape index: {}, may-alias: {0,1}]   ;;  %s638_s2 = inlined_call_operand.vmem [shape: f32[2,1,16], index: 2, kind: input, shape index: {}]   ;;  %s639_s3 = inlined_call_operand.vmem [shape: f32[2,16,16], index: 3, kind: output, shape index: {}]  }
   0x1   :  { %s590_s14 = smov 0  }
   0x2 LB: > { %s25_s15 = sadd.s32 1, %s560_s13  ;;  %p476_p0 = scmp.ge.s32.totalorder %s564_s14, 1  ;;  %s564_s14 = sphi %s590_s14, %s13_s14   ;;  %s560_s13 = sphi %s588_s13, %s641_s13   ;;  %s556_s12 = sphi %s586_s12, %s640_s12  }
   0x3   : > { %p27_p1 = scmp.ge.s32.totalorder %s25_s15, 2  ;;  %p176_p2 = scmp.lt.s32.totalorder %s564_s14, 3 }
   0x5   : > { %s643_s15 = smov (%p27_p1, %s25_s15), 0  ;;  %p177_p3 = pnand %p476_p0, %p176_p2 }
   0x6   : > { %p217_p4 = scmp.lt.s32.totalorder (!%p177_p3), %s556_s12, 1  ;;  %vm252_vm0 = vcmask (!%p177_p3), 523264   ;;  %vm361_vm2 = vcmask (!%p177_p3), 130048  }
   0x7   : > { %180 = sbr.rel (%p177_p3) target bundleno = 246 (0xf6), region = 32  ;;  %vm513_vm1 = vmpackc.low (!%p177_p3), %vm252_vm0, %vm252_vm0 }
   0xe   : > { %s645_s12 = smov (!%p217_p4, %s556_s12), 1 }
   0xf   : > { %s490_s16 = sshll.u32 %s645_s12, 3  ;;  %s233_s25 = scalar_lea.vmem %s638_s2, %s645_s12 }
  0x10   : > { %s230_s19 = scalar_lea.vmem %s637_s1, %s490_s16  ;;  %s224_s22 = scalar_lea.vmem %s636_s0, %s490_s16  ;;  %v487_v14 = vld [vmem:[%s233_s25] ss:$0 sm:$0xff] }
  0x11   : > { %v498_v0 = vld [vmem:[%s230_s19] sm:$0xff]   ;;  %s492_s26 = sshll.u32 %s645_s12, 4 }
  0x12   : > { %v494_v1 = vld [vmem:[%s224_s22] sm:$0xff]   ;;  %514 = vmatprep.subr.msk.bf16.mxu0 %vm513_vm1, %v498_v0  ;;  %s242_s29 = scalar_lea.vmem %s639_s3, %s492_s26 }
  0x13   : > { %v495_v2 = vunpack.c.l.bf16 %v494_v1  ;;  %v496_v3 = vunpack.c.h.bf16 %v494_v1  ;;  %517 = vmatpush3.bf16.xpose.msk.msra.mxu0 %vm513_vm1, %v498_v0 }
  0x15   : > { %509 = vmatprep.mubr.msk.f32.mxu0 %vm252_vm0, %v495_v2  ;;  %v340_v4 = vmul.f32 %v495_v2, %v495_v2  ;;  %v341_v5 = vmul.f32 %v496_v3, %v496_v3 }
  0x17   : > { %v342_v6 = vsel %vm252_vm0, %v340_v4, 0.0  ;;  %v345_v7 = vsel %vm252_vm0, %v341_v5, 0.0 }
  0x18   : > { %343 = vadd.xlane.f32.xlu0 %v342_v6 }
  0x1a   : > { %510 = vmatmul.mubr.msk.f32.vlgmr.msra.gmra.mrb[0].mxu0 %vm252_vm0, %v496_v3 }
  0x1c   : > { %346 = vadd.xlane.f32.xlu0 %v345_v7 }
  0xa5   : > { %v344_v8 = vpop.xlane.xlu0 %343 }
  0xa9   : > { %v347_v10 = vpop.xlane.xlu0 %346 }
  0xed   : > { %v511_v9 = vpop.f32.mrb[0].mxu0 }
  0xee   : > { %v349_v11 = vmul.f32 2.0, %v511_v9  ;;  %v331_v12 = vpop.f32.mrb[1].mxu0 }
  0xef   : > { %v348_v13 = vmul.f32 2.0, %v331_v12 }
  0xf0   : > { %v351_v15 = vsub.f32 %v349_v11, %v347_v10 }
  0xf1   : > { %v350_v16 = vsub.f32 %v348_v13, %v344_v8 }
  0xf2   : > { %v360_v17 = vsub.f32 %v351_v15, %v487_v14 }
  0xf3   : > { %v359_v18 = vsub.f32 %v350_v16, %v487_v14 }
  0xf4   : > { %363 = vst.msk [vmem:[%s242_s29 + $0x8] sm:$0xff] %vm361_vm2, %v360_v17 }
  0xf5   : > { %362 = vst.msk [vmem:[%s242_s29] sm:$0xff] %vm361_vm2, %v359_v18 }
  0xf6 PF: > { %s13_s14 = sadd.s32 1, %s564_s14   ;;  %s640_s12 = smov %s560_s13 }
  0xf7   : > { %p10_p5 = scmp.ge.s32.totalorder %s13_s14, 4   ;;  %s641_s13 = smov %s643_s15 }
  0xf9   :  { %12 = sbr.rel (!%p10_p5) target bundleno = 2 (0x2), region = 68 }

// kernel: dgcnn_partseg_forward.26
= control target key start
LH: loop header
LB: loop body
LE: loop exit
PB: predicated region body
PF: predicated region fallthrough
CT: control target
= control target key end

     0   :  { %s1050_s21 = smov 0   ;;  %s1052_s22 = smov 0   ;;  %s1165_s0 = inlined_call_operand.vmem [shape: bf16[2,4,16,64], index: 0, kind: input, shape index: {}]   ;;  %s1166_s1 = inlined_call_operand.vmem [shape: bf16[2,16,64], index: 1, kind: input, shape index: {}]   ;;  %s1167_s2 = inlined_call_operand.vmem [shape: bf16[64,64], index: 2, kind: input, shape index: {}]   ;;  %s1168_s3 = inlined_call_operand.vmem [shape: bf16[64,64], index: 3, kind: input, shape index: {}]   ;;  %s1169_s4 = inlined_call_operand.vmem [shape: f32[1,64], index: 4, kind: input, shape index: {}]   ;;  %s1170_s5 = inlined_call_operand.vmem [shape: f32[1,64], index: 5, kind: input, shape index: {}]   ;;  %s1171_s6 = inlined_call_operand.vmem [shape: bf16[2,16,64], index: 6, kind: output, shape index: {}]  }
   0x1   :  { %s1054_s23 = smov 0  }
   0x2 LB: > { %s28_s24 = sadd.s32 1, %s1007_s22  ;;  %p823_p0 = scmp.ge.s32.totalorder %s1011_s23, 1  ;;  %s1011_s23 = sphi %s1054_s23, %s16_s23   ;;  %s1007_s22 = sphi %s1052_s22, %s1173_s22   ;;  %s1003_s21 = sphi %s1050_s21, %s1172_s21  }
   0x3   : > { %p30_p1 = scmp.ge.s32.totalorder %s28_s24, 2  ;;  %p250_p2 = scmp.lt.s32.totalorder %s1011_s23, 3 }
   0x5   : > { %s1175_s24 = smov (%p30_p1, %s28_s24), 0  ;;  %p251_p3 = pnand %p823_p0, %p250_p2 }
   0x6   : > { %v976_v0 = vld [vmem:[%s1168_s3] sm:$0xff] (!%p251_p3)   ;;  %v1013_v1 = vmov (!%p251_p3), 0.0   ;;  %v978_v3 = vld [vmem:[%s1168_s3 + $0x8] sm:$0xff] (!%p251_p3)   ;;  %vm1014_vm0 = vmmov (!%p251_p3), 0   ;;  %p298_p4 = scmp.lt.s32.totalorder (!%p251_p3), %s1003_s21, 1  ;;  %v980_v5 = vld [vmem:[%s1168_s3 + $0x10] sm:$0xff] (!%p251_p3)  }
   0x7   : > { %254 = sbr.rel (%p251_p3) target bundleno = 284 (0x11c), region = 44  ;;  %890 = vmatprep.subr.bf16.mxu0 (!%p251_p3), %v1013_v1  ;;  %902 = vmatprep.subr.bf16.mxu1 (!%p251_p3), %v1013_v1  ;;  %v977_v2 = vld [vmem:[%s1167_s2] sm:$0xff] (!%p251_p3)   ;;  %v979_v4 = vld [vmem:[%s1167_s2 + $0x8] sm:$0xff] (!%p251_p3)   ;;  %v981_v6 = vld [vmem:[%s1167_s2 + $0x10] sm:$0xff] (!%p251_p3)   ;;  %vm377_vm1 = vcmask (!%p251_p3), 523264   ;;  %vm711_vm2 = vcmask (!%p251_p3), 519168  }
   0x8   : > { %891 = vmatpush3.bf16.msra.mxu0 (!%p251_p3), %v976_v0  ;;  %898 = vmatprep.mubr.msk.bf16.mxu0 (!%p251_p3), %vm1014_vm0, %v1013_v1  ;;  %v982_v7 = vld [vmem:[%s1168_s3 + $0x18] sm:$0xff] (!%p251_p3)   ;;  %v842_v24 = vld [vmem:[%s1169_s4] ss:$0 sm:$0xff] (!%p251_p3) }
   0x9   : > { %903 = vmatpush3.bf16.msra.mxu1 (!%p251_p3), %v977_v2  ;;  %892 = vmatprep.subr.bf16.mxu0 (!%p251_p3), %v1013_v1  ;;  %v983_v8 = vld [vmem:[%s1167_s2 + $0x18] sm:$0xff] (!%p251_p3)   ;;  %v843_v26 = vld [vmem:[%s1170_s5] ss:$0 sm:$0xff] (!%p251_p3) }
   0xa   : > { %904 = vmatprep.subr.bf16.mxu1 (!%p251_p3), %v1013_v1  ;;  %910 = vmatprep.mubr.msk.bf16.mxu1 (!%p251_p3), %vm1014_vm0, %v1013_v1 }
   0xc   : > { %893 = vmatpush3.bf16.msra.mxu0 (!%p251_p3), %v978_v3 }
   0xd   : > { %905 = vmatpush3.bf16.msra.mxu1 (!%p251_p3), %v979_v4  ;;  %894 = vmatprep.subr.bf16.mxu0 (!%p251_p3), %v1013_v1 }
   0xe   : > { %s1177_s21 = smov (!%p298_p4, %s1003_s21), 1  ;;  %906 = vmatprep.subr.bf16.mxu1 %v1013_v1 }
   0xf   : > { %s860_s11 = sshll.u32 %s1177_s21, 5  ;;  %s861_s17 = sshll.u32 %s1177_s21, 3 }
  0x10   : > { %s1101_s16 = scalar_lea.vmem %s1165_s0, %s860_s11  ;;  %s315_s20 = scalar_lea.vmem %s1166_s1, %s861_s17  ;;  %895 = vmatpush3.bf16.msra.mxu0 %v980_v5 }
  0x11   : > { %907 = vmatpush3.bf16.msra.mxu1 %v981_v6  ;;  %896 = vmatprep.subr.bf16.mxu0 %v1013_v1  ;;  %v984_v9 = vld [vmem:[%s315_s20] sm:$0xff]   ;;  %v986_v11 = vld [vmem:[%s1101_s16 + $0x8] sm:$0xff]   ;;  %v987_v12 = vld [vmem:[%s1101_s16 + $0x10] sm:$0xff]   ;;  %s325_s11 = scalar_lea.vmem %s1171_s6, %s861_s17 }
  0x12   : > { %908 = vmatprep.subr.bf16.mxu1 %v1013_v1  ;;  %v985_v10 = vld [vmem:[%s1101_s16] sm:$0xff]   ;;  %v988_v13 = vld [vmem:[%s1101_s16 + $0x18] sm:$0xff]  }
  0x14   : > { %897 = vmatpush3.bf16.msra.mxu0 %v982_v7 }
  0x15   : > { %909 = vmatpush3.bf16.msra.mxu1 %v983_v8  ;;  %914 = vmatprep.subr.bf16.mxu0 %v1013_v1 }
  0x16   : > { %926 = vmatprep.subr.bf16.mxu1 %v1013_v1 }
  0x17   : > { %899 = vmatmul.mubr.msk.bf16.vlgmr.msra.gmra.mrb[0].mxu0 %vm377_vm1, %v984_v9 }
  0x18   : > { %911 = vmatmul.mubr.msk.bf16.vlgmr.msra.gmra.mrb[0].mxu1 %vm377_vm1, %v985_v10  ;;  %915 = vmatpush3.bf16.msra.mxu0 %v977_v2 }
  0x19   : > { %927 = vmatpush3.bf16.msra.mxu1 %v977_v2  ;;  %916 = vmatprep.subr.bf16.mxu0 %v1013_v1 }
  0x1a   : > { %928 = vmatprep.subr.bf16.mxu1 %v1013_v1  ;;  %922 = vmatprep.mubr.msk.bf16.mxu0 %vm1014_vm0, %v1013_v1 }
  0x1b   : > { %934 = vmatprep.mubr.msk.bf16.mxu1 %vm1014_vm0, %v1013_v1 }
  0x1c   : > { %917 = vmatpush3.bf16.msra.mxu0 %v979_v4 }
  0x1d   : > { %929 = vmatpush3.bf16.msra.mxu1 %v979_v4  ;;  %918 = vmatprep.subr.bf16.mxu0 %v1013_v1 }
  0x1e   : > { %930 = vmatprep.subr.bf16.mxu1 %v1013_v1 }
  0x20   : > { %919 = vmatpush3.bf16.msra.mxu0 %v981_v6 }
  0x21   : > { %931 = vmatpush3.bf16.msra.mxu1 %v981_v6  ;;  %920 = vmatprep.subr.bf16.mxu0 %v1013_v1 }
  0x22   : > { %932 = vmatprep.subr.bf16.mxu1 %v1013_v1 }
  0x24   : > { %921 = vmatpush3.bf16.msra.mxu0 %v983_v8 }
  0x25   : > { %933 = vmatpush3.bf16.msra.mxu1 %v983_v8  ;;  %938 = vmatprep.subr.bf16.mxu0 %v1013_v1 }
  0x27   : > { %923 = vmatmul.mubr.msk.bf16.vlgmr.msra.gmra.mrb[4].mxu0 %vm377_vm1, %v986_v11 }
  0x28   : > { %935 = vmatmul.mubr.msk.bf16.vlgmr.msra.gmra.mrb[4].mxu1 %vm377_vm1, %v987_v12  ;;  %939 = vmatpush3.bf16.msra.mxu0 %v977_v2 }
  0x29   : > { %940 = vmatprep.subr.bf16.mxu0 %v1013_v1  ;;  %946 = vmatprep.mubr.msk.bf16.mxu0 %vm1014_vm0, %v1013_v1 }
  0x2c   : > { %941 = vmatpush3.bf16.msra.mxu0 %v979_v4 }
  0x2d   : > { %942 = vmatprep.subr.bf16.mxu0 %v1013_v1 }
  0x30   : > { %943 = vmatpush3.bf16.msra.mxu0 %v981_v6 }
  0x31   : > { %944 = vmatprep.subr.bf16.mxu0 %v1013_v1 }
  0x34   : > { %945 = vmatpush3.bf16.msra.mxu0 %v983_v8 }
  0x37   : > { %947 = vmatmul.mubr.msk.bf16.vlgmr.msra.gmra.mrb[8].mxu0 %vm377_vm1, %v988_v13 }
  0xea   : > { %v415_v14 = vpop.f32.mrb[0].mxu0 }
  0xeb   : > { %v490_v15 = vpop.f32.mrb[0].mxu1  ;;  %v900_v16 = vpop.f32.mrb[1].mxu0 }
  0xec   : > { %v491_v17 = vadd.f32 %v490_v15, %v415_v14  ;;  %v912_v18 = vpop.f32.mrb[1].mxu1  ;;  %v418_v19 = vpop.f32.mrb[2].mxu0 }
  0xed   : > { %v493_v20 = vpop.f32.mrb[2].mxu1  ;;  %v901_v21 = vpop.f32.mrb[3].mxu0 }
  0xee   : > { %v494_v22 = vadd.f32 %v493_v20, %v418_v19  ;;  %v913_v23 = vpop.f32.mrb[3].mxu1  ;;  %v503_v25 = vmul.f32 %v842_v24, %v491_v17 }
  0xf0   : > { %v504_v27 = vmul.f32 %v842_v24, %v494_v22  ;;  %v511_v29 = vadd.f32 %v843_v26, %v503_v25 }
  0xf2   : > { %v512_v36 = vadd.f32 %v843_v26, %v504_v27  ;;  %v513_v44 = vmul.f32 0.2, %v511_v29 }
  0xf4   : > { %v514_v49 = vmul.f32 0.2, %v512_v36  ;;  %v515_v54 = vmax.f32 %v511_v29, %v513_v44 }
  0xf6   : > { %v516_v58 = vmax.f32 %v512_v36, %v514_v49 }
  0xfa   : > { %v562_v28 = vpop.f32.mrb[4].mxu0 }
  0xfb   : > { %v563_v30 = vadd.f32 %v562_v28, %v415_v14  ;;  %v624_v31 = vpop.f32.mrb[4].mxu1  ;;  %v924_v32 = vpop.f32.mrb[5].mxu0 }
  0xfc   : > { %v625_v33 = vadd.f32 %v624_v31, %v415_v14  ;;  %v936_v34 = vpop.f32.mrb[5].mxu1  ;;  %v565_v35 = vpop.f32.mrb[6].mxu0 }
  0xfd   : > { %v569_v37 = vmul.f32 %v842_v24, %v563_v30  ;;  %v566_v38 = vadd.f32 %v565_v35, %v418_v19  ;;  %v627_v39 = vpop.f32.mrb[6].mxu1  ;;  %v925_v40 = vpop.f32.mrb[7].mxu0 }
  0xfe   : > { %v631_v41 = vmul.f32 %v842_v24, %v625_v33  ;;  %v628_v42 = vadd.f32 %v627_v39, %v418_v19  ;;  %v937_v43 = vpop.f32.mrb[7].mxu1 }
  0xff   : > { %v571_v45 = vadd.f32 %v843_v26, %v569_v37  ;;  %v570_v46 = vmul.f32 %v842_v24, %v566_v38 }
 0x100   : > { %v633_v47 = vadd.f32 %v843_v26, %v631_v41  ;;  %v632_v48 = vmul.f32 %v842_v24, %v628_v42 }
 0x101   : > { %v573_v50 = vmul.f32 0.2, %v571_v45  ;;  %v572_v51 = vadd.f32 %v843_v26, %v570_v46 }
 0x102   : > { %v635_v52 = vmul.f32 0.2, %v633_v47  ;;  %v634_v53 = vadd.f32 %v843_v26, %v632_v48 }
 0x103   : > { %v575_v55 = vmax.f32 %v571_v45, %v573_v50  ;;  %v574_v56 = vmul.f32 0.2, %v572_v51 }
 0x104   : > { %v636_v57 = vmul.f32 0.2, %v634_v53  ;;  %v637_v60 = vmax.f32 %v633_v47, %v635_v52 }
 0x105   : > { %v577_v59 = vmax.f32 %v515_v54, %v575_v55  ;;  %v576_v61 = vmax.f32 %v572_v51, %v574_v56 }
 0x106   : > { %v638_v0 = vmax.f32 %v634_v53, %v636_v57 }
 0x107   : > { %v639_v62 = vmax.f32 %v577_v59, %v637_v60  ;;  %v578_v63 = vmax.f32 %v516_v58, %v576_v61 }
 0x109   : > { %v640_v1 = vmax.f32 %v578_v63, %v638_v0 }
 0x10a   : > { %v686_v2 = vpop.f32.mrb[8].mxu0 }
 0x10b   : > { %v687_v3 = vadd.f32 %v686_v2, %v415_v14  ;;  %v948_v4 = vpop.f32.mrb[9].mxu0 }
 0x10c   : > { %v689_v5 = vpop.f32.mrb[10].mxu0 }
 0x10d   : > { %v693_v6 = vmul.f32 %v842_v24, %v687_v3  ;;  %v690_v7 = vadd.f32 %v689_v5, %v418_v19  ;;  %v949_v8 = vpop.f32.mrb[11].mxu0 }
 0x10f   : > { %v695_v9 = vadd.f32 %v843_v26, %v693_v6  ;;  %v694_v10 = vmul.f32 %v842_v24, %v690_v7 }
 0x111   : > { %v697_v11 = vmul.f32 0.2, %v695_v9  ;;  %v696_v12 = vadd.f32 %v843_v26, %v694_v10 }
 0x113   : > { %v699_v13 = vmax.f32 %v695_v9, %v697_v11  ;;  %v698_v15 = vmul.f32 0.2, %v696_v12 }
 0x115   : > { %v701_v16 = vmax.f32 %v639_v62, %v699_v13  ;;  %v700_v17 = vmax.f32 %v696_v12, %v698_v15 }
 0x117   : > { %v863_v14 = vpack.c.bf16 %v701_v16, %v701_v16  ;;  %v702_v18 = vmax.f32 %v640_v1, %v700_v17 }
 0x119   : > { %712 = vst.msk [vmem:[%s325_s11] sm:$0xf] %vm711_vm2, %v863_v14  ;;  %v864_v20 = vpack.c.bf16 %v702_v18, %v702_v18 }
 0x11b   : > { %713 = vst.msk [vmem:[%s325_s11 + $0x4] sm:$0xf] %vm711_vm2, %v864_v20 }
 0x11c PF: > { %s16_s23 = sadd.s32 1, %s1011_s23   ;;  %s1172_s21 = smov %s1007_s22 }
 0x11d   : > { %p13_p5 = scmp.ge.s32.totalorder %s16_s23, 4   ;;  %s1173_s22 = smov %s1175_s24 }
 0x11f   :  { %15 = sbr.rel (!%p13_p5) target bundleno = 2 (0x2), region = 80 }

// kernel: dgcnn_partseg_forward.24
= control target key start
LH: loop header
LB: loop body
LE: loop exit
PB: predicated region body
PF: predicated region fallthrough
CT: control target
= control target key end

     0   :  { %s1486_s30 = smov 0   ;;  %s1488_s10 = smov 0   ;;  %s1703_s0 = inlined_call_operand.vmem [shape: bf16[2,4,16,64], index: 0, kind: input, shape index: {}]   ;;  %s1704_s1 = inlined_call_operand.vmem [shape: bf16[2,16,64], index: 1, kind: input, shape index: {}]   ;;  %s1705_s2 = inlined_call_operand.vmem [shape: bf16[64,64], index: 2, kind: input, shape index: {}]   ;;  %s1706_s3 = inlined_call_operand.vmem [shape: bf16[64,64], index: 3, kind: input, shape index: {}]   ;;  %s1707_s4 = inlined_call_operand.vmem [shape: f32[1,64], index: 4, kind: input, shape index: {}]   ;;  %s1708_s5 = inlined_call_operand.vmem [shape: f32[1,64], index: 5, kind: input, shape index: {}]   ;;  %s1709_s6 = inlined_call_operand.vmem [shape: bf16[64,64], index: 6, kind: input, shape index: {}]   ;;  %s1710_s7 = inlined_call_operand.vmem [shape: f32[1,64], index: 7, kind: input, shape index: {}]   ;;  %s1711_s8 = inlined_call_operand.vmem [shape: f32[1,64], index: 8, kind: input, shape index: {}]   ;;  %s1712_s9 = inlined_call_operand.vmem [shape: bf16[2,16,64], index: 9, kind: output, shape index: {}]  }
   0x1   :  { %s1490_s11 = smov 0  }
   0x2 LB: > { %s31_s12 = sadd.s32 1, %s1428_s10  ;;  %p1162_p0 = scmp.ge.s32.totalorder %s1432_s11, 1  ;;  %s1432_s11 = sphi %s1490_s11, %s19_s11   ;;  %s1428_s10 = sphi %s1488_s10, %s1714_s10   ;;  %s1424_s30 = sphi %s1486_s30, %s1713_s30  }
   0x3   : > { %p33_p1 = scmp.ge.s32.totalorder %s31_s12, 2  ;;  %p325_p2 = scmp.lt.s32.totalorder %s1432_s11, 3 }
   0x5   : > { %s1716_s12 = smov (%p33_p1, %s31_s12), 0  ;;  %p326_p3 = pnand %p1162_p0, %p325_p2 }
   0x6   : > { %v1393_v0 = vld [vmem:[%s1706_s3] sm:$0xff] (!%p326_p3)   ;;  %v1434_v1 = vmov (!%p326_p3), 0.0   ;;  %v1395_v3 = vld [vmem:[%s1706_s3 + $0x8] sm:$0xff] (!%p326_p3)   ;;  %vm1435_vm0 = vmmov (!%p326_p3), 0   ;;  %p379_p4 = scmp.lt.s32.totalorder (!%p326_p3), %s1424_s30, 1  ;;  %v1397_v5 = vld [vmem:[%s1706_s3 + $0x10] sm:$0xff] (!%p326_p3)  }
   0x7   : > { %329 = sbr.rel (%p326_p3) target bundleno = 525 (0x20d), region = 56  ;;  %1259 = vmatprep.subr.bf16.mxu0 (!%p326_p3), %v1434_v1  ;;  %1271 = vmatprep.subr.bf16.mxu1 (!%p326_p3), %v1434_v1  ;;  %v1394_v2 = vld [vmem:[%s1705_s2] sm:$0xff] (!%p326_p3)   ;;  %v1396_v4 = vld [vmem:[%s1705_s2 + $0x8] sm:$0xff] (!%p326_p3)   ;;  %v1398_v6 = vld [vmem:[%s1705_s2 + $0x10] sm:$0xff] (!%p326_p3)   ;;  %vm458_vm1 = vcmask (!%p326_p3), 523264   ;;  %vm1050_vm2 = vcmask (!%p326_p3), 519168  }
   0x8   : > { %1260 = vmatpush3.bf16.msra.mxu0 (!%p326_p3), %v1393_v0  ;;  %1267 = vmatprep.mubr.msk.bf16.mxu0 (!%p326_p3), %vm1435_vm0, %v1434_v1  ;;  %v1399_v7 = vld [vmem:[%s1706_s3 + $0x18] sm:$0xff] (!%p326_p3)   ;;  %v1587_v14 = vld [vmem:[%s1709_s6] sm:$0xff] (!%p326_p3)   ;;  %v1594_v15 = vld [vmem:[%s1709_s6 + $0x8] sm:$0xff] (!%p326_p3)  }
   0x9   : > { %1272 = vmatpush3.bf16.msra.mxu1 (!%p326_p3), %v1394_v2  ;;  %1261 = vmatprep.subr.bf16.mxu0 (!%p326_p3), %v1434_v1  ;;  %v1400_v8 = vld [vmem:[%s1705_s2 + $0x18] sm:$0xff] (!%p326_p3)   ;;  %v1601_v16 = vld [vmem:[%s1709_s6 + $0x10] sm:$0xff] (!%p326_p3)   ;;  %v1617_v19 = vld [vmem:[%s1707_s4] ss:$0 sm:$0xff] (!%p326_p3) }
   0xa   : > { %1273 = vmatprep.subr.bf16.mxu1 (!%p326_p3), %v1434_v1  ;;  %1279 = vmatprep.mubr.msk.bf16.mxu1 (!%p326_p3), %vm1435_vm0, %v1434_v1  ;;  %v1608_v17 = vld [vmem:[%s1709_s6 + $0x18] sm:$0xff] (!%p326_p3)   ;;  %v1625_v25 = vld [vmem:[%s1708_s5] ss:$0 sm:$0xff] (!%p326_p3) }
   0xc   : > { %1262 = vmatpush3.bf16.msra.mxu0 (!%p326_p3), %v1395_v3 }
   0xd   : > { %1274 = vmatpush3.bf16.msra.mxu1 (!%p326_p3), %v1396_v4  ;;  %1263 = vmatprep.subr.bf16.mxu0 (!%p326_p3), %v1434_v1 }
   0xe   : > { %s1718_s30 = smov (!%p379_p4, %s1424_s30), 1  ;;  %1275 = vmatprep.subr.bf16.mxu1 %v1434_v1 }
   0xf   : > { %s1209_s23 = sshll.u32 %s1718_s30, 5  ;;  %s1210_s29 = sshll.u32 %s1718_s30, 3 }
  0x10   : > { %s1537_s28 = scalar_lea.vmem %s1703_s0, %s1209_s23  ;;  %s396_s15 = scalar_lea.vmem %s1704_s1, %s1210_s29  ;;  %1264 = vmatpush3.bf16.msra.mxu0 %v1397_v5 }
  0x11   : > { %1276 = vmatpush3.bf16.msra.mxu1 %v1398_v6  ;;  %1265 = vmatprep.subr.bf16.mxu0 %v1434_v1  ;;  %v1401_v9 = vld [vmem:[%s396_s15] sm:$0xff]   ;;  %v1403_v11 = vld [vmem:[%s1537_s28 + $0x8] sm:$0xff]   ;;  %v1404_v12 = vld [vmem:[%s1537_s28 + $0x10] sm:$0xff]   ;;  %s406_s22 = scalar_lea.vmem %s1712_s9, %s1210_s29 }
  0x12   : > { %1277 = vmatprep.subr.bf16.mxu1 %v1434_v1  ;;  %v1402_v10 = vld [vmem:[%s1537_s28] sm:$0xff]   ;;  %v1405_v13 = vld [vmem:[%s1537_s28 + $0x18] sm:$0xff]  }
  0x14   : > { %1266 = vmatpush3.bf16.msra.mxu0 %v1399_v7 }
  0x15   : > { %1278 = vmatpush3.bf16.msra.mxu1 %v1400_v8  ;;  %1283 = vmatprep.subr.bf16.mxu0 %v1434_v1 }
  0x16   : > { %1295 = vmatprep.subr.bf16.mxu1 %v1434_v1 }
  0x17   : > { %1268 = vmatmul.mubr.msk.bf16.vlgmr.msra.gmra.mrb[0].mxu0 %vm458_vm1, %v1401_v9 }
  0x18   : > { %1280 = vmatmul.mubr.msk.bf16.vlgmr.msra.gmra.mrb[0].mxu1 %vm458_vm1, %v1402_v10  ;;  %1291 = vmatprep.mubr.msk.bf16.mxu0 %vm1435_vm0, %v1434_v1 }
  0x19   : > { %1296 = vmatpush3.bf16.msra.mxu1 %v1394_v2  ;;  %1303 = vmatprep.mubr.msk.bf16.mxu1 %vm1435_vm0, %v1434_v1 }
  0x1a   : > { %1297 = vmatprep.subr.bf16.mxu1 %v1434_v1  ;;  %1284 = vmatpush3.bf16.msra.mxu0 %v1587_v14 }
  0x1b   : > { %1285 = vmatprep.subr.bf16.mxu0 %v1434_v1 }
  0x1d   : > { %1298 = vmatpush3.bf16.msra.mxu1 %v1396_v4 }
  0x1e   : > { %1299 = vmatprep.subr.bf16.mxu1 %v1434_v1  ;;  %1286 = vmatpush3.bf16.msra.mxu0 %v1594_v15 }
  0x1f   : > { %1287 = vmatprep.subr.bf16.mxu0 %v1434_v1 }
  0x21   : > { %1300 = vmatpush3.bf16.msra.mxu1 %v1398_v6 }
  0x22   : > { %1301 = vmatprep.subr.bf16.mxu1 %v1434_v1  ;;  %1288 = vmatpush3.bf16.msra.mxu0 %v1601_v16 }
  0x23   : > { %1289 = vmatprep.subr.bf16.mxu0 %v1434_v1 }
  0x25   : > { %1302 = vmatpush3.bf16.msra.mxu1 %v1400_v8 }
  0x26   : > { %1319 = vmatprep.subr.bf16.mxu1 %v1434_v1  ;;  %1290 = vmatpush3.bf16.msra.mxu0 %v1608_v17 }
  0x27   : > { %1307 = vmatprep.subr.bf16.mxu0 %v1434_v1 }
  0x28   : > { %1304 = vmatmul.mubr.msk.bf16.vlgmr.msra.gmra.mrb[4].mxu1 %vm458_vm1, %v1403_v11 }
  0x29   : > { %1320 = vmatpush3.bf16.msra.mxu1 %v1394_v2  ;;  %1327 = vmatprep.mubr.msk.bf16.mxu1 %vm1435_vm0, %v1434_v1 }
  0x2a   : > { %1321 = vmatprep.subr.bf16.mxu1 %v1434_v1 }
  0x2d   : > { %1322 = vmatpush3.bf16.msra.mxu1 %v1396_v4 }
  0x2e   : > { %1323 = vmatprep.subr.bf16.mxu1 %v1434_v1 }
  0x31   : > { %1324 = vmatpush3.bf16.msra.mxu1 %v1398_v6 }
  0x32   : > { %1325 = vmatprep.subr.bf16.mxu1 %v1434_v1 }
  0x35   : > { %1326 = vmatpush3.bf16.msra.mxu1 %v1400_v8 }
  0x36   : > { %1343 = vmatprep.subr.bf16.mxu1 %v1434_v1 }
  0x38   : > { %1328 = vmatmul.mubr.msk.bf16.vlgmr.msra.gmra.mrb[8].mxu1 %vm458_vm1, %v1404_v12 }
  0x39   : > { %1344 = vmatpush3.bf16.msra.mxu1 %v1394_v2  ;;  %1351 = vmatprep.mubr.msk.bf16.mxu1 %vm1435_vm0, %v1434_v1 }
  0x3a   : > { %1345 = vmatprep.subr.bf16.mxu1 %v1434_v1 }
  0x3d   : > { %1346 = vmatpush3.bf16.msra.mxu1 %v1396_v4 }
  0x3e   : > { %1347 = vmatprep.subr.bf16.mxu1 %v1434_v1 }
  0x41   : > { %1348 = vmatpush3.bf16.msra.mxu1 %v1398_v6 }
  0x42   : > { %1349 = vmatprep.subr.bf16.mxu1 %v1434_v1 }
  0x45   : > { %1350 = vmatpush3.bf16.msra.mxu1 %v1400_v8 }
  0x48   : > { %1352 = vmatmul.mubr.msk.bf16.vlgmr.msra.gmra.mrb[12].mxu1 %vm458_vm1, %v1405_v13 }
  0xea   : > { %v1612_v18 = vpop.f32.mrb[0].mxu0 }
  0xeb   : > { %v581_v20 = vpop.f32.mrb[0].mxu1  ;;  %v1269_v21 = vpop.f32.mrb[1].mxu0 }
  0xec   : > { %v582_v22 = vadd.f32 %v581_v20, %v1612_v18  ;;  %v1281_v23 = vpop.f32.mrb[1].mxu1  ;;  %v1620_v24 = vpop.f32.mrb[2].mxu0 }
  0xed   : > { %v584_v26 = vpop.f32.mrb[2].mxu1  ;;  %v1270_v27 = vpop.f32.mrb[3].mxu0 }
  0xee   : > { %v594_v28 = vmul.f32 %v1617_v19, %v582_v22  ;;  %v585_v29 = vadd.f32 %v584_v26, %v1620_v24  ;;  %v1282_v30 = vpop.f32.mrb[3].mxu1 }
  0xf0   : > { %v602_v31 = vadd.f32 %v1625_v25, %v594_v28  ;;  %v595_v32 = vmul.f32 %v1617_v19, %v585_v29 }
  0xf2   : > { %v604_v33 = vmul.f32 0.2, %v602_v31  ;;  %v603_v34 = vadd.f32 %v1625_v25, %v595_v32 }
  0xf4   : > { %v605_v35 = vmul.f32 0.2, %v603_v34  ;;  %v606_v36 = vmax.f32 %v602_v31, %v604_v33 }
  0xf6   : > { %v607_v37 = vmax.f32 %v603_v34, %v605_v35 }
  0xf8   : > { %v608_v38 = vpack.c.bf16 %v607_v37, %v606_v36 }
  0xfa   : > { %1292 = vmatmul.mubr.msk.bf16.vlgmr.msra.gmra.mrb[4].mxu0 %vm458_vm1, %v608_v38 }
  0xfb   : > { %v742_v39 = vpop.f32.mrb[4].mxu1  ;;  %1308 = vmatpush3.bf16.msra.mxu0 %v1587_v14  ;;  %1315 = vmatprep.mubr.msk.bf16.mxu0 %vm1435_vm0, %v1434_v1 }
  0xfc   : > { %v743_v40 = vadd.f32 %v742_v39, %v1612_v18  ;;  %v1305_v41 = vpop.f32.mrb[5].mxu1  ;;  %1309 = vmatprep.subr.bf16.mxu0 %v1434_v1 }
  0xfd   : > { %v745_v42 = vpop.f32.mrb[6].mxu1 }
  0xfe   : > { %v749_v43 = vmul.f32 %v1617_v19, %v743_v40  ;;  %v746_v44 = vadd.f32 %v745_v42, %v1620_v24  ;;  %v1306_v45 = vpop.f32.mrb[7].mxu1 }
  0xff   : > { %1310 = vmatpush3.bf16.msra.mxu0 %v1594_v15 }
 0x100   : > { %v751_v46 = vadd.f32 %v1625_v25, %v749_v43  ;;  %v750_v47 = vmul.f32 %v1617_v19, %v746_v44  ;;  %1311 = vmatprep.subr.bf16.mxu0 %v1434_v1 }
 0x102   : > { %v753_v48 = vmul.f32 0.2, %v751_v46  ;;  %v752_v49 = vadd.f32 %v1625_v25, %v750_v47 }
 0x103   : > { %1312 = vmatpush3.bf16.msra.mxu0 %v1601_v16 }
 0x104   : > { %v754_v50 = vmul.f32 0.2, %v752_v49  ;;  %1313 = vmatprep.subr.bf16.mxu0 %v1434_v1  ;;  %v755_v51 = vmax.f32 %v751_v46, %v753_v48 }
 0x106   : > { %v756_v52 = vmax.f32 %v752_v49, %v754_v50 }
 0x107   : > { %1314 = vmatpush3.bf16.msra.mxu0 %v1608_v17 }
 0x108   : > { %v757_v53 = vpack.c.bf16 %v756_v52, %v755_v51  ;;  %1331 = vmatprep.subr.bf16.mxu0 %v1434_v1 }
 0x10a   : > { %1316 = vmatmul.mubr.msk.bf16.vlgmr.msra.gmra.mrb[8].mxu0 %vm458_vm1, %v757_v53 }
 0x10b   : > { %v857_v54 = vpop.f32.mrb[8].mxu1  ;;  %1332 = vmatpush3.bf16.msra.mxu0 %v1587_v14  ;;  %1339 = vmatprep.mubr.msk.bf16.mxu0 %vm1435_vm0, %v1434_v1 }
 0x10c   : > { %v858_v55 = vadd.f32 %v857_v54, %v1612_v18  ;;  %v1329_v56 = vpop.f32.mrb[9].mxu1  ;;  %1333 = vmatprep.subr.bf16.mxu0 %v1434_v1 }
 0x10d   : > { %v860_v57 = vpop.f32.mrb[10].mxu1 }
 0x10e   : > { %v864_v58 = vmul.f32 %v1617_v19, %v858_v55  ;;  %v861_v59 = vadd.f32 %v860_v57, %v1620_v24  ;;  %v1330_v60 = vpop.f32.mrb[11].mxu1 }
 0x10f   : > { %1334 = vmatpush3.bf16.msra.mxu0 %v1594_v15 }
 0x110   : > { %v866_v61 = vadd.f32 %v1625_v25, %v864_v58  ;;  %v865_v62 = vmul.f32 %v1617_v19, %v861_v59  ;;  %1335 = vmatprep.subr.bf16.mxu0 %v1434_v1 }
 0x112   : > { %v868_v63 = vmul.f32 0.2, %v866_v61  ;;  %v867_v0 = vadd.f32 %v1625_v25, %v865_v62 }
 0x113   : > { %1336 = vmatpush3.bf16.msra.mxu0 %v1601_v16 }
 0x114   : > { %v869_v2 = vmul.f32 0.2, %v867_v0  ;;  %1337 = vmatprep.subr.bf16.mxu0 %v1434_v1  ;;  %v870_v3 = vmax.f32 %v866_v61, %v868_v63 }
 0x116   : > { %v871_v4 = vmax.f32 %v867_v0, %v869_v2 }
 0x117   : > { %1338 = vmatpush3.bf16.msra.mxu0 %v1608_v17 }
 0x118   : > { %v872_v5 = vpack.c.bf16 %v871_v4, %v870_v3  ;;  %1355 = vmatprep.subr.bf16.mxu0 %v1434_v1 }
 0x11a   : > { %1340 = vmatmul.mubr.msk.bf16.vlgmr.msra.gmra.mrb[12].mxu0 %vm458_vm1, %v872_v5 }
 0x11b   : > { %v972_v6 = vpop.f32.mrb[12].mxu1  ;;  %1356 = vmatpush3.bf16.msra.mxu0 %v1587_v14  ;;  %1363 = vmatprep.mubr.msk.bf16.mxu0 %vm1435_vm0, %v1434_v1 }
 0x11c   : > { %v973_v7 = vadd.f32 %v972_v6, %v1612_v18  ;;  %v1353_v8 = vpop.f32.mrb[13].mxu1  ;;  %1357 = vmatprep.subr.bf16.mxu0 %v1434_v1 }
 0x11d   : > { %v975_v9 = vpop.f32.mrb[14].mxu1 }
 0x11e   : > { %v979_v10 = vmul.f32 %v1617_v19, %v973_v7  ;;  %v976_v11 = vadd.f32 %v975_v9, %v1620_v24  ;;  %v1354_v12 = vpop.f32.mrb[15].mxu1 }
 0x11f   : > { %1358 = vmatpush3.bf16.msra.mxu0 %v1594_v15 }
 0x120   : > { %v981_v13 = vadd.f32 %v1625_v25, %v979_v10  ;;  %v980_v14 = vmul.f32 %v1617_v19, %v976_v11  ;;  %1359 = vmatprep.subr.bf16.mxu0 %v1434_v1 }
 0x122   : > { %v983_v20 = vmul.f32 0.2, %v981_v13  ;;  %v982_v18 = vadd.f32 %v1625_v25, %v980_v14  ;;  %v1188_v25 = vld [vmem:[%s1710_s7] ss:$0 sm:$0xff] }
 0x123   : > { %1360 = vmatpush3.bf16.msra.mxu0 %v1601_v16 }
 0x124   : > { %v984_v21 = vmul.f32 0.2, %v982_v18  ;;  %1361 = vmatprep.subr.bf16.mxu0 %v1434_v1  ;;  %v985_v22 = vmax.f32 %v981_v13, %v983_v20  ;;  %v1189_v1 = vld [vmem:[%s1711_s8] ss:$0 sm:$0xff] }
 0x126   : > { %v986_v23 = vmax.f32 %v982_v18, %v984_v21 }
 0x127   : > { %1362 = vmatpush3.bf16.msra.mxu0 %v1608_v17 }
 0x128   : > { %v987_v24 = vpack.c.bf16 %v986_v23, %v985_v22 }
 0x12a   : > { %1364 = vmatmul.mubr.msk.bf16.vlgmr.msra.gmra.mrb[16].mxu0 %vm458_vm1, %v987_v24 }
 0x1cd   : > { %v670_v15 = vpop.f32.mrb[4].mxu0 }
 0x1ce   : > { %v1293_v26 = vpop.f32.mrb[5].mxu0  ;;  %v683_v28 = vmul.f32 %v1188_v25, %v670_v15 }
 0x1cf   : > { %v673_v19 = vpop.f32.mrb[6].mxu0 }
 0x1d0   : > { %v1294_v27 = vpop.f32.mrb[7].mxu0  ;;  %v684_v16 = vmul.f32 %v1188_v25, %v673_v19  ;;  %v691_v29 = vadd.f32 %v1189_v1, %v683_v28 }
 0x1d2   : > { %v692_v17 = vadd.f32 %v1189_v1, %v684_v16  ;;  %v693_v34 = vmul.f32 0.2, %v691_v29 }
 0x1d4   : > { %v694_v38 = vmul.f32 0.2, %v692_v17  ;;  %v695_v41 = vmax.f32 %v691_v29, %v693_v34 }
 0x1d6   : > { %v696_v44 = vmax.f32 %v692_v17, %v694_v38 }
 0x1dd   : > { %v795_v30 = vpop.f32.mrb[8].mxu0 }
 0x1de   : > { %v802_v31 = vmul.f32 %v1188_v25, %v795_v30  ;;  %v1317_v32 = vpop.f32.mrb[9].mxu0 }
 0x1df   : > { %v798_v33 = vpop.f32.mrb[10].mxu0 }
 0x1e0   : > { %v804_v35 = vadd.f32 %v1189_v1, %v802_v31  ;;  %v803_v36 = vmul.f32 %v1188_v25, %v798_v33  ;;  %v1318_v37 = vpop.f32.mrb[11].mxu0 }
 0x1e2   : > { %v806_v39 = vmul.f32 0.2, %v804_v35  ;;  %v805_v40 = vadd.f32 %v1189_v1, %v803_v36 }
 0x1e4   : > { %v808_v42 = vmax.f32 %v804_v35, %v806_v39  ;;  %v807_v43 = vmul.f32 0.2, %v805_v40 }
 0x1e6   : > { %v810_v45 = vmax.f32 %v695_v41, %v808_v42  ;;  %v809_v46 = vmax.f32 %v805_v40, %v807_v43 }
 0x1e8   : > { %v811_v47 = vmax.f32 %v696_v44, %v809_v46 }
 0x1ed   : > { %v910_v48 = vpop.f32.mrb[12].mxu0 }
 0x1ee   : > { %v917_v49 = vmul.f32 %v1188_v25, %v910_v48  ;;  %v1341_v50 = vpop.f32.mrb[13].mxu0 }
 0x1ef   : > { %v913_v51 = vpop.f32.mrb[14].mxu0 }
 0x1f0   : > { %v919_v52 = vadd.f32 %v1189_v1, %v917_v49  ;;  %v918_v53 = vmul.f32 %v1188_v25, %v913_v51  ;;  %v1342_v54 = vpop.f32.mrb[15].mxu0 }
 0x1f2   : > { %v921_v55 = vmul.f32 0.2, %v919_v52  ;;  %v920_v56 = vadd.f32 %v1189_v1, %v918_v53 }
 0x1f4   : > { %v923_v57 = vmax.f32 %v919_v52, %v921_v55  ;;  %v922_v58 = vmul.f32 0.2, %v920_v56 }
 0x1f6   : > { %v925_v59 = vmax.f32 %v810_v45, %v923_v57  ;;  %v924_v60 = vmax.f32 %v920_v56, %v922_v58 }
 0x1f8   : > { %v926_v61 = vmax.f32 %v811_v47, %v924_v60 }
 0x1fd   : > { %v1025_v62 = vpop.f32.mrb[16].mxu0 }
 0x1fe   : > { %v1032_v63 = vmul.f32 %v1188_v25, %v1025_v62  ;;  %v1365_v0 = vpop.f32.mrb[17].mxu0 }
 0x1ff   : > { %v1028_v2 = vpop.f32.mrb[18].mxu0 }
 0x200   : > { %v1034_v3 = vadd.f32 %v1189_v1, %v1032_v63  ;;  %v1033_v4 = vmul.f32 %v1188_v25, %v1028_v2  ;;  %v1366_v5 = vpop.f32.mrb[19].mxu0 }
 0x202   : > { %v1036_v6 = vmul.f32 0.2, %v1034_v3  ;;  %v1035_v7 = vadd.f32 %v1189_v1, %v1033_v4 }
 0x204   : > { %v1038_v8 = vmax.f32 %v1034_v3, %v1036_v6  ;;  %v1037_v9 = vmul.f32 0.2, %v1035_v7 }
 0x206   : > { %v1040_v10 = vmax.f32 %v925_v59, %v1038_v8  ;;  %v1039_v11 = vmax.f32 %v1035_v7, %v1037_v9 }
 0x208   : > { %v1212_v12 = vpack.c.bf16 %v1040_v10, %v1040_v10  ;;  %v1041_v13 = vmax.f32 %v926_v61, %v1039_v11 }
 0x20a   : > { %1051 = vst.msk [vmem:[%s406_s22] sm:$0xf] %vm1050_vm2, %v1212_v12  ;;  %v1213_v14 = vpack.c.bf16 %v1041_v13, %v1041_v13 }
 0x20c   : > { %1052 = vst.msk [vmem:[%s406_s22 + $0x4] sm:$0xf] %vm1050_vm2, %v1213_v14 }
 0x20d PF: > { %s19_s11 = sadd.s32 1, %s1432_s11   ;;  %s1713_s30 = smov %s1428_s10 }
 0x20e   : > { %p16_p5 = scmp.ge.s32.totalorder %s19_s11, 4   ;;  %s1714_s10 = smov %s1716_s12 }
 0x210   :  { %18 = sbr.rel (!%p16_p5) target bundleno = 2 (0x2), region = 92 }

// kernel: dgcnn_partseg_forward.28
= control target key start
LH: loop header
LB: loop body
LE: loop exit
PB: predicated region body
PF: predicated region fallthrough
CT: control target
= control target key end

     0   :  { %v110_v0 = vmov 0.0   ;;  %vm111_vm0 = vmmov 0   ;;  %vm27_vm1 = vcmask 130048   ;;  %vm89_vm2 = vcmask 523264   ;;  %s152_s1 = inlined_call_operand.vmem [shape: bf16[16,64], index: 1, kind: input, shape index: {}]   ;;  %s153_s0 = inlined_call_operand.vmem [shape: bf16[8,16], index: 0, kind: input, shape index: {}]   ;;  %s154_s2 = inlined_call_operand.vmem [shape: f32[1,64], index: 2, kind: input, shape index: {}]   ;;  %s155_s3 = inlined_call_operand.vmem [shape: f32[1,64], index: 3, kind: input, shape index: {}]   ;;  %s156_s4 = inlined_call_operand.vmem [shape: f32[8,64], index: 4, kind: output, shape index: {}]  }
   0x1   :  { %101 = vmatprep.subr.bf16.mxu0 %v110_v0  ;;  %v109_v1 = vld [vmem:[%s152_s1] sm:$0xff]   ;;  %103 = vmatprep.mubr.msk.bf16.mxu0 %vm111_vm0, %v110_v0 }
   0x2   :  { %102 = vmatpush3.bf16.msra.mxu0 %v109_v1  ;;  %v18_v2 = vld [vmem:[%s153_s0] sm:$0xf] }
   0x3   :  { %v97_v3 = vld [vmem:[%s154_s2] ss:$0 sm:$0xff] }
   0x4   :  { %v98_v5 = vld [vmem:[%s155_s3] ss:$0 sm:$0xff] }
   0x5   :  { %104 = vmatmul.mubr.msk.bf16.vlgmr.msra.gmra.mrb[0].mxu0 %vm27_vm1, %v18_v2 }
  0xd8   :  { %v65_v4 = vpop.f32.mrb[0].mxu0 }
  0xd9   :  { %v78_v6 = vmul.f32 %v97_v3, %v65_v4  ;;  %v105_v7 = vpop.f32.mrb[1].mxu0 }
  0xda   :  { %v68_v8 = vpop.f32.mrb[2].mxu0 }
  0xdb   :  { %v86_v9 = vadd.f32 %v98_v5, %v78_v6  ;;  %v106_v10 = vpop.f32.mrb[3].mxu0 }
  0xdd   :  { %v87_v11 = vmul.f32 0.2, %v86_v9 }
  0xdf   :  { %v88_v12 = vmax.f32 %v86_v9, %v87_v11 }
  0xe1   :  { %90 = vst.msk [vmem:[%s156_s4] sm:$0xff] %vm89_vm2, %v88_v12 }

// kernel: dgcnn_partseg_forward.27
= control target key start
LH: loop header
LB: loop body
LE: loop exit
PB: predicated region body
PF: predicated region fallthrough
CT: control target
= control target key end

     0   :  { %s2239_s27 = smov 0   ;;  %s2241_s28 = smov 0   ;;  %s2664_s0 = inlined_call_operand.vmem [shape: bf16[2,16,64], index: 0, kind: input, shape index: {}]   ;;  %s2665_s1 = inlined_call_operand.vmem [shape: bf16[2,16,64], index: 1, kind: input, shape index: {}]   ;;  %s2666_s2 = inlined_call_operand.vmem [shape: bf16[2,16,64], index: 2, kind: input, shape index: {}]   ;;  %s2667_s3 = inlined_call_operand.vmem [shape: bf16[64,1024], index: 3, kind: input, shape index: {}]   ;;  %s2668_s4 = inlined_call_operand.vmem [shape: bf16[64,1024], index: 4, kind: input, shape index: {}]   ;;  %s2669_s5 = inlined_call_operand.vmem [shape: bf16[64,1024], index: 5, kind: input, shape index: {}]   ;;  %s2670_s6 = inlined_call_operand.vmem [shape: f32[1,1024], index: 6, kind: input, shape index: {}]   ;;  %s2671_s7 = inlined_call_operand.vmem [shape: f32[1,1024], index: 7, kind: input, shape index: {}]   ;;  %s2672_s8 = inlined_call_operand.vmem [shape: f32[2,1,1024], index: 8, kind: output, shape index: {}]  }
   0x1   :  { %s2243_s29 = smov 0  }
   0x2 LB: > { %s30_s30 = sadd.s32 1, %s2186_s28  ;;  %p1983_p0 = scmp.ge.s32.totalorder %s2190_s29, 1  ;;  %s2190_s29 = sphi %s2243_s29, %s18_s29   ;;  %s2186_s28 = sphi %s2241_s28, %s2674_s28   ;;  %s2182_s27 = sphi %s2239_s27, %s2673_s27  }
   0x3   : > { %p32_p1 = scmp.ge.s32.totalorder %s30_s30, 2  ;;  %p315_p2 = scmp.lt.s32.totalorder %s2190_s29, 3 }
   0x5   : > { %s2676_s30 = smov (%p32_p1, %s30_s30), 0  ;;  %p316_p3 = pnand %p1983_p0, %p315_p2 }
   0x6   : > { %v441_v0 = vld [vmem:[%s2668_s4] sm:$0xff] (!%p316_p3)  ;;  %v442_v2 = vld [vmem:[%s2668_s4 + $0x8] sm:$0xff] (!%p316_p3)  ;;  %p371_p4 = scmp.lt.s32.totalorder (!%p316_p3), %s2182_s27, 1  ;;  %v2192_v8 = vmov (!%p316_p3), 0   ;;  %v443_v31 = vld [vmem:[%s2668_s4 + $0x10] sm:$0xff] (!%p316_p3)  ;;  %vm638_vm0 = vcmask (!%p316_p3), 523264  }
   0x7   : > { %319 = sbr.rel (%p316_p3) target bundleno = 357 (0x165), region = 52  ;;  %v445_v1 = vld [vmem:[%s2668_s4 + $0x20] sm:$0xff] (!%p316_p3)  ;;  %v446_v4 = vld [vmem:[%s2668_s4 + $0x28] sm:$0xff] (!%p316_p3)  ;;  %674 = vmatprep.mubr.bf16.mxu0 (!%p316_p3), %v2192_v8  ;;  %717 = vmatprep.mubr.bf16.mxu1 (!%p316_p3), %v2192_v8  ;;  %v447_v32 = vld [vmem:[%s2668_s4 + $0x30] sm:$0xff] (!%p316_p3) }
   0x8   : > { %v1993_v3 = vcombine.high (!%p316_p3), %v441_v0, %v445_v1  ;;  %v1992_v5 = vcombine.low (!%p316_p3), %v441_v0, %v445_v1  ;;  %v449_v6 = vld [vmem:[%s2668_s4 + $0x40] sm:$0xff] (!%p316_p3)  ;;  %v1995_v9 = vcombine.high (!%p316_p3), %v442_v2, %v446_v4  ;;  %v1994_v10 = vcombine.low (!%p316_p3), %v442_v2, %v446_v4  ;;  %v450_v12 = vld [vmem:[%s2668_s4 + $0x48] sm:$0xff] (!%p316_p3)  ;;  %v444_v33 = vld [vmem:[%s2668_s4 + $0x18] sm:$0xff] (!%p316_p3) }
   0x9   : > { %v453_v7 = vld [vmem:[%s2668_s4 + $0x60] sm:$0xff] (!%p316_p3)  ;;  %v454_v13 = vld [vmem:[%s2668_s4 + $0x68] sm:$0xff] (!%p316_p3)  ;;  %v448_v34 = vld [vmem:[%s2668_s4 + $0x38] sm:$0xff] (!%p316_p3)  ;;  %v1997_v37 = vcombine.high (!%p316_p3), %v443_v31, %v447_v32  ;;  %v1996_v44 = vcombine.low (!%p316_p3), %v443_v31, %v447_v32 }
   0xa   : > { %v2001_v11 = vcombine.high (!%p316_p3), %v449_v6, %v453_v7  ;;  %v457_v14 = vld [vmem:[%s2668_s4 + $0x80] sm:$0xff] (!%p316_p3)  ;;  %642 = vmatprep.subr.bf16.mxu0 (!%p316_p3), %v1993_v3  ;;  %v2003_v15 = vcombine.high (!%p316_p3), %v450_v12, %v454_v13  ;;  %v458_v17 = vld [vmem:[%s2668_s4 + $0x88] sm:$0xff] (!%p316_p3)  ;;  %685 = vmatprep.subr.bf16.mxu1 (!%p316_p3), %v1995_v9  ;;  %v2000_v19 = vcombine.low (!%p316_p3), %v449_v6, %v453_v7  ;;  %v451_v39 = vld [vmem:[%s2668_s4 + $0x50] sm:$0xff] (!%p316_p3) }
   0xb   : > { %v461_v16 = vld [vmem:[%s2668_s4 + $0xa0] sm:$0xff] (!%p316_p3)  ;;  %v462_v18 = vld [vmem:[%s2668_s4 + $0xa8] sm:$0xff] (!%p316_p3)  ;;  %643 = vmatpush1.bf16.msra.mxu0 (!%p316_p3), %v1992_v5  ;;  %686 = vmatpush1.bf16.msra.mxu1 (!%p316_p3), %v1994_v10  ;;  %v2002_v20 = vcombine.low (!%p316_p3), %v450_v12, %v454_v13  ;;  %v1999_v38 = vcombine.high (!%p316_p3), %v444_v33, %v448_v34  ;;  %v455_v40 = vld [vmem:[%s2668_s4 + $0x70] sm:$0xff] (!%p316_p3)  ;;  %v1998_v45 = vcombine.low (!%p316_p3), %v444_v33, %v448_v34 }
   0xc   : > { %644 = vmatprep.subr.bf16.mxu0 (!%p316_p3), %v2001_v11  ;;  %v2009_v21 = vcombine.high (!%p316_p3), %v457_v14, %v461_v16  ;;  %687 = vmatprep.subr.bf16.mxu1 (!%p316_p3), %v2003_v15  ;;  %v2011_v22 = vcombine.high (!%p316_p3), %v458_v17, %v462_v18  ;;  %v465_v23 = vld [vmem:[%s2668_s4 + $0xc0] sm:$0xff] (!%p316_p3)  ;;  %v466_v25 = vld [vmem:[%s2668_s4 + $0xc8] sm:$0xff] (!%p316_p3)  ;;  %v2008_v27 = vcombine.low (!%p316_p3), %v457_v14, %v461_v16  ;;  %v452_v42 = vld [vmem:[%s2668_s4 + $0x58] sm:$0xff] (!%p316_p3) }
   0xd   : > { %v469_v24 = vld [vmem:[%s2668_s4 + $0xe0] sm:$0xff] (!%p316_p3)  ;;  %v470_v26 = vld [vmem:[%s2668_s4 + $0xe8] sm:$0xff] (!%p316_p3)  ;;  %v2010_v28 = vcombine.low (!%p316_p3), %v458_v17, %v462_v18  ;;  %v456_v43 = vld [vmem:[%s2668_s4 + $0x78] sm:$0xff] (!%p316_p3)  ;;  %v2005_v46 = vcombine.high (!%p316_p3), %v451_v39, %v455_v40  ;;  %v2004_v52 = vcombine.low (!%p316_p3), %v451_v39, %v455_v40 }
   0xe   : > { %s2678_s27 = smov (!%p371_p4, %s2182_s27), 1  ;;  %v2017_v29 = vcombine.high %v465_v23, %v469_v24  ;;  %v2019_v30 = vcombine.high %v466_v25, %v470_v26  ;;  %v2016_v35 = vcombine.low %v465_v23, %v469_v24  ;;  %v2018_v36 = vcombine.low %v466_v25, %v470_v26  ;;  %v459_v47 = vld [vmem:[%s2668_s4 + $0x90] sm:$0xff]  ;;  %v460_v50 = vld [vmem:[%s2668_s4 + $0x98] sm:$0xff]  ;;  %v407_v0 = vld [vmem:[%s2667_s3] sm:$0xff] }
   0xf   : > { %s2296_s15 = sshll.u32 %s2678_s27, 3  ;;  %645 = vmatpush1.bf16.msra.mxu0 %v2000_v19  ;;  %688 = vmatpush1.bf16.msra.mxu1 %v2002_v20  ;;  %v2007_v48 = vcombine.high %v452_v42, %v456_v43  ;;  %v463_v49 = vld [vmem:[%s2668_s4 + $0xb0] sm:$0xff]  ;;  %v464_v51 = vld [vmem:[%s2668_s4 + $0xb8] sm:$0xff]  ;;  %v2006_v53 = vcombine.low %v452_v42, %v456_v43  ;;  %v411_v1 = vld [vmem:[%s2667_s3 + $0x20] sm:$0xff] }
  0x10   : > { %s388_s18 = scalar_lea.vmem %s2665_s1, %s2296_s15  ;;  %646 = vmatprep.subr.bf16.mxu0 %v2009_v21  ;;  %689 = vmatprep.subr.bf16.mxu1 %v2011_v22  ;;  %s378_s10 = scalar_lea.vmem %s2664_s0, %s2296_s15  ;;  %v2013_v54 = vcombine.high %v459_v47, %v463_v49  ;;  %v2015_v55 = vcombine.high %v460_v50, %v464_v51  ;;  %v467_v56 = vld [vmem:[%s2668_s4 + $0xd0] sm:$0xff]  ;;  %v468_v58 = vld [vmem:[%s2668_s4 + $0xd8] sm:$0xff]  ;;  %v2012_v60 = vcombine.low %v459_v47, %v463_v49  ;;  %v408_v2 = vld [vmem:[%s2667_s3 + $0x8] sm:$0xff] }
  0x11   : > { %v2332_v41 = vld [vmem:[%s388_s18] sm:$0xff]   ;;  %v471_v57 = vld [vmem:[%s2668_s4 + $0xf0] sm:$0xff]  ;;  %v472_v59 = vld [vmem:[%s2668_s4 + $0xf8] sm:$0xff]  ;;  %v2014_v61 = vcombine.low %v460_v50, %v464_v51  ;;  %s398_s20 = scalar_lea.vmem %s2666_s2, %s2296_s15  ;;  %v2030_v6 = vcombine.high %v407_v0, %v411_v1  ;;  %v2029_v13 = vcombine.low %v407_v0, %v411_v1  ;;  %s403_s13 = scalar_lea.vmem %s2672_s8, %s2296_s15 }
  0x12   : > { %v2021_v62 = vcombine.high %v467_v56, %v471_v57  ;;  %v2023_v63 = vcombine.high %v468_v58, %v472_v59  ;;  %v412_v3 = vld [vmem:[%s2667_s3 + $0x28] sm:$0xff]  ;;  %v2020_v4 = vcombine.low %v467_v56, %v471_v57  ;;  %v2022_v5 = vcombine.low %v468_v58, %v472_v59  ;;  %v415_v9 = vld [vmem:[%s2667_s3 + $0x40] sm:$0xff]  ;;  %v409_v33 = vld [vmem:[%s2667_s3 + $0x10] sm:$0xff] }
  0x13   : > { %647 = vmatpush1.bf16.msra.mxu0 %v2008_v27  ;;  %690 = vmatpush1.bf16.msra.mxu1 %v2010_v28  ;;  %v2032_v7 = vcombine.high %v408_v2, %v412_v3  ;;  %v419_v10 = vld [vmem:[%s2667_s3 + $0x60] sm:$0xff]  ;;  %v416_v11 = vld [vmem:[%s2667_s3 + $0x48] sm:$0xff]  ;;  %v2031_v14 = vcombine.low %v408_v2, %v412_v3  ;;  %v413_v34 = vld [vmem:[%s2667_s3 + $0x30] sm:$0xff] }
  0x14   : > { %648 = vmatprep.subr.bf16.mxu0 %v2017_v29  ;;  %691 = vmatprep.subr.bf16.mxu1 %v2019_v30  ;;  %v420_v12 = vld [vmem:[%s2667_s3 + $0x68] sm:$0xff]  ;;  %v2038_v15 = vcombine.high %v415_v9, %v419_v10  ;;  %v423_v17 = vld [vmem:[%s2667_s3 + $0x80] sm:$0xff]  ;;  %v2037_v21 = vcombine.low %v415_v9, %v419_v10  ;;  %v2034_v39 = vcombine.high %v409_v33, %v413_v34  ;;  %v421_v42 = vld [vmem:[%s2667_s3 + $0x70] sm:$0xff] }
  0x15   : > { %v2040_v16 = vcombine.high %v416_v11, %v420_v12  ;;  %v427_v18 = vld [vmem:[%s2667_s3 + $0xa0] sm:$0xff]  ;;  %v424_v19 = vld [vmem:[%s2667_s3 + $0x88] sm:$0xff]  ;;  %v2039_v22 = vcombine.low %v416_v11, %v420_v12  ;;  %v425_v50 = vld [vmem:[%s2667_s3 + $0x90] sm:$0xff] }
  0x16   : > { %v428_v20 = vld [vmem:[%s2667_s3 + $0xa8] sm:$0xff]  ;;  %v2046_v23 = vcombine.high %v423_v17, %v427_v18  ;;  %v431_v25 = vld [vmem:[%s2667_s3 + $0xc0] sm:$0xff]  ;;  %v2045_v29 = vcombine.low %v423_v17, %v427_v18  ;;  %v429_v51 = vld [vmem:[%s2667_s3 + $0xb0] sm:$0xff] }
  0x17   : > { %649 = vmatpush1.bf16.msra.mxu0 %v2016_v35  ;;  %692 = vmatpush1.bf16.msra.mxu1 %v2018_v36  ;;  %v2048_v24 = vcombine.high %v424_v19, %v428_v20  ;;  %v435_v26 = vld [vmem:[%s2667_s3 + $0xe0] sm:$0xff]  ;;  %v432_v27 = vld [vmem:[%s2667_s3 + $0xc8] sm:$0xff]  ;;  %v2047_v30 = vcombine.low %v424_v19, %v428_v20  ;;  %v410_v35 = vld [vmem:[%s2667_s3 + $0x18] sm:$0xff]  ;;  %v2050_v56 = vcombine.high %v425_v50, %v429_v51 }
  0x18   : > { %728 = vmatprep.subr.bf16.mxu0 %v1997_v37  ;;  %771 = vmatprep.subr.bf16.mxu1 %v1999_v38  ;;  %v436_v28 = vld [vmem:[%s2667_s3 + $0xe8] sm:$0xff]  ;;  %v2054_v31 = vcombine.high %v431_v25, %v435_v26  ;;  %v414_v36 = vld [vmem:[%s2667_s3 + $0x38] sm:$0xff]  ;;  %v2053_v37 = vcombine.low %v431_v25, %v435_v26  ;;  %v2455_v43 = vld [vmem:[%s378_s10] sm:$0xff]  }
  0x19   : > { %v2056_v32 = vcombine.high %v432_v27, %v436_v28  ;;  %v2055_v38 = vcombine.low %v432_v27, %v436_v28  ;;  %v2036_v40 = vcombine.high %v410_v35, %v414_v36  ;;  %v2035_v47 = vcombine.low %v410_v35, %v414_v36  ;;  %v433_v58 = vld [vmem:[%s2667_s3 + $0xd0] sm:$0xff]  ;;  %v1156_v2 = vld [vmem:[%s2669_s5] sm:$0xff] }
  0x1a   : > { %2024 = vmatmul.mubr.msk.bf16.vlgmr.msra.gmra.mrb[0].mxu0 %vm638_vm0, %v2332_v41  ;;  %2025 = vmatmul.mubr.msk.bf16.vlgmr.msra.gmra.mrb[0].mxu1 %vm638_vm0, %v2332_v41  ;;  %v437_v59 = vld [vmem:[%s2667_s3 + $0xf0] sm:$0xff]  ;;  %v1160_v3 = vld [vmem:[%s2669_s5 + $0x20] sm:$0xff] }
  0x1b   : > { %729 = vmatpush1.bf16.msra.mxu0 %v1996_v44  ;;  %772 = vmatpush1.bf16.msra.mxu1 %v1998_v45  ;;  %v418_v44 = vld [vmem:[%s2667_s3 + $0x58] sm:$0xff]  ;;  %v2058_v0 = vcombine.high %v433_v58, %v437_v59  ;;  %v2067_v9 = vcombine.high %v1156_v2, %v1160_v3  ;;  %v1164_v11 = vld [vmem:[%s2669_s5 + $0x40] sm:$0xff]  ;;  %v1158_v35 = vld [vmem:[%s2669_s5 + $0x10] sm:$0xff] }
  0x1c   : > { %730 = vmatprep.subr.bf16.mxu0 %v2005_v46  ;;  %773 = vmatprep.subr.bf16.mxu1 %v2007_v48  ;;  %v422_v45 = vld [vmem:[%s2667_s3 + $0x78] sm:$0xff]  ;;  %v2033_v46 = vcombine.low %v409_v33, %v413_v34  ;;  %v1168_v12 = vld [vmem:[%s2669_s5 + $0x60] sm:$0xff]  ;;  %v1162_v36 = vld [vmem:[%s2669_s5 + $0x30] sm:$0xff] }
  0x1d   : > { %760 = vmatprep.mubr.bf16.mxu0 %v2192_v8  ;;  %803 = vmatprep.mubr.bf16.mxu1 %v2192_v8  ;;  %v2044_v49 = vcombine.high %v418_v44, %v422_v45  ;;  %v2075_v17 = vcombine.high %v1164_v11, %v1168_v12  ;;  %v1172_v19 = vld [vmem:[%s2669_s5 + $0x80] sm:$0xff] }
  0x1e   : > { %v1176_v20 = vld [vmem:[%s2669_s5 + $0xa0] sm:$0xff] }
  0x1f   : > { %731 = vmatpush1.bf16.msra.mxu0 %v2004_v52  ;;  %774 = vmatpush1.bf16.msra.mxu1 %v2006_v53  ;;  %v426_v52 = vld [vmem:[%s2667_s3 + $0x98] sm:$0xff]  ;;  %v2083_v25 = vcombine.high %v1172_v19, %v1176_v20  ;;  %v1180_v27 = vld [vmem:[%s2669_s5 + $0xc0] sm:$0xff] }
  0x20   : > { %732 = vmatprep.subr.bf16.mxu0 %v2013_v54  ;;  %775 = vmatprep.subr.bf16.mxu1 %v2015_v55  ;;  %v430_v53 = vld [vmem:[%s2667_s3 + $0xb8] sm:$0xff]  ;;  %v2043_v55 = vcombine.low %v418_v44, %v422_v45  ;;  %v1184_v28 = vld [vmem:[%s2669_s5 + $0xe0] sm:$0xff]  ;;  %v1170_v44 = vld [vmem:[%s2669_s5 + $0x70] sm:$0xff] }
  0x21   : > { %v2052_v57 = vcombine.high %v426_v52, %v430_v53  ;;  %v2091_v33 = vcombine.high %v1180_v27, %v1184_v28  ;;  %v2167_v45 = vld [vmem:[%s398_s20] sm:$0xff]  }
  0x23   : > { %733 = vmatpush1.bf16.msra.mxu0 %v2012_v60  ;;  %776 = vmatpush1.bf16.msra.mxu1 %v2014_v61  ;;  %v434_v60 = vld [vmem:[%s2667_s3 + $0xd8] sm:$0xff] }
  0x24   : > { %734 = vmatprep.subr.bf16.mxu0 %v2021_v62  ;;  %777 = vmatprep.subr.bf16.mxu1 %v2023_v63  ;;  %v438_v61 = vld [vmem:[%s2667_s3 + $0xf8] sm:$0xff]  ;;  %v2049_v62 = vcombine.low %v425_v50, %v429_v51  ;;  %v2051_v63 = vcombine.low %v426_v52, %v430_v53  ;;  %v1174_v52 = vld [vmem:[%s2669_s5 + $0x90] sm:$0xff] }
  0x25   : > { %v2060_v1 = vcombine.high %v434_v60, %v438_v61  ;;  %v1178_v53 = vld [vmem:[%s2669_s5 + $0xb0] sm:$0xff] }
  0x27   : > { %735 = vmatpush1.bf16.msra.mxu0 %v2020_v4  ;;  %778 = vmatpush1.bf16.msra.mxu1 %v2022_v5  ;;  %v1157_v4 = vld [vmem:[%s2669_s5 + $0x8] sm:$0xff] }
  0x28   : > { %982 = vmatprep.subr.bf16.mxu0 %v2030_v6  ;;  %1025 = vmatprep.subr.bf16.mxu1 %v2032_v7  ;;  %v1161_v5 = vld [vmem:[%s2669_s5 + $0x28] sm:$0xff]  ;;  %v2057_v6 = vcombine.low %v433_v58, %v437_v59  ;;  %v2059_v7 = vcombine.low %v434_v60, %v438_v61  ;;  %v2087_v58 = vcombine.high %v1174_v52, %v1178_v53  ;;  %v1182_v60 = vld [vmem:[%s2669_s5 + $0xd0] sm:$0xff] }
  0x29   : > { %v2069_v10 = vcombine.high %v1157_v4, %v1161_v5  ;;  %v1186_v61 = vld [vmem:[%s2669_s5 + $0xf0] sm:$0xff] }
  0x2a   : > { %2026 = vmatmul.mubr.msk.bf16.vlgmr.msra.gmra.mrb[4].mxu0 %vm638_vm0, %v2332_v41  ;;  %2027 = vmatmul.mubr.msk.bf16.vlgmr.msra.gmra.mrb[4].mxu1 %vm638_vm0, %v2332_v41  ;;  %v417_v41 = vld [vmem:[%s2667_s3 + $0x50] sm:$0xff] }
  0x2b   : > { %983 = vmatpush1.bf16.msra.mxu0 %v2029_v13  ;;  %1026 = vmatpush1.bf16.msra.mxu1 %v2031_v14  ;;  %v2042_v48 = vcombine.high %v417_v41, %v421_v42  ;;  %v2041_v54 = vcombine.low %v417_v41, %v421_v42  ;;  %v1165_v13 = vld [vmem:[%s2669_s5 + $0x48] sm:$0xff]  ;;  %v2071_v41 = vcombine.high %v1158_v35, %v1162_v36 }
  0x2c   : > { %984 = vmatprep.subr.bf16.mxu0 %v2038_v15  ;;  %1027 = vmatprep.subr.bf16.mxu1 %v2040_v16  ;;  %v1169_v14 = vld [vmem:[%s2669_s5 + $0x68] sm:$0xff]  ;;  %v2066_v15 = vcombine.low %v1156_v2, %v1160_v3  ;;  %v2068_v16 = vcombine.low %v1157_v4, %v1161_v5  ;;  %v2095_v2 = vcombine.high %v1182_v60, %v1186_v61 }
  0x2d   : > { %1014 = vmatprep.mubr.bf16.mxu0 %v2192_v8  ;;  %1057 = vmatprep.mubr.bf16.mxu1 %v2192_v8  ;;  %v2077_v18 = vcombine.high %v1165_v13, %v1169_v14  ;;  %v2094_v4 = vcombine.low %v1182_v60, %v1186_v61 }
  0x2f   : > { %985 = vmatpush1.bf16.msra.mxu0 %v2037_v21  ;;  %1028 = vmatpush1.bf16.msra.mxu1 %v2039_v22  ;;  %v1173_v21 = vld [vmem:[%s2669_s5 + $0x88] sm:$0xff] }
  0x30   : > { %986 = vmatprep.subr.bf16.mxu0 %v2046_v23  ;;  %1029 = vmatprep.subr.bf16.mxu1 %v2048_v24  ;;  %v1177_v22 = vld [vmem:[%s2669_s5 + $0xa8] sm:$0xff]  ;;  %v2074_v23 = vcombine.low %v1164_v11, %v1168_v12  ;;  %v2076_v24 = vcombine.low %v1165_v13, %v1169_v14  ;;  %v2620_v13 = vld [vmem:[%s2671_s7] sm:$0xff] }
  0x31   : > { %v2085_v26 = vcombine.high %v1173_v21, %v1177_v22 }
  0x33   : > { %987 = vmatpush1.bf16.msra.mxu0 %v2045_v29  ;;  %1030 = vmatpush1.bf16.msra.mxu1 %v2047_v30  ;;  %v1181_v29 = vld [vmem:[%s2669_s5 + $0xc8] sm:$0xff] }
  0x34   : > { %988 = vmatprep.subr.bf16.mxu0 %v2054_v31  ;;  %1031 = vmatprep.subr.bf16.mxu1 %v2056_v32  ;;  %v1185_v30 = vld [vmem:[%s2669_s5 + $0xe8] sm:$0xff]  ;;  %v2082_v31 = vcombine.low %v1172_v19, %v1176_v20  ;;  %v2084_v32 = vcombine.low %v1173_v21, %v1177_v22 }
  0x35   : > { %v2093_v34 = vcombine.high %v1181_v29, %v1185_v30 }
  0x37   : > { %989 = vmatpush1.bf16.msra.mxu0 %v2053_v37  ;;  %1032 = vmatpush1.bf16.msra.mxu1 %v2055_v38  ;;  %v1159_v37 = vld [vmem:[%s2669_s5 + $0x18] sm:$0xff] }
  0x38   : > { %1068 = vmatprep.subr.bf16.mxu0 %v2034_v39  ;;  %1111 = vmatprep.subr.bf16.mxu1 %v2036_v40  ;;  %v1163_v38 = vld [vmem:[%s2669_s5 + $0x38] sm:$0xff]  ;;  %v2090_v39 = vcombine.low %v1180_v27, %v1184_v28  ;;  %v2092_v40 = vcombine.low %v1181_v29, %v1185_v30 }
  0x39   : > { %v2073_v42 = vcombine.high %v1159_v37, %v1163_v38 }
  0x3a   : > { %2061 = vmatmul.mubr.msk.bf16.vlgmr.msra.gmra.mrb[0].mxu0 %vm638_vm0, %v2455_v43  ;;  %2062 = vmatmul.mubr.msk.bf16.vlgmr.msra.gmra.mrb[0].mxu1 %vm638_vm0, %v2455_v43 }
  0x3b   : > { %1069 = vmatpush1.bf16.msra.mxu0 %v2033_v46  ;;  %1112 = vmatpush1.bf16.msra.mxu1 %v2035_v47  ;;  %v1167_v46 = vld [vmem:[%s2669_s5 + $0x58] sm:$0xff] }
  0x3c   : > { %1070 = vmatprep.subr.bf16.mxu0 %v2042_v48  ;;  %1113 = vmatprep.subr.bf16.mxu1 %v2044_v49  ;;  %v1171_v47 = vld [vmem:[%s2669_s5 + $0x78] sm:$0xff]  ;;  %v2070_v48 = vcombine.low %v1158_v35, %v1162_v36  ;;  %v2072_v49 = vcombine.low %v1159_v37, %v1163_v38 }
  0x3d   : > { %1100 = vmatprep.mubr.bf16.mxu0 %v2192_v8  ;;  %1143 = vmatprep.mubr.bf16.mxu1 %v2192_v8  ;;  %v2081_v51 = vcombine.high %v1167_v46, %v1171_v47 }
  0x3f   : > { %1071 = vmatpush1.bf16.msra.mxu0 %v2041_v54  ;;  %1114 = vmatpush1.bf16.msra.mxu1 %v2043_v55  ;;  %v1175_v54 = vld [vmem:[%s2669_s5 + $0x98] sm:$0xff] }
  0x40   : > { %1072 = vmatprep.subr.bf16.mxu0 %v2050_v56  ;;  %1115 = vmatprep.subr.bf16.mxu1 %v2052_v57  ;;  %v1179_v55 = vld [vmem:[%s2669_s5 + $0xb8] sm:$0xff]  ;;  %v2080_v57 = vcombine.low %v1167_v46, %v1171_v47 }
  0x41   : > { %v2089_v59 = vcombine.high %v1175_v54, %v1179_v55 }
  0x43   : > { %1073 = vmatpush1.bf16.msra.mxu0 %v2049_v62  ;;  %1116 = vmatpush1.bf16.msra.mxu1 %v2051_v63  ;;  %v1183_v62 = vld [vmem:[%s2669_s5 + $0xd8] sm:$0xff] }
  0x44   : > { %1074 = vmatprep.subr.bf16.mxu0 %v2058_v0  ;;  %1117 = vmatprep.subr.bf16.mxu1 %v2060_v1  ;;  %v1187_v63 = vld [vmem:[%s2669_s5 + $0xf8] sm:$0xff]  ;;  %v2086_v0 = vcombine.low %v1174_v52, %v1178_v53  ;;  %v2088_v1 = vcombine.low %v1175_v54, %v1179_v55 }
  0x45   : > { %v2097_v3 = vcombine.high %v1183_v62, %v1187_v63  ;;  %v2096_v5 = vcombine.low %v1183_v62, %v1187_v63 }
  0x47   : > { %1075 = vmatpush1.bf16.msra.mxu0 %v2057_v6  ;;  %1118 = vmatpush1.bf16.msra.mxu1 %v2059_v7 }
  0x48   : > { %1356 = vmatprep.subr.bf16.mxu0 %v2067_v9  ;;  %1399 = vmatprep.subr.bf16.mxu1 %v2069_v10  ;;  %v2612_v9 = vld [vmem:[%s2670_s6] sm:$0xff] }
  0x4a   : > { %2063 = vmatmul.mubr.msk.bf16.vlgmr.msra.gmra.mrb[4].mxu0 %vm638_vm0, %v2455_v43  ;;  %2064 = vmatmul.mubr.msk.bf16.vlgmr.msra.gmra.mrb[4].mxu1 %vm638_vm0, %v2455_v43  ;;  %v1166_v43 = vld [vmem:[%s2669_s5 + $0x50] sm:$0xff] }
  0x4b   : > { %1357 = vmatpush1.bf16.msra.mxu0 %v2066_v15  ;;  %1400 = vmatpush1.bf16.msra.mxu1 %v2068_v16  ;;  %v2079_v50 = vcombine.high %v1166_v43, %v1170_v44  ;;  %v2078_v56 = vcombine.low %v1166_v43, %v1170_v44 }
  0x4c   : > { %1358 = vmatprep.subr.bf16.mxu0 %v2075_v17  ;;  %1401 = vmatprep.subr.bf16.mxu1 %v2077_v18 }
  0x4d   : > { %1388 = vmatprep.mubr.bf16.mxu0 %v2192_v8  ;;  %1431 = vmatprep.mubr.bf16.mxu1 %v2192_v8 }
  0x4f   : > { %1359 = vmatpush1.bf16.msra.mxu0 %v2074_v23  ;;  %1402 = vmatpush1.bf16.msra.mxu1 %v2076_v24 }
  0x50   : > { %1360 = vmatprep.subr.bf16.mxu0 %v2083_v25  ;;  %1403 = vmatprep.subr.bf16.mxu1 %v2085_v26 }
  0x53   : > { %1361 = vmatpush1.bf16.msra.mxu0 %v2082_v31  ;;  %1404 = vmatpush1.bf16.msra.mxu1 %v2084_v32 }
  0x54   : > { %1362 = vmatprep.subr.bf16.mxu0 %v2091_v33  ;;  %1405 = vmatprep.subr.bf16.mxu1 %v2093_v34 }
  0x57   : > { %1363 = vmatpush1.bf16.msra.mxu0 %v2090_v39  ;;  %1406 = vmatpush1.bf16.msra.mxu1 %v2092_v40 }
  0x58   : > { %1442 = vmatprep.subr.bf16.mxu0 %v2071_v41  ;;  %1485 = vmatprep.subr.bf16.mxu1 %v2073_v42 }
  0x5a   : > { %2098 = vmatmul.mubr.msk.bf16.vlgmr.msra.gmra.mrb[0].mxu0 %vm638_vm0, %v2167_v45  ;;  %2099 = vmatmul.mubr.msk.bf16.vlgmr.msra.gmra.mrb[0].mxu1 %vm638_vm0, %v2167_v45 }
  0x5b   : > { %1443 = vmatpush1.bf16.msra.mxu0 %v2070_v48  ;;  %1486 = vmatpush1.bf16.msra.mxu1 %v2072_v49 }
  0x5c   : > { %1444 = vmatprep.subr.bf16.mxu0 %v2079_v50  ;;  %1487 = vmatprep.subr.bf16.mxu1 %v2081_v51 }
  0x5d   : > { %1474 = vmatprep.mubr.bf16.mxu0 %v2192_v8  ;;  %1517 = vmatprep.mubr.bf16.mxu1 %v2192_v8  ;;  %v1546_v8 = vlaneseq }
  0x5f   : > { %1445 = vmatpush1.bf16.msra.mxu0 %v2078_v56  ;;  %1488 = vmatpush1.bf16.msra.mxu1 %v2080_v57  ;;  %v2606_v6 = vshrl.u32 %v1546_v8, 7 }
  0x60   : > { %1446 = vmatprep.subr.bf16.mxu0 %v2087_v58  ;;  %1489 = vmatprep.subr.bf16.mxu1 %v2089_v59 }
  0x61   : > { %v1548_v7 = vsub.s32 0, %v2606_v6  ;;  %v1556_v10 = vsub.s32 2, %v2606_v6  ;;  %v1552_v11 = vsub.s32 1, %v2606_v6  ;;  %v1560_v12 = vsub.s32 3, %v2606_v6 }
  0x62   : > { %v1564_v53 = vsub.s32 4, %v2606_v6  ;;  %v1572_v54 = vsub.s32 6, %v2606_v6  ;;  %v1568_v58 = vsub.s32 5, %v2606_v6 }
  0x63   : > { %1447 = vmatpush1.bf16.msra.mxu0 %v2086_v0  ;;  %1490 = vmatpush1.bf16.msra.mxu1 %v2088_v1  ;;  %v1549_v14 = vrot.slane %v2612_v9, %v1548_v7  ;;  %v1557_v15 = vrot.slane %v2612_v9, %v1556_v10  ;;  %v1553_v16 = vrot.slane %v2612_v9, %v1552_v11 }
  0x64   : > { %1448 = vmatprep.subr.bf16.mxu0 %v2095_v2  ;;  %1491 = vmatprep.subr.bf16.mxu1 %v2097_v3  ;;  %v1607_v17 = vrot.slane %v2620_v13, %v1548_v7  ;;  %v1561_v18 = vrot.slane %v2612_v9, %v1560_v12  ;;  %v1615_v20 = vrot.slane %v2620_v13, %v1556_v10  ;;  %v1576_v2 = vsub.s32 7, %v2606_v6 }
  0x65   : > { %v1611_v21 = vrot.slane %v2620_v13, %v1552_v11  ;;  %v1619_v25 = vrot.slane %v2620_v13, %v1560_v12  ;;  %v1565_v7 = vrot.slane %v2612_v9, %v1564_v53  ;;  %v1573_v12 = vrot.slane %v2612_v9, %v1572_v54 }
  0x67   : > { %1449 = vmatpush1.bf16.msra.mxu0 %v2094_v4  ;;  %1492 = vmatpush1.bf16.msra.mxu1 %v2096_v5 }
  0x6a   : > { %2100 = vmatmul.mubr.msk.bf16.vlgmr.msra.gmra.mrb[4].mxu0 %vm638_vm0, %v2167_v45  ;;  %2101 = vmatmul.mubr.msk.bf16.vlgmr.msra.gmra.mrb[4].mxu1 %vm638_vm0, %v2167_v45 }
 0x12d   : > { %v1390_v19 = vpop.f32.mrb[0].mxu0  ;;  %v1433_v23 = vpop.f32.mrb[0].mxu1 }
 0x12e   : > { %v1586_v22 = vmul.f32 %v1549_v14, %v1390_v19  ;;  %v1392_v24 = vpop.f32.mrb[1].mxu0  ;;  %v1588_v26 = vmul.f32 %v1557_v15, %v1433_v23  ;;  %v1435_v28 = vpop.f32.mrb[1].mxu1  ;;  %v1623_v23 = vrot.slane %v2620_v13, %v1564_v53 }
 0x12f   : > { %v1587_v27 = vmul.f32 %v1553_v16, %v1392_v24  ;;  %v1394_v29 = vpop.f32.mrb[2].mxu0  ;;  %v1589_v31 = vmul.f32 %v1561_v18, %v1435_v28  ;;  %v1437_v33 = vpop.f32.mrb[2].mxu1  ;;  %v1631_v28 = vrot.slane %v2620_v13, %v1572_v54 }
 0x130   : > { %v1644_v30 = vadd.f32 %v1607_v17, %v1586_v22  ;;  %v1594_v32 = vmul.f32 %v1549_v14, %v1394_v29  ;;  %v1396_v34 = vpop.f32.mrb[3].mxu0  ;;  %v1646_v35 = vadd.f32 %v1615_v20, %v1588_v26  ;;  %v1596_v37 = vmul.f32 %v1557_v15, %v1437_v33  ;;  %v1439_v39 = vpop.f32.mrb[3].mxu1 }
 0x131   : > { %v1645_v36 = vadd.f32 %v1611_v21, %v1587_v27  ;;  %v1595_v38 = vmul.f32 %v1553_v16, %v1396_v34  ;;  %v1647_v41 = vadd.f32 %v1619_v25, %v1589_v31  ;;  %v1597_v43 = vmul.f32 %v1561_v18, %v1439_v39 }
 0x132   : > { %v1660_v40 = vmul.f32 0.2, %v1644_v30  ;;  %v1652_v42 = vadd.f32 %v1607_v17, %v1594_v32  ;;  %v1662_v44 = vmul.f32 0.2, %v1646_v35  ;;  %v1654_v46 = vadd.f32 %v1615_v20, %v1596_v37 }
 0x133   : > { %v1661_v45 = vmul.f32 0.2, %v1645_v36  ;;  %v1653_v47 = vadd.f32 %v1611_v21, %v1595_v38  ;;  %v1663_v48 = vmul.f32 0.2, %v1647_v41  ;;  %v1655_v50 = vadd.f32 %v1619_v25, %v1597_v43 }
 0x134   : > { %v1668_v49 = vmul.f32 0.2, %v1652_v42  ;;  %v1670_v51 = vmul.f32 0.2, %v1654_v46  ;;  %v1676_v55 = vmax.f32 %v1644_v30, %v1660_v40  ;;  %v1678_v59 = vmax.f32 %v1646_v35, %v1662_v44 }
 0x135   : > { %v1669_v52 = vmul.f32 0.2, %v1653_v47  ;;  %v1671_v57 = vmul.f32 0.2, %v1655_v50  ;;  %v1677_v60 = vmax.f32 %v1645_v36, %v1661_v45  ;;  %v1679_v63 = vmax.f32 %v1647_v41, %v1663_v48 }
 0x136   : > { %v1684_v56 = vmax.f32 %v1652_v42, %v1668_v49  ;;  %v1686_v61 = vmax.f32 %v1654_v46, %v1670_v51  ;;  %v1569_v16 = vrot.slane %v2612_v9, %v1568_v58  ;;  %v1577_v17 = vrot.slane %v2612_v9, %v1576_v2 }
 0x137   : > { %v1685_v62 = vmax.f32 %v1653_v47, %v1669_v52  ;;  %v1687_v1 = vmax.f32 %v1655_v50, %v1671_v57  ;;  %v2193_v20 = vmov 1966171168   ;;  %v1627_v33 = vrot.slane %v2620_v13, %v1568_v58 }
 0x138   : > { %v1692_v0 = vmax.f32 %v1676_v55, %v1684_v56  ;;  %v1706_v3 = vmax.f32 %v1678_v59, %v1686_v61  ;;  %v1765_v21 = vunpack.c.l.s4 %v2193_v20  ;;  %v1635_v38 = vrot.slane %v2620_v13, %v1576_v2 }
 0x139   : > { %v1699_v4 = vmax.f32 %v1677_v60, %v1685_v62  ;;  %v1713_v8 = vmax.f32 %v1679_v63, %v1687_v1 }
 0x13a   : > { %v1693_v5 = vrot.slane %v1692_v0, 4  ;;  %v1707_v10 = vrot.slane %v1706_v3, 4  ;;  %v1766_v43 = vunpack.c.0.s8 %v1765_v21 }
 0x13b   : > { %v1700_v11 = vrot.slane %v1699_v4, 4  ;;  %v1714_v15 = vrot.slane %v1713_v8, 4 }
 0x13c   : > { %v1694_v14 = vmax.f32 %v1692_v0, %v1693_v5  ;;  %v1708_v18 = vmax.f32 %v1706_v3, %v1707_v10  ;;  %v2643_v13 = vsub.s32 %v1766_v43, %v2606_v6 }
 0x13d   : > { %v1701_v19 = vmax.f32 %v1699_v4, %v1700_v11  ;;  %v1476_v22 = vpop.f32.mrb[4].mxu0  ;;  %v1715_v25 = vmax.f32 %v1713_v8, %v1714_v15  ;;  %v1519_v27 = vpop.f32.mrb[4].mxu1 }
 0x13e   : > { %v1695_v24 = vrot.slane %v1694_v14, 2  ;;  %v1590_v26 = vmul.f32 %v1565_v7, %v1476_v22  ;;  %v1478_v29 = vpop.f32.mrb[5].mxu0  ;;  %v1709_v30 = vrot.slane %v1708_v18, 2  ;;  %v1592_v32 = vmul.f32 %v1573_v12, %v1519_v27  ;;  %v1521_v9 = vpop.f32.mrb[5].mxu1 }
 0x13f   : > { %v1702_v31 = vrot.slane %v1701_v19, 2  ;;  %v1480_v34 = vpop.f32.mrb[6].mxu0  ;;  %v1716_v36 = vrot.slane %v1715_v25, 2  ;;  %v1591_v37 = vmul.f32 %v1569_v16, %v1478_v29  ;;  %v1523_v39 = vpop.f32.mrb[6].mxu1  ;;  %v1593_v44 = vmul.f32 %v1577_v17, %v1521_v9 }
 0x140   : > { %v1696_v35 = vmax.f32 %v1694_v14, %v1695_v24  ;;  %v1482_v40 = vpop.f32.mrb[7].mxu0  ;;  %v1710_v41 = vmax.f32 %v1708_v18, %v1709_v30  ;;  %v1525_v45 = vpop.f32.mrb[7].mxu1  ;;  %v1648_v48 = vadd.f32 %v1623_v23, %v1590_v26  ;;  %v1650_v51 = vadd.f32 %v1631_v28, %v1592_v32 }
 0x141   : > { %v1703_v42 = vmax.f32 %v1701_v19, %v1702_v31  ;;  %v1717_v47 = vmax.f32 %v1715_v25, %v1716_v36  ;;  %v1649_v54 = vadd.f32 %v1627_v33, %v1591_v37  ;;  %v1651_v57 = vadd.f32 %v1635_v38, %v1593_v44 }
 0x142   : > { %v1697_v46 = vrot.slane %v1696_v35, 1  ;;  %v1711_v49 = vrot.slane %v1710_v41, 1  ;;  %v1664_v59 = vmul.f32 0.2, %v1648_v48  ;;  %v1598_v60 = vmul.f32 %v1565_v7, %v1480_v34 }
 0x143   : > { %v1704_v50 = vrot.slane %v1703_v42, 1  ;;  %v1718_v53 = vrot.slane %v1717_v47, 1  ;;  %v1600_v61 = vmul.f32 %v1573_v12, %v1523_v39  ;;  %v1666_v63 = vmul.f32 0.2, %v1650_v51 }
 0x144   : > { %v1698_v52 = vmax.f32 %v1696_v35, %v1697_v46  ;;  %v1712_v55 = vmax.f32 %v1710_v41, %v1711_v49  ;;  %v1599_v0 = vmul.f32 %v1569_v16, %v1482_v40  ;;  %v1601_v1 = vmul.f32 %v1577_v17, %v1525_v45 }
 0x145   : > { %v1705_v56 = vmax.f32 %v1703_v42, %v1704_v50  ;;  %v1719_v58 = vmax.f32 %v1717_v47, %v1718_v53  ;;  %v1665_v3 = vmul.f32 0.2, %v1649_v54  ;;  %v1656_v4 = vadd.f32 %v1623_v23, %v1598_v60 }
 0x146   : > { %v1658_v5 = vadd.f32 %v1631_v28, %v1600_v61  ;;  %v1667_v10 = vmul.f32 0.2, %v1651_v57  ;;  %v1657_v11 = vadd.f32 %v1627_v33, %v1599_v0  ;;  %v1659_v14 = vadd.f32 %v1635_v38, %v1601_v1 }
 0x147   : > { %v1760_v62 = vcombine.low %v1698_v52, %v1705_v56  ;;  %v1761_v2 = vcombine.low %v1712_v55, %v1719_v58  ;;  %v1672_v15 = vmul.f32 0.2, %v1656_v4  ;;  %v1680_v19 = vmax.f32 %v1648_v48, %v1664_v59 }
 0x148   : > { %v1674_v18 = vmul.f32 0.2, %v1658_v5  ;;  %v1673_v7 = vmul.f32 0.2, %v1657_v11  ;;  %v1675_v12 = vmul.f32 0.2, %v1659_v14  ;;  %v1682_v21 = vmax.f32 %v1650_v51, %v1666_v63 }
 0x149   : > { %v1770_v8 = vrot.slane %v1760_v62, %v2643_v13  ;;  %v1777_v6 = vrot.slane %v1761_v2, %v2643_v13  ;;  %v1688_v16 = vmax.f32 %v1656_v4, %v1672_v15  ;;  %v1681_v22 = vmax.f32 %v1649_v54, %v1665_v3 }
 0x14a   : > { %v1690_v17 = vmax.f32 %v1658_v5, %v1674_v18  ;;  %v1683_v24 = vmax.f32 %v1651_v57, %v1667_v10  ;;  %v1689_v23 = vmax.f32 %v1657_v11, %v1673_v7  ;;  %v1691_v25 = vmax.f32 %v1659_v14, %v1675_v12 }
 0x14b   : > { %v1792_v20 = vcombine.low %v1770_v8, %v1777_v6  ;;  %v1720_v26 = vmax.f32 %v1680_v19, %v1688_v16 }
 0x14c   : > { %v1734_v27 = vmax.f32 %v1682_v21, %v1690_v17  ;;  %v1727_v28 = vmax.f32 %v1681_v22, %v1689_v23  ;;  %v1741_v29 = vmax.f32 %v1683_v24, %v1691_v25 }
 0x14d   : > { %v1721_v30 = vrot.slane %v1720_v26, 4  ;;  %v1800_v58 = vrot.slane %v1792_v20, %v2643_v13 }
 0x14e   : > { %v1735_v31 = vrot.slane %v1734_v27, 4  ;;  %v1728_v32 = vrot.slane %v1727_v28, 4  ;;  %v1742_v33 = vrot.slane %v1741_v29, 4 }
 0x14f   : > { %v1722_v9 = vmax.f32 %v1720_v26, %v1721_v30 }
 0x150   : > { %v1736_v34 = vmax.f32 %v1734_v27, %v1735_v31  ;;  %v1729_v35 = vmax.f32 %v1727_v28, %v1728_v32  ;;  %v1743_v36 = vmax.f32 %v1741_v29, %v1742_v33 }
 0x151   : > { %v1723_v37 = vrot.slane %v1722_v9, 2 }
 0x152   : > { %v1737_v38 = vrot.slane %v1736_v34, 2  ;;  %v1730_v39 = vrot.slane %v1729_v35, 2  ;;  %v1744_v40 = vrot.slane %v1743_v36, 2 }
 0x153   : > { %v1724_v41 = vmax.f32 %v1722_v9, %v1723_v37 }
 0x154   : > { %v1738_v42 = vmax.f32 %v1736_v34, %v1737_v38  ;;  %v1731_v43 = vmax.f32 %v1729_v35, %v1730_v39  ;;  %v1745_v44 = vmax.f32 %v1743_v36, %v1744_v40 }
 0x155   : > { %v1725_v45 = vrot.slane %v1724_v41, 1 }
 0x156   : > { %v1739_v46 = vrot.slane %v1738_v42, 1  ;;  %v1732_v47 = vrot.slane %v1731_v43, 1  ;;  %v1746_v48 = vrot.slane %v1745_v44, 1 }
 0x157   : > { %v1726_v49 = vmax.f32 %v1724_v41, %v1725_v45 }
 0x158   : > { %v1740_v50 = vmax.f32 %v1738_v42, %v1739_v46  ;;  %v1733_v51 = vmax.f32 %v1731_v43, %v1732_v47  ;;  %v1747_v52 = vmax.f32 %v1745_v44, %v1746_v48 }
 0x15a   : > { %v1762_v53 = vcombine.low %v1726_v49, %v1733_v51  ;;  %v1763_v54 = vcombine.low %v1740_v50, %v1747_v52 }
 0x15c   : > { %v1784_v55 = vrot.slane %v1762_v53, %v2643_v13  ;;  %v1791_v56 = vrot.slane %v1763_v54, %v2643_v13 }
 0x15e   : > { %v1793_v57 = vcombine.low %v1784_v55, %v1791_v56 }
 0x160   : > { %v1807_v59 = vrot.slane %v1793_v57, %v2643_v13 }
 0x162   : > { %v1808_v60 = vcombine.low %v1800_v58, %v1807_v59 }
 0x164   : > { %1810 = vst [vmem:[%s403_s13] sm:$0xff] %v1808_v60 }
 0x165 PF: > { %s18_s29 = sadd.s32 1, %s2190_s29   ;;  %s2673_s27 = smov %s2186_s28 }
 0x166   : > { %p15_p5 = scmp.ge.s32.totalorder %s18_s29, 4   ;;  %s2674_s28 = smov %s2676_s30 }
 0x168   :  { %17 = sbr.rel (!%p15_p5) target bundleno = 2 (0x2), region = 96 }

// kernel: dgcnn_partseg_forward.29
= control target key start
LH: loop header
LB: loop body
LE: loop exit
PB: predicated region body
PF: predicated region fallthrough
CT: control target
= control target key end

     0   :  { %s3631_s24 = smov 0   ;;  %s3633_s25 = smov 0   ;;  %s4409_s0 = inlined_call_operand.vmem [shape: bf16[2,1,1088], index: 0, kind: input, shape index: {}]   ;;  %s4410_s1 = inlined_call_operand.vmem [shape: bf16[2,16,64], index: 1, kind: input, shape index: {}]   ;;  %s4411_s2 = inlined_call_operand.vmem [shape: bf16[2,16,64], index: 2, kind: input, shape index: {}]   ;;  %s4412_s3 = inlined_call_operand.vmem [shape: bf16[2,16,64], index: 3, kind: input, shape index: {}]   ;;  %s4413_s4 = inlined_call_operand.vmem [shape: bf16[1088,256], index: 4, kind: input, shape index: {}]   ;;  %s4414_s5 = inlined_call_operand.vmem [shape: bf16[64,256], index: 5, kind: input, shape index: {}]   ;;  %s4415_s6 = inlined_call_operand.vmem [shape: bf16[64,256], index: 6, kind: input, shape index: {}]   ;;  %s4416_s7 = inlined_call_operand.vmem [shape: bf16[64,256], index: 7, kind: input, shape index: {}]   ;;  %s4417_s8 = inlined_call_operand.vmem [shape: f32[1,256], index: 8, kind: input, shape index: {}]   ;;  %s4418_s9 = inlined_call_operand.vmem [shape: f32[1,256], index: 9, kind: input, shape index: {}]   ;;  %s4419_s10 = inlined_call_operand.vmem [shape: bf16[256,256], index: 10, kind: input, shape index: {}]   ;;  %s4420_s11 = inlined_call_operand.vmem [shape: f32[1,256], index: 11, kind: input, shape index: {}]   ;;  %s4421_s12 = inlined_call_operand.vmem [shape: f32[1,256], index: 12, kind: input, shape index: {}]   ;;  %s4422_s13 = inlined_call_operand.vmem [shape: bf16[256,128], index: 13, kind: input, shape index: {}]   ;;  %s4423_s14 = inlined_call_operand.vmem [shape: f32[1,128], index: 14, kind: input, shape index: {}]   ;;  %s4424_s15 = inlined_call_operand.vmem [shape: f32[1,128], index: 15, kind: input, shape index: {}]   ;;  %s4425_s16 = inlined_call_operand.vmem [shape: bf16[128,128], index: 16, kind: input, shape index: {}]   ;;  %s4426_s17 = inlined_call_operand.vmem [shape: f32[2,16,128], index: 17, kind: output, shape index: {}]  }
   0x1   :  { %4429 = sst [smem:[#allocation5_spill]] %s4409_s0  ;;  %s3635_s26 = smov 0  }
   0x2   :  { %4430 = sst [smem:[#allocation6_spill]] %s4410_s1 }
   0x3 LB: > { %4431 = sst [smem:[#allocation2_spill]] %s3531_s25  ;;  %s39_s27 = sadd.s32 1, %s3531_s25  ;;  %s3535_s26 = sphi %s3635_s26, %s27_s26   ;;  %s3531_s25 = sphi %s3633_s25, %s4438_s25   ;;  %s3527_s24 = sphi %s3631_s24, %s4437_s24  }
   0x4   : > { %4432 = sst [smem:[#allocation3_spill]] %s3535_s26  ;;  %p2854_p0 = scmp.ge.s32.totalorder %s3535_s26, 1 }
   0x5   : > { %p41_p1 = scmp.ge.s32.totalorder %s39_s27, 2  ;;  %p551_p2 = scmp.lt.s32.totalorder %s3535_s26, 3 }
   0x7   : > { %s4440_s27 = smov (%p41_p1, %s39_s27), 0  ;;  %p552_p3 = pnand %p2854_p0, %p551_p2 }
   0x8   : > { %4433 = sst [smem:[#allocation4_spill]] %s4440_s27  ;;  %v3197_v0 = vld [vmem:[%s4415_s6 + $0x4] ss:$8 sps:$4 sm:$0xff] (!%p552_p3)   ;;  %p633_p4 = scmp.lt.s32.totalorder (!%p552_p3), %s3527_s24, 1  ;;  %v3537_v2 = vmov (!%p552_p3), 0   ;;  %vm743_vm0 = vcmask (!%p552_p3), 523264   ;;  %v1130_v38 = vlaneseq (!%p552_p3) }
   0x9   : > { %555 = sbr.rel (%p552_p3) target bundleno = 1132 (0x46c), region = 88  ;;  %v3199_v1 = vld [vmem:[%s4414_s5 + $0x4] ss:$8 sps:$4 sm:$0xff] (!%p552_p3)   ;;  %779 = vmatprep.mubr.bf16.mxu1 (!%p552_p3), %v3537_v2  ;;  %870 = vmatprep.mubr.bf16.mxu0 (!%p552_p3), %v3537_v2  ;;  %v3201_v3 = vld [vmem:[%s4415_s6] ss:$8 sps:$4 sm:$0xff] (!%p552_p3)   ;;  %s4434_s25 = sld [smem:[#allocation6_spill]] (!%p552_p3) }
   0xa   : > { %747 = vmatprep.subr.bf16.mxu1 (!%p552_p3), %v3197_v0  ;;  %v3202_v4 = vld [vmem:[%s4414_s5] ss:$8 sps:$4 sm:$0xff] (!%p552_p3)   ;;  %838 = vmatprep.subr.bf16.mxu0 (!%p552_p3), %v3199_v1  ;;  %v3203_v5 = vld [vmem:[%s4415_s6 + $0x14] ss:$8 sps:$4 sm:$0xff] (!%p552_p3)   ;;  %v3207_v7 = vld [vmem:[%s4415_s6 + $0x10] ss:$8 sps:$4 sm:$0xff] (!%p552_p3)  }
   0xb   : > { %748 = vmatpush1.bf16.msra.mxu1 (!%p552_p3), %v3201_v3  ;;  %839 = vmatpush1.bf16.msra.mxu0 (!%p552_p3), %v3202_v4  ;;  %v3205_v6 = vld [vmem:[%s4414_s5 + $0x14] ss:$8 sps:$4 sm:$0xff] (!%p552_p3)   ;;  %v3208_v8 = vld [vmem:[%s4414_s5 + $0x10] ss:$8 sps:$4 sm:$0xff] (!%p552_p3)   ;;  %v3209_v9 = vld [vmem:[%s4415_s6 + $0x24] ss:$8 sps:$4 sm:$0xff] (!%p552_p3)  }
   0xc   : > { %749 = vmatprep.subr.bf16.mxu1 (!%p552_p3), %v3203_v5  ;;  %840 = vmatprep.subr.bf16.mxu0 (!%p552_p3), %v3205_v6  ;;  %v3211_v10 = vld [vmem:[%s4414_s5 + $0x24] ss:$8 sps:$4 sm:$0xff] (!%p552_p3)   ;;  %v3213_v11 = vld [vmem:[%s4415_s6 + $0x20] ss:$8 sps:$4 sm:$0xff] (!%p552_p3)   ;;  %v3215_v13 = vld [vmem:[%s4415_s6 + $0x34] ss:$8 sps:$4 sm:$0xff] (!%p552_p3)  }
   0xd   : > { %v3214_v12 = vld [vmem:[%s4414_s5 + $0x20] ss:$8 sps:$4 sm:$0xff] (!%p552_p3)   ;;  %v3217_v14 = vld [vmem:[%s4414_s5 + $0x34] ss:$8 sps:$4 sm:$0xff] (!%p552_p3)   ;;  %v3219_v15 = vld [vmem:[%s4415_s6 + $0x30] ss:$8 sps:$4 sm:$0xff] (!%p552_p3)  }
   0xe   : > { %v3220_v16 = vld [vmem:[%s4414_s5 + $0x30] ss:$8 sps:$4 sm:$0xff] (!%p552_p3)   ;;  %v3224_v18 = vld [vmem:[%s4416_s7 + $0x4] ss:$8 sps:$4 sm:$0xff] (!%p552_p3)   ;;  %v3222_v21 = vld [vmem:[%s4416_s7] ss:$8 sps:$4 sm:$0xff] (!%p552_p3)  }
   0xf   : > { %750 = vmatpush1.bf16.msra.mxu1 (!%p552_p3), %v3207_v7  ;;  %841 = vmatpush1.bf16.msra.mxu0 (!%p552_p3), %v3208_v8  ;;  %v3227_v19 = vld [vmem:[%s4413_s4 + $0x104] ss:$8 sps:$4 sm:$0xff] (!%p552_p3)   ;;  %v3225_v22 = vld [vmem:[%s4413_s4 + $0x100] ss:$8 sps:$4 sm:$0xff] (!%p552_p3)   ;;  %v3231_v23 = vld [vmem:[%s4416_s7 + $0x14] ss:$8 sps:$4 sm:$0xff] (!%p552_p3)  }
  0x10   : > { %s4442_s24 = smov (!%p633_p4, %s3527_s24), 1  ;;  %751 = vmatprep.subr.bf16.mxu1 %v3209_v9  ;;  %842 = vmatprep.subr.bf16.mxu0 %v3211_v10  ;;  %v3234_v24 = vld [vmem:[%s4413_s4 + $0x114] ss:$8 sps:$4 sm:$0xff]   ;;  %v3229_v25 = vld [vmem:[%s4416_s7 + $0x10] ss:$8 sps:$4 sm:$0xff]   ;;  %v3777_v43 = vshrl.u32 %v1130_v38, 7 }
  0x11   : > { %s3681_s20 = sshll.u32 %s4442_s24, 3  ;;  %v3232_v26 = vld [vmem:[%s4413_s4 + $0x110] ss:$8 sps:$4 sm:$0xff]   ;;  %v3237_v27 = vld [vmem:[%s4416_s7 + $0x24] ss:$8 sps:$4 sm:$0xff]   ;;  %s3168_s21 = smul.u32 9, %s4442_s24 }
  0x12   : > { %s655_s23 = scalar_lea.vmem %s4411_s2, %s3681_s20  ;;  %s645_s26 = scalar_lea.vmem %s4434_s25, %s3681_s20  ;;  %v3240_v28 = vld [vmem:[%s4413_s4 + $0x124] ss:$8 sps:$4 sm:$0xff]   ;;  %v3235_v29 = vld [vmem:[%s4416_s7 + $0x20] ss:$8 sps:$4 sm:$0xff]   ;;  %v3243_v31 = vld [vmem:[%s4416_s7 + $0x34] ss:$8 sps:$4 sm:$0xff]  }
  0x13   : > { %752 = vmatpush1.bf16.msra.mxu1 %v3213_v11  ;;  %843 = vmatpush1.bf16.msra.mxu0 %v3214_v12  ;;  %v3221_v17 = vld [vmem:[%s655_s23] sm:$0xff]   ;;  %s665_s0 = scalar_lea.vmem %s4412_s3, %s3681_s20  ;;  %v3246_v32 = vld [vmem:[%s4413_s4 + $0x134] ss:$8 sps:$4 sm:$0xff]   ;;  %v3241_v33 = vld [vmem:[%s4416_s7 + $0x30] ss:$8 sps:$4 sm:$0xff]   ;;  %s4435_s29 = sld [smem:[#allocation5_spill]] }
  0x14   : > { %753 = vmatprep.subr.bf16.mxu1 %v3215_v13  ;;  %844 = vmatprep.subr.bf16.mxu0 %v3217_v14  ;;  %v3228_v20 = vld [vmem:[%s645_s26] sm:$0xff]   ;;  %v3244_v34 = vld [vmem:[%s4413_s4 + $0x130] ss:$8 sps:$4 sm:$0xff]   ;;  %v3538_v36 = vmov 1966171168   ;;  %vm3540_vm1 = vmmov 0  }
  0x15   : > { %v3238_v30 = vld [vmem:[%s4413_s4 + $0x120] ss:$8 sps:$4 sm:$0xff]   ;;  %v3250_v35 = vld [vmem:[%s4413_s4 + $0x144] ss:$8 sps:$4 sm:$0xff]   ;;  %v1128_v37 = vunpack.c.l.s4 %v3538_v36  ;;  %v3253_v41 = vld [vmem:[%s4413_s4 + $0x154] ss:$8 sps:$4 sm:$0xff]  }
  0x16   : > { %v3247_v39 = vld [vmem:[%s665_s0] sm:$0xff]   ;;  %v3251_v44 = vld [vmem:[%s4413_s4 + $0x150] ss:$8 sps:$4 sm:$0xff]   ;;  %v3259_v49 = vld [vmem:[%s4413_s4 + $0x174] ss:$8 sps:$4 sm:$0xff]   ;;  %s3094_s30 = sshll.u32 %s4442_s24, 4 }
  0x17   : > { %754 = vmatpush1.bf16.msra.mxu1 %v3219_v15  ;;  %845 = vmatpush1.bf16.msra.mxu0 %v3220_v16  ;;  %v3248_v40 = vld [vmem:[%s4413_s4 + $0x140] ss:$8 sps:$4 sm:$0xff]   ;;  %v1129_v42 = vunpack.c.0.s8 %v1128_v37  ;;  %v3256_v45 = vld [vmem:[%s4413_s4 + $0x164] ss:$8 sps:$4 sm:$0xff]   ;;  %v3257_v52 = vld [vmem:[%s4413_s4 + $0x170] ss:$8 sps:$4 sm:$0xff]   ;;  %s675_s19 = scalar_lea.vmem %s4426_s17, %s3094_s30 }
  0x18   : > { %939 = vmatprep.subr.bf16.mxu0 %v3224_v18  ;;  %1921 = vmatprep.subr.bf16.mxu1 %v3227_v19  ;;  %v3254_v47 = vld [vmem:[%s4413_s4 + $0x160] ss:$8 sps:$4 sm:$0xff]   ;;  %v3262_v53 = vld [vmem:[%s4413_s4 + $0x184] ss:$8 sps:$4 sm:$0xff]   ;;  %v3265_v57 = vld [vmem:[%s4413_s4 + $0x194] ss:$8 sps:$4 sm:$0xff]  }
  0x19   : > { %s3789_s23 = scalar_lea.vmem %s4435_s29, %s3168_s21  ;;  %v3792_v46 = vsub.s32 %v1129_v42, %v3777_v43  ;;  %v3260_v56 = vld [vmem:[%s4413_s4 + $0x180] ss:$8 sps:$4 sm:$0xff]   ;;  %v3263_v58 = vld [vmem:[%s4413_s4 + $0x190] ss:$8 sps:$4 sm:$0xff]   ;;  %v3268_v59 = vld [vmem:[%s4413_s4 + $0x1a4] ss:$8 sps:$4 sm:$0xff]  }
  0x1a   : > { %2872 = vmatmul.mubr.msk.bf16.vlgmr.msra.gmra.mrb[0].mxu1 %vm743_vm0, %v3221_v17  ;;  %2882 = vmatmul.mubr.msk.bf16.vlgmr.msra.gmra.mrb[0].mxu0 %vm743_vm0, %v3228_v20  ;;  %v986_v48 = vld [vmem:[%s3789_s23] sm:$0xff]  ;;  %v3271_v61 = vld [vmem:[%s4413_s4 + $0x1b4] ss:$8 sps:$4 sm:$0xff]   ;;  %v3269_v62 = vld [vmem:[%s4413_s4 + $0x1b0] ss:$8 sps:$4 sm:$0xff]  }
  0x1b   : > { %940 = vmatpush1.bf16.msra.mxu0 %v3222_v21  ;;  %1922 = vmatpush1.bf16.msra.mxu1 %v3225_v22  ;;  %v1133_v50 = vrot.slane %v986_v48, %v3792_v46  ;;  %v3266_v60 = vld [vmem:[%s4413_s4 + $0x1a0] ss:$8 sps:$4 sm:$0xff]   ;;  %v3274_v63 = vld [vmem:[%s4413_s4 + $0x1c4] ss:$8 sps:$4 sm:$0xff]   ;;  %v3277_v1 = vld [vmem:[%s4413_s4 + $0x1d4] ss:$8 sps:$4 sm:$0xff]   ;;  %v1126_v4 = vcombine.high %v986_v48, %v986_v48 }
  0x1c   : > { %941 = vmatprep.subr.bf16.mxu0 %v3231_v23  ;;  %1923 = vmatprep.subr.bf16.mxu1 %v3234_v24  ;;  %v3272_v0 = vld [vmem:[%s4413_s4 + $0x1c0] ss:$8 sps:$4 sm:$0xff]   ;;  %v3275_v3 = vld [vmem:[%s4413_s4 + $0x1d0] ss:$8 sps:$4 sm:$0xff]   ;;  %v3347_v6 = vld [vmem:[%s4413_s4 + $0x4] ss:$8 sps:$4 sm:$0xff]  }
  0x1d   : > { %971 = vmatprep.mubr.bf16.mxu0 %v3537_v2  ;;  %v1141_v51 = vcombine.high %v1133_v50, %v1133_v50  ;;  %v3345_v5 = vld [vmem:[%s4413_s4] ss:$8 sps:$4 sm:$0xff]   ;;  %v3280_v7 = vld [vmem:[%s4413_s4 + $0x1e4] ss:$8 sps:$4 sm:$0xff]   ;;  %v3351_v8 = vld [vmem:[%s4413_s4 + $0x10] ss:$8 sps:$4 sm:$0xff]   ;;  %v3861_v11 = vrot.slane %v1126_v4, %v3792_v46  ;;  %v3870_v14 = vrot.slane %v1133_v50, %v3792_v46 }
  0x1e   : > { %v3353_v9 = vld [vmem:[%s4413_s4 + $0x14] ss:$8 sps:$4 sm:$0xff]   ;;  %v3278_v10 = vld [vmem:[%s4413_s4 + $0x1e0] ss:$8 sps:$4 sm:$0xff]   ;;  %v3359_v13 = vld [vmem:[%s4413_s4 + $0x24] ss:$8 sps:$4 sm:$0xff]  }
  0x1f   : > { %942 = vmatpush1.bf16.msra.mxu0 %v3229_v25  ;;  %1924 = vmatpush1.bf16.msra.mxu1 %v3232_v26  ;;  %v1163_v54 = vrot.slane %v1141_v51, %v3792_v46  ;;  %v3283_v12 = vld [vmem:[%s4413_s4 + $0x1f4] ss:$8 sps:$4 sm:$0xff]   ;;  %v3357_v15 = vld [vmem:[%s4413_s4 + $0x20] ss:$8 sps:$4 sm:$0xff]   ;;  %v3281_v16 = vld [vmem:[%s4413_s4 + $0x1f0] ss:$8 sps:$4 sm:$0xff]   ;;  %v1142_v17 = vcombine.high %v3861_v11, %v3861_v11  ;;  %v1171_v20 = vcombine.high %v3870_v14, %v3870_v14 }
  0x20   : > { %943 = vmatprep.subr.bf16.mxu0 %v3237_v27  ;;  %1925 = vmatprep.subr.bf16.mxu1 %v3240_v28  ;;  %v3365_v18 = vld [vmem:[%s4413_s4 + $0x34] ss:$8 sps:$4 sm:$0xff]   ;;  %v3286_v19 = vld [vmem:[%s4413_s4 + $0x204] ss:$8 sps:$4 sm:$0xff]   ;;  %v3363_v21 = vld [vmem:[%s4413_s4 + $0x30] ss:$8 sps:$4 sm:$0xff]  }
  0x21   : > { %v1173_v55 = vcombine.high %v1163_v54, %v1163_v54  ;;  %v3284_v22 = vld [vmem:[%s4413_s4 + $0x200] ss:$8 sps:$4 sm:$0xff]   ;;  %v3895_v23 = vrot.slane %v1142_v17, %v3792_v46  ;;  %v3289_v24 = vld [vmem:[%s4413_s4 + $0x214] ss:$8 sps:$4 sm:$0xff]   ;;  %v3371_v25 = vld [vmem:[%s4413_s4 + $0x44] ss:$8 sps:$4 sm:$0xff]  }
  0x22   : > { %v3369_v26 = vld [vmem:[%s4413_s4 + $0x40] ss:$8 sps:$4 sm:$0xff]   ;;  %v3287_v27 = vld [vmem:[%s4413_s4 + $0x210] ss:$8 sps:$4 sm:$0xff]   ;;  %v3377_v28 = vld [vmem:[%s4413_s4 + $0x54] ss:$8 sps:$4 sm:$0xff]  }
  0x23   : > { %944 = vmatpush1.bf16.msra.mxu0 %v3235_v29  ;;  %1926 = vmatpush1.bf16.msra.mxu1 %v3238_v30  ;;  %v3292_v29 = vld [vmem:[%s4413_s4 + $0x224] ss:$8 sps:$4 sm:$0xff]   ;;  %v3375_v30 = vld [vmem:[%s4413_s4 + $0x50] ss:$8 sps:$4 sm:$0xff]   ;;  %v3389_v36 = vld [vmem:[%s4413_s4 + $0x74] ss:$8 sps:$4 sm:$0xff]  }
  0x24   : > { %945 = vmatprep.subr.bf16.mxu0 %v3243_v31  ;;  %1927 = vmatprep.subr.bf16.mxu1 %v3246_v32  ;;  %v3290_v31 = vld [vmem:[%s4413_s4 + $0x220] ss:$8 sps:$4 sm:$0xff]   ;;  %v3383_v32 = vld [vmem:[%s4413_s4 + $0x64] ss:$8 sps:$4 sm:$0xff]   ;;  %v3387_v38 = vld [vmem:[%s4413_s4 + $0x70] ss:$8 sps:$4 sm:$0xff]  }
  0x25   : > { %1953 = vmatprep.mubr.bf16.mxu1 %v1173_v55  ;;  %v3298_v37 = vld [vmem:[%s4413_s4 + $0x244] ss:$8 sps:$4 sm:$0xff]   ;;  %v3393_v42 = vld [vmem:[%s4413_s4 + $0x80] ss:$8 sps:$4 sm:$0xff]   ;;  %v3399_v48 = vld [vmem:[%s4413_s4 + $0x90] ss:$8 sps:$4 sm:$0xff]  }
  0x26   : > { %v3407_v50 = vld [vmem:[%s4413_s4 + $0xa4] ss:$8 sps:$4 sm:$0xff]   ;;  %v3307_v51 = vld [vmem:[%s4413_s4 + $0x274] ss:$8 sps:$4 sm:$0xff]  }
  0x27   : > { %946 = vmatpush1.bf16.msra.mxu0 %v3241_v33  ;;  %1928 = vmatpush1.bf16.msra.mxu1 %v3244_v34  ;;  %v3295_v33 = vld [vmem:[%s4413_s4 + $0x234] ss:$8 sps:$4 sm:$0xff]   ;;  %v3381_v34 = vld [vmem:[%s4413_s4 + $0x60] ss:$8 sps:$4 sm:$0xff]   ;;  %v3310_v55 = vld [vmem:[%s4413_s4 + $0x284] ss:$8 sps:$4 sm:$0xff]  }
  0x28   : > { %1929 = vmatprep.subr.bf16.mxu1 %v3250_v35  ;;  %1880 = vmatprep.subr.bf16.mxu0 %v3347_v6  ;;  %v3293_v35 = vld [vmem:[%s4413_s4 + $0x230] ss:$8 sps:$4 sm:$0xff]   ;;  %v3319_v4 = vld [vmem:[%s4413_s4 + $0x2b4] ss:$8 sps:$4 sm:$0xff]  }
  0x29   : > { %v3317_v6 = vld [vmem:[%s4413_s4 + $0x2b0] ss:$8 sps:$4 sm:$0xff]   ;;  %v3446_v17 = vld [vmem:[%s4419_s10 + $0x14] ss:$8 sps:$4 sm:$0xff]  }
  0x2a   : > { %2892 = vmatmul.mubr.msk.bf16.vlgmr.msra.gmra.mrb[0].mxu0 %vm743_vm0, %v3247_v39  ;;  %v3296_v39 = vld [vmem:[%s4413_s4 + $0x240] ss:$8 sps:$4 sm:$0xff]  }
  0x2b   : > { %1930 = vmatpush1.bf16.msra.mxu1 %v3248_v40  ;;  %1912 = vmatprep.mubr.bf16.mxu0 %v1163_v54  ;;  %v3395_v40 = vld [vmem:[%s4413_s4 + $0x84] ss:$8 sps:$4 sm:$0xff]   ;;  %v3413_v54 = vld [vmem:[%s4413_s4 + $0xb4] ss:$8 sps:$4 sm:$0xff]  }
  0x2c   : > { %1931 = vmatprep.subr.bf16.mxu1 %v3253_v41  ;;  %1881 = vmatpush1.bf16.msra.mxu0 %v3345_v5  ;;  %v3301_v41 = vld [vmem:[%s4413_s4 + $0x254] ss:$8 sps:$4 sm:$0xff]   ;;  %v3429_v5 = vld [vmem:[%s4413_s4 + $0xe0] ss:$8 sps:$4 sm:$0xff]  }
  0x2d   : > { %1882 = vmatprep.subr.bf16.mxu0 %v3353_v9  ;;  %v3435_v9 = vld [vmem:[%s4413_s4 + $0xf0] ss:$8 sps:$4 sm:$0xff]  }
  0x2f   : > { %1932 = vmatpush1.bf16.msra.mxu1 %v3251_v44  ;;  %v3299_v44 = vld [vmem:[%s4413_s4 + $0x250] ss:$8 sps:$4 sm:$0xff]  }
  0x30   : > { %1933 = vmatprep.subr.bf16.mxu1 %v3256_v45  ;;  %1883 = vmatpush1.bf16.msra.mxu0 %v3351_v8  ;;  %v3401_v45 = vld [vmem:[%s4413_s4 + $0x94] ss:$8 sps:$4 sm:$0xff]   ;;  %v3322_v8 = vld [vmem:[%s4413_s4 + $0x2c4] ss:$8 sps:$4 sm:$0xff]  }
  0x31   : > { %1884 = vmatprep.subr.bf16.mxu0 %v3359_v13  ;;  %v3443_v13 = vld [vmem:[%s4419_s10 + $0x4] ss:$8 sps:$4 sm:$0xff]  }
  0x33   : > { %1934 = vmatpush1.bf16.msra.mxu1 %v3254_v47  ;;  %v3304_v47 = vld [vmem:[%s4413_s4 + $0x264] ss:$8 sps:$4 sm:$0xff]  }
  0x34   : > { %1935 = vmatprep.subr.bf16.mxu1 %v3259_v49  ;;  %1885 = vmatpush1.bf16.msra.mxu0 %v3357_v15  ;;  %v3302_v49 = vld [vmem:[%s4413_s4 + $0x260] ss:$8 sps:$4 sm:$0xff]  }
  0x35   : > { %1886 = vmatprep.subr.bf16.mxu0 %v3365_v18  ;;  %v3441_v15 = vld [vmem:[%s4419_s10] ss:$8 sps:$4 sm:$0xff]   ;;  %v3328_v18 = vld [vmem:[%s4413_s4 + $0x2e4] ss:$8 sps:$4 sm:$0xff]  }
  0x37   : > { %1936 = vmatpush1.bf16.msra.mxu1 %v3257_v52  ;;  %v3405_v52 = vld [vmem:[%s4413_s4 + $0xa0] ss:$8 sps:$4 sm:$0xff]  }
  0x38   : > { %1937 = vmatprep.subr.bf16.mxu1 %v3262_v53  ;;  %1887 = vmatpush1.bf16.msra.mxu0 %v3363_v21  ;;  %v3305_v53 = vld [vmem:[%s4413_s4 + $0x270] ss:$8 sps:$4 sm:$0xff]   ;;  %v3449_v21 = vld [vmem:[%s4419_s10 + $0x24] ss:$8 sps:$4 sm:$0xff]  }
  0x39   : > { %1888 = vmatprep.subr.bf16.mxu0 %v3371_v25  ;;  %v3452_v25 = vld [vmem:[%s4419_s10 + $0x34] ss:$8 sps:$4 sm:$0xff]  }
  0x3b   : > { %1938 = vmatpush1.bf16.msra.mxu1 %v3260_v56  ;;  %v3411_v56 = vld [vmem:[%s4413_s4 + $0xb0] ss:$8 sps:$4 sm:$0xff]  }
  0x3c   : > { %1939 = vmatprep.subr.bf16.mxu1 %v3265_v57  ;;  %1889 = vmatpush1.bf16.msra.mxu0 %v3369_v26  ;;  %v3308_v57 = vld [vmem:[%s4413_s4 + $0x280] ss:$8 sps:$4 sm:$0xff]   ;;  %v3335_v26 = vld [vmem:[%s4413_s4 + $0x304] ss:$8 sps:$4 sm:$0xff]  }
  0x3d   : > { %1890 = vmatprep.subr.bf16.mxu0 %v3377_v28  ;;  %v4090_v28 = vrot.slane %v3861_v11, %v3792_v46  ;;  %v3455_v11 = vld [vmem:[%s4419_s10 + $0x44] ss:$8 sps:$4 sm:$0xff]  }
  0x3f   : > { %1940 = vmatpush1.bf16.msra.mxu1 %v3263_v58  ;;  %v3419_v58 = vld [vmem:[%s4413_s4 + $0xc4] ss:$8 sps:$4 sm:$0xff]  }
  0x40   : > { %1941 = vmatprep.subr.bf16.mxu1 %v3268_v59  ;;  %1891 = vmatpush1.bf16.msra.mxu0 %v3375_v30  ;;  %v3313_v59 = vld [vmem:[%s4413_s4 + $0x294] ss:$8 sps:$4 sm:$0xff]   ;;  %v1174_v30 = vcombine.high %v3895_v23, %v3895_v23 }
  0x41   : > { %1892 = vmatprep.subr.bf16.mxu0 %v3383_v32  ;;  %v3453_v32 = vld [vmem:[%s4419_s10 + $0x40] ss:$8 sps:$4 sm:$0xff]  }
  0x43   : > { %1942 = vmatpush1.bf16.msra.mxu1 %v3266_v60  ;;  %v3417_v60 = vld [vmem:[%s4413_s4 + $0xc0] ss:$8 sps:$4 sm:$0xff]  }
  0x44   : > { %1943 = vmatprep.subr.bf16.mxu1 %v3271_v61  ;;  %1893 = vmatpush1.bf16.msra.mxu0 %v3381_v34  ;;  %v3311_v61 = vld [vmem:[%s4413_s4 + $0x290] ss:$8 sps:$4 sm:$0xff]   ;;  %v3341_v34 = vld [vmem:[%s4413_s4 + $0x324] ss:$8 sps:$4 sm:$0xff]  }
  0x45   : > { %1894 = vmatprep.subr.bf16.mxu0 %v3389_v36  ;;  %v3339_v36 = vld [vmem:[%s4413_s4 + $0x320] ss:$8 sps:$4 sm:$0xff]  }
  0x47   : > { %1944 = vmatpush1.bf16.msra.mxu1 %v3269_v62  ;;  %v3425_v62 = vld [vmem:[%s4413_s4 + $0xd4] ss:$8 sps:$4 sm:$0xff]  }
  0x48   : > { %1945 = vmatprep.subr.bf16.mxu1 %v3274_v63  ;;  %1895 = vmatpush1.bf16.msra.mxu0 %v3387_v38  ;;  %v3316_v63 = vld [vmem:[%s4413_s4 + $0x2a4] ss:$8 sps:$4 sm:$0xff]   ;;  %v3344_v38 = vld [vmem:[%s4413_s4 + $0x334] ss:$8 sps:$4 sm:$0xff]  }
  0x49   : > { %1896 = vmatprep.subr.bf16.mxu0 %v3395_v40  ;;  %v3342_v40 = vld [vmem:[%s4413_s4 + $0x330] ss:$8 sps:$4 sm:$0xff]  }
  0x4b   : > { %1946 = vmatpush1.bf16.msra.mxu1 %v3272_v0  ;;  %v3423_v0 = vld [vmem:[%s4413_s4 + $0xd0] ss:$8 sps:$4 sm:$0xff]  }
  0x4c   : > { %1947 = vmatprep.subr.bf16.mxu1 %v3277_v1  ;;  %1897 = vmatpush1.bf16.msra.mxu0 %v3393_v42  ;;  %v3314_v1 = vld [vmem:[%s4413_s4 + $0x2a0] ss:$8 sps:$4 sm:$0xff]   ;;  %v3350_v42 = vld [vmem:[%s4413_s4 + $0x344] ss:$8 sps:$4 sm:$0xff]  }
  0x4d   : > { %1898 = vmatprep.subr.bf16.mxu0 %v3401_v45  ;;  %v3348_v45 = vld [vmem:[%s4413_s4 + $0x340] ss:$8 sps:$4 sm:$0xff]  }
  0x4f   : > { %1948 = vmatpush1.bf16.msra.mxu1 %v3275_v3  ;;  %v3431_v3 = vld [vmem:[%s4413_s4 + $0xe4] ss:$8 sps:$4 sm:$0xff]  }
  0x50   : > { %1949 = vmatprep.subr.bf16.mxu1 %v3280_v7  ;;  %1899 = vmatpush1.bf16.msra.mxu0 %v3399_v48  ;;  %v3437_v7 = vld [vmem:[%s4413_s4 + $0xf4] ss:$8 sps:$4 sm:$0xff]  }
  0x51   : > { %1900 = vmatprep.subr.bf16.mxu0 %v3407_v50  ;;  %v3356_v48 = vld [vmem:[%s4413_s4 + $0x354] ss:$8 sps:$4 sm:$0xff]   ;;  %v3354_v50 = vld [vmem:[%s4413_s4 + $0x350] ss:$8 sps:$4 sm:$0xff]  }
  0x53   : > { %1950 = vmatpush1.bf16.msra.mxu1 %v3278_v10  ;;  %v3320_v10 = vld [vmem:[%s4413_s4 + $0x2c0] ss:$8 sps:$4 sm:$0xff]  }
  0x54   : > { %1951 = vmatprep.subr.bf16.mxu1 %v3283_v12  ;;  %1901 = vmatpush1.bf16.msra.mxu0 %v3405_v52  ;;  %v3325_v12 = vld [vmem:[%s4413_s4 + $0x2d4] ss:$8 sps:$4 sm:$0xff]   ;;  %v3362_v52 = vld [vmem:[%s4413_s4 + $0x364] ss:$8 sps:$4 sm:$0xff]  }
  0x55   : > { %1902 = vmatprep.subr.bf16.mxu0 %v3413_v54  ;;  %v3360_v54 = vld [vmem:[%s4413_s4 + $0x360] ss:$8 sps:$4 sm:$0xff]  }
  0x57   : > { %1952 = vmatpush1.bf16.msra.mxu1 %v3281_v16  ;;  %v3323_v16 = vld [vmem:[%s4413_s4 + $0x2d0] ss:$8 sps:$4 sm:$0xff]  }
  0x58   : > { %1962 = vmatprep.subr.bf16.mxu1 %v3286_v19  ;;  %1903 = vmatpush1.bf16.msra.mxu0 %v3411_v56  ;;  %v3444_v19 = vld [vmem:[%s4419_s10 + $0x10] ss:$8 sps:$4 sm:$0xff]   ;;  %v3368_v56 = vld [vmem:[%s4413_s4 + $0x374] ss:$8 sps:$4 sm:$0xff]  }
  0x59   : > { %1904 = vmatprep.subr.bf16.mxu0 %v3419_v58  ;;  %v3366_v58 = vld [vmem:[%s4413_s4 + $0x370] ss:$8 sps:$4 sm:$0xff]  }
  0x5a   : > { %1954 = vmatmul.mubr.bf16.vlgmr.msra.gmra.mrb[4].mxu1 %v1171_v20  ;;  %v3326_v20 = vld [vmem:[%s4413_s4 + $0x2e0] ss:$8 sps:$4 sm:$0xff]  }
  0x5b   : > { %1963 = vmatpush1.bf16.msra.mxu1 %v3284_v22  ;;  %1994 = vmatprep.mubr.bf16.mxu1 %v3895_v23  ;;  %v3331_v22 = vld [vmem:[%s4413_s4 + $0x2f4] ss:$8 sps:$4 sm:$0xff]   ;;  %v3336_v23 = vld [vmem:[%s4413_s4 + $0x310] ss:$8 sps:$4 sm:$0xff]  }
  0x5c   : > { %1964 = vmatprep.subr.bf16.mxu1 %v3289_v24  ;;  %1905 = vmatpush1.bf16.msra.mxu0 %v3417_v60  ;;  %v3447_v24 = vld [vmem:[%s4419_s10 + $0x20] ss:$8 sps:$4 sm:$0xff]  }
  0x5d   : > { %1906 = vmatprep.subr.bf16.mxu0 %v3425_v62  ;;  %v3372_v60 = vld [vmem:[%s4413_s4 + $0x380] ss:$8 sps:$4 sm:$0xff]   ;;  %v3378_v62 = vld [vmem:[%s4413_s4 + $0x390] ss:$8 sps:$4 sm:$0xff]  }
  0x5f   : > { %1965 = vmatpush1.bf16.msra.mxu1 %v3287_v27  ;;  %v3450_v27 = vld [vmem:[%s4419_s10 + $0x30] ss:$8 sps:$4 sm:$0xff]  }
  0x60   : > { %1966 = vmatprep.subr.bf16.mxu1 %v3292_v29  ;;  %1907 = vmatpush1.bf16.msra.mxu0 %v3423_v0  ;;  %v3333_v29 = vld [vmem:[%s4413_s4 + $0x300] ss:$8 sps:$4 sm:$0xff]  }
  0x61   : > { %1908 = vmatprep.subr.bf16.mxu0 %v3431_v3  ;;  %v3384_v0 = vld [vmem:[%s4413_s4 + $0x3a0] ss:$8 sps:$4 sm:$0xff]   ;;  %v3390_v3 = vld [vmem:[%s4413_s4 + $0x3b0] ss:$8 sps:$4 sm:$0xff]  }
  0x63   : > { %1967 = vmatpush1.bf16.msra.mxu1 %v3290_v31  ;;  %v3338_v31 = vld [vmem:[%s4413_s4 + $0x314] ss:$8 sps:$4 sm:$0xff]  }
  0x64   : > { %1968 = vmatprep.subr.bf16.mxu1 %v3295_v33  ;;  %1909 = vmatpush1.bf16.msra.mxu0 %v3429_v5  ;;  %v3458_v33 = vld [vmem:[%s4419_s10 + $0x54] ss:$8 sps:$4 sm:$0xff]   ;;  %v3396_v5 = vld [vmem:[%s4413_s4 + $0x3c0] ss:$8 sps:$4 sm:$0xff]  }
  0x65   : > { %1910 = vmatprep.subr.bf16.mxu0 %v3437_v7  ;;  %v3402_v7 = vld [vmem:[%s4413_s4 + $0x3d0] ss:$8 sps:$4 sm:$0xff]  }
  0x67   : > { %1969 = vmatpush1.bf16.msra.mxu1 %v3293_v35  ;;  %v3456_v35 = vld [vmem:[%s4419_s10 + $0x50] ss:$8 sps:$4 sm:$0xff]  }
  0x68   : > { %1970 = vmatprep.subr.bf16.mxu1 %v3298_v37  ;;  %1911 = vmatpush1.bf16.msra.mxu0 %v3435_v9  ;;  %v3461_v37 = vld [vmem:[%s4419_s10 + $0x64] ss:$8 sps:$4 sm:$0xff]   ;;  %v3408_v9 = vld [vmem:[%s4413_s4 + $0x3e0] ss:$8 sps:$4 sm:$0xff]  }
  0x69   : > { %2331 = vmatprep.subr.bf16.mxu0 %v3443_v13  ;;  %v3422_v13 = vld [vmem:[%s4413_s4 + $0x404] ss:$8 sps:$4 sm:$0xff]  }
  0x6b   : > { %1971 = vmatpush1.bf16.msra.mxu1 %v3296_v39  ;;  %1913 = vmatmul.mubr.bf16.vlgmr.msra.gmra.mrb[4].mxu0 %v3870_v14  ;;  %v3329_v14 = vld [vmem:[%s4413_s4 + $0x2f0] ss:$8 sps:$4 sm:$0xff]   ;;  %v3459_v39 = vld [vmem:[%s4419_s10 + $0x60] ss:$8 sps:$4 sm:$0xff]  }
  0x6c   : > { %1972 = vmatprep.subr.bf16.mxu1 %v3301_v41  ;;  %2332 = vmatpush1.bf16.msra.mxu0 %v3441_v15  ;;  %v3464_v41 = vld [vmem:[%s4419_s10 + $0x74] ss:$8 sps:$4 sm:$0xff]   ;;  %v1172_v15 = vcombine.high %v4090_v28, %v4090_v28 }
  0x6d   : > { %2333 = vmatprep.subr.bf16.mxu0 %v3446_v17  ;;  %v3428_v17 = vld [vmem:[%s4413_s4 + $0x414] ss:$8 sps:$4 sm:$0xff]  }
  0x6f   : > { %1973 = vmatpush1.bf16.msra.mxu1 %v3299_v44  ;;  %v3462_v44 = vld [vmem:[%s4419_s10 + $0x70] ss:$8 sps:$4 sm:$0xff]  }
  0x70   : > { %1974 = vmatprep.subr.bf16.mxu1 %v3304_v47  ;;  %2334 = vmatpush1.bf16.msra.mxu0 %v3444_v19  ;;  %v3467_v47 = vld [vmem:[%s4419_s10 + $0x84] ss:$8 sps:$4 sm:$0xff]  }
  0x71   : > { %2335 = vmatprep.subr.bf16.mxu0 %v3449_v21  ;;  %v3434_v19 = vld [vmem:[%s4413_s4 + $0x424] ss:$8 sps:$4 sm:$0xff]   ;;  %v3440_v21 = vld [vmem:[%s4413_s4 + $0x434] ss:$8 sps:$4 sm:$0xff]  }
  0x73   : > { %1975 = vmatpush1.bf16.msra.mxu1 %v3302_v49  ;;  %v3465_v49 = vld [vmem:[%s4419_s10 + $0x80] ss:$8 sps:$4 sm:$0xff]  }
  0x74   : > { %1976 = vmatprep.subr.bf16.mxu1 %v3307_v51  ;;  %2336 = vmatpush1.bf16.msra.mxu0 %v3447_v24  ;;  %v3470_v51 = vld [vmem:[%s4419_s10 + $0x94] ss:$8 sps:$4 sm:$0xff]   ;;  %v3438_v24 = vld [vmem:[%s4413_s4 + $0x430] ss:$8 sps:$4 sm:$0xff]  }
  0x75   : > { %2337 = vmatprep.subr.bf16.mxu0 %v3452_v25 }
  0x77   : > { %1977 = vmatpush1.bf16.msra.mxu1 %v3305_v53  ;;  %v3468_v53 = vld [vmem:[%s4419_s10 + $0x90] ss:$8 sps:$4 sm:$0xff]  }
  0x78   : > { %1978 = vmatprep.subr.bf16.mxu1 %v3310_v55  ;;  %2338 = vmatpush1.bf16.msra.mxu0 %v3450_v27  ;;  %v3473_v55 = vld [vmem:[%s4419_s10 + $0xa4] ss:$8 sps:$4 sm:$0xff]  }
  0x79   : > { %2339 = vmatprep.subr.bf16.mxu0 %v3455_v11 }
  0x7b   : > { %1979 = vmatpush1.bf16.msra.mxu1 %v3308_v57  ;;  %v3471_v57 = vld [vmem:[%s4419_s10 + $0xa0] ss:$8 sps:$4 sm:$0xff]  }
  0x7c   : > { %1980 = vmatprep.subr.bf16.mxu1 %v3313_v59  ;;  %2340 = vmatpush1.bf16.msra.mxu0 %v3453_v32  ;;  %v3374_v59 = vld [vmem:[%s4413_s4 + $0x384] ss:$8 sps:$4 sm:$0xff]  }
  0x7d   : > { %2341 = vmatprep.subr.bf16.mxu0 %v3458_v33 }
  0x7f   : > { %1981 = vmatpush1.bf16.msra.mxu1 %v3311_v61  ;;  %v3380_v61 = vld [vmem:[%s4413_s4 + $0x394] ss:$8 sps:$4 sm:$0xff]  }
  0x80   : > { %1982 = vmatprep.subr.bf16.mxu1 %v3316_v63  ;;  %2342 = vmatpush1.bf16.msra.mxu0 %v3456_v35  ;;  %v3386_v63 = vld [vmem:[%s4413_s4 + $0x3a4] ss:$8 sps:$4 sm:$0xff]  }
  0x81   : > { %2343 = vmatprep.subr.bf16.mxu0 %v3461_v37  ;;  %v3482_v37 = vld [vmem:[%s4419_s10 + $0xd4] ss:$8 sps:$4 sm:$0xff]  }
  0x83   : > { %1983 = vmatpush1.bf16.msra.mxu1 %v3314_v1  ;;  %v3392_v1 = vld [vmem:[%s4413_s4 + $0x3b4] ss:$8 sps:$4 sm:$0xff]  }
  0x84   : > { %1984 = vmatprep.subr.bf16.mxu1 %v3319_v4  ;;  %2344 = vmatpush1.bf16.msra.mxu0 %v3459_v39  ;;  %v3398_v4 = vld [vmem:[%s4413_s4 + $0x3c4] ss:$8 sps:$4 sm:$0xff]  }
  0x85   : > { %2345 = vmatprep.subr.bf16.mxu0 %v3464_v41  ;;  %v3485_v39 = vld [vmem:[%s4419_s10 + $0xe4] ss:$8 sps:$4 sm:$0xff]   ;;  %v3488_v41 = vld [vmem:[%s4419_s10 + $0xf4] ss:$8 sps:$4 sm:$0xff]  }
  0x87   : > { %1985 = vmatpush1.bf16.msra.mxu1 %v3317_v6  ;;  %v3404_v6 = vld [vmem:[%s4413_s4 + $0x3d4] ss:$8 sps:$4 sm:$0xff]  }
  0x88   : > { %1986 = vmatprep.subr.bf16.mxu1 %v3322_v8  ;;  %2346 = vmatpush1.bf16.msra.mxu0 %v3462_v44  ;;  %v3410_v8 = vld [vmem:[%s4413_s4 + $0x3e4] ss:$8 sps:$4 sm:$0xff]  }
  0x89   : > { %2347 = vmatprep.subr.bf16.mxu0 %v3467_v47  ;;  %v3489_v44 = vld [vmem:[%s4422_s13 + $0x40] sm:$0xff]  }
  0x8b   : > { %1987 = vmatpush1.bf16.msra.mxu1 %v3320_v10  ;;  %v3416_v10 = vld [vmem:[%s4413_s4 + $0x3f4] ss:$8 sps:$4 sm:$0xff]  }
  0x8c   : > { %1988 = vmatprep.subr.bf16.mxu1 %v3325_v12  ;;  %2348 = vmatpush1.bf16.msra.mxu0 %v3465_v49  ;;  %v3414_v12 = vld [vmem:[%s4413_s4 + $0x3f0] ss:$8 sps:$4 sm:$0xff]  }
  0x8d   : > { %2349 = vmatprep.subr.bf16.mxu0 %v3470_v51 }
  0x8f   : > { %1989 = vmatpush1.bf16.msra.mxu1 %v3323_v16  ;;  %v3420_v16 = vld [vmem:[%s4413_s4 + $0x400] ss:$8 sps:$4 sm:$0xff]  }
  0x90   : > { %1990 = vmatprep.subr.bf16.mxu1 %v3328_v18  ;;  %2350 = vmatpush1.bf16.msra.mxu0 %v3468_v53  ;;  %v3426_v18 = vld [vmem:[%s4413_s4 + $0x410] ss:$8 sps:$4 sm:$0xff]   ;;  %v4300_v53 = vsub.s32 1, %v3777_v43 }
  0x91   : > { %2351 = vmatprep.subr.bf16.mxu0 %v3473_v55 }
  0x93   : > { %1991 = vmatpush1.bf16.msra.mxu1 %v3326_v20  ;;  %v3432_v20 = vld [vmem:[%s4413_s4 + $0x420] ss:$8 sps:$4 sm:$0xff]  }
  0x94   : > { %1992 = vmatprep.subr.bf16.mxu1 %v3331_v22  ;;  %2352 = vmatpush1.bf16.msra.mxu0 %v3471_v57  ;;  %v3474_v22 = vld [vmem:[%s4419_s10 + $0xb0] ss:$8 sps:$4 sm:$0xff]  }
  0x97   : > { %1993 = vmatpush1.bf16.msra.mxu1 %v3329_v14  ;;  %v2893_v14 = vld.sshfl [vmem:[%s3789_s23 + $0x8] sm:$0x1 pattern:$0x75316420] }
  0x98   : > { %2003 = vmatprep.subr.bf16.mxu1 %v3335_v26  ;;  %v1188_v25 = vrot.slane %v2893_v14, %v3792_v46  ;;  %v3477_v46 = vld [vmem:[%s4419_s10 + $0xc0] ss:$8 sps:$4 sm:$0xff]  }
  0x9a   : > { %1995 = vmatmul.mubr.bf16.vlgmr.msra.gmra.mrb[4].mxu1 %v4090_v28 }
  0x9b   : > { %2004 = vmatpush1.bf16.msra.mxu1 %v3333_v29  ;;  %2035 = vmatprep.mubr.bf16.mxu1 %v1174_v30 }
  0x9c   : > { %2005 = vmatprep.subr.bf16.mxu1 %v3338_v31 }
  0x9f   : > { %2006 = vmatpush1.bf16.msra.mxu1 %v3336_v23 }
  0xa0   : > { %2007 = vmatprep.subr.bf16.mxu1 %v3341_v34 }
  0xa3   : > { %2008 = vmatpush1.bf16.msra.mxu1 %v3339_v36  ;;  %v3479_v36 = vld [vmem:[%s4419_s10 + $0xc4] ss:$8 sps:$4 sm:$0xff]  }
  0xa4   : > { %2009 = vmatprep.subr.bf16.mxu1 %v3344_v38  ;;  %v3480_v38 = vld [vmem:[%s4419_s10 + $0xd0] ss:$8 sps:$4 sm:$0xff]  }
  0xa7   : > { %2010 = vmatpush1.bf16.msra.mxu1 %v3342_v40  ;;  %v3483_v40 = vld [vmem:[%s4419_s10 + $0xe0] ss:$8 sps:$4 sm:$0xff]  }
  0xa8   : > { %2011 = vmatprep.subr.bf16.mxu1 %v3350_v42  ;;  %v3486_v42 = vld [vmem:[%s4419_s10 + $0xf0] ss:$8 sps:$4 sm:$0xff]  }
  0xab   : > { %2012 = vmatpush1.bf16.msra.mxu1 %v3348_v45 }
  0xac   : > { %2013 = vmatprep.subr.bf16.mxu1 %v3356_v48 }
  0xaf   : > { %2014 = vmatpush1.bf16.msra.mxu1 %v3354_v50  ;;  %v4294_v50 = vsub.s32 0, %v3777_v43 }
  0xb0   : > { %2015 = vmatprep.subr.bf16.mxu1 %v3362_v52  ;;  %v2097_v52 = vld [vmem:[%s4417_s8] sm:$0x3] }
  0xb3   : > { %2016 = vmatpush1.bf16.msra.mxu1 %v3360_v54 }
  0xb4   : > { %2017 = vmatprep.subr.bf16.mxu1 %v3368_v56  ;;  %v2113_v56 = vld [vmem:[%s4418_s9] sm:$0x3] }
  0xb7   : > { %2018 = vmatpush1.bf16.msra.mxu1 %v3366_v58 }
  0xb8   : > { %2019 = vmatprep.subr.bf16.mxu1 %v3374_v59 }
  0xbb   : > { %2020 = vmatpush1.bf16.msra.mxu1 %v3372_v60  ;;  %v2102_v60 = vrot.slane %v2097_v52, %v4294_v50 }
  0xbc   : > { %2021 = vmatprep.subr.bf16.mxu1 %v3380_v61 }
  0xbf   : > { %2022 = vmatpush1.bf16.msra.mxu1 %v3378_v62 }
  0xc0   : > { %2023 = vmatprep.subr.bf16.mxu1 %v3386_v63  ;;  %v2106_v63 = vrot.slane %v2097_v52, %v4300_v53 }
  0xc3   : > { %2024 = vmatpush1.bf16.msra.mxu1 %v3384_v0 }
  0xc4   : > { %2025 = vmatprep.subr.bf16.mxu1 %v3392_v1  ;;  %v2118_v1 = vrot.slane %v2113_v56, %v4294_v50 }
  0xc7   : > { %2026 = vmatpush1.bf16.msra.mxu1 %v3390_v3 }
  0xc8   : > { %2027 = vmatprep.subr.bf16.mxu1 %v3398_v4 }
  0xcb   : > { %2028 = vmatpush1.bf16.msra.mxu1 %v3396_v5  ;;  %v2122_v5 = vrot.slane %v2113_v56, %v4300_v53 }
  0xcc   : > { %2029 = vmatprep.subr.bf16.mxu1 %v3404_v6 }
  0xcf   : > { %2030 = vmatpush1.bf16.msra.mxu1 %v3402_v7 }
  0xd0   : > { %2031 = vmatprep.subr.bf16.mxu1 %v3410_v8 }
  0xd3   : > { %2032 = vmatpush1.bf16.msra.mxu1 %v3408_v9 }
  0xd4   : > { %2033 = vmatprep.subr.bf16.mxu1 %v3416_v10 }
  0xd7   : > { %2034 = vmatpush1.bf16.msra.mxu1 %v3414_v12 }
  0xd8   : > { %2044 = vmatprep.subr.bf16.mxu1 %v3422_v13 }
  0xda   : > { %2036 = vmatmul.mubr.bf16.vlgmr.msra.gmra.mrb[4].mxu1 %v1172_v15 }
  0xdb   : > { %2045 = vmatpush1.bf16.msra.mxu1 %v3420_v16  ;;  %2076 = vmatprep.mubr.bf16.mxu1 %v3537_v2  ;;  %v3476_v2 = vld [vmem:[%s4419_s10 + $0xb4] ss:$8 sps:$4 sm:$0xff]  }
  0xdc   : > { %2046 = vmatprep.subr.bf16.mxu1 %v3428_v17  ;;  %2353 = vmatprep.subr.bf16.mxu0 %v3476_v2 }
  0xdd   : > { %2354 = vmatpush1.bf16.msra.mxu0 %v3474_v22 }
  0xde   : > { %2355 = vmatprep.subr.bf16.mxu0 %v3479_v36  ;;  %v3503_v36 = vld [vmem:[%s4422_s13 + $0x78] sm:$0xff]  }
  0xdf   : > { %2047 = vmatpush1.bf16.msra.mxu1 %v3426_v18 }
  0xe0   : > { %2048 = vmatprep.subr.bf16.mxu1 %v3434_v19 }
  0xe1   : > { %2356 = vmatpush1.bf16.msra.mxu0 %v3477_v46  ;;  %v3504_v46 = vld [vmem:[%s4422_s13 + $0x38] sm:$0xff]  }
  0xe2   : > { %2357 = vmatprep.subr.bf16.mxu0 %v3482_v37  ;;  %v3539_v37 = vmov 0.0  }
  0xe3   : > { %2049 = vmatpush1.bf16.msra.mxu1 %v3432_v20 }
  0xe4   : > { %2050 = vmatprep.subr.bf16.mxu1 %v3440_v21 }
  0xe5   : > { %2358 = vmatpush1.bf16.msra.mxu0 %v3480_v38  ;;  %v2374_v38 = vld [vmem:[%s4420_s11] sm:$0x3] }
  0xe6   : > { %2359 = vmatprep.subr.bf16.mxu0 %v3485_v39  ;;  %v2390_v39 = vld [vmem:[%s4421_s12] sm:$0x3] }
  0xe7   : > { %2051 = vmatpush1.bf16.msra.mxu1 %v3438_v24 }
  0xe9   : > { %2360 = vmatpush1.bf16.msra.mxu0 %v3483_v40  ;;  %v2379_v40 = vrot.slane %v2374_v38, %v4294_v50 }
  0xea   : > { %3030 = vmatmul.mubr.msk.bf16.vlgmr.msra.gmra.mrb[4].mxu1 %vm743_vm0, %v1188_v25  ;;  %2361 = vmatprep.subr.bf16.mxu0 %v3488_v41  ;;  %v3490_v25 = vld [vmem:[%s4422_s13] sm:$0xff]   ;;  %v2383_v41 = vrot.slane %v2374_v38, %v4300_v53 }
  0xed   : > { %v781_v26 = vpop.f32.mrb[0].mxu1  ;;  %2362 = vmatpush1.bf16.msra.mxu0 %v3486_v42  ;;  %v2395_v42 = vrot.slane %v2390_v39, %v4294_v50 }
  0xee   : > { %v783_v27 = vpop.f32.mrb[1].mxu1  ;;  %3095 = vmatprep.subr.bf16.mxu0 %v3489_v44 }
  0xef   : > { %v785_v28 = vpop.f32.mrb[2].mxu1 }
  0xf0   : > { %v787_v29 = vpop.f32.mrb[3].mxu1 }
  0xfd   : > { %v973_v30 = vpop.f32.mrb[0].mxu0 }
  0xfe   : > { %v3146_v31 = vadd.f32 %v973_v30, %v781_v26  ;;  %v975_v11 = vpop.f32.mrb[1].mxu0  ;;  %v3491_v26 = vld [vmem:[%s4422_s13 + $0x48] sm:$0xff]   ;;  %v3495_v30 = vld [vmem:[%s4422_s13 + $0x58] sm:$0xff]  }
  0xff   : > { %v3147_v32 = vadd.f32 %v975_v11, %v783_v27  ;;  %v977_v23 = vpop.f32.mrb[2].mxu0  ;;  %v3492_v27 = vld [vmem:[%s4422_s13 + $0x8] sm:$0xff]   ;;  %v3497_v11 = vld [vmem:[%s4422_s13 + $0x60] sm:$0xff]  }
 0x100   : > { %v3148_v33 = vadd.f32 %v977_v23, %v785_v28  ;;  %v979_v34 = vpop.f32.mrb[3].mxu0  ;;  %v3493_v28 = vld [vmem:[%s4422_s13 + $0x50] sm:$0xff]   ;;  %v3499_v23 = vld [vmem:[%s4422_s13 + $0x68] sm:$0xff]  }
 0x101   : > { %v3149_v35 = vadd.f32 %v979_v34, %v787_v29  ;;  %v3494_v29 = vld [vmem:[%s4422_s13 + $0x10] sm:$0xff]  }
 0x102   : > { %v3501_v34 = vld [vmem:[%s4422_s13 + $0x70] sm:$0xff]  }
 0x13e   : > { %v1914_v45 = vpop.f32.mrb[4].mxu0 }
 0x13f   : > { %v1916_v47 = vpop.f32.mrb[5].mxu0 }
 0x140   : > { %v1918_v48 = vpop.f32.mrb[6].mxu0 }
 0x141   : > { %v1919_v49 = vpop.f32.mrb[7].mxu0 }
 0x1bd   : > { %v2078_v51 = vpop.f32.mrb[4].mxu1 }
 0x1be   : > { %v3150_v54 = vadd.f32 %v2078_v51, %v1914_v45  ;;  %v2080_v55 = vpop.f32.mrb[5].mxu1  ;;  %v2399_v45 = vrot.slane %v2390_v39, %v4300_v53 }
 0x1bf   : > { %v3151_v57 = vadd.f32 %v2080_v55, %v1916_v47  ;;  %v2082_v58 = vpop.f32.mrb[6].mxu1 }
 0x1c0   : > { %v2088_v59 = vrot.slane %v3150_v54, %v4294_v50  ;;  %v2083_v61 = vpop.f32.mrb[7].mxu1 }
 0x1c1   : > { %v2092_v62 = vrot.slane %v3151_v57, %v4294_v50 }
 0x1c2   : > { %v2093_v0 = vadd.f32 %v3146_v31, %v2088_v59  ;;  %v2095_v43 = vadd.f32 %v3148_v33, %v2088_v59  ;;  %v3496_v31 = vld [vmem:[%s4422_s13 + $0x18] sm:$0xff]   ;;  %v3500_v33 = vld [vmem:[%s4422_s13 + $0x28] sm:$0xff]  }
 0x1c3   : > { %v2094_v3 = vadd.f32 %v3147_v32, %v2092_v62  ;;  %v2096_v4 = vadd.f32 %v3149_v35, %v2092_v62  ;;  %v3498_v32 = vld [vmem:[%s4422_s13 + $0x20] sm:$0xff]   ;;  %v3502_v35 = vld [vmem:[%s4422_s13 + $0x30] sm:$0xff]  }
 0x1c4   : > { %v2109_v6 = vmul.f32 %v2102_v60, %v2093_v0  ;;  %v2111_v7 = vmul.f32 %v2102_v60, %v2095_v43 }
 0x1c5   : > { %v2110_v8 = vmul.f32 %v2106_v63, %v2094_v3  ;;  %v2112_v9 = vmul.f32 %v2106_v63, %v2096_v4  ;;  %v3505_v4 = vld [vmem:[%s4425_s16] sm:$0xff]  }
 0x1c6   : > { %v2125_v10 = vadd.f32 %v2118_v1, %v2109_v6  ;;  %v2127_v12 = vadd.f32 %v2118_v1, %v2111_v7  ;;  %v3507_v6 = vld [vmem:[%s4425_s16 + $0x10] sm:$0xff]   ;;  %v3508_v7 = vld [vmem:[%s4425_s16 + $0x18] sm:$0xff]  }
 0x1c7   : > { %v2126_v13 = vadd.f32 %v2122_v5, %v2110_v8  ;;  %v2128_v15 = vadd.f32 %v2122_v5, %v2112_v9  ;;  %v3506_v5 = vld [vmem:[%s4425_s16 + $0x8] sm:$0xff]   ;;  %v3509_v8 = vld [vmem:[%s4425_s16 + $0x20] sm:$0xff]  }
 0x1c8   : > { %v2129_v16 = vmul.f32 0.2, %v2125_v10  ;;  %v2131_v17 = vmul.f32 0.2, %v2127_v12  ;;  %v3510_v9 = vld [vmem:[%s4425_s16 + $0x28] sm:$0xff]  }
 0x1c9   : > { %v2130_v18 = vmul.f32 0.2, %v2126_v13  ;;  %v2132_v19 = vmul.f32 0.2, %v2128_v15 }
 0x1ca   : > { %v2133_v20 = vmax.f32 %v2125_v10, %v2129_v16  ;;  %v2135_v21 = vmax.f32 %v2127_v12, %v2131_v17  ;;  %v3511_v10 = vld [vmem:[%s4425_s16 + $0x30] sm:$0xff]   ;;  %v3512_v12 = vld [vmem:[%s4425_s16 + $0x38] sm:$0xff]   ;;  %v3079_v16 = vld [vmem:[%s4423_s14] ss:$0 sm:$0xff] }
 0x1cb   : > { %v2134_v22 = vmax.f32 %v2126_v13, %v2130_v18  ;;  %v2136_v2 = vmax.f32 %v2128_v15, %v2132_v19  ;;  %v3080_v19 = vld [vmem:[%s4424_s15] ss:$0 sm:$0xff] }
 0x1cc   : > { %v2137_v24 = vpack.c.bf16 %v2135_v21, %v2133_v20 }
 0x1cd   : > { %v2138_v14 = vpack.c.bf16 %v2136_v2, %v2134_v22 }
 0x1cf   : > { %2363 = vmatprep.mubr.bf16.mxu0 %v2138_v14 }
 0x1d0   : > { %2364 = vmatmul.mubr.bf16.vlgmr.msra.gmra.mrb[8].mxu0 %v2137_v24 }
 0x1d1   : > { %3096 = vmatpush3.bf16.msra.mxu0 %v3490_v25 }
 0x1d2   : > { %3097 = vmatprep.subr.bf16.mxu0 %v3491_v26 }
 0x1d5   : > { %3098 = vmatpush3.bf16.msra.mxu0 %v3492_v27 }
 0x1d6   : > { %3099 = vmatprep.subr.bf16.mxu0 %v3493_v28 }
 0x1d9   : > { %3100 = vmatpush3.bf16.msra.mxu0 %v3494_v29 }
 0x1da   : > { %3101 = vmatprep.subr.bf16.mxu0 %v3495_v30 }
 0x1dd   : > { %3102 = vmatpush3.bf16.msra.mxu0 %v3496_v31 }
 0x1de   : > { %3103 = vmatprep.subr.bf16.mxu0 %v3497_v11 }
 0x1e1   : > { %3104 = vmatpush3.bf16.msra.mxu0 %v3498_v32 }
 0x1e2   : > { %3105 = vmatprep.subr.bf16.mxu0 %v3499_v23 }
 0x1e5   : > { %3106 = vmatpush3.bf16.msra.mxu0 %v3500_v33 }
 0x1e6   : > { %3107 = vmatprep.subr.bf16.mxu0 %v3501_v34 }
 0x1e9   : > { %3108 = vmatpush3.bf16.msra.mxu0 %v3502_v35 }
 0x1ea   : > { %3109 = vmatprep.subr.bf16.mxu0 %v3503_v36 }
 0x1ed   : > { %3110 = vmatpush3.bf16.msra.mxu0 %v3504_v46 }
 0x1ee   : > { %3126 = vmatprep.subr.bf16.mxu0 %v3539_v37 }
 0x2a3   : > { %v2365_v44 = vpop.f32.mrb[8].mxu0 }
 0x2a4   : > { %v2386_v47 = vmul.f32 %v2379_v40, %v2365_v44  ;;  %v2367_v48 = vpop.f32.mrb[9].mxu0 }
 0x2a5   : > { %v2387_v49 = vmul.f32 %v2383_v41, %v2367_v48  ;;  %v2369_v51 = vpop.f32.mrb[10].mxu0 }
 0x2a6   : > { %v2402_v52 = vadd.f32 %v2395_v42, %v2386_v47  ;;  %v2388_v54 = vmul.f32 %v2379_v40, %v2369_v51  ;;  %v2371_v55 = vpop.f32.mrb[11].mxu0 }
 0x2a7   : > { %v2403_v56 = vadd.f32 %v2399_v45, %v2387_v49  ;;  %v2389_v57 = vmul.f32 %v2383_v41, %v2371_v55 }
 0x2a8   : > { %v2406_v58 = vmul.f32 0.2, %v2402_v52  ;;  %v2404_v59 = vadd.f32 %v2395_v42, %v2388_v54 }
 0x2a9   : > { %v2407_v60 = vmul.f32 0.2, %v2403_v56  ;;  %v2405_v61 = vadd.f32 %v2399_v45, %v2389_v57 }
 0x2aa   : > { %v2408_v62 = vmul.f32 0.2, %v2404_v59  ;;  %v2410_v0 = vmax.f32 %v2402_v52, %v2406_v58 }
 0x2ab   : > { %v2409_v63 = vmul.f32 0.2, %v2405_v61  ;;  %v2411_v43 = vmax.f32 %v2403_v56, %v2407_v60 }
 0x2ac   : > { %v2412_v50 = vmax.f32 %v2404_v59, %v2408_v62 }
 0x2ad   : > { %v2413_v1 = vmax.f32 %v2405_v61, %v2409_v63 }
 0x2ae   : > { %v2414_v53 = vpack.c.bf16 %v2412_v50, %v2410_v0 }
 0x2af   : > { %v2415_v3 = vpack.c.bf16 %v2413_v1, %v2411_v43 }
 0x2b1   : > { %2576 = vmatprep.mubr.bf16.mxu0 %v2415_v3 }
 0x2b2   : > { %2577 = vmatmul.mubr.bf16.vlgmr.msra.gmra.mrb[12].mxu0 %v2414_v53 }
 0x2b3   : > { %3127 = vmatpush3.bf16.msra.mxu0 %v3505_v4  ;;  %3142 = vmatprep.mubr.msk.bf16.mxu0 %vm3540_vm1, %v3539_v37 }
 0x2b4   : > { %3128 = vmatprep.subr.bf16.mxu0 %v3539_v37 }
 0x2b7   : > { %3129 = vmatpush3.bf16.msra.mxu0 %v3506_v5 }
 0x2b8   : > { %3130 = vmatprep.subr.bf16.mxu0 %v3539_v37 }
 0x2bb   : > { %3131 = vmatpush3.bf16.msra.mxu0 %v3507_v6 }
 0x2bc   : > { %3132 = vmatprep.subr.bf16.mxu0 %v3539_v37 }
 0x2bf   : > { %3133 = vmatpush3.bf16.msra.mxu0 %v3508_v7 }
 0x2c0   : > { %3134 = vmatprep.subr.bf16.mxu0 %v3539_v37 }
 0x2c3   : > { %3135 = vmatpush3.bf16.msra.mxu0 %v3509_v8 }
 0x2c4   : > { %3136 = vmatprep.subr.bf16.mxu0 %v3539_v37 }
 0x2c7   : > { %3137 = vmatpush3.bf16.msra.mxu0 %v3510_v9 }
 0x2c8   : > { %3138 = vmatprep.subr.bf16.mxu0 %v3539_v37 }
 0x2cb   : > { %3139 = vmatpush3.bf16.msra.mxu0 %v3511_v10 }
 0x2cc   : > { %3140 = vmatprep.subr.bf16.mxu0 %v3539_v37 }
 0x2cf   : > { %3141 = vmatpush3.bf16.msra.mxu0 %v3512_v12 }
 0x385   : > { %v3111_v13 = vpop.f32.mrb[12].mxu0 }
 0x386   : > { %v3112_v15 = vpop.f32.mrb[13].mxu0 }
 0x387   : > { %v3113_v17 = vadd.f32 %v3112_v15, %v3111_v13  ;;  %v3114_v18 = vpop.f32.mrb[14].mxu0 }
 0x388   : > { %v3115_v20 = vpop.f32.mrb[15].mxu0 }
 0x389   : > { %v2592_v21 = vmul.f32 %v3113_v17, %v3079_v16  ;;  %v3116_v22 = vadd.f32 %v3115_v20, %v3114_v18 }
 0x38b   : > { %v2601_v2 = vadd.f32 %v3080_v19, %v2592_v21  ;;  %v2593_v24 = vmul.f32 %v3116_v22, %v3079_v16 }
 0x38d   : > { %v2603_v14 = vmul.f32 0.2, %v2601_v2  ;;  %v2602_v25 = vadd.f32 %v3080_v19, %v2593_v24 }
 0x38f   : > { %v2604_v26 = vmul.f32 0.2, %v2602_v25  ;;  %v2605_v27 = vmax.f32 %v2601_v2, %v2603_v14 }
 0x391   : > { %v2606_v28 = vmax.f32 %v2602_v25, %v2604_v26 }
 0x393   : > { %v2607_v29 = vpack.c.bf16 %v2606_v28, %v2605_v27 }
 0x395   : > { %3143 = vmatmul.mubr.bf16.vlgmr.msra.gmra.mrb[16].mxu0 %v2607_v29 }
 0x468   : > { %v2706_v30 = vpop.f32.mrb[16].mxu0 }
 0x469   : > { %2713 = vst [vmem:[%s675_s19] sm:$0xff] %v2706_v30  ;;  %v3144_v31 = vpop.f32.mrb[17].mxu0 }
 0x46a   : > { %v2709_v11 = vpop.f32.mrb[18].mxu0 }
 0x46b   : > { %2714 = vst [vmem:[%s675_s19 + $0x8] sm:$0xff] %v2709_v11  ;;  %v3145_v32 = vpop.f32.mrb[19].mxu0 }
 0x46c PF: > { %s4436_s1 = sld [smem:[#allocation3_spill]]  ;;  %s4437_s24 = sld [smem:[#allocation2_spill]] }
 0x46d   : > { %s4438_s25 = sld [smem:[#allocation4_spill]] }
 0x472   : > { %s27_s26 = sadd.s32 1, %s4436_s1  }
 0x473   : > { %p24_p5 = scmp.ge.s32.totalorder %s27_s26, 4  }
 0x475   :  { %26 = sbr.rel (!%p24_p5) target bundleno = 3 (0x3), region = 127 }

</bundles_post_ra>
